<compile_context>
chip_gen: v6e
topology: v6e:2x2x1
jax: 0.10.0
libtpu: 0.0.40
codegen_flags: <defaults>
</compile_context>

<pallas_src>
import functools

import jax
import jax.numpy as jnp
from jax.experimental import pallas as pl
from jax.experimental.pallas import tpu as pltpu


MATMUL_DTYPE = jnp.bfloat16      # MXU operand dtype (accumulation stays f32)
VMEM_LIMIT = 32 * 1024 * 1024    # modest cap: fits v7x (64 MiB) and v5e defaults
M_TILE = 2048                    # lane tile for layers without InstanceNorm


# ---------------------------------------------------------------------------
# Pallas kernel:  Y^T = W^T @ P^T  (+ bias) [-> ReLU -> InstanceNorm]
#   p_ref : (1, K, TM)      transposed im2col patches (bf16), one batch / M-tile
#   w_ref : (C_out, K)      transposed (flipped) weights (bf16)
#   b_ref : (C_out, 1)      bias (f32)
#   o_ref : (1, C_out, TM)  output (f32); spatial dim on the lane axis
# ---------------------------------------------------------------------------
def _convt_kernel(p_ref, w_ref, b_ref, o_ref, *, relu, inorm, eps):
    y = jnp.dot(w_ref[...], p_ref[0], preferred_element_type=jnp.float32)
    y = y + b_ref[...]
    if relu:
        y = jnp.maximum(y, 0.0)
    if inorm:
        # InstanceNorm2d(affine=False): per-channel biased mean/var over H*W,
        # reduced along the lane (spatial) axis.  Applied AFTER ReLU, matching
        # the torch Sequential order.
        mean = jnp.mean(y, axis=-1, keepdims=True)
        var = jnp.mean((y - mean) ** 2, axis=-1, keepdims=True)
        y = (y - mean) * jax.lax.rsqrt(var + eps)
    o_ref[0] = y.astype(o_ref.dtype)


def _convt_matmul(patches_t, w_t, bias, *, relu, inorm, m_tile, eps=1e-5):
    """(B, K, M) x (C_out, K) -> (B, C_out, M) with fused bias/ReLU/InstanceNorm."""
    B, K, M = patches_t.shape
    C_out = w_t.shape[0]
    if inorm or m_tile >= M:
        tm = M                    # InstanceNorm needs the full spatial extent
    else:
        assert m_tile % 128 == 0  # lane tiles must be 128-aligned
        tm = m_tile
    n_mt = pl.cdiv(M, tm)         # ragged last tile is clipped by Pallas

    kern = functools.partial(_convt_kernel, relu=relu, inorm=inorm, eps=eps)
    return pl.pallas_call(
        kern,
        out_shape=jax.ShapeDtypeStruct((B, C_out, M), jnp.float32),
        grid_spec=pltpu.PrefetchScalarGridSpec(
            num_scalar_prefetch=0,
            grid=(B, n_mt),
            in_specs=[
                pl.BlockSpec((1, K, tm), lambda b, m: (b, 0, m)),
                pl.BlockSpec((C_out, K), lambda b, m: (0, 0)),
                pl.BlockSpec((C_out, 1), lambda b, m: (0, 0)),
            ],
            out_specs=pl.BlockSpec((1, C_out, tm), lambda b, m: (b, 0, m)),
        ),
        compiler_params=pltpu.CompilerParams(
            dimension_semantics=("parallel", "parallel"),
            vmem_limit_bytes=VMEM_LIMIT,
        ),
    )(patches_t.astype(MATMUL_DTYPE), w_t.astype(MATMUL_DTYPE),
      bias.astype(jnp.float32))


# ---------------------------------------------------------------------------
# Plain-JAX glue (NCHW throughout).
# Generic path: ConvTranspose2d == conv(dilate+pad(x), flip(W)), via im2col.
# ---------------------------------------------------------------------------
def _dilate_pad(x, stride, k):
    # (B, C, H, W) -> zero-insert by `stride`, pad k-1 on each spatial side.
    B, C, H, W = x.shape
    if stride == 1:
        xd = x
    else:
        Hd, Wd = (H - 1) * stride + 1, (W - 1) * stride + 1
        xd = jnp.zeros((B, C, Hd, Wd), x.dtype).at[:, :, ::stride, ::stride].set(x)
    return jnp.pad(xd, ((0, 0), (0, 0), (k - 1, k - 1), (k - 1, k - 1)))


def _im2col_t(xpad, k, h_out, w_out):
    # (B, C, Hp, Wp) -> (B, k*k*C, h_out*w_out); row = (dh*k + dw)*C + c.
    B, C = xpad.shape[:2]
    rows = [xpad[:, :, dh:dh + h_out, dw:dw + w_out].reshape(B, C, h_out * w_out)
            for dh in range(k) for dw in range(k)]
    return jnp.concatenate(rows, axis=1)


def _weight_matrix_t(w):
    # w: (C_in, C_out, k, k) torch ConvTranspose2d layout -> (C_out, k*k*C_in),
    # spatially flipped, column order matching _im2col_t rows.
    C_in, C_out, k, _ = w.shape
    wflip = w[:, :, ::-1, ::-1]
    return jnp.transpose(wflip, (1, 2, 3, 0)).reshape(C_out, k * k * C_in)


# ---------------------------------------------------------------------------
# Final-layer fast path: k=4, stride=2 transposed conv via the s^2 = 4 phase
# decomposition.  Output pixel (2a+py, 2b+px) only touches weight taps
# (py+2ta, px+2tb) with ta,tb in {0,1}, so all four parities share ONE patch
# matrix built from the (un-dilated) input padded by 1.
# ---------------------------------------------------------------------------
def _phase_patches_k4s2(x):
    # x: (B, C, H, W) -> (B, 4*C, (H+1)*(W+1)); row = (ta*2 + tb)*C + c,
    # value = xpad1[c, a+1-ta, b+1-tb].
    B, C, H, W = x.shape
    xp = jnp.pad(x, ((0, 0), (0, 0), (1, 1), (1, 1)))
    Mo = (H + 1) * (W + 1)
    rows = [xp[:, :, 1 - ta:2 - ta + H, 1 - tb:2 - tb + W].reshape(B, C, Mo)
            for ta in range(2) for tb in range(2)]
    return jnp.concatenate(rows, axis=1)


def _phase_weight_k4s2(w):
    # w: (C_in, C_out, 4, 4) -> (4*C_out, 4*C_in);
    # row = (py*2 + px)*C_out + n, col = (ta*2 + tb)*C_in + c,
    # value = w[c, n, py + 2*ta, px + 2*tb].
    C_in, C_out = w.shape[:2]
    blocks = []
    for py in range(2):
        for px in range(2):
            wp = w[:, :, py::2, px::2]            # (C_in, C_out, ta, tb)
            wp = jnp.transpose(wp, (1, 2, 3, 0))  # (C_out, ta, tb, C_in)
            blocks.append(wp.reshape(C_out, 4 * C_in))
    return jnp.concatenate(blocks, axis=0)


def _phase_interleave_k4s2(y_t, C_out, h_half, w_half):
    # y_t: (B, 4*C_out, h_half*w_half) with rows (py*2+px)*C_out + n
    # -> (B, C_out, 2*h_half, 2*w_half), out[:, n, 2a+py, 2b+px] = phase value.
    B = y_t.shape[0]
    y = y_t.reshape(B, 2, 2, C_out, h_half, w_half)   # (B, py, px, n, a, b)
    y = jnp.transpose(y, (0, 3, 4, 1, 5, 2))          # (B, n, a, py, b, px)
    return y.reshape(B, C_out, 2 * h_half, 2 * w_half)


# ---------------------------------------------------------------------------
# Decoder definition (matches the torch Sequential in ImageDecoder_1)
# ---------------------------------------------------------------------------
# (kernel_size, stride, followed-by-ReLU+InstanceNorm)
LAYER_CFG = [
    (4, 1, True),
    (4, 2, True),
    (3, 2, True),
    (4, 2, True),
    (3, 2, True),
    (4, 2, False),   # final layer: bias only
]


def init_params(key, nf):
    chans = [nf + 12, nf, nf, nf // 2, nf // 2, nf // 4, 3]
    params = []
    for i, (k, _, _) in enumerate(LAYER_CFG):
        c_in, c_out = chans[i], chans[i + 1]
        key, kw, kb = jax.random.split(key, 3)
        bound = 1.0 / float(c_in * k * k) ** 0.5
        w = jax.random.uniform(kw, (c_in, c_out, k, k), jnp.float32, -bound, bound)
        b = jax.random.uniform(kb, (c_out,), jnp.float32, -bound, bound)
        params.append((w, b))
    return params


def image_decoder_forward(params, zAggr, KT):
    # zAggr: (B, k_imageDec), KT: (B, 3, 4)  ->  (B, 3, 180, 180) NCHW
    B = zAggr.shape[0]
    z = jnp.concatenate([zAggr, KT.reshape(B, 12)], axis=1)
    x = z.reshape(B, -1, 1, 1)                          # NCHW, 1x1 spatial
    for (k, s, act), (w, b) in zip(LAYER_CFG, params):
        C_out = w.shape[1]
        H, W = x.shape[2], x.shape[3]
        h_out, w_out = (H - 1) * s + k, (W - 1) * s + k
        use_phase = (k == 4 and s == 2 and not act)
        if use_phase:
            p_t = _phase_patches_k4s2(x)                # (B, 4*C_in, (H+1)*(W+1))
            w_t = _phase_weight_k4s2(w)                 # (4*C_out, 4*C_in)
            bias = jnp.tile(b, 4).reshape(4 * C_out, 1)
            y_t = _convt_matmul(p_t, w_t, bias, relu=False, inorm=False,
                                m_tile=M_TILE)
            x = _phase_interleave_k4s2(y_t, C_out, H + 1, W + 1)
        else:
            xpad = _dilate_pad(x, s, k)
            p_t = _im2col_t(xpad, k, h_out, w_out)      # (B, k*k*C_in, M)
            w_t = _weight_matrix_t(w)                   # (C_out, k*k*C_in)
            y_t = _convt_matmul(p_t, w_t, b.reshape(-1, 1),
                                relu=act, inorm=act, m_tile=M_TILE)
            x = y_t.reshape(B, C_out, h_out, w_out)
    return x                                            # (B, 3, 180, 180) NCHW


if __name__ == "__main__":
    nf = 32          # k_imageDec
    B = 2
    key = jax.random.PRNGKey(0)
    kz, kk, kp = jax.random.split(key, 3)
    zAggr = jax.random.normal(kz, (B, nf), jnp.float32)
    KT = jax.random.normal(kk, (B, 3, 4), jnp.float32)
    params = init_params(kp, nf)

    out = jax.jit(image_decoder_forward)(params, zAggr, KT)
    out = jax.block_until_ready(out)
    assert out.shape == (B, 3, 180, 180), out.shape
    assert bool(jnp.all(jnp.isfinite(out)))
    print("KERNEL_OK")
</pallas_src>

<mosaic_0001>
module attributes {stable_mosaic.version = 11 : i64} {
  func.func @_convt_kernel(%arg0: i32, %arg1: i32, %arg2: memref<1x704x16xbf16, #tpu.memory_space<vmem>>, %arg3: memref<32x704xbf16, #tpu.memory_space<vmem>>, %arg4: memref<32x1xf32, #tpu.memory_space<vmem>>, %arg5: memref<1x32x16xf32, #tpu.memory_space<vmem>>) attributes {dimension_semantics = [#tpu.dimension_semantics<parallel>, #tpu.dimension_semantics<parallel>], iteration_bounds = array<i64: 2, 1>, scalar_prefetch = 0 : i64, scratch_operands = 0 : i64, tpu.core_type = #tpu.core_type<tc>, window_params = [{transform_indices = @transform_0, window_bounds = array<i64: 1, 704, 16>}, {pipeline_mode = #tpu.pipeline_mode<synchronous>, transform_indices = @transform_1, window_bounds = array<i64: 32, 704>}, {pipeline_mode = #tpu.pipeline_mode<synchronous>, transform_indices = @transform_2, window_bounds = array<i64: 32, 1>}, {transform_indices = @transform_3, window_bounds = array<i64: 1, 32, 16>}]} {
    %c0 = arith.constant 0 : index
    %c0_0 = arith.constant 0 : index
    %0 = vector.load %arg3[%c0, %c0_0] : memref<32x704xbf16, #tpu.memory_space<vmem>>, vector<32x704xbf16>
    %c0_1 = arith.constant 0 : index
    %c0_2 = arith.constant 0 : index
    %c0_3 = arith.constant 0 : index
    %1 = vector.load %arg2[%c0_1, %c0_2, %c0_3] : memref<1x704x16xbf16, #tpu.memory_space<vmem>>, vector<1x704x16xbf16>
    %2 = vector.shape_cast %1 : vector<1x704x16xbf16> to vector<704x16xbf16>
    %cst = arith.constant dense<0.000000e+00> : vector<32x16xf32>
    %3 = tpu.matmul %0, %2, %cst {dimension_numbers = #tpu.dot_dimension_numbers<[1], [0], [0], [1], [0, 0, 1, 1], [], []>} : vector<32x704xbf16>, vector<704x16xbf16>, vector<32x16xf32> -> vector<32x16xf32>
    %c0_4 = arith.constant 0 : index
    %c0_5 = arith.constant 0 : index
    %4 = vector.load %arg4[%c0_4, %c0_5] : memref<32x1xf32, #tpu.memory_space<vmem>>, vector<32x1xf32>
    %5 = vector.broadcast %4 : vector<32x1xf32> to vector<32x16xf32>
    %6 = arith.addf %3, %5 : vector<32x16xf32>
    %cst_6 = arith.constant 0.000000e+00 : f32
    %7 = vector.broadcast %cst_6 : f32 to vector<32x16xf32>
    %8 = arith.maximumf %6, %7 : vector<32x16xf32>
    %cst_7 = arith.constant dense<0.000000e+00> : vector<32xf32>
    %9 = vector.multi_reduction <add>, %8, %cst_7 [1] : vector<32x16xf32> to vector<32xf32>
    %10 = vector.shape_cast %9 : vector<32xf32> to vector<32x1xf32>
    %cst_8 = arith.constant 1.600000e+01 : f32
    %11 = vector.broadcast %cst_8 : f32 to vector<32x1xf32>
    %12 = arith.divf %10, %11 : vector<32x1xf32>
    %13 = vector.broadcast %12 : vector<32x1xf32> to vector<32x16xf32>
    %14 = arith.subf %8, %13 : vector<32x16xf32>
    %15 = arith.mulf %14, %14 : vector<32x16xf32>
    %cst_9 = arith.constant dense<0.000000e+00> : vector<32xf32>
    %16 = vector.multi_reduction <add>, %15, %cst_9 [1] : vector<32x16xf32> to vector<32xf32>
    %17 = vector.shape_cast %16 : vector<32xf32> to vector<32x1xf32>
    %cst_10 = arith.constant 1.600000e+01 : f32
    %18 = vector.broadcast %cst_10 : f32 to vector<32x1xf32>
    %19 = arith.divf %17, %18 : vector<32x1xf32>
    %20 = vector.broadcast %12 : vector<32x1xf32> to vector<32x16xf32>
    %21 = arith.subf %8, %20 : vector<32x16xf32>
    %cst_11 = arith.constant 9.99999974E-6 : f32
    %22 = vector.broadcast %cst_11 : f32 to vector<32x1xf32>
    %23 = arith.addf %19, %22 : vector<32x1xf32>
    %24 = math.rsqrt %23 : vector<32x1xf32>
    %25 = vector.broadcast %24 : vector<32x1xf32> to vector<32x16xf32>
    %26 = arith.mulf %21, %25 : vector<32x16xf32>
    %c0_12 = arith.constant 0 : index
    %c0_13 = arith.constant 0 : index
    %c0_14 = arith.constant 0 : index
    %27 = vector.load %arg5[%c0_12, %c0_13, %c0_14] : memref<1x32x16xf32, #tpu.memory_space<vmem>>, vector<1x32x16xf32>
    %28 = vector.shape_cast %27 : vector<1x32x16xf32> to vector<32x16xf32>
    %29 = vector.shape_cast %26 : vector<32x16xf32> to vector<1x32x16xf32>
    tpu.vector_store %arg5[%c0_12, %c0_13, %c0_14], %29 {strides = array<i32>} : memref<1x32x16xf32, #tpu.memory_space<vmem>>, vector<1x32x16xf32>,
    return
  }
  func.func @transform_0(%arg0: i32, %arg1: i32) -> (i32, i32, i32) {
    %c0_i32 = arith.constant 0 : i32
    %c0_i32_0 = arith.constant 0 : i32
    return %arg0, %c0_i32, %arg1 : i32, i32, i32
  }
  func.func @transform_1(%arg0: i32, %arg1: i32) -> (i32, i32) {
    %c0_i32 = arith.constant 0 : i32
    %c0_i32_0 = arith.constant 0 : i32
    %c0_i32_1 = arith.constant 0 : i32
    return %c0_i32, %c0_i32_0 : i32, i32
  }
  func.func @transform_2(%arg0: i32, %arg1: i32) -> (i32, i32) {
    %c0_i32 = arith.constant 0 : i32
    %c0_i32_0 = arith.constant 0 : i32
    %c0_i32_1 = arith.constant 0 : i32
    return %c0_i32, %c0_i32_0 : i32, i32
  }
  func.func @transform_3(%arg0: i32, %arg1: i32) -> (i32, i32, i32) {
    %c0_i32 = arith.constant 0 : i32
    %c0_i32_0 = arith.constant 0 : i32
    return %arg0, %c0_i32, %arg1 : i32, i32, i32
  }
}

module attributes {stable_mosaic.version = 11 : i64} {
  func.func @_convt_kernel(%arg0: i32, %arg1: i32, %arg2: memref<1x512x100xbf16, #tpu.memory_space<vmem>>, %arg3: memref<32x512xbf16, #tpu.memory_space<vmem>>, %arg4: memref<32x1xf32, #tpu.memory_space<vmem>>, %arg5: memref<1x32x100xf32, #tpu.memory_space<vmem>>) attributes {dimension_semantics = [#tpu.dimension_semantics<parallel>, #tpu.dimension_semantics<parallel>], iteration_bounds = array<i64: 2, 1>, scalar_prefetch = 0 : i64, scratch_operands = 0 : i64, tpu.core_type = #tpu.core_type<tc>, window_params = [{transform_indices = @transform_0, window_bounds = array<i64: 1, 512, 100>}, {pipeline_mode = #tpu.pipeline_mode<synchronous>, transform_indices = @transform_1, window_bounds = array<i64: 32, 512>}, {pipeline_mode = #tpu.pipeline_mode<synchronous>, transform_indices = @transform_2, window_bounds = array<i64: 32, 1>}, {transform_indices = @transform_3, window_bounds = array<i64: 1, 32, 100>}]} {
    %c0 = arith.constant 0 : index
    %c0_0 = arith.constant 0 : index
    %0 = vector.load %arg3[%c0, %c0_0] : memref<32x512xbf16, #tpu.memory_space<vmem>>, vector<32x512xbf16>
    %c0_1 = arith.constant 0 : index
    %c0_2 = arith.constant 0 : index
    %c0_3 = arith.constant 0 : index
    %1 = vector.load %arg2[%c0_1, %c0_2, %c0_3] : memref<1x512x100xbf16, #tpu.memory_space<vmem>>, vector<1x512x100xbf16>
    %2 = vector.shape_cast %1 : vector<1x512x100xbf16> to vector<512x100xbf16>
    %cst = arith.constant dense<0.000000e+00> : vector<32x100xf32>
    %3 = tpu.matmul %0, %2, %cst {dimension_numbers = #tpu.dot_dimension_numbers<[1], [0], [0], [1], [0, 0, 1, 1], [], []>} : vector<32x512xbf16>, vector<512x100xbf16>, vector<32x100xf32> -> vector<32x100xf32>
    %c0_4 = arith.constant 0 : index
    %c0_5 = arith.constant 0 : index
    %4 = vector.load %arg4[%c0_4, %c0_5] : memref<32x1xf32, #tpu.memory_space<vmem>>, vector<32x1xf32>
    %5 = vector.broadcast %4 : vector<32x1xf32> to vector<32x100xf32>
    %6 = arith.addf %3, %5 : vector<32x100xf32>
    %cst_6 = arith.constant 0.000000e+00 : f32
    %7 = vector.broadcast %cst_6 : f32 to vector<32x100xf32>
    %8 = arith.maximumf %6, %7 : vector<32x100xf32>
    %cst_7 = arith.constant dense<0.000000e+00> : vector<32xf32>
    %9 = vector.multi_reduction <add>, %8, %cst_7 [1] : vector<32x100xf32> to vector<32xf32>
    %10 = vector.shape_cast %9 : vector<32xf32> to vector<32x1xf32>
    %cst_8 = arith.constant 1.000000e+02 : f32
    %11 = vector.broadcast %cst_8 : f32 to vector<32x1xf32>
    %12 = arith.divf %10, %11 : vector<32x1xf32>
    %13 = vector.broadcast %12 : vector<32x1xf32> to vector<32x100xf32>
    %14 = arith.subf %8, %13 : vector<32x100xf32>
    %15 = arith.mulf %14, %14 : vector<32x100xf32>
    %cst_9 = arith.constant dense<0.000000e+00> : vector<32xf32>
    %16 = vector.multi_reduction <add>, %15, %cst_9 [1] : vector<32x100xf32> to vector<32xf32>
    %17 = vector.shape_cast %16 : vector<32xf32> to vector<32x1xf32>
    %cst_10 = arith.constant 1.000000e+02 : f32
    %18 = vector.broadcast %cst_10 : f32 to vector<32x1xf32>
    %19 = arith.divf %17, %18 : vector<32x1xf32>
    %20 = vector.broadcast %12 : vector<32x1xf32> to vector<32x100xf32>
    %21 = arith.subf %8, %20 : vector<32x100xf32>
    %cst_11 = arith.constant 9.99999974E-6 : f32
    %22 = vector.broadcast %cst_11 : f32 to vector<32x1xf32>
    %23 = arith.addf %19, %22 : vector<32x1xf32>
    %24 = math.rsqrt %23 : vector<32x1xf32>
    %25 = vector.broadcast %24 : vector<32x1xf32> to vector<32x100xf32>
    %26 = arith.mulf %21, %25 : vector<32x100xf32>
    %c0_12 = arith.constant 0 : index
    %c0_13 = arith.constant 0 : index
    %c0_14 = arith.constant 0 : index
    %27 = vector.load %arg5[%c0_12, %c0_13, %c0_14] : memref<1x32x100xf32, #tpu.memory_space<vmem>>, vector<1x32x100xf32>
    %28 = vector.shape_cast %27 : vector<1x32x100xf32> to vector<32x100xf32>
    %29 = vector.shape_cast %26 : vector<32x100xf32> to vector<1x32x100xf32>
    tpu.vector_store %arg5[%c0_12, %c0_13, %c0_14], %29 {strides = array<i32>} : memref<1x32x100xf32, #tpu.memory_space<vmem>>, vector<1x32x100xf32>,
    return
  }
  func.func @transform_0(%arg0: i32, %arg1: i32) -> (i32, i32, i32) {
    %c0_i32 = arith.constant 0 : i32
    %c0_i32_0 = arith.constant 0 : i32
    return %arg0, %c0_i32, %arg1 : i32, i32, i32
  }
  func.func @transform_1(%arg0: i32, %arg1: i32) -> (i32, i32) {
    %c0_i32 = arith.constant 0 : i32
    %c0_i32_0 = arith.constant 0 : i32
    %c0_i32_1 = arith.constant 0 : i32
    return %c0_i32, %c0_i32_0 : i32, i32
  }
  func.func @transform_2(%arg0: i32, %arg1: i32) -> (i32, i32) {
    %c0_i32 = arith.constant 0 : i32
    %c0_i32_0 = arith.constant 0 : i32
    %c0_i32_1 = arith.constant 0 : i32
    return %c0_i32, %c0_i32_0 : i32, i32
  }
  func.func @transform_3(%arg0: i32, %arg1: i32) -> (i32, i32, i32) {
    %c0_i32 = arith.constant 0 : i32
    %c0_i32_0 = arith.constant 0 : i32
    return %arg0, %c0_i32, %arg1 : i32, i32, i32
  }
}

module attributes {stable_mosaic.version = 11 : i64} {
  func.func @_convt_kernel(%arg0: i32, %arg1: i32, %arg2: memref<1x288x441xbf16, #tpu.memory_space<vmem>>, %arg3: memref<16x288xbf16, #tpu.memory_space<vmem>>, %arg4: memref<16x1xf32, #tpu.memory_space<vmem>>, %arg5: memref<1x16x441xf32, #tpu.memory_space<vmem>>) attributes {dimension_semantics = [#tpu.dimension_semantics<parallel>, #tpu.dimension_semantics<parallel>], iteration_bounds = array<i64: 2, 1>, scalar_prefetch = 0 : i64, scratch_operands = 0 : i64, tpu.core_type = #tpu.core_type<tc>, window_params = [{transform_indices = @transform_0, window_bounds = array<i64: 1, 288, 441>}, {pipeline_mode = #tpu.pipeline_mode<synchronous>, transform_indices = @transform_1, window_bounds = array<i64: 16, 288>}, {pipeline_mode = #tpu.pipeline_mode<synchronous>, transform_indices = @transform_2, window_bounds = array<i64: 16, 1>}, {transform_indices = @transform_3, window_bounds = array<i64: 1, 16, 441>}]} {
    %c0 = arith.constant 0 : index
    %c0_0 = arith.constant 0 : index
    %0 = vector.load %arg3[%c0, %c0_0] : memref<16x288xbf16, #tpu.memory_space<vmem>>, vector<16x288xbf16>
    %c0_1 = arith.constant 0 : index
    %c0_2 = arith.constant 0 : index
    %c0_3 = arith.constant 0 : index
    %1 = vector.load %arg2[%c0_1, %c0_2, %c0_3] : memref<1x288x441xbf16, #tpu.memory_space<vmem>>, vector<1x288x441xbf16>
    %2 = vector.shape_cast %1 : vector<1x288x441xbf16> to vector<288x441xbf16>
    %cst = arith.constant dense<0.000000e+00> : vector<16x441xf32>
    %3 = tpu.matmul %0, %2, %cst {dimension_numbers = #tpu.dot_dimension_numbers<[1], [0], [0], [1], [0, 0, 1, 1], [], []>} : vector<16x288xbf16>, vector<288x441xbf16>, vector<16x441xf32> -> vector<16x441xf32>
    %c0_4 = arith.constant 0 : index
    %c0_5 = arith.constant 0 : index
    %4 = vector.load %arg4[%c0_4, %c0_5] : memref<16x1xf32, #tpu.memory_space<vmem>>, vector<16x1xf32>
    %5 = vector.broadcast %4 : vector<16x1xf32> to vector<16x441xf32>
    %6 = arith.addf %3, %5 : vector<16x441xf32>
    %cst_6 = arith.constant 0.000000e+00 : f32
    %7 = vector.broadcast %cst_6 : f32 to vector<16x441xf32>
    %8 = arith.maximumf %6, %7 : vector<16x441xf32>
    %cst_7 = arith.constant dense<0.000000e+00> : vector<16xf32>
    %9 = vector.multi_reduction <add>, %8, %cst_7 [1] : vector<16x441xf32> to vector<16xf32>
    %10 = vector.shape_cast %9 : vector<16xf32> to vector<16x1xf32>
    %cst_8 = arith.constant 4.410000e+02 : f32
    %11 = vector.broadcast %cst_8 : f32 to vector<16x1xf32>
    %12 = arith.divf %10, %11 : vector<16x1xf32>
    %13 = vector.broadcast %12 : vector<16x1xf32> to vector<16x441xf32>
    %14 = arith.subf %8, %13 : vector<16x441xf32>
    %15 = arith.mulf %14, %14 : vector<16x441xf32>
    %cst_9 = arith.constant dense<0.000000e+00> : vector<16xf32>
    %16 = vector.multi_reduction <add>, %15, %cst_9 [1] : vector<16x441xf32> to vector<16xf32>
    %17 = vector.shape_cast %16 : vector<16xf32> to vector<16x1xf32>
    %cst_10 = arith.constant 4.410000e+02 : f32
    %18 = vector.broadcast %cst_10 : f32 to vector<16x1xf32>
    %19 = arith.divf %17, %18 : vector<16x1xf32>
    %20 = vector.broadcast %12 : vector<16x1xf32> to vector<16x441xf32>
    %21 = arith.subf %8, %20 : vector<16x441xf32>
    %cst_11 = arith.constant 9.99999974E-6 : f32
    %22 = vector.broadcast %cst_11 : f32 to vector<16x1xf32>
    %23 = arith.addf %19, %22 : vector<16x1xf32>
    %24 = math.rsqrt %23 : vector<16x1xf32>
    %25 = vector.broadcast %24 : vector<16x1xf32> to vector<16x441xf32>
    %26 = arith.mulf %21, %25 : vector<16x441xf32>
    %c0_12 = arith.constant 0 : index
    %c0_13 = arith.constant 0 : index
    %c0_14 = arith.constant 0 : index
    %27 = vector.load %arg5[%c0_12, %c0_13, %c0_14] : memref<1x16x441xf32, #tpu.memory_space<vmem>>, vector<1x16x441xf32>
    %28 = vector.shape_cast %27 : vector<1x16x441xf32> to vector<16x441xf32>
    %29 = vector.shape_cast %26 : vector<16x441xf32> to vector<1x16x441xf32>
    tpu.vector_store %arg5[%c0_12, %c0_13, %c0_14], %29 {strides = array<i32>} : memref<1x16x441xf32, #tpu.memory_space<vmem>>, vector<1x16x441xf32>,
    return
  }
  func.func @transform_0(%arg0: i32, %arg1: i32) -> (i32, i32, i32) {
    %c0_i32 = arith.constant 0 : i32
    %c0_i32_0 = arith.constant 0 : i32
    return %arg0, %c0_i32, %arg1 : i32, i32, i32
  }
  func.func @transform_1(%arg0: i32, %arg1: i32) -> (i32, i32) {
    %c0_i32 = arith.constant 0 : i32
    %c0_i32_0 = arith.constant 0 : i32
    %c0_i32_1 = arith.constant 0 : i32
    return %c0_i32, %c0_i32_0 : i32, i32
  }
  func.func @transform_2(%arg0: i32, %arg1: i32) -> (i32, i32) {
    %c0_i32 = arith.constant 0 : i32
    %c0_i32_0 = arith.constant 0 : i32
    %c0_i32_1 = arith.constant 0 : i32
    return %c0_i32, %c0_i32_0 : i32, i32
  }
  func.func @transform_3(%arg0: i32, %arg1: i32) -> (i32, i32, i32) {
    %c0_i32 = arith.constant 0 : i32
    %c0_i32_0 = arith.constant 0 : i32
    return %arg0, %c0_i32, %arg1 : i32, i32, i32
  }
}

module attributes {stable_mosaic.version = 11 : i64} {
  func.func @_convt_kernel(%arg0: i32, %arg1: i32, %arg2: memref<1x256x1936xbf16, #tpu.memory_space<vmem>>, %arg3: memref<16x256xbf16, #tpu.memory_space<vmem>>, %arg4: memref<16x1xf32, #tpu.memory_space<vmem>>, %arg5: memref<1x16x1936xf32, #tpu.memory_space<vmem>>) attributes {dimension_semantics = [#tpu.dimension_semantics<parallel>, #tpu.dimension_semantics<parallel>], iteration_bounds = array<i64: 2, 1>, scalar_prefetch = 0 : i64, scratch_operands = 0 : i64, tpu.core_type = #tpu.core_type<tc>, window_params = [{transform_indices = @transform_0, window_bounds = array<i64: 1, 256, 1936>}, {pipeline_mode = #tpu.pipeline_mode<synchronous>, transform_indices = @transform_1, window_bounds = array<i64: 16, 256>}, {pipeline_mode = #tpu.pipeline_mode<synchronous>, transform_indices = @transform_2, window_bounds = array<i64: 16, 1>}, {transform_indices = @transform_3, window_bounds = array<i64: 1, 16, 1936>}]} {
    %c0 = arith.constant 0 : index
    %c0_0 = arith.constant 0 : index
    %0 = vector.load %arg3[%c0, %c0_0] : memref<16x256xbf16, #tpu.memory_space<vmem>>, vector<16x256xbf16>
    %c0_1 = arith.constant 0 : index
    %c0_2 = arith.constant 0 : index
    %c0_3 = arith.constant 0 : index
    %1 = vector.load %arg2[%c0_1, %c0_2, %c0_3] : memref<1x256x1936xbf16, #tpu.memory_space<vmem>>, vector<1x256x1936xbf16>
    %2 = vector.shape_cast %1 : vector<1x256x1936xbf16> to vector<256x1936xbf16>
    %cst = arith.constant dense<0.000000e+00> : vector<16x1936xf32>
    %3 = tpu.matmul %0, %2, %cst {dimension_numbers = #tpu.dot_dimension_numbers<[1], [0], [0], [1], [0, 0, 1, 1], [], []>} : vector<16x256xbf16>, vector<256x1936xbf16>, vector<16x1936xf32> -> vector<16x1936xf32>
    %c0_4 = arith.constant 0 : index
    %c0_5 = arith.constant 0 : index
    %4 = vector.load %arg4[%c0_4, %c0_5] : memref<16x1xf32, #tpu.memory_space<vmem>>, vector<16x1xf32>
    %5 = vector.broadcast %4 : vector<16x1xf32> to vector<16x1936xf32>
    %6 = arith.addf %3, %5 : vector<16x1936xf32>
    %cst_6 = arith.constant 0.000000e+00 : f32
    %7 = vector.broadcast %cst_6 : f32 to vector<16x1936xf32>
    %8 = arith.maximumf %6, %7 : vector<16x1936xf32>
    %cst_7 = arith.constant dense<0.000000e+00> : vector<16xf32>
    %9 = vector.multi_reduction <add>, %8, %cst_7 [1] : vector<16x1936xf32> to vector<16xf32>
    %10 = vector.shape_cast %9 : vector<16xf32> to vector<16x1xf32>
    %cst_8 = arith.constant 1.936000e+03 : f32
    %11 = vector.broadcast %cst_8 : f32 to vector<16x1xf32>
    %12 = arith.divf %10, %11 : vector<16x1xf32>
    %13 = vector.broadcast %12 : vector<16x1xf32> to vector<16x1936xf32>
    %14 = arith.subf %8, %13 : vector<16x1936xf32>
    %15 = arith.mulf %14, %14 : vector<16x1936xf32>
    %cst_9 = arith.constant dense<0.000000e+00> : vector<16xf32>
    %16 = vector.multi_reduction <add>, %15, %cst_9 [1] : vector<16x1936xf32> to vector<16xf32>
    %17 = vector.shape_cast %16 : vector<16xf32> to vector<16x1xf32>
    %cst_10 = arith.constant 1.936000e+03 : f32
    %18 = vector.broadcast %cst_10 : f32 to vector<16x1xf32>
    %19 = arith.divf %17, %18 : vector<16x1xf32>
    %20 = vector.broadcast %12 : vector<16x1xf32> to vector<16x1936xf32>
    %21 = arith.subf %8, %20 : vector<16x1936xf32>
    %cst_11 = arith.constant 9.99999974E-6 : f32
    %22 = vector.broadcast %cst_11 : f32 to vector<16x1xf32>
    %23 = arith.addf %19, %22 : vector<16x1xf32>
    %24 = math.rsqrt %23 : vector<16x1xf32>
    %25 = vector.broadcast %24 : vector<16x1xf32> to vector<16x1936xf32>
    %26 = arith.mulf %21, %25 : vector<16x1936xf32>
    %c0_12 = arith.constant 0 : index
    %c0_13 = arith.constant 0 : index
    %c0_14 = arith.constant 0 : index
    %27 = vector.load %arg5[%c0_12, %c0_13, %c0_14] : memref<1x16x1936xf32, #tpu.memory_space<vmem>>, vector<1x16x1936xf32>
    %28 = vector.shape_cast %27 : vector<1x16x1936xf32> to vector<16x1936xf32>
    %29 = vector.shape_cast %26 : vector<16x1936xf32> to vector<1x16x1936xf32>
    tpu.vector_store %arg5[%c0_12, %c0_13, %c0_14], %29 {strides = array<i32>} : memref<1x16x1936xf32, #tpu.memory_space<vmem>>, vector<1x16x1936xf32>,
    return
  }
  func.func @transform_0(%arg0: i32, %arg1: i32) -> (i32, i32, i32) {
    %c0_i32 = arith.constant 0 : i32
    %c0_i32_0 = arith.constant 0 : i32
    return %arg0, %c0_i32, %arg1 : i32, i32, i32
  }
  func.func @transform_1(%arg0: i32, %arg1: i32) -> (i32, i32) {
    %c0_i32 = arith.constant 0 : i32
    %c0_i32_0 = arith.constant 0 : i32
    %c0_i32_1 = arith.constant 0 : i32
    return %c0_i32, %c0_i32_0 : i32, i32
  }
  func.func @transform_2(%arg0: i32, %arg1: i32) -> (i32, i32) {
    %c0_i32 = arith.constant 0 : i32
    %c0_i32_0 = arith.constant 0 : i32
    %c0_i32_1 = arith.constant 0 : i32
    return %c0_i32, %c0_i32_0 : i32, i32
  }
  func.func @transform_3(%arg0: i32, %arg1: i32) -> (i32, i32, i32) {
    %c0_i32 = arith.constant 0 : i32
    %c0_i32_0 = arith.constant 0 : i32
    return %arg0, %c0_i32, %arg1 : i32, i32, i32
  }
}

module attributes {stable_mosaic.version = 11 : i64} {
  func.func @_convt_kernel(%arg0: i32, %arg1: i32, %arg2: memref<1x144x7921xbf16, #tpu.memory_space<vmem>>, %arg3: memref<8x144xbf16, #tpu.memory_space<vmem>>, %arg4: memref<8x1xf32, #tpu.memory_space<vmem>>, %arg5: memref<1x8x7921xf32, #tpu.memory_space<vmem>>) attributes {dimension_semantics = [#tpu.dimension_semantics<parallel>, #tpu.dimension_semantics<parallel>], iteration_bounds = array<i64: 2, 1>, scalar_prefetch = 0 : i64, scratch_operands = 0 : i64, tpu.core_type = #tpu.core_type<tc>, window_params = [{transform_indices = @transform_0, window_bounds = array<i64: 1, 144, 7921>}, {pipeline_mode = #tpu.pipeline_mode<synchronous>, transform_indices = @transform_1, window_bounds = array<i64: 8, 144>}, {pipeline_mode = #tpu.pipeline_mode<synchronous>, transform_indices = @transform_2, window_bounds = array<i64: 8, 1>}, {transform_indices = @transform_3, window_bounds = array<i64: 1, 8, 7921>}]} {
    %c0 = arith.constant 0 : index
    %c0_0 = arith.constant 0 : index
    %0 = vector.load %arg3[%c0, %c0_0] : memref<8x144xbf16, #tpu.memory_space<vmem>>, vector<8x144xbf16>
    %c0_1 = arith.constant 0 : index
    %c0_2 = arith.constant 0 : index
    %c0_3 = arith.constant 0 : index
    %1 = vector.load %arg2[%c0_1, %c0_2, %c0_3] : memref<1x144x7921xbf16, #tpu.memory_space<vmem>>, vector<1x144x7921xbf16>
    %2 = vector.shape_cast %1 : vector<1x144x7921xbf16> to vector<144x7921xbf16>
    %cst = arith.constant dense<0.000000e+00> : vector<8x7921xf32>
    %3 = tpu.matmul %0, %2, %cst {dimension_numbers = #tpu.dot_dimension_numbers<[1], [0], [0], [1], [0, 0, 1, 1], [], []>} : vector<8x144xbf16>, vector<144x7921xbf16>, vector<8x7921xf32> -> vector<8x7921xf32>
    %c0_4 = arith.constant 0 : index
    %c0_5 = arith.constant 0 : index
    %4 = vector.load %arg4[%c0_4, %c0_5] : memref<8x1xf32, #tpu.memory_space<vmem>>, vector<8x1xf32>
    %5 = vector.broadcast %4 : vector<8x1xf32> to vector<8x7921xf32>
    %6 = arith.addf %3, %5 : vector<8x7921xf32>
    %cst_6 = arith.constant 0.000000e+00 : f32
    %7 = vector.broadcast %cst_6 : f32 to vector<8x7921xf32>
    %8 = arith.maximumf %6, %7 : vector<8x7921xf32>
    %cst_7 = arith.constant dense<0.000000e+00> : vector<8xf32>
    %9 = vector.multi_reduction <add>, %8, %cst_7 [1] : vector<8x7921xf32> to vector<8xf32>
    %10 = vector.shape_cast %9 : vector<8xf32> to vector<8x1xf32>
    %cst_8 = arith.constant 7.921000e+03 : f32
    %11 = vector.broadcast %cst_8 : f32 to vector<8x1xf32>
    %12 = arith.divf %10, %11 : vector<8x1xf32>
    %13 = vector.broadcast %12 : vector<8x1xf32> to vector<8x7921xf32>
    %14 = arith.subf %8, %13 : vector<8x7921xf32>
    %15 = arith.mulf %14, %14 : vector<8x7921xf32>
    %cst_9 = arith.constant dense<0.000000e+00> : vector<8xf32>
    %16 = vector.multi_reduction <add>, %15, %cst_9 [1] : vector<8x7921xf32> to vector<8xf32>
    %17 = vector.shape_cast %16 : vector<8xf32> to vector<8x1xf32>
    %cst_10 = arith.constant 7.921000e+03 : f32
    %18 = vector.broadcast %cst_10 : f32 to vector<8x1xf32>
    %19 = arith.divf %17, %18 : vector<8x1xf32>
    %20 = vector.broadcast %12 : vector<8x1xf32> to vector<8x7921xf32>
    %21 = arith.subf %8, %20 : vector<8x7921xf32>
    %cst_11 = arith.constant 9.99999974E-6 : f32
    %22 = vector.broadcast %cst_11 : f32 to vector<8x1xf32>
    %23 = arith.addf %19, %22 : vector<8x1xf32>
    %24 = math.rsqrt %23 : vector<8x1xf32>
    %25 = vector.broadcast %24 : vector<8x1xf32> to vector<8x7921xf32>
    %26 = arith.mulf %21, %25 : vector<8x7921xf32>
    %c0_12 = arith.constant 0 : index
    %c0_13 = arith.constant 0 : index
    %c0_14 = arith.constant 0 : index
    %27 = vector.load %arg5[%c0_12, %c0_13, %c0_14] : memref<1x8x7921xf32, #tpu.memory_space<vmem>>, vector<1x8x7921xf32>
    %28 = vector.shape_cast %27 : vector<1x8x7921xf32> to vector<8x7921xf32>
    %29 = vector.shape_cast %26 : vector<8x7921xf32> to vector<1x8x7921xf32>
    tpu.vector_store %arg5[%c0_12, %c0_13, %c0_14], %29 {strides = array<i32>} : memref<1x8x7921xf32, #tpu.memory_space<vmem>>, vector<1x8x7921xf32>,
    return
  }
  func.func @transform_0(%arg0: i32, %arg1: i32) -> (i32, i32, i32) {
    %c0_i32 = arith.constant 0 : i32
    %c0_i32_0 = arith.constant 0 : i32
    return %arg0, %c0_i32, %arg1 : i32, i32, i32
  }
  func.func @transform_1(%arg0: i32, %arg1: i32) -> (i32, i32) {
    %c0_i32 = arith.constant 0 : i32
    %c0_i32_0 = arith.constant 0 : i32
    %c0_i32_1 = arith.constant 0 : i32
    return %c0_i32, %c0_i32_0 : i32, i32
  }
  func.func @transform_2(%arg0: i32, %arg1: i32) -> (i32, i32) {
    %c0_i32 = arith.constant 0 : i32
    %c0_i32_0 = arith.constant 0 : i32
    %c0_i32_1 = arith.constant 0 : i32
    return %c0_i32, %c0_i32_0 : i32, i32
  }
  func.func @transform_3(%arg0: i32, %arg1: i32) -> (i32, i32, i32) {
    %c0_i32 = arith.constant 0 : i32
    %c0_i32_0 = arith.constant 0 : i32
    return %arg0, %c0_i32, %arg1 : i32, i32, i32
  }
}

module attributes {stable_mosaic.version = 11 : i64} {
  func.func @_convt_kernel(%arg0: i32, %arg1: i32, %arg2: memref<1x32x2048xbf16, #tpu.memory_space<vmem>>, %arg3: memref<12x32xbf16, #tpu.memory_space<vmem>>, %arg4: memref<12x1xf32, #tpu.memory_space<vmem>>, %arg5: memref<1x12x2048xf32, #tpu.memory_space<vmem>>) attributes {dimension_semantics = [#tpu.dimension_semantics<parallel>, #tpu.dimension_semantics<parallel>], iteration_bounds = array<i64: 2, 4>, scalar_prefetch = 0 : i64, scratch_operands = 0 : i64, tpu.core_type = #tpu.core_type<tc>, window_params = [{transform_indices = @transform_0, window_bounds = array<i64: 1, 32, 2048>}, {pipeline_mode = #tpu.pipeline_mode<synchronous>, transform_indices = @transform_1, window_bounds = array<i64: 12, 32>}, {pipeline_mode = #tpu.pipeline_mode<synchronous>, transform_indices = @transform_2, window_bounds = array<i64: 12, 1>}, {transform_indices = @transform_3, window_bounds = array<i64: 1, 12, 2048>}]} {
    %c0 = arith.constant 0 : index
    %c0_0 = arith.constant 0 : index
    %0 = vector.load %arg3[%c0, %c0_0] : memref<12x32xbf16, #tpu.memory_space<vmem>>, vector<12x32xbf16>
    %c0_1 = arith.constant 0 : index
    %c0_2 = arith.constant 0 : index
    %c0_3 = arith.constant 0 : index
    %1 = vector.load %arg2[%c0_1, %c0_2, %c0_3] : memref<1x32x2048xbf16, #tpu.memory_space<vmem>>, vector<1x32x2048xbf16>
    %2 = vector.shape_cast %1 : vector<1x32x2048xbf16> to vector<32x2048xbf16>
    %cst = arith.constant dense<0.000000e+00> : vector<12x2048xf32>
    %3 = tpu.matmul %0, %2, %cst {dimension_numbers = #tpu.dot_dimension_numbers<[1], [0], [0], [1], [0, 0, 1, 1], [], []>} : vector<12x32xbf16>, vector<32x2048xbf16>, vector<12x2048xf32> -> vector<12x2048xf32>
    %c0_4 = arith.constant 0 : index
    %c0_5 = arith.constant 0 : index
    %4 = vector.load %arg4[%c0_4, %c0_5] : memref<12x1xf32, #tpu.memory_space<vmem>>, vector<12x1xf32>
    %5 = vector.broadcast %4 : vector<12x1xf32> to vector<12x2048xf32>
    %6 = arith.addf %3, %5 : vector<12x2048xf32>
    %c0_6 = arith.constant 0 : index
    %c0_7 = arith.constant 0 : index
    %c0_8 = arith.constant 0 : index
    %7 = vector.load %arg5[%c0_6, %c0_7, %c0_8] : memref<1x12x2048xf32, #tpu.memory_space<vmem>>, vector<1x12x2048xf32>
    %8 = vector.shape_cast %7 : vector<1x12x2048xf32> to vector<12x2048xf32>
    %9 = vector.shape_cast %6 : vector<12x2048xf32> to vector<1x12x2048xf32>
    tpu.vector_store %arg5[%c0_6, %c0_7, %c0_8], %9 {strides = array<i32>} : memref<1x12x2048xf32, #tpu.memory_space<vmem>>, vector<1x12x2048xf32>,
    return
  }
  func.func @transform_0(%arg0: i32, %arg1: i32) -> (i32, i32, i32) {
    %c0_i32 = arith.constant 0 : i32
    %c0_i32_0 = arith.constant 0 : i32
    return %arg0, %c0_i32, %arg1 : i32, i32, i32
  }
  func.func @transform_1(%arg0: i32, %arg1: i32) -> (i32, i32) {
    %c0_i32 = arith.constant 0 : i32
    %c0_i32_0 = arith.constant 0 : i32
    %c0_i32_1 = arith.constant 0 : i32
    return %c0_i32, %c0_i32_0 : i32, i32
  }
  func.func @transform_2(%arg0: i32, %arg1: i32) -> (i32, i32) {
    %c0_i32 = arith.constant 0 : i32
    %c0_i32_0 = arith.constant 0 : i32
    %c0_i32_1 = arith.constant 0 : i32
    return %c0_i32, %c0_i32_0 : i32, i32
  }
  func.func @transform_3(%arg0: i32, %arg1: i32) -> (i32, i32, i32) {
    %c0_i32 = arith.constant 0 : i32
    %c0_i32_0 = arith.constant 0 : i32
    return %arg0, %c0_i32, %arg1 : i32, i32, i32
  }
}

</mosaic_0001>

<bundles_post_ra>
// kernel: tile.8
= control target key start
LH: loop header
LB: loop body
LE: loop exit
PB: predicated region body
PF: predicated region fallthrough
CT: control target
= control target key end

     0   :  { %2 = vsyncpa [#allocation1], 0  ;;  %s42_s6 = smov [#allocation0]   ;;  %s59_s0 = inlined_call_operand.hbm [shape: f32[3], index: 0, kind: input, shape index: {}]   ;;  %s60_s1 = inlined_call_operand.vmem [shape: f32[4,3], index: 1, kind: output, shape index: {}]  }
   0x1   :  { %s9_s7 = sshll.u32 %s42_s6, 4  ;;  %s10_s7 = int_to_ptr.vmem [resolvable:$true] %s9_s7 }
   0x2   :  { %s28_s8 = scalar_lea.vmem %s10_s7, 16  ;;  %s32_s9 = scalar_lea.vmem %s10_s7, 32 }
   0x3   :  { %p29_p0 = scmp.ne.s32.totalorder %s10_s7, %s28_s8  ;;  %p33_p1 = scmp.lt.s32.totalorder %s10_s7, %s10_s7 }
   0x4   :  { %p34_p2 = scmp.lt.s32.totalorder %s32_s9, %s28_s8 }
   0x6   :  { %p35_p3 = por %p34_p2, %p33_p1 }
   0x8   :  { %p36_p4 = pnand %p35_p3, %p29_p0 }
   0xa   :  { %39 = shalt.err (!%p36_p4)
}
   0xb   :  { %12 = dma.hbm_to_vmem [thread:$0]  %s59_s0, 16, %s10_s7, [#allocation1]  }
   0xc   :  { %40 = dma.done.wait [#allocation1], 16  }
   0xd   :  { %41 = vsyncadd [#allocation1], 4294967280  ;;  %v16_v0 = vld [vmem:[#allocation0] ss:$0 sm:$0xff] }
   0xe   :  { %17 = vst [vmem:[%s60_s1] sm:$0xf] %v16_v0 }
   0xf   :  { %18 = vsyncpa [#allocation1], 1 }

// kernel: tile.0
= control target key start
LH: loop header
LB: loop body
LE: loop exit
PB: predicated region body
PF: predicated region fallthrough
CT: control target
= control target key end

     0   :  { %vm8_vm0 = vcmask 7168   ;;  %s27_s10 = smov 126   ;;  %s50_s0 = inlined_call_operand.vmem [shape: f32[4,3], index: 0, kind: input, shape index: {}]   ;;  %s51_s1 = inlined_call_operand.vmem [shape: f32[12,1], index: 1, kind: output, shape index: {}]  }
   0x1   :  { %v5_v0 = vld [vmem:[%s50_s0] sm:$0xf]  ;;  %s26_s0 = smov 127  }
   0x2   :  { %6 = vst [vmem:[#allocation0] sm:$0xf] %v5_v0 }
   0x9   :  { %v10_v1 = vld [vmem:[#allocation0] sm:$0xf]  }
   0xa   :  { %v7_v2 = vld [vmem:[#allocation0] sm:$0xf]   ;;  %11 = vrot.lane.b32.xlu0 %v10_v1, %s26_s0 }
   0xb   :  { %9 = vst.msk [vmem:[%s51_s1] ss:$3 sm:$0xf] %vm8_vm0, %v7_v2   ;;  %v16_v3 = vld [vmem:[#allocation0] sm:$0xf]  }
   0xe   :  { %17 = vrot.lane.b32.xlu0 %v16_v3, %s27_s10 }
  0x7c   :  { %v12_v4 = vpop.permute.xlu0 %11  }
  0x7d   :  { %22 = vst.msk [vmem:[%s51_s1 + $0x1] ss:$3 sm:$0xf] %vm8_vm0, %v12_v4  }
  0x80   :  { %v18_v5 = vpop.permute.xlu0 %17  }
  0x81   :  { %23 = vst.msk [vmem:[%s51_s1 + $0x2] ss:$3 sm:$0xf] %vm8_vm0, %v18_v5  }

// kernel: image_decoder_forward.6
= control target key start
LH: loop header
LB: loop body
LE: loop exit
PB: predicated region body
PF: predicated region fallthrough
CT: control target
= control target key end

     0   :  { %s1216_s12 = smov 0   ;;  %s1218_s13 = smov 0   ;;  %s1375_s0 = inlined_call_operand.vmem [shape: bf16[2,704,16], index: 0, kind: input, shape index: {}]   ;;  %s1376_s1 = inlined_call_operand.vmem [shape: bf16[32,704], index: 1, kind: input, shape index: {}]   ;;  %s1377_s2 = inlined_call_operand.vmem [shape: f32[32,1], index: 2, kind: input, shape index: {}]   ;;  %s1378_s3 = inlined_call_operand.vmem [shape: f32[2,32,16], index: 3, kind: output, shape index: {}]  }
   0x1   :  { %s1220_s14 = smov 0  }
   0x2 LB: > { %s25_s15 = sadd.s32 1, %s1189_s13  ;;  %p952_p0 = scmp.ge.s32.totalorder %s1193_s14, 1  ;;  %s1193_s14 = sphi %s1220_s14, %s13_s14   ;;  %s1189_s13 = sphi %s1218_s13, %s1380_s13   ;;  %s1185_s12 = sphi %s1216_s12, %s1379_s12  }
   0x3   : > { %p27_p1 = scmp.ge.s32.totalorder %s25_s15, 2  ;;  %p156_p2 = scmp.lt.s32.totalorder %s1193_s14, 3 }
   0x5   : > { %s1382_s15 = smov (%p27_p1, %s25_s15), 0  ;;  %p157_p3 = pnand %p952_p0, %p156_p2 }
   0x6   : > { %p186_p4 = scmp.lt.s32.totalorder (!%p157_p3), %s1185_s12, 1 }
   0x7   : > { %160 = sbr.rel (%p157_p3) target bundleno = 601 (0x259), region = 32 }
   0xc   : > { %v1195_v0 = vmov 0   ;;  %v1123_v1 = vld [vmem:[%s1376_s1 + $0x4] ss:$24 sps:$4 sm:$0xff]   ;;  %s1384_s12 = smov (!%p186_p4, %s1185_s12), 1  ;;  %vm649_vm0 = vcmask 523264   ;;  %v305_v43 = vld [vmem:[%s1377_s2 + $0x10] sm:$0xff] }
   0xd   : > { %754 = vmatprep.subr.bf16.mxu0 %v1195_v0  ;;  %1099 = vset.pattern.permute.xlu0 %v1195_v0  ;;  %s1073_s18 = smul.u32 352, %s1384_s12  ;;  %v1156_v2 = vld [vmem:[%s1376_s1 + $0x14] ss:$24 sps:$4 sm:$0xff]   ;;  %v1121_v25 = vld [vmem:[%s1376_s1] ss:$24 sps:$4 sm:$0xff]   ;;  %vm807_vm1 = vcmask 130048  }
   0xe   : > { %1100 = vset.pattern.permute.xlu1 %v1195_v0  ;;  %688 = vmatprep.mubr.bf16.mxu1 %v1123_v1  ;;  %v1137_v27 = vld [vmem:[%s1376_s1 + $0x34] ss:$24 sps:$4 sm:$0xff]   ;;  %v1141_v34 = vld [vmem:[%s1376_s1 + $0x30] ss:$24 sps:$4 sm:$0xff]   ;;  %v303_v42 = vld [vmem:[%s1377_s2] sm:$0xff]  ;;  %s1016_s29 = sshll.u32 %s1384_s12, 5 }
   0xf   : > { %s1249_s23 = scalar_lea.vmem %s1375_s0, %s1073_s18  ;;  %1012 = vmatprep.mubr.msk.bf16.mxu0 %vm649_vm0, %v1156_v2  ;;  %v1153_v35 = vld [vmem:[%s1376_s1 + $0xc] ss:$24 sps:$4 sm:$0xff]   ;;  %309 = vperm.xlu0 %1099, %v303_v42   ;;  %v306_v46 = vld [vmem:[%s1377_s2 + $0x18] sm:$0xff]  ;;  %v1154_v53 = vld [vmem:[%s1376_s1 + $0x10] ss:$24 sps:$4 sm:$0xff]   ;;  %s201_s5 = scalar_lea.vmem %s1378_s3, %s1016_s29 }
  0x10   : > { %v1101_v3 = vld [vmem:[%s1249_s23 + $0x78] sm:$0xff]   ;;  %v1103_v5 = vld [vmem:[%s1249_s23 + $0x70] sm:$0xff]   ;;  %v1105_v7 = vld [vmem:[%s1249_s23 + $0x68] sm:$0xff]   ;;  %319 = vperm.xlu1 %1100, %v305_v43  }
  0x11   : > { %v1102_v4 = vld [vmem:[%s1249_s23 + $0x38] sm:$0xff]   ;;  %1017 = vmatprep.subr.bf16.mxu1 %v1101_v3  ;;  %v1104_v6 = vld [vmem:[%s1249_s23 + $0x30] sm:$0xff]   ;;  %v1106_v8 = vld [vmem:[%s1249_s23 + $0x28] sm:$0xff]  }
  0x12   : > { %1018 = vmatpush3.bf16.msra.mxu1 %v1102_v4  ;;  %v1107_v9 = vld [vmem:[%s1249_s23 + $0x60] sm:$0xff]   ;;  %v1111_v10 = vld [vmem:[%s1249_s23 + $0x138] sm:$0xff]   ;;  %v1114_v13 = vld [vmem:[%s1249_s23 + $0x130] sm:$0xff]  }
  0x13   : > { %1019 = vmatprep.subr.bf16.mxu1 %v1103_v5  ;;  %v1108_v11 = vld [vmem:[%s1249_s23 + $0x20] sm:$0xff]   ;;  %v1109_v12 = vld [vmem:[%s1249_s23 + $0x58] sm:$0xff]   ;;  %755 = vmatpush1.bf16.msra.mxu0 %v1111_v10  ;;  %v1112_v15 = vld [vmem:[%s1249_s23 + $0x50] sm:$0xff]  }
  0x14   : > { %756 = vmatprep.subr.bf16.mxu0 %v1195_v0  ;;  %v1110_v14 = vld [vmem:[%s1249_s23 + $0x18] sm:$0xff]   ;;  %v1117_v16 = vld [vmem:[%s1249_s23 + $0x128] sm:$0xff]   ;;  %v1113_v17 = vld [vmem:[%s1249_s23 + $0x10] sm:$0xff]   ;;  %324 = vperm.xlu1 %1100, %v306_v46  }
  0x15   : > { %v1115_v18 = vld [vmem:[%s1249_s23 + $0x48] sm:$0xff]   ;;  %v1120_v19 = vld [vmem:[%s1249_s23 + $0x120] sm:$0xff]   ;;  %v1126_v22 = vld [vmem:[%s1249_s23 + $0x118] sm:$0xff]  }
  0x16   : > { %1020 = vmatpush3.bf16.msra.mxu1 %v1104_v6  ;;  %v1116_v20 = vld [vmem:[%s1249_s23 + $0x8] sm:$0xff]   ;;  %v1118_v21 = vld [vmem:[%s1249_s23 + $0x40] sm:$0xff]   ;;  %v1124_v24 = vld [vmem:[%s1249_s23 + $0xf8] sm:$0xff]  }
  0x17   : > { %1021 = vmatprep.subr.bf16.mxu1 %v1105_v7  ;;  %757 = vmatpush1.bf16.msra.mxu0 %v1114_v13  ;;  %v1119_v23 = vld [vmem:[%s1249_s23] sm:$0xff]   ;;  %v1129_v26 = vld [vmem:[%s1249_s23 + $0x110] sm:$0xff]   ;;  %v1125_v28 = vld [vmem:[%s1249_s23 + $0xb8] sm:$0xff]  }
  0x18   : > { %758 = vmatprep.subr.bf16.mxu0 %v1195_v0  ;;  %v1127_v29 = vld [vmem:[%s1249_s23 + $0xf0] sm:$0xff]   ;;  %v1132_v30 = vld [vmem:[%s1249_s23 + $0x108] sm:$0xff]   ;;  %v1135_v33 = vld [vmem:[%s1249_s23 + $0x100] sm:$0xff]  }
  0x19   : > { %v1128_v31 = vld [vmem:[%s1249_s23 + $0xb0] sm:$0xff]   ;;  %v1130_v32 = vld [vmem:[%s1249_s23 + $0xe8] sm:$0xff]   ;;  %v1133_v37 = vld [vmem:[%s1249_s23 + $0xe0] sm:$0xff]  }
  0x1a   : > { %1022 = vmatpush3.bf16.msra.mxu1 %v1106_v8  ;;  %v1131_v36 = vld [vmem:[%s1249_s23 + $0xa8] sm:$0xff]   ;;  %v1140_v38 = vld [vmem:[%s1249_s23 + $0x158] sm:$0xff]   ;;  %v1134_v39 = vld [vmem:[%s1249_s23 + $0xa0] sm:$0xff]  }
  0x1b   : > { %1023 = vmatprep.subr.bf16.mxu1 %v1107_v9  ;;  %759 = vmatpush1.bf16.msra.mxu0 %v1117_v16  ;;  %v1136_v40 = vld [vmem:[%s1249_s23 + $0xd8] sm:$0xff]   ;;  %v1144_v41 = vld [vmem:[%s1249_s23 + $0x150] sm:$0xff]   ;;  %v304_v45 = vld [vmem:[%s1377_s2 + $0x8] sm:$0xff] }
  0x1c   : > { %760 = vmatprep.subr.bf16.mxu0 %v1195_v0  ;;  %v1139_v44 = vld [vmem:[%s1249_s23 + $0x98] sm:$0xff]   ;;  %v1142_v47 = vld [vmem:[%s1249_s23 + $0xd0] sm:$0xff]   ;;  %v1147_v48 = vld [vmem:[%s1249_s23 + $0x148] sm:$0xff]   ;;  %314 = vperm.xlu0 %1099, %v304_v45  }
  0x1d   : > { %v1143_v49 = vld [vmem:[%s1249_s23 + $0x90] sm:$0xff]   ;;  %v1145_v50 = vld [vmem:[%s1249_s23 + $0xc8] sm:$0xff]   ;;  %v1150_v51 = vld [vmem:[%s1249_s23 + $0x140] sm:$0xff]  }
  0x1e   : > { %1024 = vmatpush3.bf16.msra.mxu1 %v1108_v11  ;;  %v1146_v52 = vld [vmem:[%s1249_s23 + $0x88] sm:$0xff]   ;;  %v1148_v54 = vld [vmem:[%s1249_s23 + $0xc0] sm:$0xff]   ;;  %v1157_v58 = vld [vmem:[%s1376_s1 + $0x3c] ss:$24 sps:$4 sm:$0xff]  }
  0x1f   : > { %1025 = vmatprep.subr.bf16.mxu1 %v1109_v12  ;;  %761 = vmatpush1.bf16.msra.mxu0 %v1120_v19  ;;  %v1159_v55 = vld [vmem:[%s1376_s1 + $0x44] ss:$24 sps:$4 sm:$0xff]   ;;  %v1151_v57 = vld [vmem:[%s1376_s1 + $0x8] ss:$24 sps:$4 sm:$0xff]   ;;  %v1161_v60 = vld [vmem:[%s1376_s1 + $0x38] ss:$24 sps:$4 sm:$0xff]  }
  0x20   : > { %762 = vmatprep.subr.bf16.mxu0 %v1195_v0  ;;  %v1149_v56 = vld [vmem:[%s1249_s23 + $0x80] sm:$0xff]  }
  0x21   : > { %v1162_v59 = vld [vmem:[%s1376_s1 + $0x40] ss:$24 sps:$4 sm:$0xff]  }
  0x22   : > { %1026 = vmatpush3.bf16.msra.mxu1 %v1110_v14 }
  0x23   : > { %1027 = vmatprep.subr.bf16.mxu1 %v1112_v15  ;;  %763 = vmatpush1.bf16.msra.mxu0 %v1126_v22 }
  0x24   : > { %764 = vmatprep.subr.bf16.mxu0 %v1195_v0 }
  0x26   : > { %1028 = vmatpush3.bf16.msra.mxu1 %v1113_v17 }
  0x27   : > { %1029 = vmatprep.subr.bf16.mxu1 %v1115_v18  ;;  %765 = vmatpush1.bf16.msra.mxu0 %v1129_v26 }
  0x28   : > { %766 = vmatprep.subr.bf16.mxu0 %v1195_v0 }
  0x2a   : > { %1030 = vmatpush3.bf16.msra.mxu1 %v1116_v20 }
  0x2b   : > { %1031 = vmatprep.subr.bf16.mxu1 %v1118_v21  ;;  %767 = vmatpush1.bf16.msra.mxu0 %v1132_v30 }
  0x2c   : > { %768 = vmatprep.subr.bf16.mxu0 %v1195_v0 }
  0x2e   : > { %1032 = vmatpush3.bf16.msra.mxu1 %v1119_v23 }
  0x2f   : > { %1045 = vmatprep.subr.bf16.mxu1 %v1124_v24  ;;  %769 = vmatpush1.bf16.msra.mxu0 %v1135_v33 }
  0x30   : > { %778 = vmatprep.subr.bf16.mxu0 %v1195_v0 }
  0x31   : > { %689 = vmatmul.mubr.bf16.vlgmr.msra.gmra.mxu1 %v1121_v25 }
  0x32   : > { %1046 = vmatpush3.bf16.msra.mxu1 %v1125_v28  ;;  %696 = vmatprep.mubr.bf16.mxu1 %v1137_v27 }
  0x33   : > { %1047 = vmatprep.subr.bf16.mxu1 %v1127_v29  ;;  %779 = vmatpush2.bf16.msra.mxu0 %v1140_v38 }
  0x34   : > { %780 = vmatprep.subr.bf16.mxu0 %v1195_v0 }
  0x36   : > { %1048 = vmatpush3.bf16.msra.mxu1 %v1128_v31 }
  0x37   : > { %1049 = vmatprep.subr.bf16.mxu1 %v1130_v32  ;;  %781 = vmatpush2.bf16.msra.mxu0 %v1144_v41 }
  0x38   : > { %782 = vmatprep.subr.bf16.mxu0 %v1195_v0 }
  0x39   : > { %697 = vmatmul.mubr.bf16.gmra.mxu1 %v1141_v34 }
  0x3a   : > { %1050 = vmatpush3.bf16.msra.mxu1 %v1131_v36  ;;  %737 = vmatprep.mubr.bf16.mxu1 %v1153_v35 }
  0x3b   : > { %1051 = vmatprep.subr.bf16.mxu1 %v1133_v37  ;;  %783 = vmatpush2.bf16.msra.mxu0 %v1147_v48 }
  0x3c   : > { %784 = vmatprep.subr.bf16.mxu0 %v1195_v0 }
  0x3e   : > { %1052 = vmatpush3.bf16.msra.mxu1 %v1134_v39 }
  0x3f   : > { %1053 = vmatprep.subr.bf16.mxu1 %v1136_v40  ;;  %785 = vmatpush2.bf16.msra.mxu0 %v1150_v51 }
  0x42   : > { %1054 = vmatpush3.bf16.msra.mxu1 %v1139_v44  ;;  %787 = vmatmul.mubr.bf16.vlgmr.msra.gmra.mxu0 %v1154_v53 }
  0x43   : > { %1055 = vmatprep.subr.bf16.mxu1 %v1142_v47  ;;  %1013 = vmatprep.mubr.msk.bf16.mxu0 %vm649_vm0, %v1159_v55 }
  0x46   : > { %1056 = vmatpush3.bf16.msra.mxu1 %v1143_v49 }
  0x47   : > { %1057 = vmatprep.subr.bf16.mxu1 %v1145_v50 }
  0x4a   : > { %1058 = vmatpush3.bf16.msra.mxu1 %v1146_v52  ;;  %795 = vmatmul.mubr.bf16.gmra.mxu0 %v1162_v59 }
  0x4b   : > { %1059 = vmatprep.subr.bf16.mxu1 %v1148_v54 }
  0x4e   : > { %1060 = vmatpush3.bf16.msra.mxu1 %v1149_v56 }
  0x51   : > { %738 = vmatmul.mubr.bf16.vlgmr.msra.gmra.mxu1 %v1151_v57 }
  0x52   : > { %745 = vmatprep.mubr.bf16.mxu1 %v1157_v58 }
  0x59   : > { %746 = vmatmul.mubr.bf16.gmra.mxu1 %v1161_v60 }
  0x8a   : > { %v310_v7 = vpop.permute.xlu0 %309 }
  0x8b   : > { %v320_v23 = vpop.permute.xlu1 %319 }
  0x8f   : > { %v325_v38 = vpop.permute.xlu1 %324 }
  0x97   : > { %v315_v18 = vpop.permute.xlu0 %314 }
  0xf1   : > { %v1033_v61 = vpop.f32.mrf.mxu1 }
  0xf3   : > { %v1034_v62 = vpop.f32.mrf.mxu1 }
  0xf4   : > { %v1035_v9 = vadd.f32 %v1034_v62, %v1033_v61 }
  0xf5   : > { %v1036_v63 = vpop.f32.mrf.mxu1 }
  0xf6   : > { %v691_v14 = vadd.f32 %v1035_v9, %v310_v7 }
  0xf7   : > { %v1037_v0 = vpop.f32.mrf.mxu1 }
  0xf8   : > { %v1038_v15 = vadd.f32 %v1037_v0, %v1036_v63 }
  0xf9   : > { %v1039_v1 = vpop.f32.mrf.mxu1 }
  0xfa   : > { %v694_v25 = vadd.f32 %v1038_v15, %v315_v18 }
  0xfb   : > { %v1040_v2 = vpop.f32.mrf.mxu1 }
  0xfc   : > { %v1041_v22 = vadd.f32 %v1040_v2, %v1039_v1 }
  0xfd   : > { %v1042_v4 = vpop.f32.mrf.mxu1 }
  0xfe   : > { %v699_v32 = vadd.f32 %v1041_v22, %v320_v23 }
  0xff   : > { %v1043_v8 = vpop.f32.mrf.mxu1 }
 0x100   : > { %v1044_v34 = vadd.f32 %v1043_v8, %v1042_v4 }
 0x102   : > { %v788_v3 = vpop.f32.mrf.mxu0  ;;  %v702_v43 = vadd.f32 %v1044_v34, %v325_v38 }
 0x104   : > { %v790_v5 = vpop.f32.mrf.mxu0 }
 0x106   : > { %v791_v6 = vpop.f32.mrf.mxu0 }
 0x108   : > { %v793_v10 = vpop.f32.mrf.mxu0 }
 0x10a   : > { %v796_v12 = vpop.f32.mrf.mxu0 }
 0x10c   : > { %v798_v17 = vpop.f32.mrf.mxu0 }
 0x10e   : > { %v799_v21 = vpop.f32.mrf.mxu0 }
 0x110   : > { %v801_v28 = vpop.f32.mrf.mxu0 }
 0x111   : > { %v1061_v11 = vpop.f32.mrf.mxu1 }
 0x113   : > { %v1062_v13 = vpop.f32.mrf.mxu1 }
 0x114   : > { %v1063_v16 = vadd.f32 %v1062_v13, %v1061_v11 }
 0x115   : > { %v1064_v19 = vpop.f32.mrf.mxu1 }
 0x116   : > { %v740_v20 = vadd.f32 %v1063_v16, %v691_v14 }
 0x117   : > { %v1065_v24 = vpop.f32.mrf.mxu1 }
 0x118   : > { %v1066_v26 = vadd.f32 %v1065_v24, %v1064_v19  ;;  %v789_v27 = vadd.f32 %v788_v3, %v740_v20 }
 0x119   : > { %v1067_v29 = vpop.f32.mrf.mxu1 }
 0x11a   : > { %v743_v30 = vadd.f32 %v1066_v26, %v694_v25  ;;  %v803_v31 = vmax.f32 %v789_v27, 0.0 }
 0x11b   : > { %v1068_v33 = vpop.f32.mrf.mxu1 }
 0x11c   : > { %v1069_v35 = vadd.f32 %v1068_v33, %v1067_v29  ;;  %v808_v36 = vsel %vm807_vm1, %v803_v31, 0.0  ;;  %v792_v37 = vadd.f32 %v791_v6, %v743_v30 }
 0x11d   : > { %v1070_v39 = vpop.f32.mrf.mxu1  ;;  %809 = vadd.xlane.f32.xlu0 %v808_v36 }
 0x11e   : > { %v748_v40 = vadd.f32 %v1069_v35, %v699_v32  ;;  %v804_v41 = vmax.f32 %v792_v37, 0.0 }
 0x11f   : > { %v1071_v42 = vpop.f32.mrf.mxu1 }
 0x120   : > { %v1072_v44 = vadd.f32 %v1071_v42, %v1070_v39  ;;  %v811_v45 = vsel %vm807_vm1, %v804_v41, 0.0  ;;  %v797_v46 = vadd.f32 %v796_v12, %v748_v40 }
 0x121   : > { %812 = vadd.xlane.f32.xlu1 %v811_v45 }
 0x122   : > { %v751_v47 = vadd.f32 %v1072_v44, %v702_v43  ;;  %v805_v48 = vmax.f32 %v797_v46, 0.0 }
 0x124   : > { %v814_v49 = vsel %vm807_vm1, %v805_v48, 0.0  ;;  %v800_v50 = vadd.f32 %v799_v21, %v751_v47 }
 0x125   : > { %815 = vadd.xlane.f32.xlu0 %v814_v49 }
 0x126   : > { %v806_v51 = vmax.f32 %v800_v50, 0.0 }
 0x128   : > { %v817_v52 = vsel %vm807_vm1, %v806_v51, 0.0 }
 0x129   : > { %818 = vadd.xlane.f32.xlu0 %v817_v52 }
 0x1a6   : > { %v810_v53 = vpop.xlane.xlu0 %809 }
 0x1a7   : > { %v821_v54 = vmul.f32 0.0625, %v810_v53 }
 0x1a9   : > { %v825_v55 = vsub.f32 %v803_v31, %v821_v54 }
 0x1aa   : > { %v813_v56 = vpop.xlane.xlu1 %812 }
 0x1ab   : > { %v822_v57 = vmul.f32 0.0625, %v813_v56  ;;  %v829_v58 = vmul.f32 %v825_v55, %v825_v55 }
 0x1ad   : > { %v826_v59 = vsub.f32 %v804_v41, %v822_v57  ;;  %v833_v60 = vsel %vm807_vm1, %v829_v58, 0.0 }
 0x1ae   : > { %834 = vadd.xlane.f32.xlu1 %v833_v60  ;;  %v816_v61 = vpop.xlane.xlu0 %815 }
 0x1af   : > { %v823_v62 = vmul.f32 0.0625, %v816_v61  ;;  %v830_v63 = vmul.f32 %v826_v59, %v826_v59 }
 0x1b1   : > { %v827_v0 = vsub.f32 %v805_v48, %v823_v62  ;;  %v836_v1 = vsel %vm807_vm1, %v830_v63, 0.0 }
 0x1b2   : > { %837 = vadd.xlane.f32.xlu0 %v836_v1  ;;  %v819_v2 = vpop.xlane.xlu0 %818 }
 0x1b3   : > { %v824_v3 = vmul.f32 0.0625, %v819_v2  ;;  %v831_v4 = vmul.f32 %v827_v0, %v827_v0 }
 0x1b5   : > { %v828_v5 = vsub.f32 %v806_v51, %v824_v3  ;;  %v839_v6 = vsel %vm807_vm1, %v831_v4, 0.0 }
 0x1b6   : > { %840 = vadd.xlane.f32.xlu1 %v839_v6 }
 0x1b7   : > { %v832_v7 = vmul.f32 %v828_v5, %v828_v5 }
 0x1b9   : > { %v842_v8 = vsel %vm807_vm1, %v832_v7, 0.0 }
 0x1ba   : > { %843 = vadd.xlane.f32.xlu0 %v842_v8 }
 0x237   : > { %v835_v9 = vpop.xlane.xlu1 %834 }
 0x238   : > { %v845_v10 = vmul.f32 0.0625, %v835_v9 }
 0x23a   : > { %v849_v11 = vadd.f32 1e-05, %v845_v10 }
 0x23b   : > { %v838_v12 = vpop.xlane.xlu0 %837 }
 0x23c   : > { %1163 = vrsqrt.f32 %v849_v11  ;;  %v846_v13 = vmul.f32 0.0625, %v838_v12 }
 0x23e   : > { %v850_v14 = vadd.f32 1e-05, %v846_v13 }
 0x23f   : > { %v841_v15 = vpop.xlane.xlu1 %840 }
 0x240   : > { %1165 = vrsqrt.f32 %v850_v14  ;;  %v847_v16 = vmul.f32 0.0625, %v841_v15 }
 0x242   : > { %v851_v17 = vadd.f32 1e-05, %v847_v16 }
 0x243   : > { %v844_v18 = vpop.xlane.xlu0 %843 }
 0x244   : > { %1167 = vrsqrt.f32 %v851_v17  ;;  %v848_v19 = vmul.f32 0.0625, %v844_v18 }
 0x246   : > { %v852_v20 = vadd.f32 1e-05, %v848_v19 }
 0x248   : > { %1169 = vrsqrt.f32 %v852_v20 }
 0x249   : > { %v1164_v21 = vpop.eup %1163 }
 0x24a   : > { %v857_v22 = vmul.f32 %v1164_v21, %v825_v55 }
 0x24c   : > { %861 = vst.msk [vmem:[%s201_s5] sm:$0xff] %vm807_vm1, %v857_v22 }
 0x24d   : > { %v1166_v23 = vpop.eup %1165 }
 0x24e   : > { %v858_v24 = vmul.f32 %v1166_v23, %v826_v59 }
 0x250   : > { %862 = vst.msk [vmem:[%s201_s5 + $0x8] sm:$0xff] %vm807_vm1, %v858_v24 }
 0x251   : > { %v1168_v25 = vpop.eup %1167 }
 0x252   : > { %v859_v26 = vmul.f32 %v1168_v25, %v827_v0 }
 0x254   : > { %863 = vst.msk [vmem:[%s201_s5 + $0x10] sm:$0xff] %vm807_vm1, %v859_v26 }
 0x255   : > { %v1170_v27 = vpop.eup %1169 }
 0x256   : > { %v860_v28 = vmul.f32 %v1170_v27, %v828_v5 }
 0x258   : > { %864 = vst.msk [vmem:[%s201_s5 + $0x18] sm:$0xff] %vm807_vm1, %v860_v28 }
 0x259 PF: > { %s13_s14 = sadd.s32 1, %s1193_s14   ;;  %s1379_s12 = smov %s1189_s13 }
 0x25a   : > { %p10_p5 = scmp.ge.s32.totalorder %s13_s14, 4   ;;  %s1380_s13 = smov %s1382_s15 }
 0x25c   :  { %12 = sbr.rel (!%p10_p5) target bundleno = 2 (0x2), region = 62 }

// kernel: image_decoder_forward.7
= control target key start
LH: loop header
LB: loop body
LE: loop exit
PB: predicated region body
PF: predicated region fallthrough
CT: control target
= control target key end

     0   :  { %s1007_s12 = smov 0   ;;  %s1009_s13 = smov 0   ;;  %s1126_s0 = inlined_call_operand.vmem [shape: bf16[2,512,100], index: 0, kind: input, shape index: {}]   ;;  %s1127_s1 = inlined_call_operand.vmem [shape: bf16[32,512], index: 1, kind: input, shape index: {}]   ;;  %s1128_s2 = inlined_call_operand.vmem [shape: f32[32,1], index: 2, kind: input, shape index: {}]   ;;  %s1129_s3 = inlined_call_operand.vmem [shape: f32[2,32,100], index: 3, kind: output, shape index: {}]  }
   0x1   :  { %s1011_s14 = smov 0  }
   0x2 LB: > { %s25_s15 = sadd.s32 1, %s980_s13  ;;  %p778_p0 = scmp.ge.s32.totalorder %s984_s14, 1  ;;  %s984_s14 = sphi %s1011_s14, %s13_s14   ;;  %s980_s13 = sphi %s1009_s13, %s1131_s13   ;;  %s976_s12 = sphi %s1007_s12, %s1130_s12  }
   0x3   : > { %p27_p1 = scmp.ge.s32.totalorder %s25_s15, 2  ;;  %p156_p2 = scmp.lt.s32.totalorder %s984_s14, 3 }
   0x5   : > { %s1133_s15 = smov (%p27_p1, %s25_s15), 0  ;;  %p157_p3 = pnand %p778_p0, %p156_p2 }
   0x6   : > { %p186_p4 = scmp.lt.s32.totalorder (!%p157_p3), %s976_s12, 1 }
   0x7   : > { %160 = sbr.rel (%p157_p3) target bundleno = 569 (0x239), region = 32 }
   0xc   : > { %v944_v0 = vld [vmem:[%s1127_s1 + $0x4] ss:$16 sps:$4 sm:$0xff]   ;;  %v986_v1 = vmov 0   ;;  %s1135_s12 = smov (!%p186_p4, %s976_s12), 1  ;;  %v947_v2 = vld [vmem:[%s1127_s1 + $0xc] ss:$16 sps:$4 sm:$0xff]  }
   0xd   : > { %908 = vset.pattern.permute.xlu0 %v986_v1  ;;  %909 = vset.pattern.permute.xlu1 %v986_v1  ;;  %s825_s20 = sshll.u32 %s1135_s12, 8  ;;  %v275_v3 = vld [vmem:[%s1128_s2] sm:$0xff]  ;;  %v277_v4 = vld [vmem:[%s1128_s2 + $0x10] sm:$0xff]  ;;  %v945_v37 = vld [vmem:[%s1127_s1 + $0x8] ss:$16 sps:$4 sm:$0xff]   ;;  %vm633_vm0 = vcmask 818176  }
   0xe   : > { %563 = vmatprep.mubr.bf16.mxu0 %v944_v0  ;;  %612 = vmatprep.mubr.bf16.mxu1 %v947_v2  ;;  %s1037_s23 = scalar_lea.vmem %s1126_s0, %s825_s20  ;;  %v942_v35 = vld [vmem:[%s1127_s1] ss:$16 sps:$4 sm:$0xff]   ;;  %v948_v39 = vld [vmem:[%s1127_s1 + $0x24] ss:$16 sps:$4 sm:$0xff]   ;;  %v276_v40 = vld [vmem:[%s1128_s2 + $0x8] sm:$0xff]  ;;  %s826_s21 = sshll.u32 %s1135_s12, 5 }
   0xf   : > { %v910_v5 = vld [vmem:[%s1037_s23 + $0x78] sm:$0xff]   ;;  %281 = vperm.xlu0 %908, %v275_v3   ;;  %291 = vperm.xlu1 %909, %v277_v4   ;;  %v914_v9 = vld [vmem:[%s1037_s23 + $0x70] sm:$0xff]   ;;  %v918_v13 = vld [vmem:[%s1037_s23 + $0x68] sm:$0xff]   ;;  %s201_s24 = scalar_lea.vmem %s1129_s3, %s826_s21 }
  0x10   : > { %v911_v6 = vld [vmem:[%s1037_s23 + $0xf8] sm:$0xff]   ;;  %827 = vmatprep.subr.bf16.mxu0 %v910_v5  ;;  %v915_v10 = vld [vmem:[%s1037_s23 + $0xf0] sm:$0xff]   ;;  %v919_v14 = vld [vmem:[%s1037_s23 + $0xe8] sm:$0xff]  }
  0x11   : > { %v912_v7 = vld [vmem:[%s1037_s23 + $0x38] sm:$0xff]   ;;  %855 = vmatprep.subr.bf16.mxu1 %v911_v6  ;;  %v916_v11 = vld [vmem:[%s1037_s23 + $0x30] sm:$0xff]   ;;  %v920_v15 = vld [vmem:[%s1037_s23 + $0x28] sm:$0xff]  }
  0x12   : > { %v913_v8 = vld [vmem:[%s1037_s23 + $0xb8] sm:$0xff]   ;;  %828 = vmatpush3.bf16.msra.mxu0 %v912_v7  ;;  %v917_v12 = vld [vmem:[%s1037_s23 + $0xb0] sm:$0xff]   ;;  %v921_v16 = vld [vmem:[%s1037_s23 + $0xa8] sm:$0xff]  }
  0x13   : > { %856 = vmatpush3.bf16.msra.mxu1 %v913_v8  ;;  %829 = vmatprep.subr.bf16.mxu0 %v914_v9  ;;  %v922_v17 = vld [vmem:[%s1037_s23 + $0x60] sm:$0xff]   ;;  %v926_v21 = vld [vmem:[%s1037_s23 + $0x58] sm:$0xff]   ;;  %v930_v25 = vld [vmem:[%s1037_s23 + $0x50] sm:$0xff]  }
  0x14   : > { %857 = vmatprep.subr.bf16.mxu1 %v915_v10  ;;  %v923_v18 = vld [vmem:[%s1037_s23 + $0xe0] sm:$0xff]   ;;  %v927_v22 = vld [vmem:[%s1037_s23 + $0xd8] sm:$0xff]   ;;  %v931_v26 = vld [vmem:[%s1037_s23 + $0xd0] sm:$0xff]   ;;  %286 = vperm.xlu0 %908, %v276_v40  }
  0x15   : > { %v924_v19 = vld [vmem:[%s1037_s23 + $0x20] sm:$0xff]   ;;  %v928_v23 = vld [vmem:[%s1037_s23 + $0x18] sm:$0xff]   ;;  %v932_v27 = vld [vmem:[%s1037_s23 + $0x10] sm:$0xff]  }
  0x16   : > { %830 = vmatpush3.bf16.msra.mxu0 %v916_v11  ;;  %v925_v20 = vld [vmem:[%s1037_s23 + $0xa0] sm:$0xff]   ;;  %v929_v24 = vld [vmem:[%s1037_s23 + $0x98] sm:$0xff]   ;;  %v933_v28 = vld [vmem:[%s1037_s23 + $0x90] sm:$0xff]  }
  0x17   : > { %858 = vmatpush3.bf16.msra.mxu1 %v917_v12  ;;  %831 = vmatprep.subr.bf16.mxu0 %v918_v13  ;;  %v934_v29 = vld [vmem:[%s1037_s23 + $0x48] sm:$0xff]   ;;  %v938_v33 = vld [vmem:[%s1037_s23 + $0x40] sm:$0xff]   ;;  %v278_v41 = vld [vmem:[%s1128_s2 + $0x18] sm:$0xff] }
  0x18   : > { %859 = vmatprep.subr.bf16.mxu1 %v919_v14  ;;  %v935_v30 = vld [vmem:[%s1037_s23 + $0xc8] sm:$0xff]   ;;  %v939_v34 = vld [vmem:[%s1037_s23 + $0xc0] sm:$0xff]   ;;  %296 = vperm.xlu1 %909, %v278_v41  }
  0x19   : > { %v936_v31 = vld [vmem:[%s1037_s23 + $0x8] sm:$0xff]   ;;  %v940_v36 = vld [vmem:[%s1037_s23] sm:$0xff]  }
  0x1a   : > { %832 = vmatpush3.bf16.msra.mxu0 %v920_v15  ;;  %v937_v32 = vld [vmem:[%s1037_s23 + $0x88] sm:$0xff]   ;;  %v941_v38 = vld [vmem:[%s1037_s23 + $0x80] sm:$0xff]  }
  0x1b   : > { %860 = vmatpush3.bf16.msra.mxu1 %v921_v16  ;;  %833 = vmatprep.subr.bf16.mxu0 %v922_v17  ;;  %v950_v42 = vld [vmem:[%s1127_s1 + $0x2c] ss:$16 sps:$4 sm:$0xff]   ;;  %v952_v43 = vld [vmem:[%s1127_s1 + $0x20] ss:$16 sps:$4 sm:$0xff]   ;;  %v953_v44 = vld [vmem:[%s1127_s1 + $0x28] ss:$16 sps:$4 sm:$0xff]  }
  0x1c   : > { %861 = vmatprep.subr.bf16.mxu1 %v923_v18 }
  0x1e   : > { %834 = vmatpush3.bf16.msra.mxu0 %v924_v19 }
  0x1f   : > { %862 = vmatpush3.bf16.msra.mxu1 %v925_v20  ;;  %835 = vmatprep.subr.bf16.mxu0 %v926_v21 }
  0x20   : > { %863 = vmatprep.subr.bf16.mxu1 %v927_v22 }
  0x22   : > { %836 = vmatpush3.bf16.msra.mxu0 %v928_v23 }
  0x23   : > { %864 = vmatpush3.bf16.msra.mxu1 %v929_v24  ;;  %837 = vmatprep.subr.bf16.mxu0 %v930_v25 }
  0x24   : > { %865 = vmatprep.subr.bf16.mxu1 %v931_v26 }
  0x26   : > { %838 = vmatpush3.bf16.msra.mxu0 %v932_v27 }
  0x27   : > { %866 = vmatpush3.bf16.msra.mxu1 %v933_v28  ;;  %839 = vmatprep.subr.bf16.mxu0 %v934_v29 }
  0x28   : > { %867 = vmatprep.subr.bf16.mxu1 %v935_v30 }
  0x2a   : > { %840 = vmatpush3.bf16.msra.mxu0 %v936_v31 }
  0x2b   : > { %868 = vmatpush3.bf16.msra.mxu1 %v937_v32  ;;  %841 = vmatprep.subr.bf16.mxu0 %v938_v33 }
  0x2c   : > { %869 = vmatprep.subr.bf16.mxu1 %v939_v34 }
  0x2e   : > { %842 = vmatpush3.bf16.msra.mxu0 %v940_v36 }
  0x2f   : > { %870 = vmatpush3.bf16.msra.mxu1 %v941_v38 }
  0x31   : > { %564 = vmatmul.mubr.bf16.vlgmr.msra.gmra.mxu0 %v942_v35 }
  0x32   : > { %613 = vmatmul.mubr.bf16.vlgmr.msra.gmra.mxu1 %v945_v37  ;;  %571 = vmatprep.mubr.bf16.mxu0 %v948_v39 }
  0x33   : > { %620 = vmatprep.mubr.bf16.mxu1 %v950_v42 }
  0x39   : > { %572 = vmatmul.mubr.bf16.gmra.mxu0 %v952_v43 }
  0x3a   : > { %621 = vmatmul.mubr.bf16.gmra.mxu1 %v953_v44 }
  0x8a   : > { %v282_v46 = vpop.permute.xlu0 %281  ;;  %v292_v1 = vpop.permute.xlu1 %291 }
  0x8f   : > { %v287_v56 = vpop.permute.xlu0 %286 }
  0x93   : > { %v297_v17 = vpop.permute.xlu1 %296 }
  0xf1   : > { %v843_v45 = vpop.f32.mrf.mxu0 }
  0xf2   : > { %v871_v47 = vpop.f32.mrf.mxu1 }
  0xf3   : > { %v844_v48 = vpop.f32.mrf.mxu0 }
  0xf4   : > { %v845_v49 = vadd.f32 %v844_v48, %v843_v45  ;;  %v872_v50 = vpop.f32.mrf.mxu1 }
  0xf5   : > { %v846_v51 = vpop.f32.mrf.mxu0  ;;  %v873_v52 = vadd.f32 %v872_v50, %v871_v47 }
  0xf6   : > { %v566_v53 = vadd.f32 %v845_v49, %v282_v46  ;;  %v874_v54 = vpop.f32.mrf.mxu1 }
  0xf7   : > { %v847_v55 = vpop.f32.mrf.mxu0 }
  0xf8   : > { %v615_v57 = vadd.f32 %v873_v52, %v566_v53  ;;  %v848_v58 = vadd.f32 %v847_v55, %v846_v51  ;;  %v875_v59 = vpop.f32.mrf.mxu1 }
  0xf9   : > { %v849_v60 = vpop.f32.mrf.mxu0  ;;  %v876_v61 = vadd.f32 %v875_v59, %v874_v54 }
  0xfa   : > { %v569_v62 = vadd.f32 %v848_v58, %v287_v56  ;;  %v877_v63 = vpop.f32.mrf.mxu1  ;;  %v629_v0 = vmax.f32 %v615_v57, 0.0 }
  0xfb   : > { %v850_v2 = vpop.f32.mrf.mxu0 }
  0xfc   : > { %v618_v3 = vadd.f32 %v876_v61, %v569_v62  ;;  %v851_v4 = vadd.f32 %v850_v2, %v849_v60  ;;  %v878_v5 = vpop.f32.mrf.mxu1  ;;  %v634_v6 = vsel %vm633_vm0, %v629_v0, 0.0 }
  0xfd   : > { %v852_v7 = vpop.f32.mrf.mxu0  ;;  %635 = vadd.xlane.f32.xlu0 %v634_v6  ;;  %v879_v9 = vadd.f32 %v878_v5, %v877_v63 }
  0xfe   : > { %v574_v8 = vadd.f32 %v851_v4, %v292_v1  ;;  %v880_v10 = vpop.f32.mrf.mxu1  ;;  %v630_v11 = vmax.f32 %v618_v3, 0.0 }
  0xff   : > { %v853_v12 = vpop.f32.mrf.mxu0 }
 0x100   : > { %v623_v13 = vadd.f32 %v879_v9, %v574_v8  ;;  %v854_v14 = vadd.f32 %v853_v12, %v852_v7  ;;  %v881_v15 = vpop.f32.mrf.mxu1  ;;  %v637_v16 = vsel %vm633_vm0, %v630_v11, 0.0 }
 0x101   : > { %638 = vadd.xlane.f32.xlu1 %v637_v16  ;;  %v882_v19 = vadd.f32 %v881_v15, %v880_v10 }
 0x102   : > { %v577_v18 = vadd.f32 %v854_v14, %v297_v17  ;;  %v631_v20 = vmax.f32 %v623_v13, 0.0 }
 0x104   : > { %v626_v21 = vadd.f32 %v882_v19, %v577_v18  ;;  %v640_v22 = vsel %vm633_vm0, %v631_v20, 0.0 }
 0x105   : > { %641 = vadd.xlane.f32.xlu0 %v640_v22 }
 0x106   : > { %v632_v23 = vmax.f32 %v626_v21, 0.0 }
 0x108   : > { %v643_v24 = vsel %vm633_vm0, %v632_v23, 0.0 }
 0x109   : > { %644 = vadd.xlane.f32.xlu0 %v643_v24 }
 0x186   : > { %v636_v25 = vpop.xlane.xlu0 %635 }
 0x187   : > { %v647_v26 = vmul.f32 0.01, %v636_v25 }
 0x189   : > { %v651_v27 = vsub.f32 %v629_v0, %v647_v26 }
 0x18a   : > { %v639_v28 = vpop.xlane.xlu1 %638 }
 0x18b   : > { %v648_v29 = vmul.f32 0.01, %v639_v28  ;;  %v655_v30 = vmul.f32 %v651_v27, %v651_v27 }
 0x18d   : > { %v652_v31 = vsub.f32 %v630_v11, %v648_v29  ;;  %v659_v32 = vsel %vm633_vm0, %v655_v30, 0.0 }
 0x18e   : > { %660 = vadd.xlane.f32.xlu1 %v659_v32  ;;  %v642_v33 = vpop.xlane.xlu0 %641 }
 0x18f   : > { %v649_v34 = vmul.f32 0.01, %v642_v33  ;;  %v656_v35 = vmul.f32 %v652_v31, %v652_v31 }
 0x191   : > { %v653_v36 = vsub.f32 %v631_v20, %v649_v34  ;;  %v662_v37 = vsel %vm633_vm0, %v656_v35, 0.0 }
 0x192   : > { %663 = vadd.xlane.f32.xlu0 %v662_v37  ;;  %v645_v38 = vpop.xlane.xlu0 %644 }
 0x193   : > { %v650_v39 = vmul.f32 0.01, %v645_v38  ;;  %v657_v40 = vmul.f32 %v653_v36, %v653_v36 }
 0x195   : > { %v654_v41 = vsub.f32 %v632_v23, %v650_v39  ;;  %v665_v42 = vsel %vm633_vm0, %v657_v40, 0.0 }
 0x196   : > { %666 = vadd.xlane.f32.xlu1 %v665_v42 }
 0x197   : > { %v658_v43 = vmul.f32 %v654_v41, %v654_v41 }
 0x199   : > { %v668_v44 = vsel %vm633_vm0, %v658_v43, 0.0 }
 0x19a   : > { %669 = vadd.xlane.f32.xlu0 %v668_v44 }
 0x217   : > { %v661_v45 = vpop.xlane.xlu1 %660 }
 0x218   : > { %v671_v46 = vmul.f32 0.01, %v661_v45 }
 0x21a   : > { %v675_v47 = vadd.f32 1e-05, %v671_v46 }
 0x21b   : > { %v664_v48 = vpop.xlane.xlu0 %663 }
 0x21c   : > { %954 = vrsqrt.f32 %v675_v47  ;;  %v672_v49 = vmul.f32 0.01, %v664_v48 }
 0x21e   : > { %v676_v50 = vadd.f32 1e-05, %v672_v49 }
 0x21f   : > { %v667_v51 = vpop.xlane.xlu1 %666 }
 0x220   : > { %956 = vrsqrt.f32 %v676_v50  ;;  %v673_v52 = vmul.f32 0.01, %v667_v51 }
 0x222   : > { %v677_v53 = vadd.f32 1e-05, %v673_v52 }
 0x223   : > { %v670_v54 = vpop.xlane.xlu0 %669 }
 0x224   : > { %958 = vrsqrt.f32 %v677_v53  ;;  %v674_v55 = vmul.f32 0.01, %v670_v54 }
 0x226   : > { %v678_v56 = vadd.f32 1e-05, %v674_v55 }
 0x228   : > { %960 = vrsqrt.f32 %v678_v56 }
 0x229   : > { %v955_v57 = vpop.eup %954 }
 0x22a   : > { %v683_v58 = vmul.f32 %v955_v57, %v651_v27 }
 0x22c   : > { %687 = vst.msk [vmem:[%s201_s24] sm:$0xff] %vm633_vm0, %v683_v58 }
 0x22d   : > { %v957_v59 = vpop.eup %956 }
 0x22e   : > { %v684_v60 = vmul.f32 %v957_v59, %v652_v31 }
 0x230   : > { %688 = vst.msk [vmem:[%s201_s24 + $0x8] sm:$0xff] %vm633_vm0, %v684_v60 }
 0x231   : > { %v959_v61 = vpop.eup %958 }
 0x232   : > { %v685_v62 = vmul.f32 %v959_v61, %v653_v36 }
 0x234   : > { %689 = vst.msk [vmem:[%s201_s24 + $0x10] sm:$0xff] %vm633_vm0, %v685_v62 }
 0x235   : > { %v961_v63 = vpop.eup %960 }
 0x236   : > { %v686_v0 = vmul.f32 %v961_v63, %v654_v41 }
 0x238   : > { %690 = vst.msk [vmem:[%s201_s24 + $0x18] sm:$0xff] %vm633_vm0, %v686_v0 }
 0x239 PF: > { %s13_s14 = sadd.s32 1, %s984_s14   ;;  %s1130_s12 = smov %s980_s13 }
 0x23a   : > { %p10_p5 = scmp.ge.s32.totalorder %s13_s14, 4   ;;  %s1131_s13 = smov %s1133_s15 }
 0x23c   :  { %12 = sbr.rel (!%p10_p5) target bundleno = 2 (0x2), region = 62 }

// kernel: image_decoder_forward.8
= control target key start
LH: loop header
LB: loop body
LE: loop exit
PB: predicated region body
PF: predicated region fallthrough
CT: control target
= control target key end

     0   :  { %s1287_s12 = smov 0   ;;  %s1289_s13 = smov 0   ;;  %s1428_s0 = inlined_call_operand.vmem [shape: bf16[2,288,441], index: 0, kind: input, shape index: {}]   ;;  %s1429_s1 = inlined_call_operand.vmem [shape: bf16[16,288], index: 1, kind: input, shape index: {}]   ;;  %s1430_s2 = inlined_call_operand.vmem [shape: f32[16,1], index: 2, kind: input, shape index: {}]   ;;  %s1431_s3 = inlined_call_operand.vmem [shape: f32[2,16,441], index: 3, kind: output, shape index: {}]  }
   0x1   :  { %s1291_s14 = smov 0  }
   0x2 LB: > { %s25_s15 = sadd.s32 1, %s1260_s13  ;;  %p1015_p0 = scmp.ge.s32.totalorder %s1264_s14, 1  ;;  %s1264_s14 = sphi %s1291_s14, %s13_s14   ;;  %s1260_s13 = sphi %s1289_s13, %s1433_s13   ;;  %s1256_s12 = sphi %s1287_s12, %s1432_s12  }
   0x3   : > { %p27_p1 = scmp.ge.s32.totalorder %s25_s15, 2  ;;  %p158_p2 = scmp.lt.s32.totalorder %s1264_s14, 3 }
   0x5   : > { %s1435_s15 = smov (%p27_p1, %s25_s15), 0  ;;  %p159_p3 = pnand %p1015_p0, %p158_p2 }
   0x6   : > { %p191_p4 = scmp.lt.s32.totalorder (!%p159_p3), %s1256_s12, 1 }
   0x7   : > { %162 = sbr.rel (%p159_p3) target bundleno = 608 (0x260), region = 32 }
   0xc   : > { %v1266_v0 = vmov 0   ;;  %s1437_s12 = smov (!%p191_p4, %s1256_s12), 1  ;;  %v1225_v1 = vld [vmem:[%s1429_s1 + $0x4] ss:$12 sps:$4 sm:$0xff]   ;;  %v288_v3 = vld [vmem:[%s1430_s2 + $0x8] sm:$0xff]  ;;  %vm674_vm0 = vcmask 261120  }
   0xd   : > { %753 = vmatprep.mubr.bf16.mxu1 %v1266_v0  ;;  %1125 = vset.pattern.permute.xlu0 %v1266_v0  ;;  %v287_v2 = vld [vmem:[%s1430_s2] sm:$0xff]  ;;  %s1099_s20 = smul.u32 576, %s1437_s12  ;;  %v1336_v13 = vld [vmem:[%s1429_s1 + $0x8] ss:$12 sps:$4 sm:$0xff]   ;;  %vm860_vm1 = vcmask 465920   ;;  %s1098_s30 = sshll.u32 %s1437_s12, 6 }
   0xe   : > { %291 = vperm.xlu0 %1125, %v287_v2   ;;  %710 = vmatprep.mubr.bf16.mxu0 %v1225_v1  ;;  %s208_s6 = scalar_lea.vmem %s1431_s3, %s1098_s30 }
   0xf   : > { %s1322_s25 = scalar_lea.vmem %s1428_s0, %s1099_s20 }
  0x10   : > { %v1126_v4 = vld [vmem:[%s1322_s25 + $0xe4] ss:$16 sps:$4 sm:$0xff]   ;;  %v1130_v6 = vld [vmem:[%s1322_s25 + $0xe0] ss:$16 sps:$4 sm:$0xff]   ;;  %v1141_v14 = vld [vmem:[%s1322_s25 + $0xe8] ss:$16 sps:$4 sm:$0xff]  }
  0x11   : > { %v1128_v5 = vld [vmem:[%s1322_s25 + $0x224] ss:$16 sps:$4 sm:$0xff]   ;;  %678 = vmatprep.subr.bf16.mxu0 %v1126_v4  ;;  %v1131_v7 = vld [vmem:[%s1322_s25 + $0x220] ss:$16 sps:$4 sm:$0xff]   ;;  %v1143_v15 = vld [vmem:[%s1322_s25 + $0xec] ss:$16 sps:$4 sm:$0xff]  }
  0x12   : > { %296 = vperm.xlu0 %1125, %v288_v3   ;;  %733 = vmatprep.subr.bf16.mxu1 %v1128_v5  ;;  %v1132_v8 = vld [vmem:[%s1322_s25 + $0xc4] ss:$16 sps:$4 sm:$0xff]   ;;  %v1136_v10 = vld [vmem:[%s1322_s25 + $0xc0] ss:$16 sps:$4 sm:$0xff]   ;;  %v1149_v18 = vld [vmem:[%s1322_s25 + $0xcc] ss:$16 sps:$4 sm:$0xff]  }
  0x13   : > { %679 = vmatpush1.bf16.msra.mxu0 %v1130_v6  ;;  %734 = vmatpush1.bf16.msra.mxu1 %v1131_v7  ;;  %v1134_v9 = vld [vmem:[%s1322_s25 + $0x204] ss:$16 sps:$4 sm:$0xff]   ;;  %v1137_v11 = vld [vmem:[%s1322_s25 + $0x200] ss:$16 sps:$4 sm:$0xff]   ;;  %v1147_v19 = vld [vmem:[%s1322_s25 + $0xc8] ss:$16 sps:$4 sm:$0xff]  }
  0x14   : > { %680 = vmatprep.subr.bf16.mxu0 %v1132_v8  ;;  %735 = vmatprep.subr.bf16.mxu1 %v1134_v9  ;;  %v1138_v12 = vld [vmem:[%s1322_s25 + $0xa4] ss:$16 sps:$4 sm:$0xff]   ;;  %v1144_v16 = vld [vmem:[%s1322_s25 + $0xa0] ss:$16 sps:$4 sm:$0xff]   ;;  %v1155_v22 = vld [vmem:[%s1322_s25 + $0xac] ss:$16 sps:$4 sm:$0xff]  }
  0x15   : > { %v1145_v17 = vld [vmem:[%s1322_s25 + $0x84] ss:$16 sps:$4 sm:$0xff]   ;;  %v1150_v20 = vld [vmem:[%s1322_s25 + $0x80] ss:$16 sps:$4 sm:$0xff]   ;;  %v1153_v23 = vld [vmem:[%s1322_s25 + $0xa8] ss:$16 sps:$4 sm:$0xff]  }
  0x16   : > { %v1151_v21 = vld [vmem:[%s1322_s25 + $0x64] ss:$16 sps:$4 sm:$0xff]   ;;  %v1156_v24 = vld [vmem:[%s1322_s25 + $0x60] ss:$16 sps:$4 sm:$0xff]   ;;  %v1161_v26 = vld [vmem:[%s1322_s25 + $0x8c] ss:$16 sps:$4 sm:$0xff]  }
  0x17   : > { %681 = vmatpush1.bf16.msra.mxu0 %v1136_v10  ;;  %736 = vmatpush1.bf16.msra.mxu1 %v1137_v11  ;;  %v1157_v25 = vld [vmem:[%s1322_s25 + $0x44] ss:$16 sps:$4 sm:$0xff]   ;;  %v1159_v27 = vld [vmem:[%s1322_s25 + $0x88] ss:$16 sps:$4 sm:$0xff]   ;;  %v1162_v28 = vld [vmem:[%s1322_s25 + $0x40] ss:$16 sps:$4 sm:$0xff]  }
  0x18   : > { %682 = vmatprep.subr.bf16.mxu0 %v1138_v12  ;;  %764 = vmatprep.subr.bf16.mxu1 %v1143_v15  ;;  %v1163_v29 = vld [vmem:[%s1322_s25 + $0x24] ss:$16 sps:$4 sm:$0xff]   ;;  %v1167_v30 = vld [vmem:[%s1322_s25 + $0x6c] ss:$16 sps:$4 sm:$0xff]   ;;  %v1165_v31 = vld [vmem:[%s1322_s25 + $0x68] ss:$16 sps:$4 sm:$0xff]  }
  0x19   : > { %v1168_v32 = vld [vmem:[%s1322_s25 + $0x20] ss:$16 sps:$4 sm:$0xff]   ;;  %v1169_v33 = vld [vmem:[%s1322_s25 + $0x4] ss:$16 sps:$4 sm:$0xff]   ;;  %v1173_v34 = vld [vmem:[%s1322_s25 + $0x4c] ss:$16 sps:$4 sm:$0xff]  }
  0x1a   : > { %1094 = vmatmul.mubr.msk.bf16.vlgmr.msra.gmra.mxu1 %vm674_vm0, %v1336_v13  ;;  %v1171_v35 = vld [vmem:[%s1322_s25 + $0x48] ss:$16 sps:$4 sm:$0xff]   ;;  %v1174_v36 = vld [vmem:[%s1322_s25] ss:$16 sps:$4 sm:$0xff]   ;;  %v1175_v37 = vld [vmem:[%s1322_s25 + $0x1e4] ss:$16 sps:$4 sm:$0xff]  }
  0x1b   : > { %683 = vmatpush1.bf16.msra.mxu0 %v1144_v16  ;;  %765 = vmatpush1.bf16.msra.mxu1 %v1141_v14  ;;  %v1179_v38 = vld [vmem:[%s1322_s25 + $0x2c] ss:$16 sps:$4 sm:$0xff]   ;;  %v1177_v39 = vld [vmem:[%s1322_s25 + $0x28] ss:$16 sps:$4 sm:$0xff]   ;;  %v1180_v40 = vld [vmem:[%s1322_s25 + $0x1e0] ss:$16 sps:$4 sm:$0xff]  }
  0x1c   : > { %684 = vmatprep.subr.bf16.mxu0 %v1145_v17  ;;  %766 = vmatprep.subr.bf16.mxu1 %v1149_v18  ;;  %v1181_v41 = vld [vmem:[%s1322_s25 + $0x1c4] ss:$16 sps:$4 sm:$0xff]   ;;  %v1185_v42 = vld [vmem:[%s1322_s25 + $0xc] ss:$16 sps:$4 sm:$0xff]   ;;  %v1183_v43 = vld [vmem:[%s1322_s25 + $0x8] ss:$16 sps:$4 sm:$0xff]  }
  0x1d   : > { %796 = vmatprep.mubr.bf16.mxu1 %v1225_v1  ;;  %v1186_v44 = vld [vmem:[%s1322_s25 + $0x1c0] ss:$16 sps:$4 sm:$0xff]   ;;  %v1187_v45 = vld [vmem:[%s1322_s25 + $0x1a4] ss:$16 sps:$4 sm:$0xff]   ;;  %v1191_v46 = vld [vmem:[%s1322_s25 + $0x1ec] ss:$16 sps:$4 sm:$0xff]  }
  0x1e   : > { %v1189_v47 = vld [vmem:[%s1322_s25 + $0x1e8] ss:$16 sps:$4 sm:$0xff]   ;;  %v1192_v48 = vld [vmem:[%s1322_s25 + $0x1a0] ss:$16 sps:$4 sm:$0xff]   ;;  %v1193_v49 = vld [vmem:[%s1322_s25 + $0x184] ss:$16 sps:$4 sm:$0xff]  }
  0x1f   : > { %685 = vmatpush1.bf16.msra.mxu0 %v1150_v20  ;;  %767 = vmatpush1.bf16.msra.mxu1 %v1147_v19  ;;  %v1197_v50 = vld [vmem:[%s1322_s25 + $0x1cc] ss:$16 sps:$4 sm:$0xff]   ;;  %v1195_v51 = vld [vmem:[%s1322_s25 + $0x1c8] ss:$16 sps:$4 sm:$0xff]   ;;  %v1198_v52 = vld [vmem:[%s1322_s25 + $0x180] ss:$16 sps:$4 sm:$0xff]  }
  0x20   : > { %686 = vmatprep.subr.bf16.mxu0 %v1151_v21  ;;  %768 = vmatprep.subr.bf16.mxu1 %v1155_v22  ;;  %v1199_v53 = vld [vmem:[%s1322_s25 + $0x164] ss:$16 sps:$4 sm:$0xff]   ;;  %v1203_v54 = vld [vmem:[%s1322_s25 + $0x1ac] ss:$16 sps:$4 sm:$0xff]   ;;  %v1201_v55 = vld [vmem:[%s1322_s25 + $0x1a8] ss:$16 sps:$4 sm:$0xff]  }
  0x21   : > { %v1204_v56 = vld [vmem:[%s1322_s25 + $0x160] ss:$16 sps:$4 sm:$0xff]   ;;  %v1205_v57 = vld [vmem:[%s1322_s25 + $0x144] ss:$16 sps:$4 sm:$0xff]   ;;  %v1209_v58 = vld [vmem:[%s1322_s25 + $0x18c] ss:$16 sps:$4 sm:$0xff]  }
  0x22   : > { %v1207_v59 = vld [vmem:[%s1322_s25 + $0x188] ss:$16 sps:$4 sm:$0xff]   ;;  %v1210_v60 = vld [vmem:[%s1322_s25 + $0x140] ss:$16 sps:$4 sm:$0xff]   ;;  %v1211_v61 = vld [vmem:[%s1322_s25 + $0x124] ss:$16 sps:$4 sm:$0xff]  }
  0x23   : > { %687 = vmatpush1.bf16.msra.mxu0 %v1156_v24  ;;  %769 = vmatpush1.bf16.msra.mxu1 %v1153_v23  ;;  %v1215_v62 = vld [vmem:[%s1322_s25 + $0x16c] ss:$16 sps:$4 sm:$0xff]   ;;  %v1213_v63 = vld [vmem:[%s1322_s25 + $0x168] ss:$16 sps:$4 sm:$0xff]   ;;  %v1216_v1 = vld [vmem:[%s1322_s25 + $0x120] ss:$16 sps:$4 sm:$0xff]  }
  0x24   : > { %688 = vmatprep.subr.bf16.mxu0 %v1157_v25  ;;  %770 = vmatprep.subr.bf16.mxu1 %v1161_v26  ;;  %v1217_v2 = vld [vmem:[%s1322_s25 + $0x104] ss:$16 sps:$4 sm:$0xff]   ;;  %v1221_v3 = vld [vmem:[%s1322_s25 + $0x14c] ss:$16 sps:$4 sm:$0xff]   ;;  %v1219_v4 = vld [vmem:[%s1322_s25 + $0x148] ss:$16 sps:$4 sm:$0xff]  }
  0x25   : > { %v1222_v5 = vld [vmem:[%s1322_s25 + $0x100] ss:$16 sps:$4 sm:$0xff]   ;;  %v1228_v6 = vld [vmem:[%s1322_s25 + $0x12c] ss:$16 sps:$4 sm:$0xff]   ;;  %v1226_v9 = vld [vmem:[%s1322_s25 + $0x128] ss:$16 sps:$4 sm:$0xff]  }
  0x26   : > { %v1231_v7 = vld [vmem:[%s1322_s25 + $0x22c] ss:$16 sps:$4 sm:$0xff]   ;;  %v1229_v10 = vld [vmem:[%s1322_s25 + $0x228] ss:$16 sps:$4 sm:$0xff]  }
  0x27   : > { %689 = vmatpush1.bf16.msra.mxu0 %v1162_v28  ;;  %771 = vmatpush1.bf16.msra.mxu1 %v1159_v27  ;;  %v1223_v8 = vld [vmem:[%s1429_s1] ss:$12 sps:$4 sm:$0xff]   ;;  %v1232_v14 = vld [vmem:[%s1322_s25 + $0x108] ss:$16 sps:$4 sm:$0xff]  }
  0x28   : > { %690 = vmatprep.subr.bf16.mxu0 %v1163_v29  ;;  %772 = vmatprep.subr.bf16.mxu1 %v1167_v30  ;;  %v1234_v11 = vld [vmem:[%s1322_s25 + $0x10c] ss:$16 sps:$4 sm:$0xff]   ;;  %v1235_v15 = vld [vmem:[%s1322_s25 + $0x208] ss:$16 sps:$4 sm:$0xff]  }
  0x29   : > { %v1237_v12 = vld [vmem:[%s1322_s25 + $0x20c] ss:$16 sps:$4 sm:$0xff]  }
  0x2b   : > { %691 = vmatpush1.bf16.msra.mxu0 %v1168_v32  ;;  %773 = vmatpush1.bf16.msra.mxu1 %v1165_v31 }
  0x2c   : > { %692 = vmatprep.subr.bf16.mxu0 %v1169_v33  ;;  %774 = vmatprep.subr.bf16.mxu1 %v1173_v34 }
  0x2f   : > { %693 = vmatpush1.bf16.msra.mxu0 %v1174_v36  ;;  %775 = vmatpush1.bf16.msra.mxu1 %v1171_v35 }
  0x30   : > { %694 = vmatprep.subr.bf16.mxu0 %v1175_v37  ;;  %776 = vmatprep.subr.bf16.mxu1 %v1179_v38 }
  0x33   : > { %695 = vmatpush2.bf16.msra.mxu0 %v1180_v40  ;;  %777 = vmatpush1.bf16.msra.mxu1 %v1177_v39 }
  0x34   : > { %696 = vmatprep.subr.bf16.mxu0 %v1181_v41  ;;  %778 = vmatprep.subr.bf16.mxu1 %v1185_v42 }
  0x37   : > { %697 = vmatpush2.bf16.msra.mxu0 %v1186_v44  ;;  %779 = vmatpush1.bf16.msra.mxu1 %v1183_v43 }
  0x38   : > { %698 = vmatprep.subr.bf16.mxu0 %v1187_v45  ;;  %780 = vmatprep.subr.bf16.mxu1 %v1191_v46 }
  0x3b   : > { %699 = vmatpush2.bf16.msra.mxu0 %v1192_v48  ;;  %781 = vmatpush2.bf16.msra.mxu1 %v1189_v47 }
  0x3c   : > { %700 = vmatprep.subr.bf16.mxu0 %v1193_v49  ;;  %782 = vmatprep.subr.bf16.mxu1 %v1197_v50 }
  0x3f   : > { %701 = vmatpush2.bf16.msra.mxu0 %v1198_v52  ;;  %783 = vmatpush2.bf16.msra.mxu1 %v1195_v51 }
  0x40   : > { %702 = vmatprep.subr.bf16.mxu0 %v1199_v53  ;;  %784 = vmatprep.subr.bf16.mxu1 %v1203_v54 }
  0x43   : > { %703 = vmatpush2.bf16.msra.mxu0 %v1204_v56  ;;  %785 = vmatpush2.bf16.msra.mxu1 %v1201_v55 }
  0x44   : > { %704 = vmatprep.subr.bf16.mxu0 %v1205_v57  ;;  %786 = vmatprep.subr.bf16.mxu1 %v1209_v58 }
  0x47   : > { %705 = vmatpush2.bf16.msra.mxu0 %v1210_v60  ;;  %787 = vmatpush2.bf16.msra.mxu1 %v1207_v59 }
  0x48   : > { %706 = vmatprep.subr.bf16.mxu0 %v1211_v61  ;;  %788 = vmatprep.subr.bf16.mxu1 %v1215_v62 }
  0x4b   : > { %707 = vmatpush2.bf16.msra.mxu0 %v1216_v1  ;;  %789 = vmatpush2.bf16.msra.mxu1 %v1213_v63 }
  0x4c   : > { %708 = vmatprep.subr.bf16.mxu0 %v1217_v2  ;;  %790 = vmatprep.subr.bf16.mxu1 %v1221_v3 }
  0x4f   : > { %709 = vmatpush2.bf16.msra.mxu0 %v1222_v5  ;;  %791 = vmatpush2.bf16.msra.mxu1 %v1219_v4 }
  0x50   : > { %792 = vmatprep.subr.bf16.mxu1 %v1228_v6  ;;  %819 = vmatprep.subr.bf16.mxu0 %v1231_v7 }
  0x52   : > { %711 = vmatmul.mubr.bf16.vlgmr.msra.gmra.mxu0 %v1223_v8 }
  0x53   : > { %793 = vmatpush2.bf16.msra.mxu1 %v1226_v9  ;;  %820 = vmatpush1.bf16.msra.mxu0 %v1229_v10 }
  0x54   : > { %794 = vmatprep.subr.bf16.mxu1 %v1234_v11  ;;  %821 = vmatprep.subr.bf16.mxu0 %v1237_v12 }
  0x55   : > { %839 = vmatprep.mubr.bf16.mxu0 %v1266_v0 }
  0x57   : > { %795 = vmatpush2.bf16.msra.mxu1 %v1232_v14  ;;  %822 = vmatpush1.bf16.msra.mxu0 %v1235_v15 }
  0x5a   : > { %797 = vmatmul.mubr.bf16.vlgmr.msra.gmra.mxu1 %v1223_v8  ;;  %1095 = vmatmul.mubr.msk.bf16.vlgmr.msra.gmra.mxu0 %vm674_vm0, %v1336_v13 }
  0x89   : > { %v292_v17 = vpop.permute.xlu0 %291 }
  0x8d   : > { %v297_v24 = vpop.permute.xlu0 %296 }
  0xda   : > { %v755_v16 = vpop.f32.mrf.mxu1 }
  0xdc   : > { %v757_v18 = vpop.f32.mrf.mxu1 }
  0xde   : > { %v759_v20 = vpop.f32.mrf.mxu1 }
  0xe0   : > { %v761_v27 = vpop.f32.mrf.mxu1 }
 0x112   : > { %v712_v19 = vpop.f32.mrf.mxu0 }
 0x113   : > { %v713_v21 = vadd.f32 %v712_v19, %v292_v17 }
 0x114   : > { %v714_v22 = vpop.f32.mrf.mxu0 }
 0x115   : > { %v715_v23 = vadd.f32 %v714_v22, %v292_v17  ;;  %v756_v28 = vadd.f32 %v755_v16, %v713_v21 }
 0x116   : > { %v716_v25 = vpop.f32.mrf.mxu0 }
 0x117   : > { %v758_v26 = vadd.f32 %v757_v18, %v715_v23  ;;  %v717_v0 = vadd.f32 %v716_v25, %v297_v24  ;;  %v850_v35 = vmax.f32 %v756_v28, 0.0 }
 0x118   : > { %v718_v29 = vpop.f32.mrf.mxu0 }
 0x119   : > { %v719_v30 = vadd.f32 %v718_v29, %v297_v24  ;;  %v851_v31 = vmax.f32 %v758_v26, 0.0  ;;  %v760_v36 = vadd.f32 %v759_v20, %v717_v0 }
 0x11a   : > { %v798_v32 = vpop.f32.mrf.mxu1  ;;  %v841_v33 = vpop.f32.mrf.mxu0 }
 0x11b   : > { %v762_v13 = vadd.f32 %v761_v27, %v719_v30  ;;  %v799_v34 = vadd.f32 %v798_v32, %v292_v17  ;;  %v858_v43 = vadd.f32 %v851_v31, %v850_v35  ;;  %v854_v48 = vmax.f32 %v760_v36, 0.0 }
 0x11c   : > { %v800_v37 = vpop.f32.mrf.mxu1  ;;  %v843_v38 = vpop.f32.mrf.mxu0 }
 0x11d   : > { %v842_v39 = vadd.f32 %v841_v33, %v799_v34  ;;  %v801_v40 = vadd.f32 %v800_v37, %v292_v17  ;;  %v855_v44 = vmax.f32 %v762_v13, 0.0 }
 0x11e   : > { %v802_v41 = vpop.f32.mrf.mxu1  ;;  %v845_v42 = vpop.f32.mrf.mxu0 }
 0x11f   : > { %v852_v45 = vmax.f32 %v842_v39, 0.0  ;;  %v844_v46 = vadd.f32 %v843_v38, %v801_v40  ;;  %v803_v47 = vadd.f32 %v802_v41, %v297_v24  ;;  %v865_v56 = vadd.f32 %v855_v44, %v854_v48 }
 0x120   : > { %v804_v49 = vpop.f32.mrf.mxu1  ;;  %v847_v54 = vpop.f32.mrf.mxu0 }
 0x121   : > { %v853_v50 = vmax.f32 %v844_v46, 0.0  ;;  %v846_v51 = vadd.f32 %v845_v42, %v803_v47  ;;  %v805_v52 = vadd.f32 %v804_v49, %v297_v24  ;;  %v859_v53 = vadd.f32 %v858_v43, %v852_v45 }
 0x123   : > { %v856_v55 = vmax.f32 %v846_v51, 0.0  ;;  %v848_v57 = vadd.f32 %v847_v54, %v805_v52  ;;  %v861_v58 = vsel %vm860_vm1, %v853_v50, 0.0 }
 0x124   : > { %v862_v59 = vadd.f32 %v861_v58, %v859_v53 }
 0x125   : > { %v866_v60 = vadd.f32 %v865_v56, %v856_v55  ;;  %v857_v61 = vmax.f32 %v848_v57, 0.0 }
 0x126   : > { %863 = vadd.xlane.f32.xlu1 %v862_v59 }
 0x127   : > { %v867_v62 = vsel %vm860_vm1, %v857_v61, 0.0 }
 0x128   : > { %v868_v63 = vadd.f32 %v867_v62, %v866_v60 }
 0x12a   : > { %869 = vadd.xlane.f32.xlu1 %v868_v63 }
 0x1af   : > { %v864_v1 = vpop.xlane.xlu1 %863 }
 0x1b0   : > { %v872_v2 = vmul.f32 0.0022675737, %v864_v1 }
 0x1b2   : > { %v874_v3 = vsub.f32 %v850_v35, %v872_v2  ;;  %v875_v4 = vsub.f32 %v851_v31, %v872_v2  ;;  %v876_v5 = vsub.f32 %v852_v45, %v872_v2  ;;  %v877_v6 = vsub.f32 %v853_v50, %v872_v2 }
 0x1b3   : > { %v870_v7 = vpop.xlane.xlu1 %869 }
 0x1b4   : > { %v873_v8 = vmul.f32 0.0022675737, %v870_v7  ;;  %v882_v9 = vmul.f32 %v874_v3, %v874_v3  ;;  %v883_v10 = vmul.f32 %v875_v4, %v875_v4  ;;  %v884_v11 = vmul.f32 %v876_v5, %v876_v5 }
 0x1b5   : > { %v885_v12 = vmul.f32 %v877_v6, %v877_v6 }
 0x1b6   : > { %v878_v14 = vsub.f32 %v854_v48, %v873_v8  ;;  %v879_v15 = vsub.f32 %v855_v44, %v873_v8  ;;  %v890_v16 = vadd.f32 %v883_v10, %v882_v9  ;;  %v880_v17 = vsub.f32 %v856_v55, %v873_v8 }
 0x1b7   : > { %v881_v18 = vsub.f32 %v857_v61, %v873_v8  ;;  %v892_v22 = vsel %vm860_vm1, %v885_v12, 0.0 }
 0x1b8   : > { %v891_v19 = vadd.f32 %v890_v16, %v884_v11  ;;  %v886_v20 = vmul.f32 %v878_v14, %v878_v14  ;;  %v887_v21 = vmul.f32 %v879_v15, %v879_v15  ;;  %v888_v25 = vmul.f32 %v880_v17, %v880_v17 }
 0x1b9   : > { %v889_v23 = vmul.f32 %v881_v18, %v881_v18 }
 0x1ba   : > { %v893_v24 = vadd.f32 %v892_v22, %v891_v19  ;;  %v896_v26 = vadd.f32 %v887_v21, %v886_v20 }
 0x1bb   : > { %v898_v28 = vsel %vm860_vm1, %v889_v23, 0.0 }
 0x1bc   : > { %894 = vadd.xlane.f32.xlu0 %v893_v24  ;;  %v897_v27 = vadd.f32 %v896_v26, %v888_v25 }
 0x1be   : > { %v899_v0 = vadd.f32 %v898_v28, %v897_v27 }
 0x1c0   : > { %900 = vadd.xlane.f32.xlu1 %v899_v0 }
 0x245   : > { %v895_v29 = vpop.xlane.xlu0 %894 }
 0x246   : > { %v902_v30 = vmul.f32 0.0022675737, %v895_v29 }
 0x248   : > { %v904_v31 = vadd.f32 1e-05, %v902_v30 }
 0x249   : > { %v901_v32 = vpop.xlane.xlu1 %900 }
 0x24a   : > { %1238 = vrsqrt.f32 %v904_v31  ;;  %v903_v33 = vmul.f32 0.0022675737, %v901_v32 }
 0x24c   : > { %v905_v13 = vadd.f32 1e-05, %v903_v33 }
 0x24e   : > { %1240 = vrsqrt.f32 %v905_v13 }
 0x257   : > { %v1239_v34 = vpop.eup %1238 }
 0x258   : > { %v908_v35 = vmul.f32 %v1239_v34, %v874_v3  ;;  %v909_v36 = vmul.f32 %v1239_v34, %v875_v4  ;;  %v910_v37 = vmul.f32 %v1239_v34, %v876_v5  ;;  %v911_v38 = vmul.f32 %v1239_v34, %v877_v6 }
 0x25a   : > { %916 = vst [vmem:[%s208_s6] sm:$0xff] %v908_v35  ;;  %917 = vst [vmem:[%s208_s6 + $0x8] sm:$0xff] %v909_v36 }
 0x25b   : > { %918 = vst [vmem:[%s208_s6 + $0x10] sm:$0xff] %v910_v37  ;;  %919 = vst.msk [vmem:[%s208_s6 + $0x18] sm:$0xff] %vm860_vm1, %v911_v38  ;;  %v1241_v39 = vpop.eup %1240 }
 0x25c   : > { %v912_v40 = vmul.f32 %v1241_v39, %v878_v14  ;;  %v913_v41 = vmul.f32 %v1241_v39, %v879_v15  ;;  %v914_v42 = vmul.f32 %v1241_v39, %v880_v17  ;;  %v915_v43 = vmul.f32 %v1241_v39, %v881_v18 }
 0x25e   : > { %920 = vst [vmem:[%s208_s6 + $0x20] sm:$0xff] %v912_v40  ;;  %921 = vst [vmem:[%s208_s6 + $0x28] sm:$0xff] %v913_v41 }
 0x25f   : > { %922 = vst [vmem:[%s208_s6 + $0x30] sm:$0xff] %v914_v42  ;;  %923 = vst.msk [vmem:[%s208_s6 + $0x38] sm:$0xff] %vm860_vm1, %v915_v43 }
 0x260 PF: > { %s13_s14 = sadd.s32 1, %s1264_s14   ;;  %s1432_s12 = smov %s1260_s13 }
 0x261   : > { %p10_p5 = scmp.ge.s32.totalorder %s13_s14, 4   ;;  %s1433_s13 = smov %s1435_s15 }
 0x263   :  { %12 = sbr.rel (!%p10_p5) target bundleno = 2 (0x2), region = 62 }

// kernel: image_decoder_forward.9
= control target key start
LH: loop header
LB: loop body
LE: loop exit
PB: predicated region body
PF: predicated region fallthrough
CT: control target
= control target key end

     0   :  { %s2794_s12 = smov 0   ;;  %s2796_s13 = smov 0   ;;  %s3619_s0 = inlined_call_operand.vmem [shape: bf16[2,256,1936], index: 0, kind: input, shape index: {}]   ;;  %s3620_s1 = inlined_call_operand.vmem [shape: bf16[16,256], index: 1, kind: input, shape index: {}]   ;;  %s3621_s2 = inlined_call_operand.vmem [shape: f32[16,1], index: 2, kind: input, shape index: {}]   ;;  %s3622_s3 = inlined_call_operand.vmem [shape: f32[2,16,1936], index: 3, kind: output, shape index: {}]  }
   0x1   :  { %s2798_s14 = smov 0  }
   0x2 LB: > { %s25_s15 = sadd.s32 1, %s2767_s13  ;;  %p2447_p0 = scmp.ge.s32.totalorder %s2771_s14, 1  ;;  %s2771_s14 = sphi %s2798_s14, %s13_s14   ;;  %s2767_s13 = sphi %s2796_s13, %s3646_s13   ;;  %s2763_s12 = sphi %s2794_s12, %s3645_s12  }
   0x3   : > { %p27_p1 = scmp.ge.s32.totalorder %s25_s15, 2  ;;  %p158_p2 = scmp.lt.s32.totalorder %s2771_s14, 3 }
   0x5   : > { %s3648_s15 = smov (%p27_p1, %s25_s15), 0  ;;  %p159_p3 = pnand %p2447_p0, %p158_p2 }
   0x6   : > { %p191_p4 = scmp.lt.s32.totalorder (!%p159_p3), %s2763_s12, 1 }
   0x7   : > { %162 = sbr.rel (%p159_p3) target bundleno = 829 (0x33d), region = 32 }
   0xc   : > { %v2815_v0 = vld [vmem:[%s3620_s1 + $0x4] ss:$8 sps:$4 sm:$0xff]   ;;  %s3650_s12 = smov (!%p191_p4, %s2763_s12), 1  ;;  %v2773_v27 = vmov 0   ;;  %vm2160_vm0 = vcmask 130048  }
   0xd   : > { %1802 = vmatprep.mubr.bf16.mxu0 %v2815_v0  ;;  %1845 = vmatprep.mubr.bf16.mxu1 %v2815_v0  ;;  %s2712_s18 = sshll.u32 %s3650_s12, 11  ;;  %s2713_s5 = sshll.u32 %s3650_s12, 8 }
   0xe   : > { %s2825_s21 = scalar_lea.vmem %s3619_s0, %s2712_s18  ;;  %2739 = vset.pattern.permute.xlu0 %v2773_v27  ;;  %s3542_s8 = scalar_lea.vmem %s3622_s3, %s2713_s5 }
   0xf   : > { %v324_v1 = vld [vmem:[%s2825_s21 + $0x380] sm:$0xff]  ;;  %v325_v3 = vld [vmem:[%s2825_s21 + $0x388] sm:$0xff] }
  0x10   : > { %v332_v2 = vld [vmem:[%s2825_s21 + $0x3c0] sm:$0xff]  ;;  %v333_v5 = vld [vmem:[%s2825_s21 + $0x3c8] sm:$0xff] }
  0x11   : > { %v2567_v4 = vcombine.high %v324_v1, %v332_v2  ;;  %v2566_v6 = vcombine.low %v324_v1, %v332_v2  ;;  %v308_v7 = vld [vmem:[%s2825_s21 + $0x300] sm:$0xff]  ;;  %v2569_v9 = vcombine.high %v325_v3, %v333_v5  ;;  %v2568_v10 = vcombine.low %v325_v3, %v333_v5  ;;  %v309_v12 = vld [vmem:[%s2825_s21 + $0x308] sm:$0xff] }
  0x12   : > { %v316_v8 = vld [vmem:[%s2825_s21 + $0x340] sm:$0xff]  ;;  %v317_v13 = vld [vmem:[%s2825_s21 + $0x348] sm:$0xff] }
  0x13   : > { %v2551_v11 = vcombine.high %v308_v7, %v316_v8  ;;  %v292_v14 = vld [vmem:[%s2825_s21 + $0x280] sm:$0xff]  ;;  %1770 = vmatprep.subr.bf16.mxu0 %v2567_v4  ;;  %v2553_v15 = vcombine.high %v309_v12, %v317_v13  ;;  %v293_v17 = vld [vmem:[%s2825_s21 + $0x288] sm:$0xff]  ;;  %1813 = vmatprep.subr.bf16.mxu1 %v2569_v9  ;;  %v2550_v19 = vcombine.low %v308_v7, %v316_v8 }
  0x14   : > { %v300_v16 = vld [vmem:[%s2825_s21 + $0x2c0] sm:$0xff]  ;;  %v301_v18 = vld [vmem:[%s2825_s21 + $0x2c8] sm:$0xff]  ;;  %1771 = vmatpush1.bf16.msra.mxu0 %v2566_v6  ;;  %1814 = vmatpush1.bf16.msra.mxu1 %v2568_v10  ;;  %v2552_v20 = vcombine.low %v309_v12, %v317_v13 }
  0x15   : > { %1772 = vmatprep.subr.bf16.mxu0 %v2551_v11  ;;  %v2535_v21 = vcombine.high %v292_v14, %v300_v16  ;;  %1815 = vmatprep.subr.bf16.mxu1 %v2553_v15  ;;  %v2537_v22 = vcombine.high %v293_v17, %v301_v18  ;;  %v276_v23 = vld [vmem:[%s2825_s21 + $0x200] sm:$0xff]  ;;  %v277_v25 = vld [vmem:[%s2825_s21 + $0x208] sm:$0xff]  ;;  %v2534_v28 = vcombine.low %v292_v14, %v300_v16 }
  0x16   : > { %v284_v24 = vld [vmem:[%s2825_s21 + $0x240] sm:$0xff]  ;;  %v285_v26 = vld [vmem:[%s2825_s21 + $0x248] sm:$0xff]  ;;  %v2536_v29 = vcombine.low %v293_v17, %v301_v18 }
  0x17   : > { %v2519_v30 = vcombine.high %v276_v23, %v284_v24  ;;  %v2521_v31 = vcombine.high %v277_v25, %v285_v26  ;;  %v260_v32 = vld [vmem:[%s2825_s21 + $0x180] sm:$0xff]  ;;  %v261_v34 = vld [vmem:[%s2825_s21 + $0x188] sm:$0xff]  ;;  %v2518_v36 = vcombine.low %v276_v23, %v284_v24  ;;  %v2520_v37 = vcombine.low %v277_v25, %v285_v26 }
  0x18   : > { %1773 = vmatpush1.bf16.msra.mxu0 %v2550_v19  ;;  %1816 = vmatpush1.bf16.msra.mxu1 %v2552_v20  ;;  %v268_v33 = vld [vmem:[%s2825_s21 + $0x1c0] sm:$0xff]  ;;  %v269_v35 = vld [vmem:[%s2825_s21 + $0x1c8] sm:$0xff] }
  0x19   : > { %1774 = vmatprep.subr.bf16.mxu0 %v2535_v21  ;;  %1817 = vmatprep.subr.bf16.mxu1 %v2537_v22  ;;  %v2503_v38 = vcombine.high %v260_v32, %v268_v33  ;;  %v2505_v39 = vcombine.high %v261_v34, %v269_v35  ;;  %v244_v40 = vld [vmem:[%s2825_s21 + $0x100] sm:$0xff]  ;;  %v245_v42 = vld [vmem:[%s2825_s21 + $0x108] sm:$0xff]  ;;  %v2502_v44 = vcombine.low %v260_v32, %v268_v33 }
  0x1a   : > { %v252_v41 = vld [vmem:[%s2825_s21 + $0x140] sm:$0xff]  ;;  %v253_v43 = vld [vmem:[%s2825_s21 + $0x148] sm:$0xff]  ;;  %v2504_v45 = vcombine.low %v261_v34, %v269_v35 }
  0x1b   : > { %v2487_v46 = vcombine.high %v244_v40, %v252_v41  ;;  %v2489_v47 = vcombine.high %v245_v42, %v253_v43  ;;  %v228_v48 = vld [vmem:[%s2825_s21 + $0x80] sm:$0xff]  ;;  %v229_v50 = vld [vmem:[%s2825_s21 + $0x88] sm:$0xff]  ;;  %v2486_v52 = vcombine.low %v244_v40, %v252_v41  ;;  %v2488_v53 = vcombine.low %v245_v42, %v253_v43 }
  0x1c   : > { %1775 = vmatpush1.bf16.msra.mxu0 %v2534_v28  ;;  %1818 = vmatpush1.bf16.msra.mxu1 %v2536_v29  ;;  %v236_v49 = vld [vmem:[%s2825_s21 + $0xc0] sm:$0xff]  ;;  %v237_v51 = vld [vmem:[%s2825_s21 + $0xc8] sm:$0xff] }
  0x1d   : > { %1776 = vmatprep.subr.bf16.mxu0 %v2519_v30  ;;  %1819 = vmatprep.subr.bf16.mxu1 %v2521_v31  ;;  %v2471_v54 = vcombine.high %v228_v48, %v236_v49  ;;  %v2473_v55 = vcombine.high %v229_v50, %v237_v51  ;;  %v212_v56 = vld [vmem:[%s2825_s21] sm:$0xff]  ;;  %v213_v58 = vld [vmem:[%s2825_s21 + $0x8] sm:$0xff]  ;;  %v2470_v60 = vcombine.low %v228_v48, %v236_v49 }
  0x1e   : > { %v220_v57 = vld [vmem:[%s2825_s21 + $0x40] sm:$0xff]  ;;  %v221_v59 = vld [vmem:[%s2825_s21 + $0x48] sm:$0xff]  ;;  %v2472_v61 = vcombine.low %v229_v50, %v237_v51 }
  0x1f   : > { %v2455_v62 = vcombine.high %v212_v56, %v220_v57  ;;  %v2457_v63 = vcombine.high %v213_v58, %v221_v59  ;;  %v452_v1 = vld [vmem:[%s2825_s21 + $0x780] sm:$0xff]  ;;  %v453_v3 = vld [vmem:[%s2825_s21 + $0x788] sm:$0xff]  ;;  %v2454_v5 = vcombine.low %v212_v56, %v220_v57  ;;  %v2456_v6 = vcombine.low %v213_v58, %v221_v59 }
  0x20   : > { %1777 = vmatpush1.bf16.msra.mxu0 %v2518_v36  ;;  %1820 = vmatpush1.bf16.msra.mxu1 %v2520_v37  ;;  %v460_v2 = vld [vmem:[%s2825_s21 + $0x7c0] sm:$0xff]  ;;  %v461_v4 = vld [vmem:[%s2825_s21 + $0x7c8] sm:$0xff] }
  0x21   : > { %1778 = vmatprep.subr.bf16.mxu0 %v2503_v38  ;;  %1821 = vmatprep.subr.bf16.mxu1 %v2505_v39  ;;  %v2695_v7 = vcombine.high %v452_v1, %v460_v2  ;;  %v2697_v8 = vcombine.high %v453_v3, %v461_v4  ;;  %v436_v9 = vld [vmem:[%s2825_s21 + $0x700] sm:$0xff]  ;;  %v437_v11 = vld [vmem:[%s2825_s21 + $0x708] sm:$0xff]  ;;  %v2694_v13 = vcombine.low %v452_v1, %v460_v2 }
  0x22   : > { %v444_v10 = vld [vmem:[%s2825_s21 + $0x740] sm:$0xff]  ;;  %v445_v12 = vld [vmem:[%s2825_s21 + $0x748] sm:$0xff]  ;;  %v2696_v14 = vcombine.low %v453_v3, %v461_v4  ;;  %v326_v4 = vld [vmem:[%s2825_s21 + $0x390] sm:$0xff] }
  0x23   : > { %v2679_v15 = vcombine.high %v436_v9, %v444_v10  ;;  %v2681_v16 = vcombine.high %v437_v11, %v445_v12  ;;  %v420_v17 = vld [vmem:[%s2825_s21 + $0x680] sm:$0xff]  ;;  %v421_v19 = vld [vmem:[%s2825_s21 + $0x688] sm:$0xff]  ;;  %v2678_v21 = vcombine.low %v436_v9, %v444_v10  ;;  %v2680_v22 = vcombine.low %v437_v11, %v445_v12  ;;  %v310_v12 = vld [vmem:[%s2825_s21 + $0x310] sm:$0xff] }
  0x24   : > { %1779 = vmatpush1.bf16.msra.mxu0 %v2502_v44  ;;  %1822 = vmatpush1.bf16.msra.mxu1 %v2504_v45  ;;  %v428_v18 = vld [vmem:[%s2825_s21 + $0x6c0] sm:$0xff]  ;;  %v429_v20 = vld [vmem:[%s2825_s21 + $0x6c8] sm:$0xff] }
  0x25   : > { %1780 = vmatprep.subr.bf16.mxu0 %v2487_v46  ;;  %1823 = vmatprep.subr.bf16.mxu1 %v2489_v47  ;;  %v2663_v23 = vcombine.high %v420_v17, %v428_v18  ;;  %v2665_v24 = vcombine.high %v421_v19, %v429_v20  ;;  %v404_v25 = vld [vmem:[%s2825_s21 + $0x600] sm:$0xff]  ;;  %v405_v27 = vld [vmem:[%s2825_s21 + $0x608] sm:$0xff]  ;;  %v2662_v29 = vcombine.low %v420_v17, %v428_v18 }
  0x26   : > { %v412_v26 = vld [vmem:[%s2825_s21 + $0x640] sm:$0xff]  ;;  %v413_v28 = vld [vmem:[%s2825_s21 + $0x648] sm:$0xff]  ;;  %v2664_v30 = vcombine.low %v421_v19, %v429_v20 }
  0x27   : > { %v2647_v31 = vcombine.high %v404_v25, %v412_v26  ;;  %v2649_v32 = vcombine.high %v405_v27, %v413_v28  ;;  %v388_v33 = vld [vmem:[%s2825_s21 + $0x580] sm:$0xff]  ;;  %v389_v35 = vld [vmem:[%s2825_s21 + $0x588] sm:$0xff]  ;;  %v2646_v37 = vcombine.low %v404_v25, %v412_v26  ;;  %v2648_v38 = vcombine.low %v405_v27, %v413_v28 }
  0x28   : > { %1781 = vmatpush1.bf16.msra.mxu0 %v2486_v52  ;;  %1824 = vmatpush1.bf16.msra.mxu1 %v2488_v53  ;;  %v396_v34 = vld [vmem:[%s2825_s21 + $0x5c0] sm:$0xff]  ;;  %v397_v36 = vld [vmem:[%s2825_s21 + $0x5c8] sm:$0xff] }
  0x29   : > { %1782 = vmatprep.subr.bf16.mxu0 %v2471_v54  ;;  %1825 = vmatprep.subr.bf16.mxu1 %v2473_v55  ;;  %v2631_v39 = vcombine.high %v388_v33, %v396_v34  ;;  %v468_v40 = vld [vmem:[%s3621_s2] sm:$0xff]  ;;  %v2633_v41 = vcombine.high %v389_v35, %v397_v36  ;;  %v373_v44 = vld [vmem:[%s2825_s21 + $0x508] sm:$0xff]  ;;  %v2630_v47 = vcombine.low %v388_v33, %v396_v34 }
  0x2a   : > { %v372_v42 = vld [vmem:[%s2825_s21 + $0x500] sm:$0xff]  ;;  %472 = vperm.xlu0 %2739, %v468_v40   ;;  %v381_v45 = vld [vmem:[%s2825_s21 + $0x548] sm:$0xff]  ;;  %v2632_v48 = vcombine.low %v389_v35, %v397_v36  ;;  %v271_v40 = vld [vmem:[%s2825_s21 + $0x1d8] sm:$0xff] }
  0x2b   : > { %v380_v43 = vld [vmem:[%s2825_s21 + $0x540] sm:$0xff]  ;;  %v469_v46 = vld [vmem:[%s3621_s2 + $0x8] sm:$0xff]  ;;  %v2617_v50 = vcombine.high %v373_v44, %v381_v45  ;;  %v2616_v56 = vcombine.low %v373_v44, %v381_v45  ;;  %v246_v45 = vld [vmem:[%s2825_s21 + $0x110] sm:$0xff] }
  0x2c   : > { %1783 = vmatpush1.bf16.msra.mxu0 %v2470_v60  ;;  %1826 = vmatpush1.bf16.msra.mxu1 %v2472_v61  ;;  %v2615_v49 = vcombine.high %v372_v42, %v380_v43  ;;  %v356_v51 = vld [vmem:[%s2825_s21 + $0x480] sm:$0xff]  ;;  %v357_v53 = vld [vmem:[%s2825_s21 + $0x488] sm:$0xff]  ;;  %v2614_v55 = vcombine.low %v372_v42, %v380_v43 }
  0x2d   : > { %1784 = vmatprep.subr.bf16.mxu0 %v2455_v62  ;;  %1827 = vmatprep.subr.bf16.mxu1 %v2457_v63  ;;  %v364_v52 = vld [vmem:[%s2825_s21 + $0x4c0] sm:$0xff]  ;;  %v365_v54 = vld [vmem:[%s2825_s21 + $0x4c8] sm:$0xff] }
  0x2e   : > { %477 = vperm.xlu0 %2739, %v469_v46   ;;  %v2599_v57 = vcombine.high %v356_v51, %v364_v52  ;;  %v2601_v58 = vcombine.high %v357_v53, %v365_v54  ;;  %v340_v59 = vld [vmem:[%s2825_s21 + $0x400] sm:$0xff]  ;;  %v341_v61 = vld [vmem:[%s2825_s21 + $0x408] sm:$0xff]  ;;  %v2598_v63 = vcombine.low %v356_v51, %v364_v52  ;;  %v2600_v1 = vcombine.low %v357_v53, %v365_v54  ;;  %v254_v46 = vld [vmem:[%s2825_s21 + $0x150] sm:$0xff] }
  0x2f   : > { %v348_v60 = vld [vmem:[%s2825_s21 + $0x440] sm:$0xff]  ;;  %v349_v62 = vld [vmem:[%s2825_s21 + $0x448] sm:$0xff]  ;;  %v2491_v51 = vcombine.high %v246_v45, %v254_v46  ;;  %v230_v53 = vld [vmem:[%s2825_s21 + $0x90] sm:$0xff] }
  0x30   : > { %1785 = vmatpush1.bf16.msra.mxu0 %v2454_v5  ;;  %1828 = vmatpush1.bf16.msra.mxu1 %v2456_v6  ;;  %v2583_v2 = vcombine.high %v340_v59, %v348_v60  ;;  %v2585_v3 = vcombine.high %v341_v61, %v349_v62  ;;  %v334_v5 = vld [vmem:[%s2825_s21 + $0x3d0] sm:$0xff]  ;;  %v327_v6 = vld [vmem:[%s2825_s21 + $0x398] sm:$0xff]  ;;  %v2584_v9 = vcombine.low %v341_v61, %v349_v62 }
  0x31   : > { %1786 = vmatprep.subr.bf16.mxu0 %v2695_v7  ;;  %1829 = vmatprep.subr.bf16.mxu1 %v2697_v8  ;;  %v335_v7 = vld [vmem:[%s2825_s21 + $0x3d8] sm:$0xff]  ;;  %v2582_v8 = vcombine.low %v340_v59, %v348_v60  ;;  %v2571_v10 = vcombine.high %v326_v4, %v334_v5  ;;  %v2570_v17 = vcombine.low %v326_v4, %v334_v5  ;;  %v238_v54 = vld [vmem:[%s2825_s21 + $0xd0] sm:$0xff] }
  0x32   : > { %v2573_v11 = vcombine.high %v327_v6, %v335_v7  ;;  %v2572_v18 = vcombine.low %v327_v6, %v335_v7  ;;  %v2475_v59 = vcombine.high %v230_v53, %v238_v54  ;;  %v214_v61 = vld [vmem:[%s2825_s21 + $0x10] sm:$0xff] }
  0x33   : > { %v222_v62 = vld [vmem:[%s2825_s21 + $0x50] sm:$0xff] }
  0x34   : > { %1787 = vmatpush2.bf16.msra.mxu0 %v2694_v13  ;;  %1830 = vmatpush2.bf16.msra.mxu1 %v2696_v14  ;;  %v318_v13 = vld [vmem:[%s2825_s21 + $0x350] sm:$0xff]  ;;  %v2906_v14 = vld [vmem:[%s3620_s1] ss:$8 sps:$4 sm:$0xff]   ;;  %v2459_v4 = vcombine.high %v214_v61, %v222_v62 }
  0x35   : > { %1788 = vmatprep.subr.bf16.mxu0 %v2679_v15  ;;  %1831 = vmatprep.subr.bf16.mxu1 %v2681_v16  ;;  %v311_v15 = vld [vmem:[%s2825_s21 + $0x318] sm:$0xff]  ;;  %v2555_v19 = vcombine.high %v310_v12, %v318_v13  ;;  %v2554_v25 = vcombine.low %v310_v12, %v318_v13  ;;  %v454_v6 = vld [vmem:[%s2825_s21 + $0x790] sm:$0xff] }
  0x36   : > { %v319_v16 = vld [vmem:[%s2825_s21 + $0x358] sm:$0xff]  ;;  %v462_v7 = vld [vmem:[%s2825_s21 + $0x7d0] sm:$0xff] }
  0x37   : > { %v2557_v20 = vcombine.high %v311_v15, %v319_v16  ;;  %v2556_v26 = vcombine.low %v311_v15, %v319_v16  ;;  %v2699_v12 = vcombine.high %v454_v6, %v462_v7  ;;  %v438_v15 = vld [vmem:[%s2825_s21 + $0x710] sm:$0xff] }
  0x38   : > { %1789 = vmatpush2.bf16.msra.mxu0 %v2678_v21  ;;  %1832 = vmatpush2.bf16.msra.mxu1 %v2680_v22  ;;  %v294_v21 = vld [vmem:[%s2825_s21 + $0x290] sm:$0xff] }
  0x39   : > { %1790 = vmatprep.subr.bf16.mxu0 %v2663_v23  ;;  %1833 = vmatprep.subr.bf16.mxu1 %v2665_v24  ;;  %v302_v22 = vld [vmem:[%s2825_s21 + $0x2d0] sm:$0xff]  ;;  %v295_v23 = vld [vmem:[%s2825_s21 + $0x298] sm:$0xff] }
  0x3a   : > { %v303_v24 = vld [vmem:[%s2825_s21 + $0x2d8] sm:$0xff]  ;;  %v2539_v27 = vcombine.high %v294_v21, %v302_v22  ;;  %v2538_v33 = vcombine.low %v294_v21, %v302_v22  ;;  %v446_v16 = vld [vmem:[%s2825_s21 + $0x750] sm:$0xff] }
  0x3b   : > { %v2541_v28 = vcombine.high %v295_v23, %v303_v24  ;;  %v2540_v34 = vcombine.low %v295_v23, %v303_v24  ;;  %v2683_v21 = vcombine.high %v438_v15, %v446_v16  ;;  %v422_v23 = vld [vmem:[%s2825_s21 + $0x690] sm:$0xff] }
  0x3c   : > { %1791 = vmatpush2.bf16.msra.mxu0 %v2662_v29  ;;  %1834 = vmatpush2.bf16.msra.mxu1 %v2664_v30  ;;  %v278_v29 = vld [vmem:[%s2825_s21 + $0x210] sm:$0xff] }
  0x3d   : > { %1792 = vmatprep.subr.bf16.mxu0 %v2647_v31  ;;  %1835 = vmatprep.subr.bf16.mxu1 %v2649_v32  ;;  %v286_v30 = vld [vmem:[%s2825_s21 + $0x250] sm:$0xff]  ;;  %v279_v31 = vld [vmem:[%s2825_s21 + $0x218] sm:$0xff] }
  0x3e   : > { %v287_v32 = vld [vmem:[%s2825_s21 + $0x258] sm:$0xff]  ;;  %v2523_v35 = vcombine.high %v278_v29, %v286_v30  ;;  %v430_v24 = vld [vmem:[%s2825_s21 + $0x6d0] sm:$0xff] }
  0x3f   : > { %v2525_v36 = vcombine.high %v279_v31, %v287_v32  ;;  %v2524_v42 = vcombine.low %v279_v31, %v287_v32  ;;  %v406_v31 = vld [vmem:[%s2825_s21 + $0x610] sm:$0xff] }
  0x40   : > { %1793 = vmatpush2.bf16.msra.mxu0 %v2646_v37  ;;  %1836 = vmatpush2.bf16.msra.mxu1 %v2648_v38  ;;  %v262_v37 = vld [vmem:[%s2825_s21 + $0x190] sm:$0xff] }
  0x41   : > { %1794 = vmatprep.subr.bf16.mxu0 %v2631_v39  ;;  %1837 = vmatprep.subr.bf16.mxu1 %v2633_v41  ;;  %v270_v38 = vld [vmem:[%s2825_s21 + $0x1d0] sm:$0xff]  ;;  %v263_v39 = vld [vmem:[%s2825_s21 + $0x198] sm:$0xff]  ;;  %v2522_v41 = vcombine.low %v278_v29, %v286_v30  ;;  %v2667_v29 = vcombine.high %v422_v23, %v430_v24 }
  0x42   : > { %v2507_v43 = vcombine.high %v262_v37, %v270_v38  ;;  %v2509_v44 = vcombine.high %v263_v39, %v271_v40  ;;  %v414_v32 = vld [vmem:[%s2825_s21 + $0x650] sm:$0xff] }
  0x44   : > { %1795 = vmatpush2.bf16.msra.mxu0 %v2630_v47  ;;  %1838 = vmatpush2.bf16.msra.mxu1 %v2632_v48  ;;  %v247_v47 = vld [vmem:[%s2825_s21 + $0x118] sm:$0xff] }
  0x45   : > { %1796 = vmatprep.subr.bf16.mxu0 %v2615_v49  ;;  %1839 = vmatprep.subr.bf16.mxu1 %v2617_v50  ;;  %v255_v48 = vld [vmem:[%s2825_s21 + $0x158] sm:$0xff]  ;;  %v2506_v49 = vcombine.low %v262_v37, %v270_v38  ;;  %v2508_v50 = vcombine.low %v263_v39, %v271_v40  ;;  %v2651_v37 = vcombine.high %v406_v31, %v414_v32  ;;  %v390_v39 = vld [vmem:[%s2825_s21 + $0x590] sm:$0xff] }
  0x46   : > { %v2493_v52 = vcombine.high %v247_v47, %v255_v48  ;;  %v398_v40 = vld [vmem:[%s2825_s21 + $0x5d0] sm:$0xff] }
  0x48   : > { %1797 = vmatpush2.bf16.msra.mxu0 %v2614_v55  ;;  %1840 = vmatpush2.bf16.msra.mxu1 %v2616_v56  ;;  %v231_v55 = vld [vmem:[%s2825_s21 + $0x98] sm:$0xff] }
  0x49   : > { %1798 = vmatprep.subr.bf16.mxu0 %v2599_v57  ;;  %1841 = vmatprep.subr.bf16.mxu1 %v2601_v58  ;;  %v239_v56 = vld [vmem:[%s2825_s21 + $0xd8] sm:$0xff]  ;;  %v2490_v57 = vcombine.low %v246_v45, %v254_v46  ;;  %v2492_v58 = vcombine.low %v247_v47, %v255_v48  ;;  %v2635_v45 = vcombine.high %v390_v39, %v398_v40  ;;  %v374_v47 = vld [vmem:[%s2825_s21 + $0x510] sm:$0xff] }
  0x4a   : > { %v2477_v60 = vcombine.high %v231_v55, %v239_v56  ;;  %v382_v48 = vld [vmem:[%s2825_s21 + $0x550] sm:$0xff] }
  0x4c   : > { %1799 = vmatpush2.bf16.msra.mxu0 %v2598_v63  ;;  %1842 = vmatpush2.bf16.msra.mxu1 %v2600_v1  ;;  %v215_v63 = vld [vmem:[%s2825_s21 + $0x18] sm:$0xff] }
  0x4d   : > { %1800 = vmatprep.subr.bf16.mxu0 %v2583_v2  ;;  %1843 = vmatprep.subr.bf16.mxu1 %v2585_v3  ;;  %v223_v1 = vld [vmem:[%s2825_s21 + $0x58] sm:$0xff]  ;;  %v2474_v2 = vcombine.low %v230_v53, %v238_v54  ;;  %v2476_v3 = vcombine.low %v231_v55, %v239_v56  ;;  %v2619_v53 = vcombine.high %v374_v47, %v382_v48  ;;  %v358_v55 = vld [vmem:[%s2825_s21 + $0x490] sm:$0xff] }
  0x4e   : > { %v2461_v5 = vcombine.high %v215_v63, %v223_v1  ;;  %v366_v56 = vld [vmem:[%s2825_s21 + $0x4d0] sm:$0xff] }
  0x50   : > { %1801 = vmatpush2.bf16.msra.mxu0 %v2582_v8  ;;  %1844 = vmatpush2.bf16.msra.mxu1 %v2584_v9  ;;  %v455_v8 = vld [vmem:[%s2825_s21 + $0x798] sm:$0xff] }
  0x51   : > { %1856 = vmatprep.subr.bf16.mxu0 %v2571_v10  ;;  %1899 = vmatprep.subr.bf16.mxu1 %v2573_v11  ;;  %v463_v9 = vld [vmem:[%s2825_s21 + $0x7d8] sm:$0xff]  ;;  %v2458_v10 = vcombine.low %v214_v61, %v222_v62  ;;  %v2460_v11 = vcombine.low %v215_v63, %v223_v1  ;;  %v2603_v61 = vcombine.high %v358_v55, %v366_v56  ;;  %v342_v63 = vld [vmem:[%s2825_s21 + $0x410] sm:$0xff] }
  0x52   : > { %v2701_v13 = vcombine.high %v455_v8, %v463_v9  ;;  %v350_v1 = vld [vmem:[%s2825_s21 + $0x450] sm:$0xff] }
  0x53   : > { %1803 = vmatmul.mubr.bf16.vlgmr.msra.gmra.mxu0 %v2906_v14  ;;  %1846 = vmatmul.mubr.bf16.vlgmr.msra.gmra.mxu1 %v2906_v14 }
  0x54   : > { %1857 = vmatpush1.bf16.msra.mxu0 %v2570_v17  ;;  %1900 = vmatpush1.bf16.msra.mxu1 %v2572_v18  ;;  %v439_v17 = vld [vmem:[%s2825_s21 + $0x718] sm:$0xff] }
  0x55   : > { %1858 = vmatprep.subr.bf16.mxu0 %v2555_v19  ;;  %1901 = vmatprep.subr.bf16.mxu1 %v2557_v20  ;;  %v447_v18 = vld [vmem:[%s2825_s21 + $0x758] sm:$0xff]  ;;  %v2698_v19 = vcombine.low %v454_v6, %v462_v7  ;;  %v2700_v20 = vcombine.low %v455_v8, %v463_v9  ;;  %v2587_v6 = vcombine.high %v342_v63, %v350_v1  ;;  %v328_v8 = vld [vmem:[%s2825_s21 + $0x3a0] sm:$0xff] }
  0x56   : > { %1888 = vmatprep.mubr.bf16.mxu0 %v2815_v0  ;;  %1931 = vmatprep.mubr.bf16.mxu1 %v2815_v0  ;;  %v2685_v22 = vcombine.high %v439_v17, %v447_v18  ;;  %v336_v9 = vld [vmem:[%s2825_s21 + $0x3e0] sm:$0xff] }
  0x58   : > { %1859 = vmatpush1.bf16.msra.mxu0 %v2554_v25  ;;  %1902 = vmatpush1.bf16.msra.mxu1 %v2556_v26  ;;  %v423_v25 = vld [vmem:[%s2825_s21 + $0x698] sm:$0xff] }
  0x59   : > { %1860 = vmatprep.subr.bf16.mxu0 %v2539_v27  ;;  %1903 = vmatprep.subr.bf16.mxu1 %v2541_v28  ;;  %v431_v26 = vld [vmem:[%s2825_s21 + $0x6d8] sm:$0xff]  ;;  %v2682_v27 = vcombine.low %v438_v15, %v446_v16  ;;  %v2684_v28 = vcombine.low %v439_v17, %v447_v18  ;;  %v2575_v15 = vcombine.high %v328_v8, %v336_v9  ;;  %v312_v17 = vld [vmem:[%s2825_s21 + $0x320] sm:$0xff] }
  0x5a   : > { %v2669_v30 = vcombine.high %v423_v25, %v431_v26  ;;  %v320_v18 = vld [vmem:[%s2825_s21 + $0x360] sm:$0xff] }
  0x5c   : > { %1861 = vmatpush1.bf16.msra.mxu0 %v2538_v33  ;;  %1904 = vmatpush1.bf16.msra.mxu1 %v2540_v34  ;;  %v407_v33 = vld [vmem:[%s2825_s21 + $0x618] sm:$0xff] }
  0x5d   : > { %1862 = vmatprep.subr.bf16.mxu0 %v2523_v35  ;;  %1905 = vmatprep.subr.bf16.mxu1 %v2525_v36  ;;  %v415_v34 = vld [vmem:[%s2825_s21 + $0x658] sm:$0xff]  ;;  %v2666_v35 = vcombine.low %v422_v23, %v430_v24  ;;  %v2668_v36 = vcombine.low %v423_v25, %v431_v26  ;;  %v2559_v23 = vcombine.high %v312_v17, %v320_v18  ;;  %v296_v25 = vld [vmem:[%s2825_s21 + $0x2a0] sm:$0xff] }
  0x5e   : > { %v2653_v38 = vcombine.high %v407_v33, %v415_v34  ;;  %v304_v26 = vld [vmem:[%s2825_s21 + $0x2e0] sm:$0xff] }
  0x60   : > { %1863 = vmatpush1.bf16.msra.mxu0 %v2522_v41  ;;  %1906 = vmatpush1.bf16.msra.mxu1 %v2524_v42  ;;  %v391_v41 = vld [vmem:[%s2825_s21 + $0x598] sm:$0xff] }
  0x61   : > { %1864 = vmatprep.subr.bf16.mxu0 %v2507_v43  ;;  %1907 = vmatprep.subr.bf16.mxu1 %v2509_v44  ;;  %v399_v42 = vld [vmem:[%s2825_s21 + $0x5d8] sm:$0xff]  ;;  %v2650_v43 = vcombine.low %v406_v31, %v414_v32  ;;  %v2652_v44 = vcombine.low %v407_v33, %v415_v34  ;;  %v2543_v31 = vcombine.high %v296_v25, %v304_v26  ;;  %v280_v33 = vld [vmem:[%s2825_s21 + $0x220] sm:$0xff] }
  0x62   : > { %v2637_v46 = vcombine.high %v391_v41, %v399_v42  ;;  %v288_v34 = vld [vmem:[%s2825_s21 + $0x260] sm:$0xff] }
  0x64   : > { %1865 = vmatpush1.bf16.msra.mxu0 %v2506_v49  ;;  %1908 = vmatpush1.bf16.msra.mxu1 %v2508_v50  ;;  %v375_v49 = vld [vmem:[%s2825_s21 + $0x518] sm:$0xff] }
  0x65   : > { %1866 = vmatprep.subr.bf16.mxu0 %v2491_v51  ;;  %1909 = vmatprep.subr.bf16.mxu1 %v2493_v52  ;;  %v383_v50 = vld [vmem:[%s2825_s21 + $0x558] sm:$0xff]  ;;  %v2634_v51 = vcombine.low %v390_v39, %v398_v40  ;;  %v2636_v52 = vcombine.low %v391_v41, %v399_v42  ;;  %v2527_v39 = vcombine.high %v280_v33, %v288_v34  ;;  %v264_v41 = vld [vmem:[%s2825_s21 + $0x1a0] sm:$0xff] }
  0x66   : > { %v2621_v54 = vcombine.high %v375_v49, %v383_v50  ;;  %v272_v42 = vld [vmem:[%s2825_s21 + $0x1e0] sm:$0xff] }
  0x68   : > { %1867 = vmatpush1.bf16.msra.mxu0 %v2490_v57  ;;  %1910 = vmatpush1.bf16.msra.mxu1 %v2492_v58  ;;  %v359_v57 = vld [vmem:[%s2825_s21 + $0x498] sm:$0xff] }
  0x69   : > { %1868 = vmatprep.subr.bf16.mxu0 %v2475_v59  ;;  %1911 = vmatprep.subr.bf16.mxu1 %v2477_v60  ;;  %v367_v58 = vld [vmem:[%s2825_s21 + $0x4d8] sm:$0xff]  ;;  %v2618_v59 = vcombine.low %v374_v47, %v382_v48  ;;  %v2620_v60 = vcombine.low %v375_v49, %v383_v50  ;;  %v248_v48 = vld [vmem:[%s2825_s21 + $0x120] sm:$0xff]  ;;  %v249_v50 = vld [vmem:[%s2825_s21 + $0x128] sm:$0xff] }
  0x6a   : > { %v2605_v62 = vcombine.high %v359_v57, %v367_v58  ;;  %v256_v49 = vld [vmem:[%s2825_s21 + $0x160] sm:$0xff] }
  0x6c   : > { %1869 = vmatpush1.bf16.msra.mxu0 %v2474_v2  ;;  %1912 = vmatpush1.bf16.msra.mxu1 %v2476_v3  ;;  %v343_v2 = vld [vmem:[%s2825_s21 + $0x418] sm:$0xff] }
  0x6d   : > { %1870 = vmatprep.subr.bf16.mxu0 %v2459_v4  ;;  %1913 = vmatprep.subr.bf16.mxu1 %v2461_v5  ;;  %v351_v3 = vld [vmem:[%s2825_s21 + $0x458] sm:$0xff]  ;;  %v2602_v4 = vcombine.low %v358_v55, %v366_v56  ;;  %v2604_v5 = vcombine.low %v359_v57, %v367_v58  ;;  %v232_v56 = vld [vmem:[%s2825_s21 + $0xa0] sm:$0xff]  ;;  %v233_v58 = vld [vmem:[%s2825_s21 + $0xa8] sm:$0xff] }
  0x6e   : > { %v2589_v7 = vcombine.high %v343_v2, %v351_v3  ;;  %v240_v57 = vld [vmem:[%s2825_s21 + $0xe0] sm:$0xff] }
  0x70   : > { %1871 = vmatpush1.bf16.msra.mxu0 %v2458_v10  ;;  %1914 = vmatpush1.bf16.msra.mxu1 %v2460_v11  ;;  %v329_v10 = vld [vmem:[%s2825_s21 + $0x3a8] sm:$0xff] }
  0x71   : > { %1872 = vmatprep.subr.bf16.mxu0 %v2699_v12  ;;  %1915 = vmatprep.subr.bf16.mxu1 %v2701_v13  ;;  %v337_v11 = vld [vmem:[%s2825_s21 + $0x3e8] sm:$0xff]  ;;  %v2586_v12 = vcombine.low %v342_v63, %v350_v1  ;;  %v2588_v13 = vcombine.low %v343_v2, %v351_v3  ;;  %v216_v1 = vld [vmem:[%s2825_s21 + $0x20] sm:$0xff] }
  0x72   : > { %v2577_v16 = vcombine.high %v329_v10, %v337_v11  ;;  %v224_v2 = vld [vmem:[%s2825_s21 + $0x60] sm:$0xff]  ;;  %v217_v3 = vld [vmem:[%s2825_s21 + $0x28] sm:$0xff] }
  0x74   : > { %1873 = vmatpush2.bf16.msra.mxu0 %v2698_v19  ;;  %1916 = vmatpush2.bf16.msra.mxu1 %v2700_v20  ;;  %v313_v19 = vld [vmem:[%s2825_s21 + $0x328] sm:$0xff] }
  0x75   : > { %1874 = vmatprep.subr.bf16.mxu0 %v2683_v21  ;;  %1917 = vmatprep.subr.bf16.mxu1 %v2685_v22  ;;  %v321_v20 = vld [vmem:[%s2825_s21 + $0x368] sm:$0xff]  ;;  %v2574_v21 = vcombine.low %v328_v8, %v336_v9  ;;  %v2576_v22 = vcombine.low %v329_v10, %v337_v11  ;;  %v456_v9 = vld [vmem:[%s2825_s21 + $0x7a0] sm:$0xff] }
  0x76   : > { %v2561_v24 = vcombine.high %v313_v19, %v321_v20  ;;  %v464_v10 = vld [vmem:[%s2825_s21 + $0x7e0] sm:$0xff]  ;;  %v457_v11 = vld [vmem:[%s2825_s21 + $0x7a8] sm:$0xff] }
  0x78   : > { %1875 = vmatpush2.bf16.msra.mxu0 %v2682_v27  ;;  %1918 = vmatpush2.bf16.msra.mxu1 %v2684_v28  ;;  %v297_v27 = vld [vmem:[%s2825_s21 + $0x2a8] sm:$0xff] }
  0x79   : > { %1876 = vmatprep.subr.bf16.mxu0 %v2667_v29  ;;  %1919 = vmatprep.subr.bf16.mxu1 %v2669_v30  ;;  %v305_v28 = vld [vmem:[%s2825_s21 + $0x2e8] sm:$0xff]  ;;  %v2558_v29 = vcombine.low %v312_v17, %v320_v18  ;;  %v2560_v30 = vcombine.low %v313_v19, %v321_v20  ;;  %v440_v18 = vld [vmem:[%s2825_s21 + $0x720] sm:$0xff] }
  0x7a   : > { %v2545_v32 = vcombine.high %v297_v27, %v305_v28  ;;  %v448_v19 = vld [vmem:[%s2825_s21 + $0x760] sm:$0xff]  ;;  %v441_v20 = vld [vmem:[%s2825_s21 + $0x728] sm:$0xff] }
  0x7c   : > { %1877 = vmatpush2.bf16.msra.mxu0 %v2666_v35  ;;  %1920 = vmatpush2.bf16.msra.mxu1 %v2668_v36  ;;  %v281_v35 = vld [vmem:[%s2825_s21 + $0x228] sm:$0xff] }
  0x7d   : > { %1878 = vmatprep.subr.bf16.mxu0 %v2651_v37  ;;  %1921 = vmatprep.subr.bf16.mxu1 %v2653_v38  ;;  %v289_v36 = vld [vmem:[%s2825_s21 + $0x268] sm:$0xff]  ;;  %v2542_v37 = vcombine.low %v296_v25, %v304_v26  ;;  %v2544_v38 = vcombine.low %v297_v27, %v305_v28  ;;  %v424_v26 = vld [vmem:[%s2825_s21 + $0x6a0] sm:$0xff] }
  0x7e   : > { %v2529_v40 = vcombine.high %v281_v35, %v289_v36  ;;  %v432_v27 = vld [vmem:[%s2825_s21 + $0x6e0] sm:$0xff]  ;;  %v425_v28 = vld [vmem:[%s2825_s21 + $0x6a8] sm:$0xff] }
  0x80   : > { %1879 = vmatpush2.bf16.msra.mxu0 %v2650_v43  ;;  %1922 = vmatpush2.bf16.msra.mxu1 %v2652_v44  ;;  %v265_v43 = vld [vmem:[%s2825_s21 + $0x1a8] sm:$0xff] }
  0x81   : > { %1880 = vmatprep.subr.bf16.mxu0 %v2635_v45  ;;  %1923 = vmatprep.subr.bf16.mxu1 %v2637_v46  ;;  %v273_v44 = vld [vmem:[%s2825_s21 + $0x1e8] sm:$0xff]  ;;  %v2526_v45 = vcombine.low %v280_v33, %v288_v34  ;;  %v2511_v46 = vcombine.high %v264_v41, %v272_v42  ;;  %v408_v34 = vld [vmem:[%s2825_s21 + $0x620] sm:$0xff] }
  0x82   : > { %v2513_v47 = vcombine.high %v265_v43, %v273_v44 }
  0x84   : > { %1881 = vmatpush2.bf16.msra.mxu0 %v2634_v51  ;;  %1924 = vmatpush2.bf16.msra.mxu1 %v2636_v52  ;;  %v257_v51 = vld [vmem:[%s2825_s21 + $0x168] sm:$0xff]  ;;  %v2510_v52 = vcombine.low %v264_v41, %v272_v42  ;;  %v392_v42 = vld [vmem:[%s2825_s21 + $0x5a0] sm:$0xff] }
  0x85   : > { %1882 = vmatprep.subr.bf16.mxu0 %v2619_v53  ;;  %1925 = vmatprep.subr.bf16.mxu1 %v2621_v54  ;;  %v2512_v53 = vcombine.low %v265_v43, %v273_v44  ;;  %v2495_v54 = vcombine.high %v248_v48, %v256_v49  ;;  %v2497_v55 = vcombine.high %v249_v50, %v257_v51  ;;  %v400_v43 = vld [vmem:[%s2825_s21 + $0x5e0] sm:$0xff]  ;;  %v393_v44 = vld [vmem:[%s2825_s21 + $0x5a8] sm:$0xff] }
  0x88   : > { %1883 = vmatpush2.bf16.msra.mxu0 %v2618_v59  ;;  %1926 = vmatpush2.bf16.msra.mxu1 %v2620_v60  ;;  %v241_v59 = vld [vmem:[%s2825_s21 + $0xe8] sm:$0xff]  ;;  %v2494_v60 = vcombine.low %v248_v48, %v256_v49  ;;  %v376_v49 = vld [vmem:[%s2825_s21 + $0x520] sm:$0xff] }
  0x89   : > { %1884 = vmatprep.subr.bf16.mxu0 %v2603_v61  ;;  %1927 = vmatprep.subr.bf16.mxu1 %v2605_v62  ;;  %v2496_v61 = vcombine.low %v249_v50, %v257_v51  ;;  %v2479_v62 = vcombine.high %v232_v56, %v240_v57  ;;  %v2481_v63 = vcombine.high %v233_v58, %v241_v59  ;;  %v384_v50 = vld [vmem:[%s2825_s21 + $0x560] sm:$0xff]  ;;  %v377_v51 = vld [vmem:[%s2825_s21 + $0x528] sm:$0xff] }
  0x8c   : > { %1885 = vmatpush2.bf16.msra.mxu0 %v2602_v4  ;;  %1928 = vmatpush2.bf16.msra.mxu1 %v2604_v5  ;;  %v225_v4 = vld [vmem:[%s2825_s21 + $0x68] sm:$0xff]  ;;  %v2478_v5 = vcombine.low %v232_v56, %v240_v57  ;;  %v360_v57 = vld [vmem:[%s2825_s21 + $0x4a0] sm:$0xff] }
  0x8d   : > { %1886 = vmatprep.subr.bf16.mxu0 %v2587_v6  ;;  %1929 = vmatprep.subr.bf16.mxu1 %v2589_v7  ;;  %v2480_v6 = vcombine.low %v233_v58, %v241_v59  ;;  %v2463_v7 = vcombine.high %v216_v1, %v224_v2  ;;  %v2465_v8 = vcombine.high %v217_v3, %v225_v4  ;;  %v368_v58 = vld [vmem:[%s2825_s21 + $0x4e0] sm:$0xff]  ;;  %v361_v59 = vld [vmem:[%s2825_s21 + $0x4a8] sm:$0xff] }
  0x90   : > { %1887 = vmatpush2.bf16.msra.mxu0 %v2586_v12  ;;  %1930 = vmatpush2.bf16.msra.mxu1 %v2588_v13  ;;  %v465_v12 = vld [vmem:[%s2825_s21 + $0x7e8] sm:$0xff]  ;;  %v2462_v13 = vcombine.low %v216_v1, %v224_v2  ;;  %v344_v2 = vld [vmem:[%s2825_s21 + $0x420] sm:$0xff] }
  0x91   : > { %1942 = vmatprep.subr.bf16.mxu0 %v2575_v15  ;;  %1985 = vmatprep.subr.bf16.mxu1 %v2577_v16  ;;  %v2464_v15 = vcombine.low %v217_v3, %v225_v4  ;;  %v2703_v16 = vcombine.high %v456_v9, %v464_v10  ;;  %v2705_v17 = vcombine.high %v457_v11, %v465_v12  ;;  %v352_v3 = vld [vmem:[%s2825_s21 + $0x460] sm:$0xff]  ;;  %v345_v4 = vld [vmem:[%s2825_s21 + $0x428] sm:$0xff] }
  0x93   : > { %1889 = vmatmul.mubr.bf16.vlgmr.msra.gmra.mxu0 %v2906_v14  ;;  %1932 = vmatmul.mubr.bf16.vlgmr.msra.gmra.mxu1 %v2906_v14 }
  0x94   : > { %1943 = vmatpush1.bf16.msra.mxu0 %v2574_v21  ;;  %1986 = vmatpush1.bf16.msra.mxu1 %v2576_v22  ;;  %v449_v21 = vld [vmem:[%s2825_s21 + $0x768] sm:$0xff]  ;;  %v2702_v22 = vcombine.low %v456_v9, %v464_v10  ;;  %v330_v10 = vld [vmem:[%s2825_s21 + $0x3b0] sm:$0xff] }
  0x95   : > { %1944 = vmatprep.subr.bf16.mxu0 %v2559_v23  ;;  %1987 = vmatprep.subr.bf16.mxu1 %v2561_v24  ;;  %v2704_v23 = vcombine.low %v457_v11, %v465_v12  ;;  %v2687_v24 = vcombine.high %v440_v18, %v448_v19  ;;  %v2689_v25 = vcombine.high %v441_v20, %v449_v21  ;;  %v338_v11 = vld [vmem:[%s2825_s21 + $0x3f0] sm:$0xff]  ;;  %v331_v12 = vld [vmem:[%s2825_s21 + $0x3b8] sm:$0xff] }
  0x96   : > { %1974 = vmatprep.mubr.bf16.mxu0 %v2815_v0  ;;  %2017 = vmatprep.mubr.bf16.mxu1 %v2815_v0  ;;  %v2528_v0 = vcombine.low %v281_v35, %v289_v36  ;;  %v416_v35 = vld [vmem:[%s2825_s21 + $0x660] sm:$0xff]  ;;  %v409_v36 = vld [vmem:[%s2825_s21 + $0x628] sm:$0xff] }
  0x98   : > { %1945 = vmatpush1.bf16.msra.mxu0 %v2558_v29  ;;  %1988 = vmatpush1.bf16.msra.mxu1 %v2560_v30  ;;  %v433_v29 = vld [vmem:[%s2825_s21 + $0x6e8] sm:$0xff]  ;;  %v2686_v30 = vcombine.low %v440_v18, %v448_v19  ;;  %v314_v19 = vld [vmem:[%s2825_s21 + $0x330] sm:$0xff] }
  0x99   : > { %1946 = vmatprep.subr.bf16.mxu0 %v2543_v31  ;;  %1989 = vmatprep.subr.bf16.mxu1 %v2545_v32  ;;  %v2688_v31 = vcombine.low %v441_v20, %v449_v21  ;;  %v2671_v32 = vcombine.high %v424_v26, %v432_v27  ;;  %v2673_v33 = vcombine.high %v425_v28, %v433_v29  ;;  %v322_v20 = vld [vmem:[%s2825_s21 + $0x370] sm:$0xff]  ;;  %v315_v21 = vld [vmem:[%s2825_s21 + $0x338] sm:$0xff] }
  0x9c   : > { %1947 = vmatpush1.bf16.msra.mxu0 %v2542_v37  ;;  %1990 = vmatpush1.bf16.msra.mxu1 %v2544_v38  ;;  %v417_v37 = vld [vmem:[%s2825_s21 + $0x668] sm:$0xff]  ;;  %v2670_v38 = vcombine.low %v424_v26, %v432_v27  ;;  %v298_v27 = vld [vmem:[%s2825_s21 + $0x2b0] sm:$0xff] }
  0x9d   : > { %1948 = vmatprep.subr.bf16.mxu0 %v2527_v39  ;;  %1991 = vmatprep.subr.bf16.mxu1 %v2529_v40  ;;  %v2672_v39 = vcombine.low %v425_v28, %v433_v29  ;;  %v2655_v40 = vcombine.high %v408_v34, %v416_v35  ;;  %v2657_v41 = vcombine.high %v409_v36, %v417_v37  ;;  %v306_v28 = vld [vmem:[%s2825_s21 + $0x2f0] sm:$0xff]  ;;  %v299_v29 = vld [vmem:[%s2825_s21 + $0x2b8] sm:$0xff] }
  0xa0   : > { %1949 = vmatpush1.bf16.msra.mxu0 %v2526_v45  ;;  %1992 = vmatpush1.bf16.msra.mxu1 %v2528_v0  ;;  %v401_v45 = vld [vmem:[%s2825_s21 + $0x5e8] sm:$0xff]  ;;  %v2654_v0 = vcombine.low %v408_v34, %v416_v35  ;;  %v282_v35 = vld [vmem:[%s2825_s21 + $0x230] sm:$0xff] }
  0xa1   : > { %1950 = vmatprep.subr.bf16.mxu0 %v2511_v46  ;;  %1993 = vmatprep.subr.bf16.mxu1 %v2513_v47  ;;  %v2656_v46 = vcombine.low %v409_v36, %v417_v37  ;;  %v2639_v47 = vcombine.high %v392_v42, %v400_v43  ;;  %v2641_v48 = vcombine.high %v393_v44, %v401_v45  ;;  %v290_v36 = vld [vmem:[%s2825_s21 + $0x270] sm:$0xff]  ;;  %v2747_v37 = vld [vmem:[%s3620_s1 + $0x4] ss:$8 sps:$4 sm:$0xff]  }
  0xa4   : > { %1951 = vmatpush1.bf16.msra.mxu0 %v2510_v52  ;;  %1994 = vmatpush1.bf16.msra.mxu1 %v2512_v53  ;;  %v385_v52 = vld [vmem:[%s2825_s21 + $0x568] sm:$0xff]  ;;  %v2638_v53 = vcombine.low %v392_v42, %v400_v43  ;;  %v266_v43 = vld [vmem:[%s2825_s21 + $0x1b0] sm:$0xff] }
  0xa5   : > { %1952 = vmatprep.subr.bf16.mxu0 %v2495_v54  ;;  %1995 = vmatprep.subr.bf16.mxu1 %v2497_v55  ;;  %v2640_v54 = vcombine.low %v393_v44, %v401_v45  ;;  %v2623_v55 = vcombine.high %v376_v49, %v384_v50  ;;  %v2625_v56 = vcombine.high %v377_v51, %v385_v52  ;;  %v274_v44 = vld [vmem:[%s2825_s21 + $0x1f0] sm:$0xff]  ;;  %v267_v45 = vld [vmem:[%s2825_s21 + $0x1b8] sm:$0xff] }
  0xa8   : > { %1953 = vmatpush1.bf16.msra.mxu0 %v2494_v60  ;;  %1996 = vmatpush1.bf16.msra.mxu1 %v2496_v61  ;;  %v369_v60 = vld [vmem:[%s2825_s21 + $0x4e8] sm:$0xff]  ;;  %v2622_v61 = vcombine.low %v376_v49, %v384_v50  ;;  %v250_v50 = vld [vmem:[%s2825_s21 + $0x130] sm:$0xff] }
  0xa9   : > { %1954 = vmatprep.subr.bf16.mxu0 %v2479_v62  ;;  %1997 = vmatprep.subr.bf16.mxu1 %v2481_v63  ;;  %v2624_v62 = vcombine.low %v377_v51, %v385_v52  ;;  %v2607_v63 = vcombine.high %v360_v57, %v368_v58  ;;  %v2609_v1 = vcombine.high %v361_v59, %v369_v60  ;;  %v258_v51 = vld [vmem:[%s2825_s21 + $0x170] sm:$0xff]  ;;  %v251_v52 = vld [vmem:[%s2825_s21 + $0x138] sm:$0xff] }
  0xac   : > { %1955 = vmatpush1.bf16.msra.mxu0 %v2478_v5  ;;  %1998 = vmatpush1.bf16.msra.mxu1 %v2480_v6  ;;  %v353_v5 = vld [vmem:[%s2825_s21 + $0x468] sm:$0xff]  ;;  %v2606_v6 = vcombine.low %v360_v57, %v368_v58  ;;  %v234_v58 = vld [vmem:[%s2825_s21 + $0xb0] sm:$0xff] }
  0xad   : > { %1956 = vmatprep.subr.bf16.mxu0 %v2463_v7  ;;  %1999 = vmatprep.subr.bf16.mxu1 %v2465_v8  ;;  %v2608_v7 = vcombine.low %v361_v59, %v369_v60  ;;  %v2591_v8 = vcombine.high %v344_v2, %v352_v3  ;;  %v2593_v9 = vcombine.high %v345_v4, %v353_v5  ;;  %v242_v59 = vld [vmem:[%s2825_s21 + $0xf0] sm:$0xff]  ;;  %v235_v60 = vld [vmem:[%s2825_s21 + $0xb8] sm:$0xff] }
  0xb0   : > { %1957 = vmatpush1.bf16.msra.mxu0 %v2462_v13  ;;  %2000 = vmatpush1.bf16.msra.mxu1 %v2464_v15  ;;  %v339_v13 = vld [vmem:[%s2825_s21 + $0x3f8] sm:$0xff]  ;;  %v2590_v15 = vcombine.low %v344_v2, %v352_v3  ;;  %v218_v3 = vld [vmem:[%s2825_s21 + $0x30] sm:$0xff] }
  0xb1   : > { %1958 = vmatprep.subr.bf16.mxu0 %v2703_v16  ;;  %2001 = vmatprep.subr.bf16.mxu1 %v2705_v17  ;;  %v2592_v16 = vcombine.low %v345_v4, %v353_v5  ;;  %v2579_v17 = vcombine.high %v330_v10, %v338_v11  ;;  %v2581_v18 = vcombine.high %v331_v12, %v339_v13  ;;  %v226_v4 = vld [vmem:[%s2825_s21 + $0x70] sm:$0xff]  ;;  %v219_v5 = vld [vmem:[%s2825_s21 + $0x38] sm:$0xff] }
  0xb4   : > { %1959 = vmatpush2.bf16.msra.mxu0 %v2702_v22  ;;  %2002 = vmatpush2.bf16.msra.mxu1 %v2704_v23  ;;  %v323_v22 = vld [vmem:[%s2825_s21 + $0x378] sm:$0xff]  ;;  %v2578_v23 = vcombine.low %v330_v10, %v338_v11  ;;  %v458_v11 = vld [vmem:[%s2825_s21 + $0x7b0] sm:$0xff] }
  0xb5   : > { %1960 = vmatprep.subr.bf16.mxu0 %v2687_v24  ;;  %2003 = vmatprep.subr.bf16.mxu1 %v2689_v25  ;;  %v2580_v24 = vcombine.low %v331_v12, %v339_v13  ;;  %v2563_v25 = vcombine.high %v314_v19, %v322_v20  ;;  %v2565_v26 = vcombine.high %v315_v21, %v323_v22  ;;  %v466_v12 = vld [vmem:[%s2825_s21 + $0x7f0] sm:$0xff]  ;;  %v459_v13 = vld [vmem:[%s2825_s21 + $0x7b8] sm:$0xff] }
  0xb8   : > { %1961 = vmatpush2.bf16.msra.mxu0 %v2686_v30  ;;  %2004 = vmatpush2.bf16.msra.mxu1 %v2688_v31  ;;  %v307_v30 = vld [vmem:[%s2825_s21 + $0x2f8] sm:$0xff]  ;;  %v2562_v31 = vcombine.low %v314_v19, %v322_v20  ;;  %v442_v20 = vld [vmem:[%s2825_s21 + $0x730] sm:$0xff] }
  0xb9   : > { %1962 = vmatprep.subr.bf16.mxu0 %v2671_v32  ;;  %2005 = vmatprep.subr.bf16.mxu1 %v2673_v33  ;;  %v2564_v32 = vcombine.low %v315_v21, %v323_v22  ;;  %v2547_v33 = vcombine.high %v298_v27, %v306_v28  ;;  %v2549_v34 = vcombine.high %v299_v29, %v307_v30  ;;  %v450_v21 = vld [vmem:[%s2825_s21 + $0x770] sm:$0xff]  ;;  %v443_v22 = vld [vmem:[%s2825_s21 + $0x738] sm:$0xff] }
  0xbc   : > { %1963 = vmatpush2.bf16.msra.mxu0 %v2670_v38  ;;  %2006 = vmatpush2.bf16.msra.mxu1 %v2672_v39  ;;  %v291_v38 = vld [vmem:[%s2825_s21 + $0x278] sm:$0xff]  ;;  %v2546_v39 = vcombine.low %v298_v27, %v306_v28  ;;  %v426_v28 = vld [vmem:[%s2825_s21 + $0x6b0] sm:$0xff] }
  0xbd   : > { %1964 = vmatprep.subr.bf16.mxu0 %v2655_v40  ;;  %2007 = vmatprep.subr.bf16.mxu1 %v2657_v41  ;;  %v2548_v40 = vcombine.low %v299_v29, %v307_v30  ;;  %v2531_v41 = vcombine.high %v282_v35, %v290_v36  ;;  %v434_v29 = vld [vmem:[%s2825_s21 + $0x6f0] sm:$0xff]  ;;  %v427_v30 = vld [vmem:[%s2825_s21 + $0x6b8] sm:$0xff] }
  0xc0   : > { %1965 = vmatpush2.bf16.msra.mxu0 %v2654_v0  ;;  %2008 = vmatpush2.bf16.msra.mxu1 %v2656_v46  ;;  %v275_v0 = vld [vmem:[%s2825_s21 + $0x1f8] sm:$0xff]  ;;  %v2530_v46 = vcombine.low %v282_v35, %v290_v36  ;;  %v410_v36 = vld [vmem:[%s2825_s21 + $0x630] sm:$0xff] }
  0xc1   : > { %1966 = vmatprep.subr.bf16.mxu0 %v2639_v47  ;;  %2009 = vmatprep.subr.bf16.mxu1 %v2641_v48  ;;  %v2515_v48 = vcombine.high %v266_v43, %v274_v44  ;;  %v2517_v49 = vcombine.high %v267_v45, %v275_v0 }
  0xc4   : > { %1967 = vmatpush2.bf16.msra.mxu0 %v2638_v53  ;;  %2010 = vmatpush2.bf16.msra.mxu1 %v2640_v54  ;;  %v259_v53 = vld [vmem:[%s2825_s21 + $0x178] sm:$0xff]  ;;  %v2514_v54 = vcombine.low %v266_v43, %v274_v44  ;;  %v394_v43 = vld [vmem:[%s2825_s21 + $0x5b0] sm:$0xff] }
  0xc5   : > { %1968 = vmatprep.subr.bf16.mxu0 %v2623_v55  ;;  %2011 = vmatprep.subr.bf16.mxu1 %v2625_v56  ;;  %v2516_v55 = vcombine.low %v267_v45, %v275_v0  ;;  %v2499_v56 = vcombine.high %v250_v50, %v258_v51  ;;  %v2501_v57 = vcombine.high %v251_v52, %v259_v53  ;;  %v402_v44 = vld [vmem:[%s2825_s21 + $0x5f0] sm:$0xff]  ;;  %v395_v45 = vld [vmem:[%s2825_s21 + $0x5b8] sm:$0xff] }
  0xc6   : > { %v403_v0 = vld [vmem:[%s2825_s21 + $0x5f8] sm:$0xff] }
  0xc8   : > { %1969 = vmatpush2.bf16.msra.mxu0 %v2622_v61  ;;  %2012 = vmatpush2.bf16.msra.mxu1 %v2624_v62  ;;  %v243_v61 = vld [vmem:[%s2825_s21 + $0xf8] sm:$0xff]  ;;  %v2498_v62 = vcombine.low %v250_v50, %v258_v51  ;;  %v378_v50 = vld [vmem:[%s2825_s21 + $0x530] sm:$0xff] }
  0xc9   : > { %1970 = vmatprep.subr.bf16.mxu0 %v2607_v63  ;;  %2013 = vmatprep.subr.bf16.mxu1 %v2609_v1  ;;  %v2500_v63 = vcombine.low %v251_v52, %v259_v53  ;;  %v2483_v1 = vcombine.high %v234_v58, %v242_v59  ;;  %v2485_v2 = vcombine.high %v235_v60, %v243_v61  ;;  %v386_v51 = vld [vmem:[%s2825_s21 + $0x570] sm:$0xff]  ;;  %v379_v52 = vld [vmem:[%s2825_s21 + $0x538] sm:$0xff] }
  0xca   : > { %v387_v53 = vld [vmem:[%s2825_s21 + $0x578] sm:$0xff] }
  0xcc   : > { %1971 = vmatpush2.bf16.msra.mxu0 %v2606_v6  ;;  %2014 = vmatpush2.bf16.msra.mxu1 %v2608_v7  ;;  %v227_v6 = vld [vmem:[%s2825_s21 + $0x78] sm:$0xff]  ;;  %v2482_v7 = vcombine.low %v234_v58, %v242_v59  ;;  %v362_v58 = vld [vmem:[%s2825_s21 + $0x4b0] sm:$0xff] }
  0xcd   : > { %1972 = vmatprep.subr.bf16.mxu0 %v2591_v8  ;;  %2015 = vmatprep.subr.bf16.mxu1 %v2593_v9  ;;  %v2484_v8 = vcombine.low %v235_v60, %v243_v61  ;;  %v2467_v9 = vcombine.high %v218_v3, %v226_v4  ;;  %v2469_v10 = vcombine.high %v219_v5, %v227_v6  ;;  %v370_v59 = vld [vmem:[%s2825_s21 + $0x4f0] sm:$0xff]  ;;  %v363_v60 = vld [vmem:[%s2825_s21 + $0x4b8] sm:$0xff] }
  0xce   : > { %v371_v61 = vld [vmem:[%s2825_s21 + $0x4f8] sm:$0xff] }
  0xd0   : > { %1973 = vmatpush2.bf16.msra.mxu0 %v2590_v15  ;;  %2016 = vmatpush2.bf16.msra.mxu1 %v2592_v16  ;;  %v467_v15 = vld [vmem:[%s2825_s21 + $0x7f8] sm:$0xff]  ;;  %v2466_v16 = vcombine.low %v218_v3, %v226_v4  ;;  %v346_v3 = vld [vmem:[%s2825_s21 + $0x430] sm:$0xff] }
  0xd1   : > { %2028 = vmatprep.subr.bf16.mxu0 %v2579_v17  ;;  %2071 = vmatprep.subr.bf16.mxu1 %v2581_v18  ;;  %v2468_v17 = vcombine.low %v219_v5, %v227_v6  ;;  %v2707_v18 = vcombine.high %v458_v11, %v466_v12  ;;  %v2709_v19 = vcombine.high %v459_v13, %v467_v15  ;;  %v354_v4 = vld [vmem:[%s2825_s21 + $0x470] sm:$0xff]  ;;  %v347_v5 = vld [vmem:[%s2825_s21 + $0x438] sm:$0xff] }
  0xd2   : > { %v355_v6 = vld [vmem:[%s2825_s21 + $0x478] sm:$0xff] }
  0xd3   : > { %1975 = vmatmul.mubr.bf16.vlgmr.msra.gmra.mxu0 %v2906_v14  ;;  %2018 = vmatmul.mubr.bf16.vlgmr.msra.gmra.mxu1 %v2906_v14  ;;  %v283_v14 = vld [vmem:[%s2825_s21 + $0x238] sm:$0xff] }
  0xd4   : > { %2029 = vmatpush1.bf16.msra.mxu0 %v2578_v23  ;;  %2072 = vmatpush1.bf16.msra.mxu1 %v2580_v24  ;;  %v2533_v42 = vcombine.high %v283_v14, %v291_v38  ;;  %v2532_v47 = vcombine.low %v283_v14, %v291_v38  ;;  %v451_v23 = vld [vmem:[%s2825_s21 + $0x778] sm:$0xff]  ;;  %v2706_v24 = vcombine.low %v458_v11, %v466_v12 }
  0xd5   : > { %2030 = vmatprep.subr.bf16.mxu0 %v2563_v25  ;;  %2073 = vmatprep.subr.bf16.mxu1 %v2565_v26  ;;  %v2708_v25 = vcombine.low %v459_v13, %v467_v15  ;;  %v2691_v26 = vcombine.high %v442_v20, %v450_v21  ;;  %v2693_v27 = vcombine.high %v443_v22, %v451_v23  ;;  %v411_v14 = vld [vmem:[%s2825_s21 + $0x638] sm:$0xff]  ;;  %v2748_v13 = vld [vmem:[%s3620_s1] ss:$8 sps:$4 sm:$0xff]  }
  0xd6   : > { %2060 = vmatprep.mubr.bf16.mxu0 %v2747_v37  ;;  %2103 = vmatprep.mubr.bf16.mxu1 %v2747_v37  ;;  %v418_v37 = vld [vmem:[%s2825_s21 + $0x670] sm:$0xff]  ;;  %v419_v38 = vld [vmem:[%s2825_s21 + $0x678] sm:$0xff]  ;;  %v2594_v11 = vcombine.low %v346_v3, %v354_v4  ;;  %v2596_v12 = vcombine.low %v347_v5, %v355_v6 }
  0xd8   : > { %2031 = vmatpush1.bf16.msra.mxu0 %v2562_v31  ;;  %2074 = vmatpush1.bf16.msra.mxu1 %v2564_v32  ;;  %v435_v31 = vld [vmem:[%s2825_s21 + $0x6f8] sm:$0xff]  ;;  %v2690_v32 = vcombine.low %v442_v20, %v450_v21 }
  0xd9   : > { %2032 = vmatprep.subr.bf16.mxu0 %v2547_v33  ;;  %2075 = vmatprep.subr.bf16.mxu1 %v2549_v34  ;;  %v2692_v33 = vcombine.low %v443_v22, %v451_v23  ;;  %v2675_v34 = vcombine.high %v426_v28, %v434_v29  ;;  %v2677_v35 = vcombine.high %v427_v30, %v435_v31 }
  0xdc   : > { %2033 = vmatpush1.bf16.msra.mxu0 %v2546_v39  ;;  %2076 = vmatpush1.bf16.msra.mxu1 %v2548_v40  ;;  %v2674_v39 = vcombine.low %v426_v28, %v434_v29  ;;  %v2676_v40 = vcombine.low %v427_v30, %v435_v31 }
  0xdd   : > { %2034 = vmatprep.subr.bf16.mxu0 %v2531_v41  ;;  %2077 = vmatprep.subr.bf16.mxu1 %v2533_v42  ;;  %v2659_v41 = vcombine.high %v410_v36, %v418_v37  ;;  %v2661_v42 = vcombine.high %v411_v14, %v419_v38 }
  0xe0   : > { %2035 = vmatpush1.bf16.msra.mxu0 %v2530_v46  ;;  %2078 = vmatpush1.bf16.msra.mxu1 %v2532_v47  ;;  %v2658_v46 = vcombine.low %v410_v36, %v418_v37  ;;  %v2660_v47 = vcombine.low %v411_v14, %v419_v38 }
  0xe1   : > { %2036 = vmatprep.subr.bf16.mxu0 %v2515_v48  ;;  %2079 = vmatprep.subr.bf16.mxu1 %v2517_v49  ;;  %v2643_v48 = vcombine.high %v394_v43, %v402_v44  ;;  %v2645_v49 = vcombine.high %v395_v45, %v403_v0 }
  0xe4   : > { %2037 = vmatpush1.bf16.msra.mxu0 %v2514_v54  ;;  %2080 = vmatpush1.bf16.msra.mxu1 %v2516_v55  ;;  %v2642_v54 = vcombine.low %v394_v43, %v402_v44  ;;  %v2644_v55 = vcombine.low %v395_v45, %v403_v0 }
  0xe5   : > { %2038 = vmatprep.subr.bf16.mxu0 %v2499_v56  ;;  %2081 = vmatprep.subr.bf16.mxu1 %v2501_v57  ;;  %v2627_v56 = vcombine.high %v378_v50, %v386_v51  ;;  %v2629_v57 = vcombine.high %v379_v52, %v387_v53 }
  0xe8   : > { %2039 = vmatpush1.bf16.msra.mxu0 %v2498_v62  ;;  %2082 = vmatpush1.bf16.msra.mxu1 %v2500_v63  ;;  %v2626_v62 = vcombine.low %v378_v50, %v386_v51  ;;  %v2628_v63 = vcombine.low %v379_v52, %v387_v53 }
  0xe9   : > { %2040 = vmatprep.subr.bf16.mxu0 %v2483_v1  ;;  %2083 = vmatprep.subr.bf16.mxu1 %v2485_v2  ;;  %v2611_v1 = vcombine.high %v362_v58, %v370_v59  ;;  %v2613_v2 = vcombine.high %v363_v60, %v371_v61 }
  0xec   : > { %2041 = vmatpush1.bf16.msra.mxu0 %v2482_v7  ;;  %2084 = vmatpush1.bf16.msra.mxu1 %v2484_v8  ;;  %v2610_v7 = vcombine.low %v362_v58, %v370_v59  ;;  %v2612_v8 = vcombine.low %v363_v60, %v371_v61 }
  0xed   : > { %2042 = vmatprep.subr.bf16.mxu0 %v2467_v9  ;;  %2085 = vmatprep.subr.bf16.mxu1 %v2469_v10  ;;  %v2595_v9 = vcombine.high %v346_v3, %v354_v4  ;;  %v2597_v10 = vcombine.high %v347_v5, %v355_v6 }
  0xf0   : > { %2043 = vmatpush1.bf16.msra.mxu0 %v2466_v16  ;;  %2086 = vmatpush1.bf16.msra.mxu1 %v2468_v17  ;;  %v3110_v17 = vpop.permute.xlu0 %472 }
  0xf1   : > { %2044 = vmatprep.subr.bf16.mxu0 %v2707_v18  ;;  %2087 = vmatprep.subr.bf16.mxu1 %v2709_v19 }
  0xf4   : > { %2045 = vmatpush2.bf16.msra.mxu0 %v2706_v24  ;;  %2088 = vmatpush2.bf16.msra.mxu1 %v2708_v25  ;;  %v3118_v23 = vpop.permute.xlu0 %477 }
  0xf5   : > { %2046 = vmatprep.subr.bf16.mxu0 %v2691_v26  ;;  %2089 = vmatprep.subr.bf16.mxu1 %v2693_v27 }
  0xf8   : > { %2047 = vmatpush2.bf16.msra.mxu0 %v2690_v32  ;;  %2090 = vmatpush2.bf16.msra.mxu1 %v2692_v33 }
  0xf9   : > { %2048 = vmatprep.subr.bf16.mxu0 %v2675_v34  ;;  %2091 = vmatprep.subr.bf16.mxu1 %v2677_v35 }
  0xfc   : > { %2049 = vmatpush2.bf16.msra.mxu0 %v2674_v39  ;;  %2092 = vmatpush2.bf16.msra.mxu1 %v2676_v40 }
  0xfd   : > { %2050 = vmatprep.subr.bf16.mxu0 %v2659_v41  ;;  %2093 = vmatprep.subr.bf16.mxu1 %v2661_v42 }
 0x100   : > { %2051 = vmatpush2.bf16.msra.mxu0 %v2658_v46  ;;  %2094 = vmatpush2.bf16.msra.mxu1 %v2660_v47 }
 0x101   : > { %2052 = vmatprep.subr.bf16.mxu0 %v2643_v48  ;;  %2095 = vmatprep.subr.bf16.mxu1 %v2645_v49 }
 0x104   : > { %2053 = vmatpush2.bf16.msra.mxu0 %v2642_v54  ;;  %2096 = vmatpush2.bf16.msra.mxu1 %v2644_v55 }
 0x105   : > { %2054 = vmatprep.subr.bf16.mxu0 %v2627_v56  ;;  %2097 = vmatprep.subr.bf16.mxu1 %v2629_v57 }
 0x108   : > { %2055 = vmatpush2.bf16.msra.mxu0 %v2626_v62  ;;  %2098 = vmatpush2.bf16.msra.mxu1 %v2628_v63 }
 0x109   : > { %2056 = vmatprep.subr.bf16.mxu0 %v2611_v1  ;;  %2099 = vmatprep.subr.bf16.mxu1 %v2613_v2 }
 0x10c   : > { %2057 = vmatpush2.bf16.msra.mxu0 %v2610_v7  ;;  %2100 = vmatpush2.bf16.msra.mxu1 %v2612_v8 }
 0x10d   : > { %2058 = vmatprep.subr.bf16.mxu0 %v2595_v9  ;;  %2101 = vmatprep.subr.bf16.mxu1 %v2597_v10 }
 0x110   : > { %2059 = vmatpush2.bf16.msra.mxu0 %v2594_v11  ;;  %2102 = vmatpush2.bf16.msra.mxu1 %v2596_v12 }
 0x113   : > { %2061 = vmatmul.mubr.bf16.vlgmr.msra.gmra.mxu0 %v2748_v13  ;;  %2104 = vmatmul.mubr.bf16.vlgmr.msra.gmra.mxu1 %v2748_v13  ;;  %v1804_v15 = vpop.f32.mrf.mxu0  ;;  %v1847_v19 = vpop.f32.mrf.mxu1 }
 0x114   : > { %v3113_v20 = vadd.f32 %v1804_v15, %v3110_v17  ;;  %v3125_v28 = vadd.f32 %v1847_v19, %v3110_v17 }
 0x115   : > { %v1806_v16 = vpop.f32.mrf.mxu0  ;;  %v1849_v24 = vpop.f32.mrf.mxu1 }
 0x116   : > { %v3116_v21 = vadd.f32 %v1806_v16, %v3110_v17  ;;  %v2114_v27 = vmax.f32 %v3113_v20, 0.0  ;;  %v2116_v34 = vmax.f32 %v3125_v28, 0.0  ;;  %v3142_v14 = vadd.f32 %v1849_v24, %v3110_v17 }
 0x117   : > { %v1808_v18 = vpop.f32.mrf.mxu0  ;;  %v1851_v31 = vpop.f32.mrf.mxu1 }
 0x118   : > { %v2115_v29 = vmax.f32 %v3116_v21, 0.0  ;;  %v3129_v30 = vadd.f32 %v1808_v18, %v3118_v23  ;;  %v3139_v37 = vadd.f32 %v1851_v31, %v3118_v23  ;;  %v2117_v46 = vmax.f32 %v3142_v14, 0.0 }
 0x119   : > { %v1810_v22 = vpop.f32.mrf.mxu0  ;;  %v1853_v38 = vpop.f32.mrf.mxu1 }
 0x11a   : > { %v3121_v26 = vadd.f32 %v1810_v22, %v3118_v23  ;;  %v2146_v35 = vadd.f32 %v2115_v29, %v2114_v27  ;;  %v2130_v36 = vmax.f32 %v3129_v30, 0.0  ;;  %v2132_v44 = vmax.f32 %v3139_v37, 0.0 }
 0x11b   : > { %v3155_v45 = vadd.f32 %v1853_v38, %v3118_v23 }
 0x11c   : > { %v2131_v33 = vmax.f32 %v3121_v26, 0.0  ;;  %v2147_v42 = vadd.f32 %v2146_v35, %v2116_v34 }
 0x11d   : > { %v2133_v54 = vmax.f32 %v3155_v45, 0.0 }
 0x11e   : > { %v2165_v41 = vadd.f32 %v2131_v33, %v2130_v36  ;;  %v2148_v51 = vadd.f32 %v2147_v42, %v2117_v46 }
 0x120   : > { %v2166_v50 = vadd.f32 %v2165_v41, %v2132_v44 }
 0x122   : > { %v2167_v60 = vadd.f32 %v2166_v50, %v2133_v54 }
 0x153   : > { %v1890_v25 = vpop.f32.mrf.mxu0  ;;  %v1933_v43 = vpop.f32.mrf.mxu1 }
 0x154   : > { %v3145_v39 = vadd.f32 %v1890_v25, %v3110_v17  ;;  %v3177_v58 = vadd.f32 %v1933_v43, %v3110_v17 }
 0x155   : > { %v1892_v32 = vpop.f32.mrf.mxu0  ;;  %v1935_v52 = vpop.f32.mrf.mxu1 }
 0x156   : > { %v2118_v47 = vmax.f32 %v3145_v39, 0.0  ;;  %v3163_v48 = vadd.f32 %v1892_v32, %v3110_v17  ;;  %v2120_v2 = vmax.f32 %v3177_v58, 0.0  ;;  %v3192_v5 = vadd.f32 %v1935_v52, %v3110_v17 }
 0x157   : > { %v1894_v40 = vpop.f32.mrf.mxu0  ;;  %v1937_v61 = vpop.f32.mrf.mxu1 }
 0x158   : > { %v3158_v0 = vadd.f32 %v1894_v40, %v3118_v23  ;;  %v2149_v57 = vadd.f32 %v2148_v51, %v2118_v47  ;;  %v2119_v59 = vmax.f32 %v3163_v48, 0.0  ;;  %v3189_v4 = vadd.f32 %v1937_v61, %v3118_v23 }
 0x159   : > { %v1896_v49 = vpop.f32.mrf.mxu0  ;;  %v1939_v6 = vpop.f32.mrf.mxu1  ;;  %v2121_v16 = vmax.f32 %v3192_v5, 0.0 }
 0x15a   : > { %v2134_v55 = vmax.f32 %v3158_v0, 0.0  ;;  %v3172_v56 = vadd.f32 %v1896_v49, %v3118_v23  ;;  %v2150_v3 = vadd.f32 %v2149_v57, %v2119_v59  ;;  %v2136_v12 = vmax.f32 %v3189_v4, 0.0 }
 0x15b   : > { %v3203_v13 = vadd.f32 %v1939_v6, %v3118_v23 }
 0x15c   : > { %v2168_v63 = vadd.f32 %v2167_v60, %v2134_v55  ;;  %v2135_v1 = vmax.f32 %v3172_v56, 0.0  ;;  %v2151_v10 = vadd.f32 %v2150_v3, %v2120_v2 }
 0x15d   : > { %v3628_v32 = vmax.f32 %v3203_v13, 0.0 }
 0x15e   : > { %v2169_v9 = vadd.f32 %v2168_v63, %v2135_v1  ;;  %v2152_v25 = vadd.f32 %v2151_v10, %v2121_v16 }
 0x160   : > { %v2170_v24 = vadd.f32 %v2169_v9, %v2136_v12 }
 0x162   : > { %v2171_v43 = vadd.f32 %v2170_v24, %v3628_v32 }
 0x193   : > { %v1976_v53 = vpop.f32.mrf.mxu0  ;;  %v2019_v11 = vpop.f32.mrf.mxu1 }
 0x194   : > { %v3195_v7 = vadd.f32 %v1976_v53, %v3110_v17  ;;  %v3225_v41 = vadd.f32 %v2019_v11, %v3110_v17 }
 0x195   : > { %v1978_v62 = vpop.f32.mrf.mxu0  ;;  %v2021_v31 = vpop.f32.mrf.mxu1 }
 0x196   : > { %v2122_v18 = vmax.f32 %v3195_v7, 0.0  ;;  %v3211_v19 = vadd.f32 %v1978_v62, %v3110_v17  ;;  %v2124_v52 = vmax.f32 %v3225_v41, 0.0  ;;  %v3240_v60 = vadd.f32 %v2021_v31, %v3110_v17 }
 0x197   : > { %v1980_v8 = vpop.f32.mrf.mxu0  ;;  %v2023_v49 = vpop.f32.mrf.mxu1 }
 0x198   : > { %v3206_v15 = vadd.f32 %v1980_v8, %v3118_v23  ;;  %v2153_v40 = vadd.f32 %v2152_v25, %v2122_v18  ;;  %v2123_v42 = vmax.f32 %v3211_v19, 0.0  ;;  %v3237_v57 = vadd.f32 %v2023_v49, %v3118_v23 }
 0x199   : > { %v1982_v22 = vpop.f32.mrf.mxu0  ;;  %v2025_v61 = vpop.f32.mrf.mxu1  ;;  %v3632_v9 = vmax.f32 %v3240_v60, 0.0 }
 0x19a   : > { %v3625_v35 = vmax.f32 %v3206_v15, 0.0  ;;  %v3220_v38 = vadd.f32 %v1982_v22, %v3118_v23  ;;  %v2154_v53 = vadd.f32 %v2153_v40, %v2123_v42  ;;  %v3623_v3 = vmax.f32 %v3237_v57, 0.0 }
 0x19b   : > { %v3248_v6 = vadd.f32 %v2025_v61, %v3118_v23 }
 0x19c   : > { %v2172_v50 = vadd.f32 %v2171_v43, %v3625_v35  ;;  %v3624_v51 = vmax.f32 %v3220_v38, 0.0  ;;  %v2155_v63 = vadd.f32 %v2154_v53, %v2124_v52 }
 0x19e   : > { %v2173_v62 = vadd.f32 %v2172_v50, %v3624_v51  ;;  %v2156_v31 = vadd.f32 %v2155_v63, %v3632_v9  ;;  %v3627_v50 = vmax.f32 %v3248_v6, 0.0 }
 0x1a0   : > { %v2174_v22 = vadd.f32 %v2173_v62, %v3623_v3 }
 0x1d3   : > { %v2062_v8 = vpop.f32.mrf.mxu0  ;;  %v2105_v11 = vpop.f32.mrf.mxu1 }
 0x1d4   : > { %v3252_v10 = vadd.f32 %v2062_v8, %v3110_v17  ;;  %v3257_v24 = vadd.f32 %v2105_v11, %v3110_v17 }
 0x1d5   : > { %v2064_v25 = vpop.f32.mrf.mxu0  ;;  %v2107_v49 = vpop.f32.mrf.mxu1 }
 0x1d6   : > { %v3626_v40 = vmax.f32 %v3252_v10, 0.0  ;;  %v3263_v43 = vadd.f32 %v2064_v25, %v3110_v17  ;;  %v3267_v53 = vadd.f32 %v2107_v49, %v3110_v17  ;;  %v2175_v25 = vadd.f32 %v2174_v22, %v3627_v50 }
 0x1d7   : > { %v2066_v61 = vpop.f32.mrf.mxu0  ;;  %v2109_v63 = vpop.f32.mrf.mxu1  ;;  %v3631_v3 = vmax.f32 %v3257_v24, 0.0 }
 0x1d8   : > { %v2157_v62 = vadd.f32 %v2156_v31, %v3626_v40  ;;  %v3629_v8 = vmax.f32 %v3263_v43, 0.0  ;;  %v3273_v11 = vadd.f32 %v2066_v61, %v3118_v23  ;;  %v3633_v51 = vmax.f32 %v3267_v53, 0.0 }
 0x1d9   : > { %v2068_v35 = vpop.f32.mrf.mxu0  ;;  %v3283_v49 = vadd.f32 %v2109_v63, %v3118_v23  ;;  %v2111_v40 = vpop.f32.mrf.mxu1 }
 0x1da   : > { %v2158_v17 = vadd.f32 %v2157_v62, %v3629_v8  ;;  %v3630_v31 = vmax.f32 %v3273_v11, 0.0  ;;  %v3286_v61 = vadd.f32 %v2068_v35, %v3118_v23  ;;  %v3289_v22 = vadd.f32 %v2111_v40, %v3118_v23 }
 0x1db   : > { %v2161_v63 = vsel %vm2160_vm0, %v3633_v51, 0.0  ;;  %v2144_v35 = vmax.f32 %v3283_v49, 0.0 }
 0x1dc   : > { %v2176_v50 = vadd.f32 %v2175_v25, %v3630_v31  ;;  %v2143_v32 = vmax.f32 %v3286_v61, 0.0  ;;  %v2159_v62 = vadd.f32 %v2158_v17, %v3631_v3  ;;  %v2145_v8 = vmax.f32 %v3289_v22, 0.0 }
 0x1de   : > { %v2177_v23 = vadd.f32 %v2176_v50, %v2143_v32  ;;  %v2162_v40 = vadd.f32 %v2161_v63, %v2159_v62  ;;  %v2179_v17 = vsel %vm2160_vm0, %v2145_v8, 0.0 }
 0x1e0   : > { %2163 = vadd.xlane.f32.xlu1 %v2162_v40  ;;  %v2178_v25 = vadd.f32 %v2177_v23, %v2144_v35 }
 0x1e2   : > { %v2180_v31 = vadd.f32 %v2179_v17, %v2178_v25 }
 0x1e4   : > { %2181 = vadd.xlane.f32.xlu1 %v2180_v31 }
 0x269   : > { %v2164_v3 = vpop.xlane.xlu1 %2163 }
 0x26a   : > { %v3308_v9 = vmul.f32 0.0005165289, %v2164_v3 }
 0x26c   : > { %v3313_v51 = vsub.f32 %v2114_v27, %v3308_v9  ;;  %v3318_v50 = vsub.f32 %v2115_v29, %v3308_v9  ;;  %v3323_v63 = vsub.f32 %v2116_v34, %v3308_v9  ;;  %v3334_v21 = vsub.f32 %v2117_v46, %v3308_v9 }
 0x26d   : > { %v2182_v62 = vpop.xlane.xlu1 %2181  ;;  %v3339_v27 = vsub.f32 %v2118_v47, %v3308_v9  ;;  %v3356_v39 = vsub.f32 %v2119_v59, %v3308_v9  ;;  %v3363_v30 = vsub.f32 %v2120_v2, %v3308_v9  ;;  %v3379_v58 = vsub.f32 %v2121_v16, %v3308_v9 }
 0x26e   : > { %v2218_v3 = vmul.f32 %v3313_v51, %v3313_v51  ;;  %v2219_v31 = vmul.f32 %v3318_v50, %v3318_v50  ;;  %v3329_v20 = vmul.f32 0.0005165289, %v2182_v62  ;;  %v2220_v28 = vmul.f32 %v3323_v63, %v3323_v63 }
 0x26f   : > { %v2221_v46 = vmul.f32 %v3334_v21, %v3334_v21  ;;  %v2223_v2 = vmul.f32 %v3356_v39, %v3356_v39  ;;  %v2224_v40 = vmul.f32 %v3363_v30, %v3363_v30  ;;  %v2225_v7 = vmul.f32 %v3379_v58, %v3379_v58 }
 0x270   : > { %v2250_v29 = vadd.f32 %v2219_v31, %v2218_v3  ;;  %v3346_v34 = vsub.f32 %v2130_v36, %v3329_v20  ;;  %v3351_v14 = vsub.f32 %v2131_v33, %v3329_v20  ;;  %v2222_v36 = vmul.f32 %v3339_v27, %v3339_v27 }
 0x271   : > { %v3370_v33 = vsub.f32 %v2132_v44, %v3329_v20  ;;  %v3386_v37 = vsub.f32 %v2133_v54, %v3329_v20  ;;  %v3391_v44 = vsub.f32 %v2122_v18, %v3308_v9  ;;  %v3398_v16 = vsub.f32 %v2134_v55, %v3329_v20 }
 0x272   : > { %v2251_v47 = vadd.f32 %v2250_v29, %v2220_v28  ;;  %v2234_v48 = vmul.f32 %v3346_v34, %v3346_v34  ;;  %v2235_v59 = vmul.f32 %v3351_v14, %v3351_v14  ;;  %v3405_v54 = vsub.f32 %v2123_v42, %v3308_v9 }
 0x273   : > { %v2236_v25 = vmul.f32 %v3370_v33, %v3370_v33  ;;  %v3412_v17 = vsub.f32 %v2135_v1, %v3329_v20  ;;  %v2237_v0 = vmul.f32 %v3386_v37, %v3386_v37  ;;  %v3419_v62 = vsub.f32 %v2124_v52, %v3308_v9 }
 0x274   : > { %v2252_v26 = vadd.f32 %v2251_v47, %v2221_v46  ;;  %v2268_v45 = vadd.f32 %v2235_v59, %v2234_v48  ;;  %v2226_v19 = vmul.f32 %v3391_v44, %v3391_v44  ;;  %v3426_v3 = vsub.f32 %v2136_v12, %v3329_v20 }
 0x275   : > { %v2238_v56 = vmul.f32 %v3398_v16, %v3398_v16  ;;  %v3634_v31 = vmax.f32 %v3240_v60, 0.0  ;;  %v2227_v41 = vmul.f32 %v3405_v54, %v3405_v54  ;;  %v3635_v29 = vmax.f32 %v3203_v13, 0.0 }
 0x276   : > { %v2253_v23 = vadd.f32 %v2252_v26, %v2222_v36  ;;  %v2269_v55 = vadd.f32 %v2268_v45, %v2236_v25  ;;  %v2239_v4 = vmul.f32 %v3412_v17, %v3412_v17  ;;  %v3636_v47 = vmax.f32 %v3252_v10, 0.0 }
 0x277   : > { %v3433_v28 = vsub.f32 %v3634_v31, %v3308_v9  ;;  %v3440_v46 = vsub.f32 %v3635_v29, %v3329_v20  ;;  %v2228_v60 = vmul.f32 %v3419_v62, %v3419_v62  ;;  %v3637_v48 = vmax.f32 %v3206_v15, 0.0 }
 0x278   : > { %v2254_v5 = vadd.f32 %v2253_v23, %v2223_v2  ;;  %v2270_v1 = vadd.f32 %v2269_v55, %v2237_v0  ;;  %v3447_v36 = vsub.f32 %v3636_v47, %v3308_v9  ;;  %v2240_v13 = vmul.f32 %v3426_v3, %v3426_v3 }
 0x279   : > { %v3454_v59 = vsub.f32 %v3637_v48, %v3329_v20  ;;  %v3638_v23 = vmax.f32 %v3263_v43, 0.0  ;;  %v2229_v10 = vmul.f32 %v3433_v28, %v3433_v28  ;;  %v3639_v25 = vmax.f32 %v3267_v53, 0.0 }
 0x27a   : > { %v2255_v18 = vadd.f32 %v2254_v5, %v2224_v40  ;;  %v2271_v12 = vadd.f32 %v2270_v1, %v2238_v56  ;;  %v3640_v15 = vmax.f32 %v3220_v38, 0.0  ;;  %v3641_v0 = vmax.f32 %v3257_v24, 0.0 }
 0x27b   : > { %v3461_v40 = vsub.f32 %v3638_v23, %v3308_v9  ;;  %v3468_v45 = vsub.f32 %v3639_v25, %v3308_v9  ;;  %v2242_v38 = vmul.f32 %v3454_v59, %v3454_v59  ;;  %v3643_v24 = vmax.f32 %v3248_v6, 0.0 }
 0x27c   : > { %v2256_v42 = vadd.f32 %v2255_v18, %v2225_v7  ;;  %v2272_v2 = vadd.f32 %v2271_v12, %v2239_v4  ;;  %v3473_v7 = vsub.f32 %v3640_v15, %v3329_v20  ;;  %v2241_v18 = vmul.f32 %v3440_v46, %v3440_v46 }
 0x27d   : > { %v3480_v55 = vsub.f32 %v3641_v0, %v3308_v9  ;;  %v2231_v31 = vmul.f32 %v3461_v40, %v3461_v40  ;;  %v2233_v9 = vmul.f32 %v3468_v45, %v3468_v45  ;;  %v3644_v47 = vmax.f32 %v3273_v11, 0.0 }
 0x27e   : > { %v2257_v52 = vadd.f32 %v2256_v42, %v2226_v19  ;;  %v2273_v43 = vadd.f32 %v2272_v2, %v2240_v13  ;;  %v2230_v19 = vmul.f32 %v3447_v36, %v3447_v36  ;;  %v3642_v42 = vmax.f32 %v3237_v57, 0.0 }
 0x27f   : > { %v2243_v57 = vmul.f32 %v3473_v7, %v3473_v7  ;;  %v2232_v4 = vmul.f32 %v3480_v55, %v3480_v55  ;;  %v2264_v13 = vsel %vm2160_vm0, %v2233_v9, 0.0  ;;  %v3515_v2 = vsub.f32 %v2143_v32, %v3329_v20 }
 0x280   : > { %v2258_v26 = vadd.f32 %v2257_v52, %v2227_v41  ;;  %v3487_v56 = vsub.f32 %v3642_v42, %v3329_v20  ;;  %v2274_v1 = vadd.f32 %v2273_v43, %v2241_v18  ;;  %v3498_v52 = vsub.f32 %v3643_v24, %v3329_v20 }
 0x281   : > { %v3522_v11 = vsub.f32 %v2145_v8, %v3329_v20  ;;  %v3527_v25 = vsub.f32 %v2144_v35, %v3329_v20  ;;  %v2247_v15 = vmul.f32 %v3515_v2, %v3515_v2 }
 0x282   : > { %v2259_v5 = vadd.f32 %v2258_v26, %v2228_v60  ;;  %v2275_v29 = vadd.f32 %v2274_v1, %v2242_v38  ;;  %v3507_v60 = vsub.f32 %v3644_v47, %v3329_v20  ;;  %v2244_v26 = vmul.f32 %v3487_v56, %v3487_v56 }
 0x283   : > { %v2245_v23 = vmul.f32 %v3498_v52, %v3498_v52  ;;  %v2249_v22 = vmul.f32 %v3522_v11, %v3522_v11  ;;  %v2248_v8 = vmul.f32 %v3527_v25, %v3527_v25 }
 0x284   : > { %v2260_v53 = vadd.f32 %v2259_v5, %v2229_v10  ;;  %v2276_v48 = vadd.f32 %v2275_v29, %v2243_v57  ;;  %v2246_v61 = vmul.f32 %v3507_v60, %v3507_v60 }
 0x285   : > { %v2282_v35 = vsel %vm2160_vm0, %v2249_v22, 0.0 }
 0x286   : > { %v2261_v41 = vadd.f32 %v2260_v53, %v2230_v19  ;;  %v2277_v10 = vadd.f32 %v2276_v48, %v2244_v26 }
 0x288   : > { %v2262_v12 = vadd.f32 %v2261_v41, %v2231_v31  ;;  %v2278_v32 = vadd.f32 %v2277_v10, %v2245_v23 }
 0x28a   : > { %v2263_v6 = vadd.f32 %v2262_v12, %v2232_v4  ;;  %v2279_v18 = vadd.f32 %v2278_v32, %v2246_v61 }
 0x28c   : > { %v2265_v5 = vadd.f32 %v2264_v13, %v2263_v6  ;;  %v2280_v43 = vadd.f32 %v2279_v18, %v2247_v15 }
 0x28e   : > { %2266 = vadd.xlane.f32.xlu0 %v2265_v5  ;;  %v2281_v49 = vadd.f32 %v2280_v43, %v2248_v8 }
 0x290   : > { %v2283_v20 = vadd.f32 %v2282_v35, %v2281_v49 }
 0x292   : > { %2284 = vadd.xlane.f32.xlu1 %v2283_v20 }
 0x317   : > { %v2267_v0 = vpop.xlane.xlu0 %2266 }
 0x318   : > { %v2286_v19 = vmul.f32 0.0005165289, %v2267_v0 }
 0x31a   : > { %v2288_v53 = vadd.f32 1e-05, %v2286_v19 }
 0x31b   : > { %v2285_v42 = vpop.xlane.xlu1 %2284 }
 0x31c   : > { %2743 = vrsqrt.f32 %v2288_v53  ;;  %v2287_v38 = vmul.f32 0.0005165289, %v2285_v42 }
 0x31e   : > { %v2289_v1 = vadd.f32 1e-05, %v2287_v38 }
 0x320   : > { %2745 = vrsqrt.f32 %v2289_v1 }
 0x329   : > { %v2744_v31 = vpop.eup %2743 }
 0x32a   : > { %v2292_v41 = vmul.f32 %v2744_v31, %v3313_v51  ;;  %v2293_v9 = vmul.f32 %v2744_v31, %v3318_v50  ;;  %v2294_v24 = vmul.f32 %v2744_v31, %v3323_v63  ;;  %v2295_v57 = vmul.f32 %v2744_v31, %v3334_v21 }
 0x32b   : > { %v2296_v29 = vmul.f32 %v2744_v31, %v3339_v27  ;;  %v2297_v4 = vmul.f32 %v2744_v31, %v3356_v39  ;;  %v2298_v12 = vmul.f32 %v2744_v31, %v3363_v30  ;;  %v2299_v47 = vmul.f32 %v2744_v31, %v3379_v58 }
 0x32c   : > { %v2300_v51 = vmul.f32 %v2744_v31, %v3391_v44  ;;  %v2301_v50 = vmul.f32 %v2744_v31, %v3405_v54  ;;  %v2302_v63 = vmul.f32 %v2744_v31, %v3419_v62  ;;  %v2303_v21 = vmul.f32 %v2744_v31, %v3433_v28  ;;  %2324 = vst [vmem:[%s3542_s8] sm:$0xff] %v2292_v41 }
 0x32d   : > { %2325 = vst [vmem:[%s3542_s8 + $0x8] sm:$0xff] %v2293_v9  ;;  %2326 = vst [vmem:[%s3542_s8 + $0x10] sm:$0xff] %v2294_v24  ;;  %v2304_v27 = vmul.f32 %v2744_v31, %v3447_v36  ;;  %v2305_v39 = vmul.f32 %v2744_v31, %v3461_v40  ;;  %v2306_v30 = vmul.f32 %v2744_v31, %v3480_v55  ;;  %v2746_v44 = vpop.eup %2745 }
 0x32e   : > { %2327 = vst [vmem:[%s3542_s8 + $0x18] sm:$0xff] %v2295_v57  ;;  %v2307_v58 = vmul.f32 %v2744_v31, %v3468_v45  ;;  %2328 = vst [vmem:[%s3542_s8 + $0x20] sm:$0xff] %v2296_v29  ;;  %v2308_v54 = vmul.f32 %v2746_v44, %v3346_v34  ;;  %v2309_v62 = vmul.f32 %v2746_v44, %v3351_v14 }
 0x32f   : > { %2329 = vst [vmem:[%s3542_s8 + $0x28] sm:$0xff] %v2297_v4  ;;  %2330 = vst [vmem:[%s3542_s8 + $0x30] sm:$0xff] %v2298_v12  ;;  %v2310_v28 = vmul.f32 %v2746_v44, %v3370_v33  ;;  %v2311_v36 = vmul.f32 %v2746_v44, %v3386_v37  ;;  %v2312_v40 = vmul.f32 %v2746_v44, %v3398_v16 }
 0x330   : > { %2331 = vst [vmem:[%s3542_s8 + $0x38] sm:$0xff] %v2299_v47  ;;  %2332 = vst [vmem:[%s3542_s8 + $0x40] sm:$0xff] %v2300_v51  ;;  %v2313_v45 = vmul.f32 %v2746_v44, %v3412_v17  ;;  %v2314_v55 = vmul.f32 %v2746_v44, %v3426_v3  ;;  %v2315_v26 = vmul.f32 %v2746_v44, %v3440_v46 }
 0x331   : > { %2333 = vst [vmem:[%s3542_s8 + $0x48] sm:$0xff] %v2301_v50  ;;  %2334 = vst [vmem:[%s3542_s8 + $0x50] sm:$0xff] %v2302_v63  ;;  %v2316_v34 = vmul.f32 %v2746_v44, %v3454_v59  ;;  %v2317_v14 = vmul.f32 %v2746_v44, %v3473_v7  ;;  %v2318_v33 = vmul.f32 %v2746_v44, %v3487_v56 }
 0x332   : > { %2335 = vst [vmem:[%s3542_s8 + $0x58] sm:$0xff] %v2303_v21  ;;  %2336 = vst [vmem:[%s3542_s8 + $0x60] sm:$0xff] %v2304_v27  ;;  %v2319_v37 = vmul.f32 %v2746_v44, %v3498_v52  ;;  %v2320_v16 = vmul.f32 %v2746_v44, %v3507_v60  ;;  %v2321_v17 = vmul.f32 %v2746_v44, %v3515_v2 }
 0x333   : > { %2337 = vst [vmem:[%s3542_s8 + $0x68] sm:$0xff] %v2305_v39  ;;  %2338 = vst [vmem:[%s3542_s8 + $0x70] sm:$0xff] %v2306_v30  ;;  %v2322_v3 = vmul.f32 %v2746_v44, %v3527_v25  ;;  %v2323_v46 = vmul.f32 %v2746_v44, %v3522_v11 }
 0x334   : > { %2339 = vst.msk [vmem:[%s3542_s8 + $0x78] sm:$0xff] %vm2160_vm0, %v2307_v58  ;;  %2340 = vst [vmem:[%s3542_s8 + $0x80] sm:$0xff] %v2308_v54 }
 0x335   : > { %2341 = vst [vmem:[%s3542_s8 + $0x88] sm:$0xff] %v2309_v62  ;;  %2342 = vst [vmem:[%s3542_s8 + $0x90] sm:$0xff] %v2310_v28 }
 0x336   : > { %2343 = vst [vmem:[%s3542_s8 + $0x98] sm:$0xff] %v2311_v36  ;;  %2344 = vst [vmem:[%s3542_s8 + $0xa0] sm:$0xff] %v2312_v40 }
 0x337   : > { %2345 = vst [vmem:[%s3542_s8 + $0xa8] sm:$0xff] %v2313_v45  ;;  %2346 = vst [vmem:[%s3542_s8 + $0xb0] sm:$0xff] %v2314_v55 }
 0x338   : > { %2347 = vst [vmem:[%s3542_s8 + $0xb8] sm:$0xff] %v2315_v26  ;;  %2348 = vst [vmem:[%s3542_s8 + $0xc0] sm:$0xff] %v2316_v34 }
 0x339   : > { %2349 = vst [vmem:[%s3542_s8 + $0xc8] sm:$0xff] %v2317_v14  ;;  %2350 = vst [vmem:[%s3542_s8 + $0xd0] sm:$0xff] %v2318_v33 }
 0x33a   : > { %2351 = vst [vmem:[%s3542_s8 + $0xd8] sm:$0xff] %v2319_v37  ;;  %2352 = vst [vmem:[%s3542_s8 + $0xe0] sm:$0xff] %v2320_v16 }
 0x33b   : > { %2353 = vst [vmem:[%s3542_s8 + $0xe8] sm:$0xff] %v2321_v17  ;;  %2354 = vst [vmem:[%s3542_s8 + $0xf0] sm:$0xff] %v2322_v3 }
 0x33c   : > { %2355 = vst.msk [vmem:[%s3542_s8 + $0xf8] sm:$0xff] %vm2160_vm0, %v2323_v46 }
 0x33d PF: > { %s13_s14 = sadd.s32 1, %s2771_s14   ;;  %s3645_s12 = smov %s2767_s13 }
 0x33e   : > { %p10_p5 = scmp.ge.s32.totalorder %s13_s14, 4   ;;  %s3646_s13 = smov %s3648_s15 }
 0x340   :  { %12 = sbr.rel (!%p10_p5) target bundleno = 2 (0x2), region = 62 }

// kernel: image_decoder_forward.10
= control target key start
LH: loop header
LB: loop body
LE: loop exit
PB: predicated region body
PF: predicated region fallthrough
CT: control target
= control target key end

     0   :  { %s6892_s12 = smov 0   ;;  %s6894_s13 = smov 0   ;;  %s8757_s0 = inlined_call_operand.vmem [shape: bf16[2,144,7921], index: 0, kind: input, shape index: {}]   ;;  %s8758_s1 = inlined_call_operand.vmem [shape: bf16[8,144], index: 1, kind: input, shape index: {}]   ;;  %s8759_s2 = inlined_call_operand.vmem [shape: f32[8,1], index: 2, kind: input, shape index: {}]   ;;  %s8760_s3 = inlined_call_operand.vmem [shape: f32[2,8,7921], index: 3, kind: output, shape index: {}]  }
   0x1   :  { %s6896_s14 = smov 0  }
   0x2 LB: > { %s25_s15 = sadd.s32 1, %s6865_s13  ;;  %p5382_p0 = scmp.ge.s32.totalorder %s6869_s14, 1  ;;  %s6869_s14 = sphi %s6896_s14, %s13_s14   ;;  %s6865_s13 = sphi %s6894_s13, %s8955_s13   ;;  %s6861_s12 = sphi %s6892_s12, %s8954_s12  }
   0x3   : > { %p27_p1 = scmp.ge.s32.totalorder %s25_s15, 2  ;;  %p158_p2 = scmp.lt.s32.totalorder %s6869_s14, 3 }
   0x5   : > { %s8957_s15 = smov (%p27_p1, %s25_s15), 0  ;;  %p159_p3 = pnand %p5382_p0, %p158_p2 }
   0x7   : > { %162 = sbr.rel (%p159_p3) target bundleno = 1253 (0x4e5), region = 32 }
   0xc   : > { %p191_p4 = scmp.lt.s32.totalorder %s6861_s12, 1  ;;  %v6913_v0 = vld [vmem:[%s8758_s1] sm:$0xff]  ;;  %vm3572_vm0 = vcmask 130048   ;;  %v6871_v3 = vmov 0   ;;  %vm4969_vm1 = vcmask 924672  }
   0xd   : > { %v770_v1 = vld [vmem:[%s8759_s2] sm:$0xff]  ;;  %v6920_v2 = vcombine.high %v6913_v0, %v6913_v0  ;;  %6005 = vset.pattern.permute.xlu0 %v6871_v3  ;;  %v6974_v42 = vcombine.low %v6913_v0, %v6913_v0 }
   0xe   : > { %s8959_s12 = smov (!%p191_p4, %s6861_s12), 1  ;;  %773 = vperm.xlu0 %6005, %v770_v1  }
   0xf   : > { %5945 = vmatprep.mubr.msk.bf16.mxu0 %vm3572_vm0, %v6920_v2  ;;  %5946 = vmatprep.mubr.msk.bf16.mxu1 %vm3572_vm0, %v6920_v2  ;;  %s5978_s20 = smul.u32 4464, %s8959_s12 }
  0x10   : > { %s5979_s24 = smul.u32 496, %s8959_s12 }
  0x11   : > { %s6932_s23 = scalar_lea.vmem %s8757_s0, %s5978_s20 }
  0x12   : > { %v6006_v4 = vld [vmem:[%s6932_s23 + $0xd94] ss:$248 sps:$4 sm:$0xff]   ;;  %v6010_v6 = vld [vmem:[%s6932_s23 + $0xd90] ss:$248 sps:$4 sm:$0xff]   ;;  %v6012_v8 = vld [vmem:[%s6932_s23 + $0xba4] ss:$248 sps:$4 sm:$0xff]   ;;  %s8559_s27 = scalar_lea.vmem %s8760_s3, %s5979_s24 }
  0x13   : > { %v6008_v5 = vld [vmem:[%s6932_s23 + $0xd9c] ss:$248 sps:$4 sm:$0xff]   ;;  %3576 = vmatprep.subr.bf16.mxu0 %v6006_v4  ;;  %v6011_v7 = vld [vmem:[%s6932_s23 + $0xd98] ss:$248 sps:$4 sm:$0xff]   ;;  %v6014_v9 = vld [vmem:[%s6932_s23 + $0xbac] ss:$248 sps:$4 sm:$0xff]  }
  0x14   : > { %3617 = vmatprep.subr.bf16.mxu1 %v6008_v5  ;;  %3577 = vmatpush1.bf16.msra.mxu0 %v6010_v6  ;;  %v6016_v10 = vld [vmem:[%s6932_s23 + $0xba0] ss:$248 sps:$4 sm:$0xff]   ;;  %v6018_v12 = vld [vmem:[%s6932_s23 + $0x9b4] ss:$248 sps:$4 sm:$0xff]   ;;  %v6022_v14 = vld [vmem:[%s6932_s23 + $0x9b0] ss:$248 sps:$4 sm:$0xff]  }
  0x15   : > { %3618 = vmatpush1.bf16.msra.mxu1 %v6011_v7  ;;  %3578 = vmatprep.subr.bf16.mxu0 %v6012_v8  ;;  %v6017_v11 = vld [vmem:[%s6932_s23 + $0xba8] ss:$248 sps:$4 sm:$0xff]   ;;  %v6020_v13 = vld [vmem:[%s6932_s23 + $0x9bc] ss:$248 sps:$4 sm:$0xff]   ;;  %v6023_v15 = vld [vmem:[%s6932_s23 + $0x9b8] ss:$248 sps:$4 sm:$0xff]  }
  0x16   : > { %3619 = vmatprep.subr.bf16.mxu1 %v6014_v9  ;;  %v6024_v16 = vld [vmem:[%s6932_s23 + $0x7c4] ss:$248 sps:$4 sm:$0xff]   ;;  %v6028_v18 = vld [vmem:[%s6932_s23 + $0x7c0] ss:$248 sps:$4 sm:$0xff]   ;;  %v6030_v20 = vld [vmem:[%s6932_s23 + $0x5d4] ss:$248 sps:$4 sm:$0xff]  }
  0x17   : > { %v6026_v17 = vld [vmem:[%s6932_s23 + $0x7cc] ss:$248 sps:$4 sm:$0xff]   ;;  %v6029_v19 = vld [vmem:[%s6932_s23 + $0x7c8] ss:$248 sps:$4 sm:$0xff]   ;;  %v6032_v21 = vld [vmem:[%s6932_s23 + $0x5dc] ss:$248 sps:$4 sm:$0xff]  }
  0x18   : > { %3579 = vmatpush1.bf16.msra.mxu0 %v6016_v10  ;;  %v6034_v22 = vld [vmem:[%s6932_s23 + $0x5d0] ss:$248 sps:$4 sm:$0xff]   ;;  %v6036_v24 = vld [vmem:[%s6932_s23 + $0x3e4] ss:$248 sps:$4 sm:$0xff]   ;;  %v6040_v26 = vld [vmem:[%s6932_s23 + $0x3e0] ss:$248 sps:$4 sm:$0xff]  }
  0x19   : > { %3620 = vmatpush1.bf16.msra.mxu1 %v6017_v11  ;;  %3580 = vmatprep.subr.bf16.mxu0 %v6018_v12  ;;  %v6035_v23 = vld [vmem:[%s6932_s23 + $0x5d8] ss:$248 sps:$4 sm:$0xff]   ;;  %v6038_v25 = vld [vmem:[%s6932_s23 + $0x3ec] ss:$248 sps:$4 sm:$0xff]   ;;  %v6041_v27 = vld [vmem:[%s6932_s23 + $0x3e8] ss:$248 sps:$4 sm:$0xff]  }
  0x1a   : > { %3621 = vmatprep.subr.bf16.mxu1 %v6020_v13  ;;  %v6042_v28 = vld [vmem:[%s6932_s23 + $0x1f4] ss:$248 sps:$4 sm:$0xff]   ;;  %v6046_v30 = vld [vmem:[%s6932_s23 + $0x1f0] ss:$248 sps:$4 sm:$0xff]   ;;  %v6048_v32 = vld [vmem:[%s6932_s23 + $0x4] ss:$248 sps:$4 sm:$0xff]  }
  0x1b   : > { %v6044_v29 = vld [vmem:[%s6932_s23 + $0x1fc] ss:$248 sps:$4 sm:$0xff]   ;;  %v6047_v31 = vld [vmem:[%s6932_s23 + $0x1f8] ss:$248 sps:$4 sm:$0xff]   ;;  %v6050_v33 = vld [vmem:[%s6932_s23 + $0xc] ss:$248 sps:$4 sm:$0xff]  }
  0x1c   : > { %3581 = vmatpush1.bf16.msra.mxu0 %v6022_v14  ;;  %v6052_v34 = vld [vmem:[%s6932_s23] ss:$248 sps:$4 sm:$0xff]   ;;  %v6054_v36 = vld [vmem:[%s6932_s23 + $0xf84] ss:$248 sps:$4 sm:$0xff]   ;;  %v6070_v45 = vld [vmem:[%s6932_s23 + $0xbb4] ss:$248 sps:$4 sm:$0xff]  }
  0x1d   : > { %3622 = vmatpush1.bf16.msra.mxu1 %v6023_v15  ;;  %3582 = vmatprep.subr.bf16.mxu0 %v6024_v16  ;;  %v6053_v35 = vld [vmem:[%s6932_s23 + $0x8] ss:$248 sps:$4 sm:$0xff]   ;;  %v6056_v37 = vld [vmem:[%s6932_s23 + $0xf8c] ss:$248 sps:$4 sm:$0xff]   ;;  %v6073_v46 = vld [vmem:[%s6932_s23 + $0xbbc] ss:$248 sps:$4 sm:$0xff]  }
  0x1e   : > { %3623 = vmatprep.subr.bf16.mxu1 %v6026_v17  ;;  %v6058_v38 = vld [vmem:[%s6932_s23 + $0xf80] ss:$248 sps:$4 sm:$0xff]   ;;  %v6064_v40 = vld [vmem:[%s6932_s23 + $0xda4] ss:$248 sps:$4 sm:$0xff]   ;;  %v6068_v47 = vld [vmem:[%s6932_s23 + $0xbb0] ss:$248 sps:$4 sm:$0xff]  }
  0x1f   : > { %v6059_v39 = vld [vmem:[%s6932_s23 + $0xf88] ss:$248 sps:$4 sm:$0xff]   ;;  %v6067_v41 = vld [vmem:[%s6932_s23 + $0xdac] ss:$248 sps:$4 sm:$0xff]   ;;  %v6071_v48 = vld [vmem:[%s6932_s23 + $0xbb8] ss:$248 sps:$4 sm:$0xff]  }
  0x20   : > { %3583 = vmatpush1.bf16.msra.mxu0 %v6028_v18  ;;  %v6062_v43 = vld [vmem:[%s6932_s23 + $0xda0] ss:$248 sps:$4 sm:$0xff]   ;;  %v6076_v49 = vld [vmem:[%s6932_s23 + $0x9c4] ss:$248 sps:$4 sm:$0xff]   ;;  %v6082_v53 = vld [vmem:[%s6932_s23 + $0x7d4] ss:$248 sps:$4 sm:$0xff]  }
  0x21   : > { %3624 = vmatpush1.bf16.msra.mxu1 %v6029_v19  ;;  %3584 = vmatprep.subr.bf16.mxu0 %v6030_v20  ;;  %v6065_v44 = vld [vmem:[%s6932_s23 + $0xda8] ss:$248 sps:$4 sm:$0xff]   ;;  %v6079_v50 = vld [vmem:[%s6932_s23 + $0x9cc] ss:$248 sps:$4 sm:$0xff]   ;;  %v6085_v54 = vld [vmem:[%s6932_s23 + $0x7dc] ss:$248 sps:$4 sm:$0xff]  }
  0x22   : > { %3625 = vmatprep.subr.bf16.mxu1 %v6032_v21  ;;  %v6074_v51 = vld [vmem:[%s6932_s23 + $0x9c0] ss:$248 sps:$4 sm:$0xff]   ;;  %v6080_v55 = vld [vmem:[%s6932_s23 + $0x7d0] ss:$248 sps:$4 sm:$0xff]   ;;  %v6088_v57 = vld [vmem:[%s6932_s23 + $0x5e4] ss:$248 sps:$4 sm:$0xff]  }
  0x23   : > { %v6077_v52 = vld [vmem:[%s6932_s23 + $0x9c8] ss:$248 sps:$4 sm:$0xff]   ;;  %v6083_v56 = vld [vmem:[%s6932_s23 + $0x7d8] ss:$248 sps:$4 sm:$0xff]   ;;  %v6091_v58 = vld [vmem:[%s6932_s23 + $0x5ec] ss:$248 sps:$4 sm:$0xff]  }
  0x24   : > { %3585 = vmatpush1.bf16.msra.mxu0 %v6034_v22  ;;  %v6086_v59 = vld [vmem:[%s6932_s23 + $0x5e0] ss:$248 sps:$4 sm:$0xff]   ;;  %v6094_v61 = vld [vmem:[%s6932_s23 + $0x3f4] ss:$248 sps:$4 sm:$0xff]   ;;  %v6092_v63 = vld [vmem:[%s6932_s23 + $0x3f0] ss:$248 sps:$4 sm:$0xff]  }
  0x25   : > { %3626 = vmatpush1.bf16.msra.mxu1 %v6035_v23  ;;  %3586 = vmatprep.subr.bf16.mxu0 %v6036_v24  ;;  %v6089_v60 = vld [vmem:[%s6932_s23 + $0x5e8] ss:$248 sps:$4 sm:$0xff]   ;;  %v6097_v62 = vld [vmem:[%s6932_s23 + $0x3fc] ss:$248 sps:$4 sm:$0xff]   ;;  %v6095_v0 = vld [vmem:[%s6932_s23 + $0x3f8] ss:$248 sps:$4 sm:$0xff]  }
  0x26   : > { %3627 = vmatprep.subr.bf16.mxu1 %v6038_v25  ;;  %v6100_v1 = vld [vmem:[%s6932_s23 + $0x204] ss:$248 sps:$4 sm:$0xff]   ;;  %v6098_v4 = vld [vmem:[%s6932_s23 + $0x200] ss:$248 sps:$4 sm:$0xff]   ;;  %v6106_v6 = vld [vmem:[%s6932_s23 + $0x14] ss:$248 sps:$4 sm:$0xff]  }
  0x27   : > { %v6103_v3 = vld [vmem:[%s6932_s23 + $0x20c] ss:$248 sps:$4 sm:$0xff]   ;;  %v6101_v5 = vld [vmem:[%s6932_s23 + $0x208] ss:$248 sps:$4 sm:$0xff]   ;;  %v6109_v7 = vld [vmem:[%s6932_s23 + $0x1c] ss:$248 sps:$4 sm:$0xff]  }
  0x28   : > { %3587 = vmatpush1.bf16.msra.mxu0 %v6040_v26  ;;  %v6104_v8 = vld [vmem:[%s6932_s23 + $0x10] ss:$248 sps:$4 sm:$0xff]   ;;  %v6112_v10 = vld [vmem:[%s6932_s23 + $0xf94] ss:$248 sps:$4 sm:$0xff]   ;;  %v6124_v18 = vld [vmem:[%s6932_s23 + $0xbc4] ss:$248 sps:$4 sm:$0xff]  }
  0x29   : > { %3628 = vmatpush1.bf16.msra.mxu1 %v6041_v27  ;;  %3588 = vmatprep.subr.bf16.mxu0 %v6042_v28  ;;  %v6107_v9 = vld [vmem:[%s6932_s23 + $0x18] ss:$248 sps:$4 sm:$0xff]   ;;  %v6115_v11 = vld [vmem:[%s6932_s23 + $0xf9c] ss:$248 sps:$4 sm:$0xff]   ;;  %v6127_v19 = vld [vmem:[%s6932_s23 + $0xbcc] ss:$248 sps:$4 sm:$0xff]  }
  0x2a   : > { %3629 = vmatprep.subr.bf16.mxu1 %v6044_v29  ;;  %v6110_v12 = vld [vmem:[%s6932_s23 + $0xf90] ss:$248 sps:$4 sm:$0xff]   ;;  %v6118_v14 = vld [vmem:[%s6932_s23 + $0xdb4] ss:$248 sps:$4 sm:$0xff]   ;;  %v6122_v20 = vld [vmem:[%s6932_s23 + $0xbc0] ss:$248 sps:$4 sm:$0xff]  }
  0x2b   : > { %v6113_v13 = vld [vmem:[%s6932_s23 + $0xf98] ss:$248 sps:$4 sm:$0xff]   ;;  %v6121_v15 = vld [vmem:[%s6932_s23 + $0xdbc] ss:$248 sps:$4 sm:$0xff]   ;;  %v6125_v21 = vld [vmem:[%s6932_s23 + $0xbc8] ss:$248 sps:$4 sm:$0xff]  }
  0x2c   : > { %3589 = vmatpush1.bf16.msra.mxu0 %v6046_v30  ;;  %v6116_v16 = vld [vmem:[%s6932_s23 + $0xdb0] ss:$248 sps:$4 sm:$0xff]   ;;  %v6130_v22 = vld [vmem:[%s6932_s23 + $0x9d4] ss:$248 sps:$4 sm:$0xff]   ;;  %v6136_v26 = vld [vmem:[%s6932_s23 + $0x7e4] ss:$248 sps:$4 sm:$0xff]  }
  0x2d   : > { %3630 = vmatpush1.bf16.msra.mxu1 %v6047_v31  ;;  %3590 = vmatprep.subr.bf16.mxu0 %v6048_v32  ;;  %v6119_v17 = vld [vmem:[%s6932_s23 + $0xdb8] ss:$248 sps:$4 sm:$0xff]   ;;  %v6133_v23 = vld [vmem:[%s6932_s23 + $0x9dc] ss:$248 sps:$4 sm:$0xff]   ;;  %v6139_v27 = vld [vmem:[%s6932_s23 + $0x7ec] ss:$248 sps:$4 sm:$0xff]  }
  0x2e   : > { %3631 = vmatprep.subr.bf16.mxu1 %v6050_v33  ;;  %v6128_v24 = vld [vmem:[%s6932_s23 + $0x9d0] ss:$248 sps:$4 sm:$0xff]   ;;  %v6134_v28 = vld [vmem:[%s6932_s23 + $0x7e0] ss:$248 sps:$4 sm:$0xff]   ;;  %v6142_v30 = vld [vmem:[%s6932_s23 + $0x5f4] ss:$248 sps:$4 sm:$0xff]  }
  0x2f   : > { %v6131_v25 = vld [vmem:[%s6932_s23 + $0x9d8] ss:$248 sps:$4 sm:$0xff]   ;;  %v6137_v29 = vld [vmem:[%s6932_s23 + $0x7e8] ss:$248 sps:$4 sm:$0xff]   ;;  %v6145_v31 = vld [vmem:[%s6932_s23 + $0x5fc] ss:$248 sps:$4 sm:$0xff]  }
  0x30   : > { %3591 = vmatpush1.bf16.msra.mxu0 %v6052_v34  ;;  %v6140_v32 = vld [vmem:[%s6932_s23 + $0x5f0] ss:$248 sps:$4 sm:$0xff]   ;;  %v6148_v34 = vld [vmem:[%s6932_s23 + $0x404] ss:$248 sps:$4 sm:$0xff]  }
  0x31   : > { %3632 = vmatpush1.bf16.msra.mxu1 %v6053_v35  ;;  %3606 = vmatprep.subr.bf16.mxu0 %v6054_v36  ;;  %v6143_v33 = vld [vmem:[%s6932_s23 + $0x5f8] ss:$248 sps:$4 sm:$0xff]   ;;  %v6151_v35 = vld [vmem:[%s6932_s23 + $0x40c] ss:$248 sps:$4 sm:$0xff]  }
  0x32   : > { %3647 = vmatprep.subr.bf16.mxu1 %v6056_v37  ;;  %v6146_v36 = vld [vmem:[%s6932_s23 + $0x400] ss:$248 sps:$4 sm:$0xff]  }
  0x33   : > { %v6149_v37 = vld [vmem:[%s6932_s23 + $0x408] ss:$248 sps:$4 sm:$0xff]  }
  0x34   : > { %3607 = vmatpush2.bf16.msra.mxu0 %v6058_v38  ;;  %v6154_v38 = vld [vmem:[%s6932_s23 + $0x214] ss:$248 sps:$4 sm:$0xff]  }
  0x35   : > { %3648 = vmatpush2.bf16.msra.mxu1 %v6059_v39  ;;  %3658 = vmatprep.subr.bf16.mxu0 %v6064_v40  ;;  %v6157_v39 = vld [vmem:[%s6932_s23 + $0x21c] ss:$248 sps:$4 sm:$0xff]   ;;  %v6152_v40 = vld [vmem:[%s6932_s23 + $0x210] ss:$248 sps:$4 sm:$0xff]  }
  0x36   : > { %3699 = vmatprep.subr.bf16.mxu1 %v6067_v41  ;;  %v6155_v41 = vld [vmem:[%s6932_s23 + $0x218] ss:$248 sps:$4 sm:$0xff]  }
  0x37   : > { %3609 = vmatmul.mubr.bf16.vlgmr.msra.gmra.mxu0 %v6974_v42 }
  0x38   : > { %3650 = vmatmul.mubr.bf16.vlgmr.msra.gmra.mxu1 %v6974_v42  ;;  %3659 = vmatpush1.bf16.msra.mxu0 %v6062_v43  ;;  %v6160_v43 = vld [vmem:[%s6932_s23 + $0x24] ss:$248 sps:$4 sm:$0xff]  }
  0x39   : > { %3700 = vmatpush1.bf16.msra.mxu1 %v6065_v44  ;;  %3660 = vmatprep.subr.bf16.mxu0 %v6070_v45  ;;  %v6163_v44 = vld [vmem:[%s6932_s23 + $0x2c] ss:$248 sps:$4 sm:$0xff]   ;;  %v6158_v45 = vld [vmem:[%s6932_s23 + $0x20] ss:$248 sps:$4 sm:$0xff]  }
  0x3a   : > { %3701 = vmatprep.subr.bf16.mxu1 %v6073_v46  ;;  %5947 = vmatprep.mubr.msk.bf16.mxu0 %vm3572_vm0, %v6920_v2  ;;  %v6161_v46 = vld [vmem:[%s6932_s23 + $0x28] ss:$248 sps:$4 sm:$0xff]  }
  0x3b   : > { %5948 = vmatprep.mubr.msk.bf16.mxu1 %vm3572_vm0, %v6920_v2 }
  0x3c   : > { %3661 = vmatpush1.bf16.msra.mxu0 %v6068_v47  ;;  %v6166_v47 = vld [vmem:[%s6932_s23 + $0xfa4] ss:$248 sps:$4 sm:$0xff]  }
  0x3d   : > { %3702 = vmatpush1.bf16.msra.mxu1 %v6071_v48  ;;  %3662 = vmatprep.subr.bf16.mxu0 %v6076_v49  ;;  %v6169_v48 = vld [vmem:[%s6932_s23 + $0xfac] ss:$248 sps:$4 sm:$0xff]   ;;  %v6164_v49 = vld [vmem:[%s6932_s23 + $0xfa0] ss:$248 sps:$4 sm:$0xff]  }
  0x3e   : > { %3703 = vmatprep.subr.bf16.mxu1 %v6079_v50  ;;  %v6167_v50 = vld [vmem:[%s6932_s23 + $0xfa8] ss:$248 sps:$4 sm:$0xff]  }
  0x40   : > { %3663 = vmatpush1.bf16.msra.mxu0 %v6074_v51  ;;  %v6172_v51 = vld [vmem:[%s6932_s23 + $0xdc4] ss:$248 sps:$4 sm:$0xff]  }
  0x41   : > { %3704 = vmatpush1.bf16.msra.mxu1 %v6077_v52  ;;  %3664 = vmatprep.subr.bf16.mxu0 %v6082_v53  ;;  %v6175_v52 = vld [vmem:[%s6932_s23 + $0xdcc] ss:$248 sps:$4 sm:$0xff]   ;;  %v6170_v53 = vld [vmem:[%s6932_s23 + $0xdc0] ss:$248 sps:$4 sm:$0xff]  }
  0x42   : > { %3705 = vmatprep.subr.bf16.mxu1 %v6085_v54  ;;  %v6173_v54 = vld [vmem:[%s6932_s23 + $0xdc8] ss:$248 sps:$4 sm:$0xff]  }
  0x44   : > { %3665 = vmatpush1.bf16.msra.mxu0 %v6080_v55  ;;  %v6178_v55 = vld [vmem:[%s6932_s23 + $0xbd4] ss:$248 sps:$4 sm:$0xff]  }
  0x45   : > { %3706 = vmatpush1.bf16.msra.mxu1 %v6083_v56  ;;  %3666 = vmatprep.subr.bf16.mxu0 %v6088_v57  ;;  %v6181_v56 = vld [vmem:[%s6932_s23 + $0xbdc] ss:$248 sps:$4 sm:$0xff]   ;;  %v6176_v57 = vld [vmem:[%s6932_s23 + $0xbd0] ss:$248 sps:$4 sm:$0xff]  }
  0x46   : > { %3707 = vmatprep.subr.bf16.mxu1 %v6091_v58  ;;  %v6179_v58 = vld [vmem:[%s6932_s23 + $0xbd8] ss:$248 sps:$4 sm:$0xff]  }
  0x48   : > { %3667 = vmatpush1.bf16.msra.mxu0 %v6086_v59  ;;  %v6184_v59 = vld [vmem:[%s6932_s23 + $0x9e4] ss:$248 sps:$4 sm:$0xff]  }
  0x49   : > { %3708 = vmatpush1.bf16.msra.mxu1 %v6089_v60  ;;  %3668 = vmatprep.subr.bf16.mxu0 %v6094_v61  ;;  %v6187_v60 = vld [vmem:[%s6932_s23 + $0x9ec] ss:$248 sps:$4 sm:$0xff]   ;;  %v6182_v61 = vld [vmem:[%s6932_s23 + $0x9e0] ss:$248 sps:$4 sm:$0xff]  }
  0x4a   : > { %3709 = vmatprep.subr.bf16.mxu1 %v6097_v62  ;;  %v6185_v62 = vld [vmem:[%s6932_s23 + $0x9e8] ss:$248 sps:$4 sm:$0xff]  }
  0x4c   : > { %3669 = vmatpush1.bf16.msra.mxu0 %v6092_v63  ;;  %v6190_v63 = vld [vmem:[%s6932_s23 + $0x7f4] ss:$248 sps:$4 sm:$0xff]  }
  0x4d   : > { %3710 = vmatpush1.bf16.msra.mxu1 %v6095_v0  ;;  %3670 = vmatprep.subr.bf16.mxu0 %v6100_v1  ;;  %v6193_v0 = vld [vmem:[%s6932_s23 + $0x7fc] ss:$248 sps:$4 sm:$0xff]   ;;  %v6188_v1 = vld [vmem:[%s6932_s23 + $0x7f0] ss:$248 sps:$4 sm:$0xff]  }
  0x4e   : > { %3711 = vmatprep.subr.bf16.mxu1 %v6103_v3  ;;  %v6191_v3 = vld [vmem:[%s6932_s23 + $0x7f8] ss:$248 sps:$4 sm:$0xff]  }
  0x50   : > { %3671 = vmatpush1.bf16.msra.mxu0 %v6098_v4  ;;  %v6196_v4 = vld [vmem:[%s6932_s23 + $0x604] ss:$248 sps:$4 sm:$0xff]  }
  0x51   : > { %3712 = vmatpush1.bf16.msra.mxu1 %v6101_v5  ;;  %3672 = vmatprep.subr.bf16.mxu0 %v6106_v6  ;;  %v6199_v5 = vld [vmem:[%s6932_s23 + $0x60c] ss:$248 sps:$4 sm:$0xff]   ;;  %v6194_v6 = vld [vmem:[%s6932_s23 + $0x600] ss:$248 sps:$4 sm:$0xff]  }
  0x52   : > { %3713 = vmatprep.subr.bf16.mxu1 %v6109_v7  ;;  %v6197_v7 = vld [vmem:[%s6932_s23 + $0x608] ss:$248 sps:$4 sm:$0xff]  }
  0x54   : > { %3673 = vmatpush1.bf16.msra.mxu0 %v6104_v8  ;;  %v6202_v8 = vld [vmem:[%s6932_s23 + $0x414] ss:$248 sps:$4 sm:$0xff]  }
  0x55   : > { %3714 = vmatpush1.bf16.msra.mxu1 %v6107_v9  ;;  %3688 = vmatprep.subr.bf16.mxu0 %v6112_v10  ;;  %v6205_v9 = vld [vmem:[%s6932_s23 + $0x41c] ss:$248 sps:$4 sm:$0xff]   ;;  %v6200_v10 = vld [vmem:[%s6932_s23 + $0x410] ss:$248 sps:$4 sm:$0xff]  }
  0x56   : > { %3729 = vmatprep.subr.bf16.mxu1 %v6115_v11  ;;  %v6203_v11 = vld [vmem:[%s6932_s23 + $0x418] ss:$248 sps:$4 sm:$0xff]  }
  0x58   : > { %3689 = vmatpush2.bf16.msra.mxu0 %v6110_v12  ;;  %v6208_v12 = vld [vmem:[%s6932_s23 + $0x224] ss:$248 sps:$4 sm:$0xff]  }
  0x59   : > { %3730 = vmatpush2.bf16.msra.mxu1 %v6113_v13  ;;  %3740 = vmatprep.subr.bf16.mxu0 %v6118_v14  ;;  %v6211_v13 = vld [vmem:[%s6932_s23 + $0x22c] ss:$248 sps:$4 sm:$0xff]   ;;  %v6206_v14 = vld [vmem:[%s6932_s23 + $0x220] ss:$248 sps:$4 sm:$0xff]  }
  0x5a   : > { %3781 = vmatprep.subr.bf16.mxu1 %v6121_v15  ;;  %v6209_v15 = vld [vmem:[%s6932_s23 + $0x228] ss:$248 sps:$4 sm:$0xff]  }
  0x5b   : > { %3691 = vmatmul.mubr.bf16.vlgmr.msra.gmra.mxu0 %v6974_v42 }
  0x5c   : > { %3732 = vmatmul.mubr.bf16.vlgmr.msra.gmra.mxu1 %v6974_v42  ;;  %3741 = vmatpush1.bf16.msra.mxu0 %v6116_v16  ;;  %v6214_v16 = vld [vmem:[%s6932_s23 + $0x34] ss:$248 sps:$4 sm:$0xff]  }
  0x5d   : > { %3782 = vmatpush1.bf16.msra.mxu1 %v6119_v17  ;;  %3742 = vmatprep.subr.bf16.mxu0 %v6124_v18  ;;  %v6217_v17 = vld [vmem:[%s6932_s23 + $0x3c] ss:$248 sps:$4 sm:$0xff]   ;;  %v6212_v18 = vld [vmem:[%s6932_s23 + $0x30] ss:$248 sps:$4 sm:$0xff]  }
  0x5e   : > { %3783 = vmatprep.subr.bf16.mxu1 %v6127_v19  ;;  %5949 = vmatprep.mubr.msk.bf16.mxu0 %vm3572_vm0, %v6920_v2  ;;  %v6215_v19 = vld [vmem:[%s6932_s23 + $0x38] ss:$248 sps:$4 sm:$0xff]  }
  0x5f   : > { %5950 = vmatprep.mubr.msk.bf16.mxu1 %vm3572_vm0, %v6920_v2 }
  0x60   : > { %3743 = vmatpush1.bf16.msra.mxu0 %v6122_v20  ;;  %v6220_v20 = vld [vmem:[%s6932_s23 + $0xfb4] ss:$248 sps:$4 sm:$0xff]  }
  0x61   : > { %3784 = vmatpush1.bf16.msra.mxu1 %v6125_v21  ;;  %3744 = vmatprep.subr.bf16.mxu0 %v6130_v22  ;;  %v6223_v21 = vld [vmem:[%s6932_s23 + $0xfbc] ss:$248 sps:$4 sm:$0xff]   ;;  %v6218_v22 = vld [vmem:[%s6932_s23 + $0xfb0] ss:$248 sps:$4 sm:$0xff]  }
  0x62   : > { %3785 = vmatprep.subr.bf16.mxu1 %v6133_v23  ;;  %v6221_v23 = vld [vmem:[%s6932_s23 + $0xfb8] ss:$248 sps:$4 sm:$0xff]  }
  0x64   : > { %3745 = vmatpush1.bf16.msra.mxu0 %v6128_v24  ;;  %v6226_v24 = vld [vmem:[%s6932_s23 + $0xdd4] ss:$248 sps:$4 sm:$0xff]  }
  0x65   : > { %3786 = vmatpush1.bf16.msra.mxu1 %v6131_v25  ;;  %3746 = vmatprep.subr.bf16.mxu0 %v6136_v26  ;;  %v6229_v25 = vld [vmem:[%s6932_s23 + $0xddc] ss:$248 sps:$4 sm:$0xff]   ;;  %v6224_v26 = vld [vmem:[%s6932_s23 + $0xdd0] ss:$248 sps:$4 sm:$0xff]  }
  0x66   : > { %3787 = vmatprep.subr.bf16.mxu1 %v6139_v27  ;;  %v6227_v27 = vld [vmem:[%s6932_s23 + $0xdd8] ss:$248 sps:$4 sm:$0xff]  }
  0x68   : > { %3747 = vmatpush1.bf16.msra.mxu0 %v6134_v28  ;;  %v6232_v28 = vld [vmem:[%s6932_s23 + $0xbe4] ss:$248 sps:$4 sm:$0xff]  }
  0x69   : > { %3788 = vmatpush1.bf16.msra.mxu1 %v6137_v29  ;;  %3748 = vmatprep.subr.bf16.mxu0 %v6142_v30  ;;  %v6235_v29 = vld [vmem:[%s6932_s23 + $0xbec] ss:$248 sps:$4 sm:$0xff]   ;;  %v6230_v30 = vld [vmem:[%s6932_s23 + $0xbe0] ss:$248 sps:$4 sm:$0xff]  }
  0x6a   : > { %3789 = vmatprep.subr.bf16.mxu1 %v6145_v31  ;;  %v6233_v31 = vld [vmem:[%s6932_s23 + $0xbe8] ss:$248 sps:$4 sm:$0xff]  }
  0x6c   : > { %3749 = vmatpush1.bf16.msra.mxu0 %v6140_v32  ;;  %v6238_v32 = vld [vmem:[%s6932_s23 + $0x9f4] ss:$248 sps:$4 sm:$0xff]  }
  0x6d   : > { %3790 = vmatpush1.bf16.msra.mxu1 %v6143_v33  ;;  %3750 = vmatprep.subr.bf16.mxu0 %v6148_v34  ;;  %v6241_v33 = vld [vmem:[%s6932_s23 + $0x9fc] ss:$248 sps:$4 sm:$0xff]   ;;  %v6236_v34 = vld [vmem:[%s6932_s23 + $0x9f0] ss:$248 sps:$4 sm:$0xff]  }
  0x6e   : > { %3791 = vmatprep.subr.bf16.mxu1 %v6151_v35  ;;  %v6239_v35 = vld [vmem:[%s6932_s23 + $0x9f8] ss:$248 sps:$4 sm:$0xff]  }
  0x70   : > { %3751 = vmatpush1.bf16.msra.mxu0 %v6146_v36  ;;  %v6244_v36 = vld [vmem:[%s6932_s23 + $0x804] ss:$248 sps:$4 sm:$0xff]  }
  0x71   : > { %3792 = vmatpush1.bf16.msra.mxu1 %v6149_v37  ;;  %3752 = vmatprep.subr.bf16.mxu0 %v6154_v38  ;;  %v6247_v37 = vld [vmem:[%s6932_s23 + $0x80c] ss:$248 sps:$4 sm:$0xff]   ;;  %v6242_v38 = vld [vmem:[%s6932_s23 + $0x800] ss:$248 sps:$4 sm:$0xff]  }
  0x72   : > { %3793 = vmatprep.subr.bf16.mxu1 %v6157_v39  ;;  %v6245_v39 = vld [vmem:[%s6932_s23 + $0x808] ss:$248 sps:$4 sm:$0xff]  }
  0x74   : > { %3753 = vmatpush1.bf16.msra.mxu0 %v6152_v40  ;;  %v6250_v40 = vld [vmem:[%s6932_s23 + $0x614] ss:$248 sps:$4 sm:$0xff]  }
  0x75   : > { %3794 = vmatpush1.bf16.msra.mxu1 %v6155_v41  ;;  %3754 = vmatprep.subr.bf16.mxu0 %v6160_v43  ;;  %v6253_v41 = vld [vmem:[%s6932_s23 + $0x61c] ss:$248 sps:$4 sm:$0xff]   ;;  %v6248_v43 = vld [vmem:[%s6932_s23 + $0x610] ss:$248 sps:$4 sm:$0xff]  }
  0x76   : > { %3795 = vmatprep.subr.bf16.mxu1 %v6163_v44  ;;  %v6251_v44 = vld [vmem:[%s6932_s23 + $0x618] ss:$248 sps:$4 sm:$0xff]  }
  0x78   : > { %3755 = vmatpush1.bf16.msra.mxu0 %v6158_v45  ;;  %v6256_v45 = vld [vmem:[%s6932_s23 + $0x424] ss:$248 sps:$4 sm:$0xff]  }
  0x79   : > { %3796 = vmatpush1.bf16.msra.mxu1 %v6161_v46  ;;  %3770 = vmatprep.subr.bf16.mxu0 %v6166_v47  ;;  %v6259_v46 = vld [vmem:[%s6932_s23 + $0x42c] ss:$248 sps:$4 sm:$0xff]   ;;  %v6254_v47 = vld [vmem:[%s6932_s23 + $0x420] ss:$248 sps:$4 sm:$0xff]  }
  0x7a   : > { %3811 = vmatprep.subr.bf16.mxu1 %v6169_v48  ;;  %v6257_v48 = vld [vmem:[%s6932_s23 + $0x428] ss:$248 sps:$4 sm:$0xff]  }
  0x7c   : > { %3771 = vmatpush2.bf16.msra.mxu0 %v6164_v49  ;;  %v6262_v49 = vld [vmem:[%s6932_s23 + $0x234] ss:$248 sps:$4 sm:$0xff]  }
  0x7d   : > { %3812 = vmatpush2.bf16.msra.mxu1 %v6167_v50  ;;  %3822 = vmatprep.subr.bf16.mxu0 %v6172_v51  ;;  %v6265_v50 = vld [vmem:[%s6932_s23 + $0x23c] ss:$248 sps:$4 sm:$0xff]   ;;  %v6260_v51 = vld [vmem:[%s6932_s23 + $0x230] ss:$248 sps:$4 sm:$0xff]  }
  0x7e   : > { %3863 = vmatprep.subr.bf16.mxu1 %v6175_v52  ;;  %v6263_v52 = vld [vmem:[%s6932_s23 + $0x238] ss:$248 sps:$4 sm:$0xff]  }
  0x7f   : > { %3773 = vmatmul.mubr.bf16.vlgmr.msra.gmra.mxu0 %v6974_v42 }
  0x80   : > { %3814 = vmatmul.mubr.bf16.vlgmr.msra.gmra.mxu1 %v6974_v42  ;;  %3823 = vmatpush1.bf16.msra.mxu0 %v6170_v53  ;;  %v6268_v53 = vld [vmem:[%s6932_s23 + $0x44] ss:$248 sps:$4 sm:$0xff]  }
  0x81   : > { %3864 = vmatpush1.bf16.msra.mxu1 %v6173_v54  ;;  %3824 = vmatprep.subr.bf16.mxu0 %v6178_v55  ;;  %v6271_v54 = vld [vmem:[%s6932_s23 + $0x4c] ss:$248 sps:$4 sm:$0xff]   ;;  %v6266_v55 = vld [vmem:[%s6932_s23 + $0x40] ss:$248 sps:$4 sm:$0xff]  }
  0x82   : > { %3865 = vmatprep.subr.bf16.mxu1 %v6181_v56  ;;  %5951 = vmatprep.mubr.msk.bf16.mxu0 %vm3572_vm0, %v6920_v2  ;;  %v6269_v56 = vld [vmem:[%s6932_s23 + $0x48] ss:$248 sps:$4 sm:$0xff]  }
  0x83   : > { %5952 = vmatprep.mubr.msk.bf16.mxu1 %vm3572_vm0, %v6920_v2 }
  0x84   : > { %3825 = vmatpush1.bf16.msra.mxu0 %v6176_v57  ;;  %v6274_v57 = vld [vmem:[%s6932_s23 + $0xfc4] ss:$248 sps:$4 sm:$0xff]  }
  0x85   : > { %3866 = vmatpush1.bf16.msra.mxu1 %v6179_v58  ;;  %3826 = vmatprep.subr.bf16.mxu0 %v6184_v59  ;;  %v6277_v58 = vld [vmem:[%s6932_s23 + $0xfcc] ss:$248 sps:$4 sm:$0xff]   ;;  %v6272_v59 = vld [vmem:[%s6932_s23 + $0xfc0] ss:$248 sps:$4 sm:$0xff]  }
  0x86   : > { %3867 = vmatprep.subr.bf16.mxu1 %v6187_v60  ;;  %v6275_v60 = vld [vmem:[%s6932_s23 + $0xfc8] ss:$248 sps:$4 sm:$0xff]  }
  0x88   : > { %3827 = vmatpush1.bf16.msra.mxu0 %v6182_v61  ;;  %v6280_v61 = vld [vmem:[%s6932_s23 + $0xde4] ss:$248 sps:$4 sm:$0xff]  }
  0x89   : > { %3868 = vmatpush1.bf16.msra.mxu1 %v6185_v62  ;;  %3828 = vmatprep.subr.bf16.mxu0 %v6190_v63  ;;  %v6283_v62 = vld [vmem:[%s6932_s23 + $0xdec] ss:$248 sps:$4 sm:$0xff]   ;;  %v6278_v63 = vld [vmem:[%s6932_s23 + $0xde0] ss:$248 sps:$4 sm:$0xff]  }
  0x8a   : > { %3869 = vmatprep.subr.bf16.mxu1 %v6193_v0  ;;  %v6281_v0 = vld [vmem:[%s6932_s23 + $0xde8] ss:$248 sps:$4 sm:$0xff]  }
  0x8c   : > { %3829 = vmatpush1.bf16.msra.mxu0 %v6188_v1  ;;  %v6286_v1 = vld [vmem:[%s6932_s23 + $0xbf4] ss:$248 sps:$4 sm:$0xff]  }
  0x8d   : > { %3870 = vmatpush1.bf16.msra.mxu1 %v6191_v3  ;;  %3830 = vmatprep.subr.bf16.mxu0 %v6196_v4  ;;  %v6289_v3 = vld [vmem:[%s6932_s23 + $0xbfc] ss:$248 sps:$4 sm:$0xff]   ;;  %v6284_v4 = vld [vmem:[%s6932_s23 + $0xbf0] ss:$248 sps:$4 sm:$0xff]  }
  0x8e   : > { %3871 = vmatprep.subr.bf16.mxu1 %v6199_v5  ;;  %v6287_v5 = vld [vmem:[%s6932_s23 + $0xbf8] ss:$248 sps:$4 sm:$0xff]  }
  0x90   : > { %3831 = vmatpush1.bf16.msra.mxu0 %v6194_v6  ;;  %v6292_v6 = vld [vmem:[%s6932_s23 + $0xa04] ss:$248 sps:$4 sm:$0xff]  }
  0x91   : > { %3872 = vmatpush1.bf16.msra.mxu1 %v6197_v7  ;;  %3832 = vmatprep.subr.bf16.mxu0 %v6202_v8  ;;  %v6295_v7 = vld [vmem:[%s6932_s23 + $0xa0c] ss:$248 sps:$4 sm:$0xff]   ;;  %v6290_v8 = vld [vmem:[%s6932_s23 + $0xa00] ss:$248 sps:$4 sm:$0xff]  }
  0x92   : > { %3873 = vmatprep.subr.bf16.mxu1 %v6205_v9  ;;  %v6293_v9 = vld [vmem:[%s6932_s23 + $0xa08] ss:$248 sps:$4 sm:$0xff]  }
  0x94   : > { %3833 = vmatpush1.bf16.msra.mxu0 %v6200_v10  ;;  %v6298_v10 = vld [vmem:[%s6932_s23 + $0x814] ss:$248 sps:$4 sm:$0xff]  }
  0x95   : > { %3874 = vmatpush1.bf16.msra.mxu1 %v6203_v11  ;;  %3834 = vmatprep.subr.bf16.mxu0 %v6208_v12  ;;  %v6301_v11 = vld [vmem:[%s6932_s23 + $0x81c] ss:$248 sps:$4 sm:$0xff]   ;;  %v6296_v12 = vld [vmem:[%s6932_s23 + $0x810] ss:$248 sps:$4 sm:$0xff]  }
  0x96   : > { %3875 = vmatprep.subr.bf16.mxu1 %v6211_v13  ;;  %v6299_v13 = vld [vmem:[%s6932_s23 + $0x818] ss:$248 sps:$4 sm:$0xff]  }
  0x98   : > { %3835 = vmatpush1.bf16.msra.mxu0 %v6206_v14  ;;  %v6304_v14 = vld [vmem:[%s6932_s23 + $0x624] ss:$248 sps:$4 sm:$0xff]  }
  0x99   : > { %3876 = vmatpush1.bf16.msra.mxu1 %v6209_v15  ;;  %3836 = vmatprep.subr.bf16.mxu0 %v6214_v16  ;;  %v6307_v15 = vld [vmem:[%s6932_s23 + $0x62c] ss:$248 sps:$4 sm:$0xff]   ;;  %v6302_v16 = vld [vmem:[%s6932_s23 + $0x620] ss:$248 sps:$4 sm:$0xff]  }
  0x9a   : > { %3877 = vmatprep.subr.bf16.mxu1 %v6217_v17  ;;  %v6305_v17 = vld [vmem:[%s6932_s23 + $0x628] ss:$248 sps:$4 sm:$0xff]  }
  0x9c   : > { %3837 = vmatpush1.bf16.msra.mxu0 %v6212_v18  ;;  %v6310_v18 = vld [vmem:[%s6932_s23 + $0x434] ss:$248 sps:$4 sm:$0xff]  }
  0x9d   : > { %3878 = vmatpush1.bf16.msra.mxu1 %v6215_v19  ;;  %3852 = vmatprep.subr.bf16.mxu0 %v6220_v20  ;;  %v6313_v19 = vld [vmem:[%s6932_s23 + $0x43c] ss:$248 sps:$4 sm:$0xff]   ;;  %v6308_v20 = vld [vmem:[%s6932_s23 + $0x430] ss:$248 sps:$4 sm:$0xff]  }
  0x9e   : > { %3893 = vmatprep.subr.bf16.mxu1 %v6223_v21  ;;  %v6311_v21 = vld [vmem:[%s6932_s23 + $0x438] ss:$248 sps:$4 sm:$0xff]  }
  0xa0   : > { %3853 = vmatpush2.bf16.msra.mxu0 %v6218_v22  ;;  %v6316_v22 = vld [vmem:[%s6932_s23 + $0x244] ss:$248 sps:$4 sm:$0xff]  }
  0xa1   : > { %3894 = vmatpush2.bf16.msra.mxu1 %v6221_v23  ;;  %3904 = vmatprep.subr.bf16.mxu0 %v6226_v24  ;;  %v6319_v23 = vld [vmem:[%s6932_s23 + $0x24c] ss:$248 sps:$4 sm:$0xff]   ;;  %v6314_v24 = vld [vmem:[%s6932_s23 + $0x240] ss:$248 sps:$4 sm:$0xff]  }
  0xa2   : > { %3945 = vmatprep.subr.bf16.mxu1 %v6229_v25  ;;  %v6317_v25 = vld [vmem:[%s6932_s23 + $0x248] ss:$248 sps:$4 sm:$0xff]  }
  0xa3   : > { %3855 = vmatmul.mubr.bf16.vlgmr.msra.gmra.mxu0 %v6974_v42 }
  0xa4   : > { %3896 = vmatmul.mubr.bf16.vlgmr.msra.gmra.mxu1 %v6974_v42  ;;  %3905 = vmatpush1.bf16.msra.mxu0 %v6224_v26  ;;  %v6322_v26 = vld [vmem:[%s6932_s23 + $0x54] ss:$248 sps:$4 sm:$0xff]  }
  0xa5   : > { %3946 = vmatpush1.bf16.msra.mxu1 %v6227_v27  ;;  %3906 = vmatprep.subr.bf16.mxu0 %v6232_v28  ;;  %v6325_v27 = vld [vmem:[%s6932_s23 + $0x5c] ss:$248 sps:$4 sm:$0xff]   ;;  %v6320_v28 = vld [vmem:[%s6932_s23 + $0x50] ss:$248 sps:$4 sm:$0xff]  }
  0xa6   : > { %3947 = vmatprep.subr.bf16.mxu1 %v6235_v29  ;;  %5953 = vmatprep.mubr.msk.bf16.mxu0 %vm3572_vm0, %v6920_v2  ;;  %v6323_v29 = vld [vmem:[%s6932_s23 + $0x58] ss:$248 sps:$4 sm:$0xff]  }
  0xa7   : > { %5954 = vmatprep.mubr.msk.bf16.mxu1 %vm3572_vm0, %v6920_v2 }
  0xa8   : > { %3907 = vmatpush1.bf16.msra.mxu0 %v6230_v30  ;;  %v6328_v30 = vld [vmem:[%s6932_s23 + $0xfd4] ss:$248 sps:$4 sm:$0xff]  }
  0xa9   : > { %3948 = vmatpush1.bf16.msra.mxu1 %v6233_v31  ;;  %3908 = vmatprep.subr.bf16.mxu0 %v6238_v32  ;;  %v6331_v31 = vld [vmem:[%s6932_s23 + $0xfdc] ss:$248 sps:$4 sm:$0xff]   ;;  %v6326_v32 = vld [vmem:[%s6932_s23 + $0xfd0] ss:$248 sps:$4 sm:$0xff]  }
  0xaa   : > { %3949 = vmatprep.subr.bf16.mxu1 %v6241_v33  ;;  %v6329_v33 = vld [vmem:[%s6932_s23 + $0xfd8] ss:$248 sps:$4 sm:$0xff]  }
  0xac   : > { %3909 = vmatpush1.bf16.msra.mxu0 %v6236_v34  ;;  %v6334_v34 = vld [vmem:[%s6932_s23 + $0xdf4] ss:$248 sps:$4 sm:$0xff]  }
  0xad   : > { %3950 = vmatpush1.bf16.msra.mxu1 %v6239_v35  ;;  %3910 = vmatprep.subr.bf16.mxu0 %v6244_v36  ;;  %v6337_v35 = vld [vmem:[%s6932_s23 + $0xdfc] ss:$248 sps:$4 sm:$0xff]   ;;  %v6332_v36 = vld [vmem:[%s6932_s23 + $0xdf0] ss:$248 sps:$4 sm:$0xff]  }
  0xae   : > { %3951 = vmatprep.subr.bf16.mxu1 %v6247_v37  ;;  %v6335_v37 = vld [vmem:[%s6932_s23 + $0xdf8] ss:$248 sps:$4 sm:$0xff]  }
  0xb0   : > { %3911 = vmatpush1.bf16.msra.mxu0 %v6242_v38  ;;  %v6340_v38 = vld [vmem:[%s6932_s23 + $0xc04] ss:$248 sps:$4 sm:$0xff]  }
  0xb1   : > { %3952 = vmatpush1.bf16.msra.mxu1 %v6245_v39  ;;  %3912 = vmatprep.subr.bf16.mxu0 %v6250_v40  ;;  %v6343_v39 = vld [vmem:[%s6932_s23 + $0xc0c] ss:$248 sps:$4 sm:$0xff]   ;;  %v6338_v40 = vld [vmem:[%s6932_s23 + $0xc00] ss:$248 sps:$4 sm:$0xff]  }
  0xb2   : > { %3953 = vmatprep.subr.bf16.mxu1 %v6253_v41  ;;  %v6341_v41 = vld [vmem:[%s6932_s23 + $0xc08] ss:$248 sps:$4 sm:$0xff]  }
  0xb4   : > { %3913 = vmatpush1.bf16.msra.mxu0 %v6248_v43  ;;  %v6346_v43 = vld [vmem:[%s6932_s23 + $0xa14] ss:$248 sps:$4 sm:$0xff]  }
  0xb5   : > { %3954 = vmatpush1.bf16.msra.mxu1 %v6251_v44  ;;  %3914 = vmatprep.subr.bf16.mxu0 %v6256_v45  ;;  %v6349_v44 = vld [vmem:[%s6932_s23 + $0xa1c] ss:$248 sps:$4 sm:$0xff]   ;;  %v6344_v45 = vld [vmem:[%s6932_s23 + $0xa10] ss:$248 sps:$4 sm:$0xff]  }
  0xb6   : > { %3955 = vmatprep.subr.bf16.mxu1 %v6259_v46  ;;  %v6347_v46 = vld [vmem:[%s6932_s23 + $0xa18] ss:$248 sps:$4 sm:$0xff]  }
  0xb8   : > { %3915 = vmatpush1.bf16.msra.mxu0 %v6254_v47  ;;  %v6352_v47 = vld [vmem:[%s6932_s23 + $0x824] ss:$248 sps:$4 sm:$0xff]  }
  0xb9   : > { %3956 = vmatpush1.bf16.msra.mxu1 %v6257_v48  ;;  %3916 = vmatprep.subr.bf16.mxu0 %v6262_v49  ;;  %v6355_v48 = vld [vmem:[%s6932_s23 + $0x82c] ss:$248 sps:$4 sm:$0xff]   ;;  %v6350_v49 = vld [vmem:[%s6932_s23 + $0x820] ss:$248 sps:$4 sm:$0xff]  }
  0xba   : > { %3957 = vmatprep.subr.bf16.mxu1 %v6265_v50  ;;  %v6353_v50 = vld [vmem:[%s6932_s23 + $0x828] ss:$248 sps:$4 sm:$0xff]  }
  0xbc   : > { %3917 = vmatpush1.bf16.msra.mxu0 %v6260_v51  ;;  %v6358_v51 = vld [vmem:[%s6932_s23 + $0x634] ss:$248 sps:$4 sm:$0xff]  }
  0xbd   : > { %3958 = vmatpush1.bf16.msra.mxu1 %v6263_v52  ;;  %3918 = vmatprep.subr.bf16.mxu0 %v6268_v53  ;;  %v6361_v52 = vld [vmem:[%s6932_s23 + $0x63c] ss:$248 sps:$4 sm:$0xff]  }
  0xbe   : > { %3959 = vmatprep.subr.bf16.mxu1 %v6271_v54 }
  0xc0   : > { %3919 = vmatpush1.bf16.msra.mxu0 %v6266_v55  ;;  %v6356_v55 = vld [vmem:[%s6932_s23 + $0x630] ss:$248 sps:$4 sm:$0xff]  }
  0xc1   : > { %3960 = vmatpush1.bf16.msra.mxu1 %v6269_v56  ;;  %3934 = vmatprep.subr.bf16.mxu0 %v6274_v57  ;;  %v6359_v56 = vld [vmem:[%s6932_s23 + $0x638] ss:$248 sps:$4 sm:$0xff]   ;;  %v6364_v57 = vld [vmem:[%s6932_s23 + $0x444] ss:$248 sps:$4 sm:$0xff]  }
  0xc2   : > { %3975 = vmatprep.subr.bf16.mxu1 %v6277_v58 }
  0xc4   : > { %3935 = vmatpush2.bf16.msra.mxu0 %v6272_v59 }
  0xc5   : > { %3976 = vmatpush2.bf16.msra.mxu1 %v6275_v60  ;;  %3986 = vmatprep.subr.bf16.mxu0 %v6280_v61  ;;  %v6367_v60 = vld [vmem:[%s6932_s23 + $0x44c] ss:$248 sps:$4 sm:$0xff]  }
  0xc6   : > { %4027 = vmatprep.subr.bf16.mxu1 %v6283_v62  ;;  %v6362_v62 = vld [vmem:[%s6932_s23 + $0x440] ss:$248 sps:$4 sm:$0xff]  }
  0xc7   : > { %3937 = vmatmul.mubr.bf16.vlgmr.msra.gmra.mxu0 %v6974_v42 }
  0xc8   : > { %3978 = vmatmul.mubr.bf16.vlgmr.msra.gmra.mxu1 %v6974_v42  ;;  %3987 = vmatpush1.bf16.msra.mxu0 %v6278_v63 }
  0xc9   : > { %4028 = vmatpush1.bf16.msra.mxu1 %v6281_v0  ;;  %3988 = vmatprep.subr.bf16.mxu0 %v6286_v1  ;;  %v6365_v0 = vld [vmem:[%s6932_s23 + $0x448] ss:$248 sps:$4 sm:$0xff]  }
  0xca   : > { %4029 = vmatprep.subr.bf16.mxu1 %v6289_v3  ;;  %5955 = vmatprep.mubr.msk.bf16.mxu0 %vm3572_vm0, %v6920_v2  ;;  %v6370_v3 = vld [vmem:[%s6932_s23 + $0x254] ss:$248 sps:$4 sm:$0xff]  }
  0xcb   : > { %5956 = vmatprep.mubr.msk.bf16.mxu1 %vm3572_vm0, %v6920_v2 }
  0xcc   : > { %3989 = vmatpush1.bf16.msra.mxu0 %v6284_v4  ;;  %v6373_v4 = vld [vmem:[%s6932_s23 + $0x25c] ss:$248 sps:$4 sm:$0xff]  }
  0xcd   : > { %4030 = vmatpush1.bf16.msra.mxu1 %v6287_v5  ;;  %3990 = vmatprep.subr.bf16.mxu0 %v6292_v6  ;;  %v6368_v6 = vld [vmem:[%s6932_s23 + $0x250] ss:$248 sps:$4 sm:$0xff]  }
  0xce   : > { %4031 = vmatprep.subr.bf16.mxu1 %v6295_v7  ;;  %v6371_v7 = vld [vmem:[%s6932_s23 + $0x258] ss:$248 sps:$4 sm:$0xff]  }
  0xd0   : > { %3991 = vmatpush1.bf16.msra.mxu0 %v6290_v8  ;;  %v6376_v8 = vld [vmem:[%s6932_s23 + $0x64] ss:$248 sps:$4 sm:$0xff]  }
  0xd1   : > { %4032 = vmatpush1.bf16.msra.mxu1 %v6293_v9  ;;  %3992 = vmatprep.subr.bf16.mxu0 %v6298_v10  ;;  %v6379_v9 = vld [vmem:[%s6932_s23 + $0x6c] ss:$248 sps:$4 sm:$0xff]   ;;  %v6374_v10 = vld [vmem:[%s6932_s23 + $0x60] ss:$248 sps:$4 sm:$0xff]  }
  0xd2   : > { %4033 = vmatprep.subr.bf16.mxu1 %v6301_v11  ;;  %v6377_v11 = vld [vmem:[%s6932_s23 + $0x68] ss:$248 sps:$4 sm:$0xff]  }
  0xd4   : > { %3993 = vmatpush1.bf16.msra.mxu0 %v6296_v12  ;;  %v6382_v12 = vld [vmem:[%s6932_s23 + $0xfe4] ss:$248 sps:$4 sm:$0xff]  }
  0xd5   : > { %4034 = vmatpush1.bf16.msra.mxu1 %v6299_v13  ;;  %3994 = vmatprep.subr.bf16.mxu0 %v6304_v14  ;;  %v6385_v13 = vld [vmem:[%s6932_s23 + $0xfec] ss:$248 sps:$4 sm:$0xff]   ;;  %v6380_v14 = vld [vmem:[%s6932_s23 + $0xfe0] ss:$248 sps:$4 sm:$0xff]  }
  0xd6   : > { %4035 = vmatprep.subr.bf16.mxu1 %v6307_v15  ;;  %v6383_v15 = vld [vmem:[%s6932_s23 + $0xfe8] ss:$248 sps:$4 sm:$0xff]  }
  0xd8   : > { %3995 = vmatpush1.bf16.msra.mxu0 %v6302_v16  ;;  %v6388_v16 = vld [vmem:[%s6932_s23 + $0xe04] ss:$248 sps:$4 sm:$0xff]  }
  0xd9   : > { %4036 = vmatpush1.bf16.msra.mxu1 %v6305_v17  ;;  %3996 = vmatprep.subr.bf16.mxu0 %v6310_v18  ;;  %v6391_v17 = vld [vmem:[%s6932_s23 + $0xe0c] ss:$248 sps:$4 sm:$0xff]   ;;  %v6386_v18 = vld [vmem:[%s6932_s23 + $0xe00] ss:$248 sps:$4 sm:$0xff]  }
  0xda   : > { %4037 = vmatprep.subr.bf16.mxu1 %v6313_v19  ;;  %v6389_v19 = vld [vmem:[%s6932_s23 + $0xe08] ss:$248 sps:$4 sm:$0xff]  }
  0xdc   : > { %3997 = vmatpush1.bf16.msra.mxu0 %v6308_v20  ;;  %v6394_v20 = vld [vmem:[%s6932_s23 + $0xc14] ss:$248 sps:$4 sm:$0xff]  }
  0xdd   : > { %4038 = vmatpush1.bf16.msra.mxu1 %v6311_v21  ;;  %3998 = vmatprep.subr.bf16.mxu0 %v6316_v22  ;;  %v6397_v21 = vld [vmem:[%s6932_s23 + $0xc1c] ss:$248 sps:$4 sm:$0xff]   ;;  %v6392_v22 = vld [vmem:[%s6932_s23 + $0xc10] ss:$248 sps:$4 sm:$0xff]  }
  0xde   : > { %4039 = vmatprep.subr.bf16.mxu1 %v6319_v23  ;;  %v6395_v23 = vld [vmem:[%s6932_s23 + $0xc18] ss:$248 sps:$4 sm:$0xff]  }
  0xe0   : > { %3999 = vmatpush1.bf16.msra.mxu0 %v6314_v24  ;;  %v6400_v24 = vld [vmem:[%s6932_s23 + $0xa24] ss:$248 sps:$4 sm:$0xff]  }
  0xe1   : > { %4040 = vmatpush1.bf16.msra.mxu1 %v6317_v25  ;;  %4000 = vmatprep.subr.bf16.mxu0 %v6322_v26  ;;  %v6403_v25 = vld [vmem:[%s6932_s23 + $0xa2c] ss:$248 sps:$4 sm:$0xff]   ;;  %v6398_v26 = vld [vmem:[%s6932_s23 + $0xa20] ss:$248 sps:$4 sm:$0xff]  }
  0xe2   : > { %4041 = vmatprep.subr.bf16.mxu1 %v6325_v27  ;;  %v6401_v27 = vld [vmem:[%s6932_s23 + $0xa28] ss:$248 sps:$4 sm:$0xff]  }
  0xe4   : > { %4001 = vmatpush1.bf16.msra.mxu0 %v6320_v28  ;;  %v6406_v28 = vld [vmem:[%s6932_s23 + $0x834] ss:$248 sps:$4 sm:$0xff]  }
  0xe5   : > { %4042 = vmatpush1.bf16.msra.mxu1 %v6323_v29  ;;  %4016 = vmatprep.subr.bf16.mxu0 %v6328_v30  ;;  %v6409_v29 = vld [vmem:[%s6932_s23 + $0x83c] ss:$248 sps:$4 sm:$0xff]   ;;  %v6404_v30 = vld [vmem:[%s6932_s23 + $0x830] ss:$248 sps:$4 sm:$0xff]  }
  0xe6   : > { %4057 = vmatprep.subr.bf16.mxu1 %v6331_v31  ;;  %v6407_v31 = vld [vmem:[%s6932_s23 + $0x838] ss:$248 sps:$4 sm:$0xff]  }
  0xe8   : > { %4017 = vmatpush2.bf16.msra.mxu0 %v6326_v32  ;;  %v6412_v32 = vld [vmem:[%s6932_s23 + $0x644] ss:$248 sps:$4 sm:$0xff]  }
  0xe9   : > { %4058 = vmatpush2.bf16.msra.mxu1 %v6329_v33  ;;  %4068 = vmatprep.subr.bf16.mxu0 %v6334_v34  ;;  %v6415_v33 = vld [vmem:[%s6932_s23 + $0x64c] ss:$248 sps:$4 sm:$0xff]   ;;  %v6410_v34 = vld [vmem:[%s6932_s23 + $0x640] ss:$248 sps:$4 sm:$0xff]  }
  0xea   : > { %4109 = vmatprep.subr.bf16.mxu1 %v6337_v35  ;;  %v6413_v35 = vld [vmem:[%s6932_s23 + $0x648] ss:$248 sps:$4 sm:$0xff]  }
  0xeb   : > { %4019 = vmatmul.mubr.bf16.vlgmr.msra.gmra.mxu0 %v6974_v42 }
  0xec   : > { %4060 = vmatmul.mubr.bf16.vlgmr.msra.gmra.mxu1 %v6974_v42  ;;  %4069 = vmatpush1.bf16.msra.mxu0 %v6332_v36 }
  0xed   : > { %4110 = vmatpush1.bf16.msra.mxu1 %v6335_v37  ;;  %4070 = vmatprep.subr.bf16.mxu0 %v6340_v38 }
  0xee   : > { %4111 = vmatprep.subr.bf16.mxu1 %v6343_v39  ;;  %5957 = vmatprep.mubr.msk.bf16.mxu0 %vm3572_vm0, %v6920_v2 }
  0xef   : > { %5958 = vmatprep.mubr.msk.bf16.mxu1 %vm3572_vm0, %v6920_v2 }
  0xf0   : > { %4071 = vmatpush1.bf16.msra.mxu0 %v6338_v40  ;;  %v6418_v40 = vld [vmem:[%s6932_s23 + $0x454] ss:$248 sps:$4 sm:$0xff]  }
  0xf1   : > { %4112 = vmatpush1.bf16.msra.mxu1 %v6341_v41  ;;  %4072 = vmatprep.subr.bf16.mxu0 %v6346_v43  ;;  %v6421_v41 = vld [vmem:[%s6932_s23 + $0x45c] ss:$248 sps:$4 sm:$0xff]  }
  0xf2   : > { %4113 = vmatprep.subr.bf16.mxu1 %v6349_v44 }
  0xf4   : > { %4073 = vmatpush1.bf16.msra.mxu0 %v6344_v45  ;;  %v6416_v45 = vld [vmem:[%s6932_s23 + $0x450] ss:$248 sps:$4 sm:$0xff]  }
  0xf5   : > { %4114 = vmatpush1.bf16.msra.mxu1 %v6347_v46  ;;  %4074 = vmatprep.subr.bf16.mxu0 %v6352_v47  ;;  %v6419_v46 = vld [vmem:[%s6932_s23 + $0x458] ss:$248 sps:$4 sm:$0xff]  }
  0xf6   : > { %4115 = vmatprep.subr.bf16.mxu1 %v6355_v48  ;;  %v6424_v48 = vld [vmem:[%s6932_s23 + $0x264] ss:$248 sps:$4 sm:$0xff]  }
  0xf7   : > { %v7208_v53 = vpop.f32.mrf.mxu0 }
  0xf8   : > { %v7210_v54 = vpop.f32.mrf.mxu1  ;;  %4075 = vmatpush1.bf16.msra.mxu0 %v6350_v49  ;;  %v6427_v49 = vld [vmem:[%s6932_s23 + $0x26c] ss:$248 sps:$4 sm:$0xff]  }
  0xf9   : > { %4116 = vmatpush1.bf16.msra.mxu1 %v6353_v50  ;;  %v7215_v58 = vpop.f32.mrf.mxu0  ;;  %4076 = vmatprep.subr.bf16.mxu0 %v6358_v51  ;;  %v6422_v51 = vld [vmem:[%s6932_s23 + $0x260] ss:$248 sps:$4 sm:$0xff]  }
  0xfa   : > { %4117 = vmatprep.subr.bf16.mxu1 %v6361_v52  ;;  %v7217_v59 = vpop.f32.mrf.mxu1  ;;  %v6425_v52 = vld [vmem:[%s6932_s23 + $0x268] ss:$248 sps:$4 sm:$0xff]  }
  0xfb   : > { %v3614_v61 = vpop.f32.mrf.mxu0 }
  0xfc   : > { %v3655_v63 = vpop.f32.mrf.mxu1  ;;  %4077 = vmatpush1.bf16.msra.mxu0 %v6356_v55  ;;  %v6430_v55 = vld [vmem:[%s6932_s23 + $0x74] ss:$248 sps:$4 sm:$0xff]  }
  0xfd   : > { %4118 = vmatpush1.bf16.msra.mxu1 %v6359_v56  ;;  %v3615_v1 = vpop.f32.mrf.mxu0  ;;  %4078 = vmatprep.subr.bf16.mxu0 %v6364_v57  ;;  %v6433_v56 = vld [vmem:[%s6932_s23 + $0x7c] ss:$248 sps:$4 sm:$0xff]   ;;  %v6428_v57 = vld [vmem:[%s6932_s23 + $0x70] ss:$248 sps:$4 sm:$0xff]  }
  0xfe   : > { %4119 = vmatprep.subr.bf16.mxu1 %v6367_v60  ;;  %v3656_v5 = vpop.f32.mrf.mxu1  ;;  %v6431_v60 = vld [vmem:[%s6932_s23 + $0x78] ss:$248 sps:$4 sm:$0xff]   ;;  %v6436_v61 = vld [vmem:[%s6932_s23 + $0xff4] ss:$248 sps:$4 sm:$0xff]  }
  0xff   : > { %v6434_v63 = vld [vmem:[%s6932_s23 + $0xff0] ss:$248 sps:$4 sm:$0xff]   ;;  %v6442_v1 = vld [vmem:[%s6932_s23 + $0xe14] ss:$248 sps:$4 sm:$0xff]  }
 0x100   : > { %4079 = vmatpush1.bf16.msra.mxu0 %v6362_v62  ;;  %v6439_v62 = vld [vmem:[%s6932_s23 + $0xffc] ss:$248 sps:$4 sm:$0xff]   ;;  %v6443_v5 = vld [vmem:[%s6932_s23 + $0xe18] ss:$248 sps:$4 sm:$0xff]  }
 0x101   : > { %4120 = vmatpush1.bf16.msra.mxu1 %v6365_v0  ;;  %4080 = vmatprep.subr.bf16.mxu0 %v6370_v3  ;;  %v6437_v0 = vld [vmem:[%s6932_s23 + $0xff8] ss:$248 sps:$4 sm:$0xff]   ;;  %v6445_v3 = vld [vmem:[%s6932_s23 + $0xe1c] ss:$248 sps:$4 sm:$0xff]  }
 0x102   : > { %4121 = vmatprep.subr.bf16.mxu1 %v6373_v4  ;;  %v6440_v4 = vld [vmem:[%s6932_s23 + $0xe10] ss:$248 sps:$4 sm:$0xff]  }
 0x104   : > { %4081 = vmatpush1.bf16.msra.mxu0 %v6368_v6  ;;  %v6448_v6 = vld [vmem:[%s6932_s23 + $0xc24] ss:$248 sps:$4 sm:$0xff]  }
 0x105   : > { %4122 = vmatpush1.bf16.msra.mxu1 %v6371_v7  ;;  %4082 = vmatprep.subr.bf16.mxu0 %v6376_v8  ;;  %v6451_v7 = vld [vmem:[%s6932_s23 + $0xc2c] ss:$248 sps:$4 sm:$0xff]   ;;  %v6446_v8 = vld [vmem:[%s6932_s23 + $0xc20] ss:$248 sps:$4 sm:$0xff]  }
 0x106   : > { %4123 = vmatprep.subr.bf16.mxu1 %v6379_v9  ;;  %v6449_v9 = vld [vmem:[%s6932_s23 + $0xc28] ss:$248 sps:$4 sm:$0xff]  }
 0x108   : > { %4083 = vmatpush1.bf16.msra.mxu0 %v6374_v10  ;;  %v6454_v10 = vld [vmem:[%s6932_s23 + $0xa34] ss:$248 sps:$4 sm:$0xff]  }
 0x109   : > { %4124 = vmatpush1.bf16.msra.mxu1 %v6377_v11  ;;  %4098 = vmatprep.subr.bf16.mxu0 %v6382_v12  ;;  %v6457_v11 = vld [vmem:[%s6932_s23 + $0xa3c] ss:$248 sps:$4 sm:$0xff]   ;;  %v6452_v12 = vld [vmem:[%s6932_s23 + $0xa30] ss:$248 sps:$4 sm:$0xff]  }
 0x10a   : > { %4139 = vmatprep.subr.bf16.mxu1 %v6385_v13  ;;  %v6455_v13 = vld [vmem:[%s6932_s23 + $0xa38] ss:$248 sps:$4 sm:$0xff]  }
 0x10c   : > { %4099 = vmatpush2.bf16.msra.mxu0 %v6380_v14  ;;  %v6460_v14 = vld [vmem:[%s6932_s23 + $0x844] ss:$248 sps:$4 sm:$0xff]  }
 0x10d   : > { %4140 = vmatpush2.bf16.msra.mxu1 %v6383_v15  ;;  %4150 = vmatprep.subr.bf16.mxu0 %v6388_v16  ;;  %v6463_v15 = vld [vmem:[%s6932_s23 + $0x84c] ss:$248 sps:$4 sm:$0xff]   ;;  %v6458_v16 = vld [vmem:[%s6932_s23 + $0x840] ss:$248 sps:$4 sm:$0xff]  }
 0x10e   : > { %4191 = vmatprep.subr.bf16.mxu1 %v6391_v17  ;;  %v6461_v17 = vld [vmem:[%s6932_s23 + $0x848] ss:$248 sps:$4 sm:$0xff]  }
 0x10f   : > { %4101 = vmatmul.mubr.bf16.vlgmr.msra.gmra.mxu0 %v6974_v42 }
 0x110   : > { %4142 = vmatmul.mubr.bf16.vlgmr.msra.gmra.mxu1 %v6974_v42  ;;  %4151 = vmatpush1.bf16.msra.mxu0 %v6386_v18  ;;  %v6466_v18 = vld [vmem:[%s6932_s23 + $0x654] ss:$248 sps:$4 sm:$0xff]  }
 0x111   : > { %4192 = vmatpush1.bf16.msra.mxu1 %v6389_v19  ;;  %4152 = vmatprep.subr.bf16.mxu0 %v6394_v20  ;;  %v6469_v19 = vld [vmem:[%s6932_s23 + $0x65c] ss:$248 sps:$4 sm:$0xff]   ;;  %v6464_v20 = vld [vmem:[%s6932_s23 + $0x650] ss:$248 sps:$4 sm:$0xff]  }
 0x112   : > { %4193 = vmatprep.subr.bf16.mxu1 %v6397_v21  ;;  %5959 = vmatprep.mubr.msk.bf16.mxu0 %vm3572_vm0, %v6920_v2  ;;  %v6467_v21 = vld [vmem:[%s6932_s23 + $0x658] ss:$248 sps:$4 sm:$0xff]  }
 0x113   : > { %5960 = vmatprep.mubr.msk.bf16.mxu1 %vm3572_vm0, %v6920_v2 }
 0x114   : > { %4153 = vmatpush1.bf16.msra.mxu0 %v6392_v22 }
 0x115   : > { %4194 = vmatpush1.bf16.msra.mxu1 %v6395_v23  ;;  %4154 = vmatprep.subr.bf16.mxu0 %v6400_v24 }
 0x116   : > { %4195 = vmatprep.subr.bf16.mxu1 %v6403_v25 }
 0x118   : > { %4155 = vmatpush1.bf16.msra.mxu0 %v6398_v26  ;;  %v6472_v26 = vld [vmem:[%s6932_s23 + $0x464] ss:$248 sps:$4 sm:$0xff]  }
 0x119   : > { %4196 = vmatpush1.bf16.msra.mxu1 %v6401_v27  ;;  %4156 = vmatprep.subr.bf16.mxu0 %v6406_v28  ;;  %v6475_v27 = vld [vmem:[%s6932_s23 + $0x46c] ss:$248 sps:$4 sm:$0xff]  }
 0x11a   : > { %4197 = vmatprep.subr.bf16.mxu1 %v6409_v29 }
 0x11b   : > { %v7260_v36 = vpop.f32.mrf.mxu0 }
 0x11c   : > { %v7262_v37 = vpop.f32.mrf.mxu1  ;;  %4157 = vmatpush1.bf16.msra.mxu0 %v6404_v30  ;;  %v6470_v30 = vld [vmem:[%s6932_s23 + $0x460] ss:$248 sps:$4 sm:$0xff]  }
 0x11d   : > { %4198 = vmatpush1.bf16.msra.mxu1 %v6407_v31  ;;  %v7264_v38 = vpop.f32.mrf.mxu0  ;;  %4158 = vmatprep.subr.bf16.mxu0 %v6412_v32  ;;  %v6473_v31 = vld [vmem:[%s6932_s23 + $0x468] ss:$248 sps:$4 sm:$0xff]  }
 0x11e   : > { %4199 = vmatprep.subr.bf16.mxu1 %v6415_v33  ;;  %v7266_v39 = vpop.f32.mrf.mxu1  ;;  %v6478_v33 = vld [vmem:[%s6932_s23 + $0x274] ss:$248 sps:$4 sm:$0xff]  }
 0x11f   : > { %v3696_v43 = vpop.f32.mrf.mxu0 }
 0x120   : > { %v3737_v44 = vpop.f32.mrf.mxu1  ;;  %4159 = vmatpush1.bf16.msra.mxu0 %v6410_v34  ;;  %v6481_v34 = vld [vmem:[%s6932_s23 + $0x27c] ss:$248 sps:$4 sm:$0xff]  }
 0x121   : > { %4200 = vmatpush1.bf16.msra.mxu1 %v6413_v35  ;;  %v3697_v47 = vpop.f32.mrf.mxu0  ;;  %4160 = vmatprep.subr.bf16.mxu0 %v6418_v40  ;;  %v6476_v40 = vld [vmem:[%s6932_s23 + $0x270] ss:$248 sps:$4 sm:$0xff]   ;;  %v6484_v43 = vld [vmem:[%s6932_s23 + $0x84] ss:$248 sps:$4 sm:$0xff]  }
 0x122   : > { %4201 = vmatprep.subr.bf16.mxu1 %v6421_v41  ;;  %v3738_v50 = vpop.f32.mrf.mxu1  ;;  %v6479_v41 = vld [vmem:[%s6932_s23 + $0x278] ss:$248 sps:$4 sm:$0xff]   ;;  %v6487_v44 = vld [vmem:[%s6932_s23 + $0x8c] ss:$248 sps:$4 sm:$0xff]  }
 0x123   : > { %v6490_v47 = vld [vmem:[%s6932_s23 + $0x1004] ss:$248 sps:$4 sm:$0xff]   ;;  %v6491_v50 = vld [vmem:[%s6932_s23 + $0x1008] ss:$248 sps:$4 sm:$0xff]  }
 0x124   : > { %4161 = vmatpush1.bf16.msra.mxu0 %v6416_v45  ;;  %v6482_v45 = vld [vmem:[%s6932_s23 + $0x80] ss:$248 sps:$4 sm:$0xff]  }
 0x125   : > { %4202 = vmatpush1.bf16.msra.mxu1 %v6419_v46  ;;  %4162 = vmatprep.subr.bf16.mxu0 %v6424_v48  ;;  %v6485_v46 = vld [vmem:[%s6932_s23 + $0x88] ss:$248 sps:$4 sm:$0xff]   ;;  %v6493_v48 = vld [vmem:[%s6932_s23 + $0x100c] ss:$248 sps:$4 sm:$0xff]  }
 0x126   : > { %4203 = vmatprep.subr.bf16.mxu1 %v6427_v49  ;;  %v6488_v49 = vld [vmem:[%s6932_s23 + $0x1000] ss:$248 sps:$4 sm:$0xff]  }
 0x128   : > { %4163 = vmatpush1.bf16.msra.mxu0 %v6422_v51  ;;  %v6496_v51 = vld [vmem:[%s6932_s23 + $0xe24] ss:$248 sps:$4 sm:$0xff]  }
 0x129   : > { %4204 = vmatpush1.bf16.msra.mxu1 %v6425_v52  ;;  %4164 = vmatprep.subr.bf16.mxu0 %v6430_v55  ;;  %v6499_v52 = vld [vmem:[%s6932_s23 + $0xe2c] ss:$248 sps:$4 sm:$0xff]   ;;  %v6494_v55 = vld [vmem:[%s6932_s23 + $0xe20] ss:$248 sps:$4 sm:$0xff]  }
 0x12a   : > { %4205 = vmatprep.subr.bf16.mxu1 %v6433_v56  ;;  %v6497_v56 = vld [vmem:[%s6932_s23 + $0xe28] ss:$248 sps:$4 sm:$0xff]  }
 0x12c   : > { %4165 = vmatpush1.bf16.msra.mxu0 %v6428_v57  ;;  %v6502_v57 = vld [vmem:[%s6932_s23 + $0xc34] ss:$248 sps:$4 sm:$0xff]  }
 0x12d   : > { %4206 = vmatpush1.bf16.msra.mxu1 %v6431_v60  ;;  %4180 = vmatprep.subr.bf16.mxu0 %v6436_v61  ;;  %v6505_v60 = vld [vmem:[%s6932_s23 + $0xc3c] ss:$248 sps:$4 sm:$0xff]   ;;  %v6500_v61 = vld [vmem:[%s6932_s23 + $0xc30] ss:$248 sps:$4 sm:$0xff]  }
 0x12e   : > { %4221 = vmatprep.subr.bf16.mxu1 %v6439_v62  ;;  %v6503_v62 = vld [vmem:[%s6932_s23 + $0xc38] ss:$248 sps:$4 sm:$0xff]  }
 0x130   : > { %4181 = vmatpush2.bf16.msra.mxu0 %v6434_v63  ;;  %v6508_v63 = vld [vmem:[%s6932_s23 + $0xa44] ss:$248 sps:$4 sm:$0xff]  }
 0x131   : > { %4222 = vmatpush2.bf16.msra.mxu1 %v6437_v0  ;;  %4232 = vmatprep.subr.bf16.mxu0 %v6442_v1  ;;  %v6511_v0 = vld [vmem:[%s6932_s23 + $0xa4c] ss:$248 sps:$4 sm:$0xff]   ;;  %v6506_v1 = vld [vmem:[%s6932_s23 + $0xa40] ss:$248 sps:$4 sm:$0xff]  }
 0x132   : > { %4273 = vmatprep.subr.bf16.mxu1 %v6445_v3  ;;  %v6509_v3 = vld [vmem:[%s6932_s23 + $0xa48] ss:$248 sps:$4 sm:$0xff]  }
 0x133   : > { %4183 = vmatmul.mubr.bf16.vlgmr.msra.gmra.mxu0 %v6974_v42 }
 0x134   : > { %4224 = vmatmul.mubr.bf16.vlgmr.msra.gmra.mxu1 %v6974_v42  ;;  %4233 = vmatpush1.bf16.msra.mxu0 %v6440_v4  ;;  %v6514_v4 = vld [vmem:[%s6932_s23 + $0x854] ss:$248 sps:$4 sm:$0xff]  }
 0x135   : > { %4274 = vmatpush1.bf16.msra.mxu1 %v6443_v5  ;;  %4234 = vmatprep.subr.bf16.mxu0 %v6448_v6  ;;  %v6517_v5 = vld [vmem:[%s6932_s23 + $0x85c] ss:$248 sps:$4 sm:$0xff]   ;;  %v6512_v6 = vld [vmem:[%s6932_s23 + $0x850] ss:$248 sps:$4 sm:$0xff]  }
 0x136   : > { %4275 = vmatprep.subr.bf16.mxu1 %v6451_v7  ;;  %5961 = vmatprep.mubr.msk.bf16.mxu0 %vm3572_vm0, %v6920_v2  ;;  %v6515_v7 = vld [vmem:[%s6932_s23 + $0x858] ss:$248 sps:$4 sm:$0xff]  }
 0x137   : > { %5962 = vmatprep.mubr.msk.bf16.mxu1 %vm3572_vm0, %v6920_v2 }
 0x138   : > { %4235 = vmatpush1.bf16.msra.mxu0 %v6446_v8  ;;  %v6520_v8 = vld [vmem:[%s6932_s23 + $0x664] ss:$248 sps:$4 sm:$0xff]  }
 0x139   : > { %4276 = vmatpush1.bf16.msra.mxu1 %v6449_v9  ;;  %4236 = vmatprep.subr.bf16.mxu0 %v6454_v10  ;;  %v6523_v9 = vld [vmem:[%s6932_s23 + $0x66c] ss:$248 sps:$4 sm:$0xff]   ;;  %v6518_v10 = vld [vmem:[%s6932_s23 + $0x660] ss:$248 sps:$4 sm:$0xff]  }
 0x13a   : > { %4277 = vmatprep.subr.bf16.mxu1 %v6457_v11  ;;  %v6521_v11 = vld [vmem:[%s6932_s23 + $0x668] ss:$248 sps:$4 sm:$0xff]  }
 0x13c   : > { %4237 = vmatpush1.bf16.msra.mxu0 %v6452_v12 }
 0x13d   : > { %4278 = vmatpush1.bf16.msra.mxu1 %v6455_v13  ;;  %4238 = vmatprep.subr.bf16.mxu0 %v6460_v14 }
 0x13e   : > { %4279 = vmatprep.subr.bf16.mxu1 %v6463_v15 }
 0x13f   : > { %v7310_v22 = vpop.f32.mrf.mxu0 }
 0x140   : > { %v7312_v23 = vpop.f32.mrf.mxu1  ;;  %4239 = vmatpush1.bf16.msra.mxu0 %v6458_v16  ;;  %v6526_v16 = vld [vmem:[%s6932_s23 + $0x474] ss:$248 sps:$4 sm:$0xff]  }
 0x141   : > { %4280 = vmatpush1.bf16.msra.mxu1 %v6461_v17  ;;  %v7314_v24 = vpop.f32.mrf.mxu0  ;;  %4240 = vmatprep.subr.bf16.mxu0 %v6466_v18  ;;  %v6529_v17 = vld [vmem:[%s6932_s23 + $0x47c] ss:$248 sps:$4 sm:$0xff]  }
 0x142   : > { %4281 = vmatprep.subr.bf16.mxu1 %v6469_v19  ;;  %v7316_v25 = vpop.f32.mrf.mxu1 }
 0x143   : > { %v3778_v28 = vpop.f32.mrf.mxu0 }
 0x144   : > { %v3819_v29 = vpop.f32.mrf.mxu1  ;;  %4241 = vmatpush1.bf16.msra.mxu0 %v6464_v20  ;;  %v6524_v20 = vld [vmem:[%s6932_s23 + $0x470] ss:$248 sps:$4 sm:$0xff]   ;;  %v6535_v28 = vld [vmem:[%s6932_s23 + $0x28c] ss:$248 sps:$4 sm:$0xff]  }
 0x145   : > { %4282 = vmatpush1.bf16.msra.mxu1 %v6467_v21  ;;  %v3779_v32 = vpop.f32.mrf.mxu0  ;;  %4242 = vmatprep.subr.bf16.mxu0 %v6472_v26  ;;  %v6527_v21 = vld [vmem:[%s6932_s23 + $0x478] ss:$248 sps:$4 sm:$0xff]  }
 0x146   : > { %4283 = vmatprep.subr.bf16.mxu1 %v6475_v27  ;;  %v3820_v35 = vpop.f32.mrf.mxu1  ;;  %v6532_v27 = vld [vmem:[%s6932_s23 + $0x284] ss:$248 sps:$4 sm:$0xff]   ;;  %v6538_v32 = vld [vmem:[%s6932_s23 + $0x94] ss:$248 sps:$4 sm:$0xff]  }
 0x147   : > { %v6539_v35 = vld [vmem:[%s6932_s23 + $0x98] ss:$248 sps:$4 sm:$0xff]  }
 0x148   : > { %4243 = vmatpush1.bf16.msra.mxu0 %v6470_v30  ;;  %v6530_v30 = vld [vmem:[%s6932_s23 + $0x280] ss:$248 sps:$4 sm:$0xff]  }
 0x149   : > { %4284 = vmatpush1.bf16.msra.mxu1 %v6473_v31  ;;  %4244 = vmatprep.subr.bf16.mxu0 %v6478_v33  ;;  %v6533_v31 = vld [vmem:[%s6932_s23 + $0x288] ss:$248 sps:$4 sm:$0xff]   ;;  %v6541_v33 = vld [vmem:[%s6932_s23 + $0x9c] ss:$248 sps:$4 sm:$0xff]  }
 0x14a   : > { %4285 = vmatprep.subr.bf16.mxu1 %v6481_v34  ;;  %v6536_v34 = vld [vmem:[%s6932_s23 + $0x90] ss:$248 sps:$4 sm:$0xff]  }
 0x14c   : > { %4245 = vmatpush1.bf16.msra.mxu0 %v6476_v40  ;;  %v6544_v40 = vld [vmem:[%s6932_s23 + $0x1014] ss:$248 sps:$4 sm:$0xff]  }
 0x14d   : > { %4286 = vmatpush1.bf16.msra.mxu1 %v6479_v41  ;;  %4246 = vmatprep.subr.bf16.mxu0 %v6484_v43  ;;  %v6547_v41 = vld [vmem:[%s6932_s23 + $0x101c] ss:$248 sps:$4 sm:$0xff]   ;;  %v6542_v43 = vld [vmem:[%s6932_s23 + $0x1010] ss:$248 sps:$4 sm:$0xff]  }
 0x14e   : > { %4287 = vmatprep.subr.bf16.mxu1 %v6487_v44  ;;  %v6545_v44 = vld [vmem:[%s6932_s23 + $0x1018] ss:$248 sps:$4 sm:$0xff]  }
 0x150   : > { %4247 = vmatpush1.bf16.msra.mxu0 %v6482_v45  ;;  %v6550_v45 = vld [vmem:[%s6932_s23 + $0xe34] ss:$248 sps:$4 sm:$0xff]  }
 0x151   : > { %4288 = vmatpush1.bf16.msra.mxu1 %v6485_v46  ;;  %4262 = vmatprep.subr.bf16.mxu0 %v6490_v47  ;;  %v6553_v46 = vld [vmem:[%s6932_s23 + $0xe3c] ss:$248 sps:$4 sm:$0xff]   ;;  %v6548_v47 = vld [vmem:[%s6932_s23 + $0xe30] ss:$248 sps:$4 sm:$0xff]  }
 0x152   : > { %4303 = vmatprep.subr.bf16.mxu1 %v6493_v48  ;;  %v6551_v48 = vld [vmem:[%s6932_s23 + $0xe38] ss:$248 sps:$4 sm:$0xff]  }
 0x154   : > { %4263 = vmatpush2.bf16.msra.mxu0 %v6488_v49  ;;  %v6556_v49 = vld [vmem:[%s6932_s23 + $0xc44] ss:$248 sps:$4 sm:$0xff]  }
 0x155   : > { %4304 = vmatpush2.bf16.msra.mxu1 %v6491_v50  ;;  %4314 = vmatprep.subr.bf16.mxu0 %v6496_v51  ;;  %v6559_v50 = vld [vmem:[%s6932_s23 + $0xc4c] ss:$248 sps:$4 sm:$0xff]   ;;  %v6554_v51 = vld [vmem:[%s6932_s23 + $0xc40] ss:$248 sps:$4 sm:$0xff]  }
 0x156   : > { %4355 = vmatprep.subr.bf16.mxu1 %v6499_v52  ;;  %v6557_v52 = vld [vmem:[%s6932_s23 + $0xc48] ss:$248 sps:$4 sm:$0xff]  }
 0x157   : > { %4265 = vmatmul.mubr.bf16.vlgmr.msra.gmra.mxu0 %v6974_v42 }
 0x158   : > { %4306 = vmatmul.mubr.bf16.vlgmr.msra.gmra.mxu1 %v6974_v42  ;;  %4315 = vmatpush1.bf16.msra.mxu0 %v6494_v55  ;;  %v6562_v55 = vld [vmem:[%s6932_s23 + $0xa54] ss:$248 sps:$4 sm:$0xff]  }
 0x159   : > { %4356 = vmatpush1.bf16.msra.mxu1 %v6497_v56  ;;  %4316 = vmatprep.subr.bf16.mxu0 %v6502_v57  ;;  %v6565_v56 = vld [vmem:[%s6932_s23 + $0xa5c] ss:$248 sps:$4 sm:$0xff]   ;;  %v6560_v57 = vld [vmem:[%s6932_s23 + $0xa50] ss:$248 sps:$4 sm:$0xff]  }
 0x15a   : > { %4357 = vmatprep.subr.bf16.mxu1 %v6505_v60  ;;  %5963 = vmatprep.mubr.msk.bf16.mxu0 %vm3572_vm0, %v6920_v2  ;;  %v6563_v60 = vld [vmem:[%s6932_s23 + $0xa58] ss:$248 sps:$4 sm:$0xff]  }
 0x15b   : > { %5964 = vmatprep.mubr.msk.bf16.mxu1 %vm3572_vm0, %v6920_v2 }
 0x15c   : > { %4317 = vmatpush1.bf16.msra.mxu0 %v6500_v61  ;;  %v6568_v61 = vld [vmem:[%s6932_s23 + $0x864] ss:$248 sps:$4 sm:$0xff]  }
 0x15d   : > { %4358 = vmatpush1.bf16.msra.mxu1 %v6503_v62  ;;  %4318 = vmatprep.subr.bf16.mxu0 %v6508_v63  ;;  %v6571_v62 = vld [vmem:[%s6932_s23 + $0x86c] ss:$248 sps:$4 sm:$0xff]   ;;  %v6566_v63 = vld [vmem:[%s6932_s23 + $0x860] ss:$248 sps:$4 sm:$0xff]  }
 0x15e   : > { %4359 = vmatprep.subr.bf16.mxu1 %v6511_v0  ;;  %v6569_v0 = vld [vmem:[%s6932_s23 + $0x868] ss:$248 sps:$4 sm:$0xff]  }
 0x160   : > { %4319 = vmatpush1.bf16.msra.mxu0 %v6506_v1  ;;  %v6574_v1 = vld [vmem:[%s6932_s23 + $0x674] ss:$248 sps:$4 sm:$0xff]  }
 0x161   : > { %4360 = vmatpush1.bf16.msra.mxu1 %v6509_v3  ;;  %4320 = vmatprep.subr.bf16.mxu0 %v6514_v4  ;;  %v6577_v3 = vld [vmem:[%s6932_s23 + $0x67c] ss:$248 sps:$4 sm:$0xff]  }
 0x162   : > { %4361 = vmatprep.subr.bf16.mxu1 %v6517_v5 }
 0x163   : > { %v7360_v12 = vpop.f32.mrf.mxu0 }
 0x164   : > { %v7362_v13 = vpop.f32.mrf.mxu1  ;;  %4321 = vmatpush1.bf16.msra.mxu0 %v6512_v6  ;;  %v6572_v6 = vld [vmem:[%s6932_s23 + $0x670] ss:$248 sps:$4 sm:$0xff]  }
 0x165   : > { %4362 = vmatpush1.bf16.msra.mxu1 %v6515_v7  ;;  %v7364_v14 = vpop.f32.mrf.mxu0  ;;  %4322 = vmatprep.subr.bf16.mxu0 %v6520_v8  ;;  %v6575_v7 = vld [vmem:[%s6932_s23 + $0x678] ss:$248 sps:$4 sm:$0xff]  }
 0x166   : > { %4363 = vmatprep.subr.bf16.mxu1 %v6523_v9  ;;  %v7366_v15 = vpop.f32.mrf.mxu1 }
 0x167   : > { %v3860_v18 = vpop.f32.mrf.mxu0 }
 0x168   : > { %v3901_v19 = vpop.f32.mrf.mxu1  ;;  %4323 = vmatpush1.bf16.msra.mxu0 %v6518_v10  ;;  %v6580_v10 = vld [vmem:[%s6932_s23 + $0x484] ss:$248 sps:$4 sm:$0xff]   ;;  %v6578_v18 = vld [vmem:[%s6932_s23 + $0x480] ss:$248 sps:$4 sm:$0xff]  }
 0x169   : > { %4364 = vmatpush1.bf16.msra.mxu1 %v6521_v11  ;;  %v3861_v26 = vpop.f32.mrf.mxu0  ;;  %4324 = vmatprep.subr.bf16.mxu0 %v6526_v16  ;;  %v6583_v11 = vld [vmem:[%s6932_s23 + $0x48c] ss:$248 sps:$4 sm:$0xff]   ;;  %v6581_v19 = vld [vmem:[%s6932_s23 + $0x488] ss:$248 sps:$4 sm:$0xff]  }
 0x16a   : > { %4365 = vmatprep.subr.bf16.mxu1 %v6529_v17  ;;  %v3902_v29 = vpop.f32.mrf.mxu1  ;;  %v6589_v26 = vld [vmem:[%s6932_s23 + $0x29c] ss:$248 sps:$4 sm:$0xff]  }
 0x16b   : > { %v6587_v29 = vld [vmem:[%s6932_s23 + $0x298] ss:$248 sps:$4 sm:$0xff]  }
 0x16c   : > { %4325 = vmatpush1.bf16.msra.mxu0 %v6524_v20 }
 0x16d   : > { %4366 = vmatpush1.bf16.msra.mxu1 %v6527_v21  ;;  %4326 = vmatprep.subr.bf16.mxu0 %v6532_v27  ;;  %v6586_v21 = vld [vmem:[%s6932_s23 + $0x294] ss:$248 sps:$4 sm:$0xff]  }
 0x16e   : > { %4367 = vmatprep.subr.bf16.mxu1 %v6535_v28  ;;  %v6584_v28 = vld [vmem:[%s6932_s23 + $0x290] ss:$248 sps:$4 sm:$0xff]  }
 0x170   : > { %4327 = vmatpush1.bf16.msra.mxu0 %v6530_v30  ;;  %v6592_v30 = vld [vmem:[%s6932_s23 + $0xa4] ss:$248 sps:$4 sm:$0xff]  }
 0x171   : > { %4368 = vmatpush1.bf16.msra.mxu1 %v6533_v31  ;;  %4328 = vmatprep.subr.bf16.mxu0 %v6538_v32  ;;  %v6595_v31 = vld [vmem:[%s6932_s23 + $0xac] ss:$248 sps:$4 sm:$0xff]   ;;  %v6590_v32 = vld [vmem:[%s6932_s23 + $0xa0] ss:$248 sps:$4 sm:$0xff]  }
 0x172   : > { %4369 = vmatprep.subr.bf16.mxu1 %v6541_v33  ;;  %v6593_v33 = vld [vmem:[%s6932_s23 + $0xa8] ss:$248 sps:$4 sm:$0xff]  }
 0x174   : > { %4329 = vmatpush1.bf16.msra.mxu0 %v6536_v34  ;;  %v6598_v34 = vld [vmem:[%s6932_s23 + $0x1024] ss:$248 sps:$4 sm:$0xff]  }
 0x175   : > { %4370 = vmatpush1.bf16.msra.mxu1 %v6539_v35  ;;  %4344 = vmatprep.subr.bf16.mxu0 %v6544_v40  ;;  %v6601_v35 = vld [vmem:[%s6932_s23 + $0x102c] ss:$248 sps:$4 sm:$0xff]   ;;  %v6596_v40 = vld [vmem:[%s6932_s23 + $0x1020] ss:$248 sps:$4 sm:$0xff]  }
 0x176   : > { %4385 = vmatprep.subr.bf16.mxu1 %v6547_v41  ;;  %v6599_v41 = vld [vmem:[%s6932_s23 + $0x1028] ss:$248 sps:$4 sm:$0xff]  }
 0x178   : > { %4345 = vmatpush2.bf16.msra.mxu0 %v6542_v43  ;;  %v6604_v43 = vld [vmem:[%s6932_s23 + $0xe44] ss:$248 sps:$4 sm:$0xff]  }
 0x179   : > { %4386 = vmatpush2.bf16.msra.mxu1 %v6545_v44  ;;  %4396 = vmatprep.subr.bf16.mxu0 %v6550_v45  ;;  %v6607_v44 = vld [vmem:[%s6932_s23 + $0xe4c] ss:$248 sps:$4 sm:$0xff]   ;;  %v6602_v45 = vld [vmem:[%s6932_s23 + $0xe40] ss:$248 sps:$4 sm:$0xff]  }
 0x17a   : > { %4437 = vmatprep.subr.bf16.mxu1 %v6553_v46  ;;  %v6605_v46 = vld [vmem:[%s6932_s23 + $0xe48] ss:$248 sps:$4 sm:$0xff]  }
 0x17b   : > { %4347 = vmatmul.mubr.bf16.vlgmr.msra.gmra.mxu0 %v6974_v42 }
 0x17c   : > { %4388 = vmatmul.mubr.bf16.vlgmr.msra.gmra.mxu1 %v6974_v42  ;;  %4397 = vmatpush1.bf16.msra.mxu0 %v6548_v47  ;;  %v6610_v47 = vld [vmem:[%s6932_s23 + $0xc54] ss:$248 sps:$4 sm:$0xff]  }
 0x17d   : > { %4438 = vmatpush1.bf16.msra.mxu1 %v6551_v48  ;;  %4398 = vmatprep.subr.bf16.mxu0 %v6556_v49  ;;  %v6613_v48 = vld [vmem:[%s6932_s23 + $0xc5c] ss:$248 sps:$4 sm:$0xff]   ;;  %v6608_v49 = vld [vmem:[%s6932_s23 + $0xc50] ss:$248 sps:$4 sm:$0xff]  }
 0x17e   : > { %4439 = vmatprep.subr.bf16.mxu1 %v6559_v50  ;;  %5965 = vmatprep.mubr.msk.bf16.mxu0 %vm3572_vm0, %v6920_v2  ;;  %v6611_v50 = vld [vmem:[%s6932_s23 + $0xc58] ss:$248 sps:$4 sm:$0xff]  }
 0x17f   : > { %5966 = vmatprep.mubr.msk.bf16.mxu1 %vm3572_vm0, %v6920_v2 }
 0x180   : > { %4399 = vmatpush1.bf16.msra.mxu0 %v6554_v51  ;;  %v6616_v51 = vld [vmem:[%s6932_s23 + $0xa64] ss:$248 sps:$4 sm:$0xff]  }
 0x181   : > { %4440 = vmatpush1.bf16.msra.mxu1 %v6557_v52  ;;  %4400 = vmatprep.subr.bf16.mxu0 %v6562_v55  ;;  %v6619_v52 = vld [vmem:[%s6932_s23 + $0xa6c] ss:$248 sps:$4 sm:$0xff]   ;;  %v6614_v55 = vld [vmem:[%s6932_s23 + $0xa60] ss:$248 sps:$4 sm:$0xff]  }
 0x182   : > { %4441 = vmatprep.subr.bf16.mxu1 %v6565_v56  ;;  %v6617_v56 = vld [vmem:[%s6932_s23 + $0xa68] ss:$248 sps:$4 sm:$0xff]  }
 0x184   : > { %4401 = vmatpush1.bf16.msra.mxu0 %v6560_v57  ;;  %v6622_v57 = vld [vmem:[%s6932_s23 + $0x874] ss:$248 sps:$4 sm:$0xff]  }
 0x185   : > { %4442 = vmatpush1.bf16.msra.mxu1 %v6563_v60  ;;  %4402 = vmatprep.subr.bf16.mxu0 %v6568_v61  ;;  %v6625_v60 = vld [vmem:[%s6932_s23 + $0x87c] ss:$248 sps:$4 sm:$0xff]   ;;  %v6620_v61 = vld [vmem:[%s6932_s23 + $0x870] ss:$248 sps:$4 sm:$0xff]  }
 0x186   : > { %4443 = vmatprep.subr.bf16.mxu1 %v6571_v62  ;;  %v6623_v62 = vld [vmem:[%s6932_s23 + $0x878] ss:$248 sps:$4 sm:$0xff]  }
 0x187   : > { %v7408_v4 = vpop.f32.mrf.mxu0 }
 0x188   : > { %v7410_v5 = vpop.f32.mrf.mxu1  ;;  %4403 = vmatpush1.bf16.msra.mxu0 %v6566_v63  ;;  %v6628_v63 = vld [vmem:[%s6932_s23 + $0x684] ss:$248 sps:$4 sm:$0xff]  }
 0x189   : > { %4444 = vmatpush1.bf16.msra.mxu1 %v6569_v0  ;;  %v7414_v8 = vpop.f32.mrf.mxu0  ;;  %4404 = vmatprep.subr.bf16.mxu0 %v6574_v1  ;;  %v6631_v0 = vld [vmem:[%s6932_s23 + $0x68c] ss:$248 sps:$4 sm:$0xff]  }
 0x18a   : > { %4445 = vmatprep.subr.bf16.mxu1 %v6577_v3  ;;  %v7416_v9 = vpop.f32.mrf.mxu1 }
 0x18b   : > { %v3942_v16 = vpop.f32.mrf.mxu0 }
 0x18c   : > { %v3983_v17 = vpop.f32.mrf.mxu1  ;;  %4405 = vmatpush1.bf16.msra.mxu0 %v6572_v6  ;;  %v6626_v6 = vld [vmem:[%s6932_s23 + $0x680] ss:$248 sps:$4 sm:$0xff]   ;;  %v6634_v16 = vld [vmem:[%s6932_s23 + $0x494] ss:$248 sps:$4 sm:$0xff]  }
 0x18d   : > { %4446 = vmatpush1.bf16.msra.mxu1 %v6575_v7  ;;  %v3943_v20 = vpop.f32.mrf.mxu0  ;;  %4406 = vmatprep.subr.bf16.mxu0 %v6580_v10  ;;  %v6629_v7 = vld [vmem:[%s6932_s23 + $0x688] ss:$248 sps:$4 sm:$0xff]   ;;  %v6637_v17 = vld [vmem:[%s6932_s23 + $0x49c] ss:$248 sps:$4 sm:$0xff]  }
 0x18e   : > { %4447 = vmatprep.subr.bf16.mxu1 %v6583_v11  ;;  %v3984_v27 = vpop.f32.mrf.mxu1  ;;  %v6632_v20 = vld [vmem:[%s6932_s23 + $0x490] ss:$248 sps:$4 sm:$0xff]  }
 0x18f   : > { %v6640_v27 = vld [vmem:[%s6932_s23 + $0x2a4] ss:$248 sps:$4 sm:$0xff]  }
 0x190   : > { %4407 = vmatpush1.bf16.msra.mxu0 %v6578_v18 }
 0x191   : > { %4448 = vmatpush1.bf16.msra.mxu1 %v6581_v19  ;;  %4408 = vmatprep.subr.bf16.mxu0 %v6586_v21  ;;  %v6635_v21 = vld [vmem:[%s6932_s23 + $0x498] ss:$248 sps:$4 sm:$0xff]  }
 0x192   : > { %4449 = vmatprep.subr.bf16.mxu1 %v6589_v26 }
 0x194   : > { %4409 = vmatpush1.bf16.msra.mxu0 %v6584_v28  ;;  %v6643_v28 = vld [vmem:[%s6932_s23 + $0x2ac] ss:$248 sps:$4 sm:$0xff]  }
 0x195   : > { %4450 = vmatpush1.bf16.msra.mxu1 %v6587_v29  ;;  %4410 = vmatprep.subr.bf16.mxu0 %v6592_v30  ;;  %v6638_v30 = vld [vmem:[%s6932_s23 + $0x2a0] ss:$248 sps:$4 sm:$0xff]  }
 0x196   : > { %4451 = vmatprep.subr.bf16.mxu1 %v6595_v31  ;;  %v6641_v31 = vld [vmem:[%s6932_s23 + $0x2a8] ss:$248 sps:$4 sm:$0xff]  }
 0x198   : > { %4411 = vmatpush1.bf16.msra.mxu0 %v6590_v32  ;;  %v6646_v32 = vld [vmem:[%s6932_s23 + $0xb4] ss:$248 sps:$4 sm:$0xff]  }
 0x199   : > { %4452 = vmatpush1.bf16.msra.mxu1 %v6593_v33  ;;  %4426 = vmatprep.subr.bf16.mxu0 %v6598_v34  ;;  %v6649_v33 = vld [vmem:[%s6932_s23 + $0xbc] ss:$248 sps:$4 sm:$0xff]   ;;  %v6644_v34 = vld [vmem:[%s6932_s23 + $0xb0] ss:$248 sps:$4 sm:$0xff]  }
 0x19a   : > { %4467 = vmatprep.subr.bf16.mxu1 %v6601_v35  ;;  %v6647_v35 = vld [vmem:[%s6932_s23 + $0xb8] ss:$248 sps:$4 sm:$0xff]  }
 0x19c   : > { %4427 = vmatpush2.bf16.msra.mxu0 %v6596_v40  ;;  %v6652_v40 = vld [vmem:[%s6932_s23 + $0x1034] ss:$248 sps:$4 sm:$0xff]  }
 0x19d   : > { %4468 = vmatpush2.bf16.msra.mxu1 %v6599_v41  ;;  %4478 = vmatprep.subr.bf16.mxu0 %v6604_v43  ;;  %v6655_v41 = vld [vmem:[%s6932_s23 + $0x103c] ss:$248 sps:$4 sm:$0xff]   ;;  %v6650_v43 = vld [vmem:[%s6932_s23 + $0x1030] ss:$248 sps:$4 sm:$0xff]  }
 0x19e   : > { %4519 = vmatprep.subr.bf16.mxu1 %v6607_v44  ;;  %v6653_v44 = vld [vmem:[%s6932_s23 + $0x1038] ss:$248 sps:$4 sm:$0xff]  }
 0x19f   : > { %4429 = vmatmul.mubr.bf16.vlgmr.msra.gmra.mxu0 %v6974_v42 }
 0x1a0   : > { %4470 = vmatmul.mubr.bf16.vlgmr.msra.gmra.mxu1 %v6974_v42  ;;  %4479 = vmatpush1.bf16.msra.mxu0 %v6602_v45  ;;  %v6658_v45 = vld [vmem:[%s6932_s23 + $0xe54] ss:$248 sps:$4 sm:$0xff]  }
 0x1a1   : > { %4520 = vmatpush1.bf16.msra.mxu1 %v6605_v46  ;;  %4480 = vmatprep.subr.bf16.mxu0 %v6610_v47  ;;  %v6661_v46 = vld [vmem:[%s6932_s23 + $0xe5c] ss:$248 sps:$4 sm:$0xff]   ;;  %v6656_v47 = vld [vmem:[%s6932_s23 + $0xe50] ss:$248 sps:$4 sm:$0xff]  }
 0x1a2   : > { %4521 = vmatprep.subr.bf16.mxu1 %v6613_v48  ;;  %5967 = vmatprep.mubr.msk.bf16.mxu0 %vm3572_vm0, %v6920_v2  ;;  %v6659_v48 = vld [vmem:[%s6932_s23 + $0xe58] ss:$248 sps:$4 sm:$0xff]  }
 0x1a3   : > { %5968 = vmatprep.mubr.msk.bf16.mxu1 %vm3572_vm0, %v6920_v2 }
 0x1a4   : > { %4481 = vmatpush1.bf16.msra.mxu0 %v6608_v49  ;;  %v6664_v49 = vld [vmem:[%s6932_s23 + $0xc64] ss:$248 sps:$4 sm:$0xff]  }
 0x1a5   : > { %4522 = vmatpush1.bf16.msra.mxu1 %v6611_v50  ;;  %4482 = vmatprep.subr.bf16.mxu0 %v6616_v51  ;;  %v6667_v50 = vld [vmem:[%s6932_s23 + $0xc6c] ss:$248 sps:$4 sm:$0xff]   ;;  %v6662_v51 = vld [vmem:[%s6932_s23 + $0xc60] ss:$248 sps:$4 sm:$0xff]  }
 0x1a6   : > { %4523 = vmatprep.subr.bf16.mxu1 %v6619_v52  ;;  %v6665_v52 = vld [vmem:[%s6932_s23 + $0xc68] ss:$248 sps:$4 sm:$0xff]  }
 0x1a8   : > { %4483 = vmatpush1.bf16.msra.mxu0 %v6614_v55  ;;  %v6670_v55 = vld [vmem:[%s6932_s23 + $0xa74] ss:$248 sps:$4 sm:$0xff]  }
 0x1a9   : > { %4524 = vmatpush1.bf16.msra.mxu1 %v6617_v56  ;;  %4484 = vmatprep.subr.bf16.mxu0 %v6622_v57  ;;  %v6673_v56 = vld [vmem:[%s6932_s23 + $0xa7c] ss:$248 sps:$4 sm:$0xff]   ;;  %v6668_v57 = vld [vmem:[%s6932_s23 + $0xa70] ss:$248 sps:$4 sm:$0xff]  }
 0x1aa   : > { %4525 = vmatprep.subr.bf16.mxu1 %v6625_v60  ;;  %v6671_v60 = vld [vmem:[%s6932_s23 + $0xa78] ss:$248 sps:$4 sm:$0xff]  }
 0x1ab   : > { %v7458_v1 = vpop.f32.mrf.mxu0 }
 0x1ac   : > { %v7460_v3 = vpop.f32.mrf.mxu1  ;;  %4485 = vmatpush1.bf16.msra.mxu0 %v6620_v61  ;;  %v6676_v61 = vld [vmem:[%s6932_s23 + $0x884] ss:$248 sps:$4 sm:$0xff]  }
 0x1ad   : > { %4526 = vmatpush1.bf16.msra.mxu1 %v6623_v62  ;;  %v7464_v10 = vpop.f32.mrf.mxu0  ;;  %4486 = vmatprep.subr.bf16.mxu0 %v6628_v63  ;;  %v6679_v62 = vld [vmem:[%s6932_s23 + $0x88c] ss:$248 sps:$4 sm:$0xff]   ;;  %v6674_v63 = vld [vmem:[%s6932_s23 + $0x880] ss:$248 sps:$4 sm:$0xff]  }
 0x1ae   : > { %4527 = vmatprep.subr.bf16.mxu1 %v6631_v0  ;;  %v7466_v11 = vpop.f32.mrf.mxu1  ;;  %v6677_v0 = vld [vmem:[%s6932_s23 + $0x888] ss:$248 sps:$4 sm:$0xff]  }
 0x1af   : > { %v4024_v18 = vpop.f32.mrf.mxu0 }
 0x1b0   : > { %v4065_v19 = vpop.f32.mrf.mxu1  ;;  %4487 = vmatpush1.bf16.msra.mxu0 %v6626_v6  ;;  %v6682_v6 = vld [vmem:[%s6932_s23 + $0x694] ss:$248 sps:$4 sm:$0xff]   ;;  %v6680_v18 = vld [vmem:[%s6932_s23 + $0x690] ss:$248 sps:$4 sm:$0xff]  }
 0x1b1   : > { %4528 = vmatpush1.bf16.msra.mxu1 %v6629_v7  ;;  %v4025_v26 = vpop.f32.mrf.mxu0  ;;  %4488 = vmatprep.subr.bf16.mxu0 %v6634_v16  ;;  %v6685_v7 = vld [vmem:[%s6932_s23 + $0x69c] ss:$248 sps:$4 sm:$0xff]   ;;  %v6683_v19 = vld [vmem:[%s6932_s23 + $0x698] ss:$248 sps:$4 sm:$0xff]  }
 0x1b2   : > { %4529 = vmatprep.subr.bf16.mxu1 %v6637_v17  ;;  %v4066_v29 = vpop.f32.mrf.mxu1  ;;  %v6688_v26 = vld [vmem:[%s6932_s23 + $0x4a4] ss:$248 sps:$4 sm:$0xff]  }
 0x1b4   : > { %4489 = vmatpush1.bf16.msra.mxu0 %v6632_v20 }
 0x1b5   : > { %4530 = vmatpush1.bf16.msra.mxu1 %v6635_v21  ;;  %4490 = vmatprep.subr.bf16.mxu0 %v6640_v27  ;;  %v6691_v27 = vld [vmem:[%s6932_s23 + $0x4ac] ss:$248 sps:$4 sm:$0xff]  }
 0x1b6   : > { %4531 = vmatprep.subr.bf16.mxu1 %v6643_v28 }
 0x1b8   : > { %4491 = vmatpush1.bf16.msra.mxu0 %v6638_v30  ;;  %v6686_v30 = vld [vmem:[%s6932_s23 + $0x4a0] ss:$248 sps:$4 sm:$0xff]  }
 0x1b9   : > { %4532 = vmatpush1.bf16.msra.mxu1 %v6641_v31  ;;  %4492 = vmatprep.subr.bf16.mxu0 %v6646_v32  ;;  %v6689_v31 = vld [vmem:[%s6932_s23 + $0x4a8] ss:$248 sps:$4 sm:$0xff]  }
 0x1ba   : > { %4533 = vmatprep.subr.bf16.mxu1 %v6649_v33  ;;  %v6694_v33 = vld [vmem:[%s6932_s23 + $0x2b4] ss:$248 sps:$4 sm:$0xff]  }
 0x1bc   : > { %4493 = vmatpush1.bf16.msra.mxu0 %v6644_v34  ;;  %v6697_v34 = vld [vmem:[%s6932_s23 + $0x2bc] ss:$248 sps:$4 sm:$0xff]  }
 0x1bd   : > { %4534 = vmatpush1.bf16.msra.mxu1 %v6647_v35  ;;  %4508 = vmatprep.subr.bf16.mxu0 %v6652_v40  ;;  %v6692_v40 = vld [vmem:[%s6932_s23 + $0x2b0] ss:$248 sps:$4 sm:$0xff]  }
 0x1be   : > { %4549 = vmatprep.subr.bf16.mxu1 %v6655_v41  ;;  %v6695_v41 = vld [vmem:[%s6932_s23 + $0x2b8] ss:$248 sps:$4 sm:$0xff]  }
 0x1c0   : > { %4509 = vmatpush2.bf16.msra.mxu0 %v6650_v43  ;;  %v6700_v43 = vld [vmem:[%s6932_s23 + $0xc4] ss:$248 sps:$4 sm:$0xff]  }
 0x1c1   : > { %4550 = vmatpush2.bf16.msra.mxu1 %v6653_v44  ;;  %4560 = vmatprep.subr.bf16.mxu0 %v6658_v45  ;;  %v6703_v44 = vld [vmem:[%s6932_s23 + $0xcc] ss:$248 sps:$4 sm:$0xff]   ;;  %v6698_v45 = vld [vmem:[%s6932_s23 + $0xc0] ss:$248 sps:$4 sm:$0xff]  }
 0x1c2   : > { %4601 = vmatprep.subr.bf16.mxu1 %v6661_v46  ;;  %v6701_v46 = vld [vmem:[%s6932_s23 + $0xc8] ss:$248 sps:$4 sm:$0xff]  }
 0x1c3   : > { %4511 = vmatmul.mubr.bf16.vlgmr.msra.gmra.mxu0 %v6974_v42 }
 0x1c4   : > { %4552 = vmatmul.mubr.bf16.vlgmr.msra.gmra.mxu1 %v6974_v42  ;;  %4561 = vmatpush1.bf16.msra.mxu0 %v6656_v47  ;;  %v6706_v47 = vld [vmem:[%s6932_s23 + $0x1044] ss:$248 sps:$4 sm:$0xff]  }
 0x1c5   : > { %4602 = vmatpush1.bf16.msra.mxu1 %v6659_v48  ;;  %4562 = vmatprep.subr.bf16.mxu0 %v6664_v49  ;;  %v6709_v48 = vld [vmem:[%s6932_s23 + $0x104c] ss:$248 sps:$4 sm:$0xff]   ;;  %v6704_v49 = vld [vmem:[%s6932_s23 + $0x1040] ss:$248 sps:$4 sm:$0xff]  }
 0x1c6   : > { %4603 = vmatprep.subr.bf16.mxu1 %v6667_v50  ;;  %5969 = vmatprep.mubr.msk.bf16.mxu0 %vm3572_vm0, %v6920_v2  ;;  %v6707_v50 = vld [vmem:[%s6932_s23 + $0x1048] ss:$248 sps:$4 sm:$0xff]  }
 0x1c7   : > { %5970 = vmatprep.mubr.msk.bf16.mxu1 %vm3572_vm0, %v6920_v2 }
 0x1c8   : > { %4563 = vmatpush1.bf16.msra.mxu0 %v6662_v51  ;;  %v6712_v51 = vld [vmem:[%s6932_s23 + $0xe64] ss:$248 sps:$4 sm:$0xff]  }
 0x1c9   : > { %4604 = vmatpush1.bf16.msra.mxu1 %v6665_v52  ;;  %4564 = vmatprep.subr.bf16.mxu0 %v6670_v55  ;;  %v6715_v52 = vld [vmem:[%s6932_s23 + $0xe6c] ss:$248 sps:$4 sm:$0xff]   ;;  %v6710_v55 = vld [vmem:[%s6932_s23 + $0xe60] ss:$248 sps:$4 sm:$0xff]  }
 0x1ca   : > { %4605 = vmatprep.subr.bf16.mxu1 %v6673_v56  ;;  %v6713_v56 = vld [vmem:[%s6932_s23 + $0xe68] ss:$248 sps:$4 sm:$0xff]  }
 0x1cc   : > { %4565 = vmatpush1.bf16.msra.mxu0 %v6668_v57  ;;  %v6718_v57 = vld [vmem:[%s6932_s23 + $0xc74] ss:$248 sps:$4 sm:$0xff]  }
 0x1cd   : > { %4606 = vmatpush1.bf16.msra.mxu1 %v6671_v60  ;;  %4566 = vmatprep.subr.bf16.mxu0 %v6676_v61  ;;  %v6721_v60 = vld [vmem:[%s6932_s23 + $0xc7c] ss:$248 sps:$4 sm:$0xff]   ;;  %v6716_v61 = vld [vmem:[%s6932_s23 + $0xc70] ss:$248 sps:$4 sm:$0xff]  }
 0x1ce   : > { %4607 = vmatprep.subr.bf16.mxu1 %v6679_v62  ;;  %v6719_v62 = vld [vmem:[%s6932_s23 + $0xc78] ss:$248 sps:$4 sm:$0xff]  }
 0x1cf   : > { %v7508_v16 = vpop.f32.mrf.mxu0 }
 0x1d0   : > { %v7510_v17 = vpop.f32.mrf.mxu1  ;;  %4567 = vmatpush1.bf16.msra.mxu0 %v6674_v63  ;;  %v6724_v63 = vld [vmem:[%s6932_s23 + $0xa84] ss:$248 sps:$4 sm:$0xff]  }
 0x1d1   : > { %4608 = vmatpush1.bf16.msra.mxu1 %v6677_v0  ;;  %v7514_v20 = vpop.f32.mrf.mxu0  ;;  %4568 = vmatprep.subr.bf16.mxu0 %v6682_v6  ;;  %v6727_v0 = vld [vmem:[%s6932_s23 + $0xa8c] ss:$248 sps:$4 sm:$0xff]   ;;  %v6722_v6 = vld [vmem:[%s6932_s23 + $0xa80] ss:$248 sps:$4 sm:$0xff]  }
 0x1d2   : > { %4609 = vmatprep.subr.bf16.mxu1 %v6685_v7  ;;  %v7516_v21 = vpop.f32.mrf.mxu1  ;;  %v6725_v7 = vld [vmem:[%s6932_s23 + $0xa88] ss:$248 sps:$4 sm:$0xff]  }
 0x1d3   : > { %v4106_v28 = vpop.f32.mrf.mxu0 }
 0x1d4   : > { %v4147_v29 = vpop.f32.mrf.mxu1  ;;  %4569 = vmatpush1.bf16.msra.mxu0 %v6680_v18  ;;  %v6730_v18 = vld [vmem:[%s6932_s23 + $0x894] ss:$248 sps:$4 sm:$0xff]   ;;  %v6736_v28 = vld [vmem:[%s6932_s23 + $0x6a4] ss:$248 sps:$4 sm:$0xff]  }
 0x1d5   : > { %4610 = vmatpush1.bf16.msra.mxu1 %v6683_v19  ;;  %v4107_v32 = vpop.f32.mrf.mxu0  ;;  %4570 = vmatprep.subr.bf16.mxu0 %v6688_v26  ;;  %v6733_v19 = vld [vmem:[%s6932_s23 + $0x89c] ss:$248 sps:$4 sm:$0xff]   ;;  %v6728_v26 = vld [vmem:[%s6932_s23 + $0x890] ss:$248 sps:$4 sm:$0xff]   ;;  %v6739_v29 = vld [vmem:[%s6932_s23 + $0x6ac] ss:$248 sps:$4 sm:$0xff]  }
 0x1d6   : > { %4611 = vmatprep.subr.bf16.mxu1 %v6691_v27  ;;  %v4148_v35 = vpop.f32.mrf.mxu1  ;;  %v6731_v27 = vld [vmem:[%s6932_s23 + $0x898] ss:$248 sps:$4 sm:$0xff]  }
 0x1d7   : > { %v6734_v32 = vld [vmem:[%s6932_s23 + $0x6a0] ss:$248 sps:$4 sm:$0xff]  }
 0x1d8   : > { %4571 = vmatpush1.bf16.msra.mxu0 %v6686_v30 }
 0x1d9   : > { %4612 = vmatpush1.bf16.msra.mxu1 %v6689_v31  ;;  %4572 = vmatprep.subr.bf16.mxu0 %v6694_v33  ;;  %v6737_v33 = vld [vmem:[%s6932_s23 + $0x6a8] ss:$248 sps:$4 sm:$0xff]  }
 0x1da   : > { %4613 = vmatprep.subr.bf16.mxu1 %v6697_v34 }
 0x1dc   : > { %4573 = vmatpush1.bf16.msra.mxu0 %v6692_v40  ;;  %v6742_v40 = vld [vmem:[%s6932_s23 + $0x4b4] ss:$248 sps:$4 sm:$0xff]  }
 0x1dd   : > { %4614 = vmatpush1.bf16.msra.mxu1 %v6695_v41  ;;  %4574 = vmatprep.subr.bf16.mxu0 %v6700_v43  ;;  %v6745_v41 = vld [vmem:[%s6932_s23 + $0x4bc] ss:$248 sps:$4 sm:$0xff]  }
 0x1de   : > { %4615 = vmatprep.subr.bf16.mxu1 %v6703_v44 }
 0x1e0   : > { %4575 = vmatpush1.bf16.msra.mxu0 %v6698_v45  ;;  %v6740_v45 = vld [vmem:[%s6932_s23 + $0x4b0] ss:$248 sps:$4 sm:$0xff]  }
 0x1e1   : > { %4616 = vmatpush1.bf16.msra.mxu1 %v6701_v46  ;;  %4590 = vmatprep.subr.bf16.mxu0 %v6706_v47  ;;  %v6743_v46 = vld [vmem:[%s6932_s23 + $0x4b8] ss:$248 sps:$4 sm:$0xff]  }
 0x1e2   : > { %4631 = vmatprep.subr.bf16.mxu1 %v6709_v48  ;;  %v6748_v48 = vld [vmem:[%s6932_s23 + $0x2c4] ss:$248 sps:$4 sm:$0xff]  }
 0x1e4   : > { %4591 = vmatpush2.bf16.msra.mxu0 %v6704_v49  ;;  %v6751_v49 = vld [vmem:[%s6932_s23 + $0x2cc] ss:$248 sps:$4 sm:$0xff]  }
 0x1e5   : > { %4632 = vmatpush2.bf16.msra.mxu1 %v6707_v50  ;;  %4642 = vmatprep.subr.bf16.mxu0 %v6712_v51  ;;  %v6746_v51 = vld [vmem:[%s6932_s23 + $0x2c0] ss:$248 sps:$4 sm:$0xff]  }
 0x1e6   : > { %4683 = vmatprep.subr.bf16.mxu1 %v6715_v52  ;;  %v6749_v52 = vld [vmem:[%s6932_s23 + $0x2c8] ss:$248 sps:$4 sm:$0xff]  }
 0x1e7   : > { %4593 = vmatmul.mubr.bf16.vlgmr.msra.gmra.mxu0 %v6974_v42 }
 0x1e8   : > { %4634 = vmatmul.mubr.bf16.vlgmr.msra.gmra.mxu1 %v6974_v42  ;;  %4643 = vmatpush1.bf16.msra.mxu0 %v6710_v55  ;;  %v6754_v55 = vld [vmem:[%s6932_s23 + $0xd4] ss:$248 sps:$4 sm:$0xff]  }
 0x1e9   : > { %4684 = vmatpush1.bf16.msra.mxu1 %v6713_v56  ;;  %4644 = vmatprep.subr.bf16.mxu0 %v6718_v57  ;;  %v6757_v56 = vld [vmem:[%s6932_s23 + $0xdc] ss:$248 sps:$4 sm:$0xff]   ;;  %v6752_v57 = vld [vmem:[%s6932_s23 + $0xd0] ss:$248 sps:$4 sm:$0xff]  }
 0x1ea   : > { %4685 = vmatprep.subr.bf16.mxu1 %v6721_v60  ;;  %5971 = vmatprep.mubr.msk.bf16.mxu0 %vm3572_vm0, %v6920_v2  ;;  %v6755_v60 = vld [vmem:[%s6932_s23 + $0xd8] ss:$248 sps:$4 sm:$0xff]  }
 0x1eb   : > { %5972 = vmatprep.mubr.msk.bf16.mxu1 %vm3572_vm0, %v6920_v2 }
 0x1ec   : > { %4645 = vmatpush1.bf16.msra.mxu0 %v6716_v61  ;;  %v6760_v61 = vld [vmem:[%s6932_s23 + $0x1054] ss:$248 sps:$4 sm:$0xff]  }
 0x1ed   : > { %4686 = vmatpush1.bf16.msra.mxu1 %v6719_v62  ;;  %4646 = vmatprep.subr.bf16.mxu0 %v6724_v63  ;;  %v6763_v62 = vld [vmem:[%s6932_s23 + $0x105c] ss:$248 sps:$4 sm:$0xff]   ;;  %v6758_v63 = vld [vmem:[%s6932_s23 + $0x1050] ss:$248 sps:$4 sm:$0xff]  }
 0x1ee   : > { %4687 = vmatprep.subr.bf16.mxu1 %v6727_v0  ;;  %v6761_v0 = vld [vmem:[%s6932_s23 + $0x1058] ss:$248 sps:$4 sm:$0xff]  }
 0x1f0   : > { %4647 = vmatpush1.bf16.msra.mxu0 %v6722_v6  ;;  %v6766_v6 = vld [vmem:[%s6932_s23 + $0xe74] ss:$248 sps:$4 sm:$0xff]  }
 0x1f1   : > { %4688 = vmatpush1.bf16.msra.mxu1 %v6725_v7  ;;  %4648 = vmatprep.subr.bf16.mxu0 %v6730_v18  ;;  %v6769_v7 = vld [vmem:[%s6932_s23 + $0xe7c] ss:$248 sps:$4 sm:$0xff]   ;;  %v6764_v18 = vld [vmem:[%s6932_s23 + $0xe70] ss:$248 sps:$4 sm:$0xff]  }
 0x1f2   : > { %4689 = vmatprep.subr.bf16.mxu1 %v6733_v19  ;;  %v6767_v19 = vld [vmem:[%s6932_s23 + $0xe78] ss:$248 sps:$4 sm:$0xff]  }
 0x1f3   : > { %v7558_v30 = vpop.f32.mrf.mxu0 }
 0x1f4   : > { %v7560_v31 = vpop.f32.mrf.mxu1  ;;  %4649 = vmatpush1.bf16.msra.mxu0 %v6728_v26  ;;  %v6772_v26 = vld [vmem:[%s6932_s23 + $0xc84] ss:$248 sps:$4 sm:$0xff]  }
 0x1f5   : > { %4690 = vmatpush1.bf16.msra.mxu1 %v6731_v27  ;;  %v7564_v34 = vpop.f32.mrf.mxu0  ;;  %4650 = vmatprep.subr.bf16.mxu0 %v6736_v28  ;;  %v6775_v27 = vld [vmem:[%s6932_s23 + $0xc8c] ss:$248 sps:$4 sm:$0xff]   ;;  %v6770_v28 = vld [vmem:[%s6932_s23 + $0xc80] ss:$248 sps:$4 sm:$0xff]  }
 0x1f6   : > { %4691 = vmatprep.subr.bf16.mxu1 %v6739_v29  ;;  %v7566_v35 = vpop.f32.mrf.mxu1  ;;  %v6773_v29 = vld [vmem:[%s6932_s23 + $0xc88] ss:$248 sps:$4 sm:$0xff]  }
 0x1f7   : > { %v4188_v43 = vpop.f32.mrf.mxu0 }
 0x1f8   : > { %v4229_v44 = vpop.f32.mrf.mxu1  ;;  %4651 = vmatpush1.bf16.msra.mxu0 %v6734_v32  ;;  %v6778_v32 = vld [vmem:[%s6932_s23 + $0xa94] ss:$248 sps:$4 sm:$0xff]   ;;  %v6784_v43 = vld [vmem:[%s6932_s23 + $0x8a4] ss:$248 sps:$4 sm:$0xff]  }
 0x1f9   : > { %4692 = vmatpush1.bf16.msra.mxu1 %v6737_v33  ;;  %v4189_v47 = vpop.f32.mrf.mxu0  ;;  %4652 = vmatprep.subr.bf16.mxu0 %v6742_v40  ;;  %v6781_v33 = vld [vmem:[%s6932_s23 + $0xa9c] ss:$248 sps:$4 sm:$0xff]   ;;  %v6776_v40 = vld [vmem:[%s6932_s23 + $0xa90] ss:$248 sps:$4 sm:$0xff]   ;;  %v6787_v44 = vld [vmem:[%s6932_s23 + $0x8ac] ss:$248 sps:$4 sm:$0xff]  }
 0x1fa   : > { %4693 = vmatprep.subr.bf16.mxu1 %v6745_v41  ;;  %v4230_v50 = vpop.f32.mrf.mxu1  ;;  %v6779_v41 = vld [vmem:[%s6932_s23 + $0xa98] ss:$248 sps:$4 sm:$0xff]   ;;  %v6790_v47 = vld [vmem:[%s6932_s23 + $0x6b4] ss:$248 sps:$4 sm:$0xff]  }
 0x1fc   : > { %4653 = vmatpush1.bf16.msra.mxu0 %v6740_v45  ;;  %v6782_v45 = vld [vmem:[%s6932_s23 + $0x8a0] ss:$248 sps:$4 sm:$0xff]  }
 0x1fd   : > { %4694 = vmatpush1.bf16.msra.mxu1 %v6743_v46  ;;  %4654 = vmatprep.subr.bf16.mxu0 %v6748_v48  ;;  %v6785_v46 = vld [vmem:[%s6932_s23 + $0x8a8] ss:$248 sps:$4 sm:$0xff]   ;;  %v6793_v48 = vld [vmem:[%s6932_s23 + $0x6bc] ss:$248 sps:$4 sm:$0xff]  }
 0x1fe   : > { %4695 = vmatprep.subr.bf16.mxu1 %v6751_v49 }
 0x200   : > { %4655 = vmatpush1.bf16.msra.mxu0 %v6746_v51  ;;  %v6788_v51 = vld [vmem:[%s6932_s23 + $0x6b0] ss:$248 sps:$4 sm:$0xff]  }
 0x201   : > { %4696 = vmatpush1.bf16.msra.mxu1 %v6749_v52  ;;  %4656 = vmatprep.subr.bf16.mxu0 %v6754_v55  ;;  %v6791_v52 = vld [vmem:[%s6932_s23 + $0x6b8] ss:$248 sps:$4 sm:$0xff]  }
 0x202   : > { %4697 = vmatprep.subr.bf16.mxu1 %v6757_v56 }
 0x204   : > { %4657 = vmatpush1.bf16.msra.mxu0 %v6752_v57  ;;  %v6796_v57 = vld [vmem:[%s6932_s23 + $0x4c4] ss:$248 sps:$4 sm:$0xff]  }
 0x205   : > { %4698 = vmatpush1.bf16.msra.mxu1 %v6755_v60  ;;  %4672 = vmatprep.subr.bf16.mxu0 %v6760_v61  ;;  %v6799_v60 = vld [vmem:[%s6932_s23 + $0x4cc] ss:$248 sps:$4 sm:$0xff]  }
 0x206   : > { %4713 = vmatprep.subr.bf16.mxu1 %v6763_v62 }
 0x208   : > { %4673 = vmatpush2.bf16.msra.mxu0 %v6758_v63  ;;  %v6794_v63 = vld [vmem:[%s6932_s23 + $0x4c0] ss:$248 sps:$4 sm:$0xff]  }
 0x209   : > { %4714 = vmatpush2.bf16.msra.mxu1 %v6761_v0  ;;  %4724 = vmatprep.subr.bf16.mxu0 %v6766_v6  ;;  %v6797_v0 = vld [vmem:[%s6932_s23 + $0x4c8] ss:$248 sps:$4 sm:$0xff]  }
 0x20a   : > { %4765 = vmatprep.subr.bf16.mxu1 %v6769_v7  ;;  %v6802_v7 = vld [vmem:[%s6932_s23 + $0x2d4] ss:$248 sps:$4 sm:$0xff]  }
 0x20b   : > { %4675 = vmatmul.mubr.bf16.vlgmr.msra.gmra.mxu0 %v6974_v42 }
 0x20c   : > { %4716 = vmatmul.mubr.bf16.vlgmr.msra.gmra.mxu1 %v6974_v42  ;;  %4725 = vmatpush1.bf16.msra.mxu0 %v6764_v18  ;;  %v6805_v18 = vld [vmem:[%s6932_s23 + $0x2dc] ss:$248 sps:$4 sm:$0xff]  }
 0x20d   : > { %4766 = vmatpush1.bf16.msra.mxu1 %v6767_v19  ;;  %4726 = vmatprep.subr.bf16.mxu0 %v6772_v26  ;;  %v6800_v26 = vld [vmem:[%s6932_s23 + $0x2d0] ss:$248 sps:$4 sm:$0xff]  }
 0x20e   : > { %4767 = vmatprep.subr.bf16.mxu1 %v6775_v27  ;;  %5973 = vmatprep.mubr.msk.bf16.mxu0 %vm3572_vm0, %v6920_v2  ;;  %v6803_v27 = vld [vmem:[%s6932_s23 + $0x2d8] ss:$248 sps:$4 sm:$0xff]  }
 0x20f   : > { %5974 = vmatprep.mubr.msk.bf16.mxu1 %vm3572_vm0, %v6920_v2 }
 0x210   : > { %4727 = vmatpush1.bf16.msra.mxu0 %v6770_v28  ;;  %v6808_v28 = vld [vmem:[%s6932_s23 + $0xe4] ss:$248 sps:$4 sm:$0xff]  }
 0x211   : > { %4768 = vmatpush1.bf16.msra.mxu1 %v6773_v29  ;;  %4728 = vmatprep.subr.bf16.mxu0 %v6778_v32  ;;  %v6811_v29 = vld [vmem:[%s6932_s23 + $0xec] ss:$248 sps:$4 sm:$0xff]   ;;  %v6806_v32 = vld [vmem:[%s6932_s23 + $0xe0] ss:$248 sps:$4 sm:$0xff]  }
 0x212   : > { %4769 = vmatprep.subr.bf16.mxu1 %v6781_v33  ;;  %v6809_v33 = vld [vmem:[%s6932_s23 + $0xe8] ss:$248 sps:$4 sm:$0xff]  }
 0x214   : > { %4729 = vmatpush1.bf16.msra.mxu0 %v6776_v40  ;;  %v6814_v40 = vld [vmem:[%s6932_s23 + $0x1064] ss:$248 sps:$4 sm:$0xff]  }
 0x215   : > { %4770 = vmatpush1.bf16.msra.mxu1 %v6779_v41  ;;  %4730 = vmatprep.subr.bf16.mxu0 %v6784_v43  ;;  %v6817_v41 = vld [vmem:[%s6932_s23 + $0x106c] ss:$248 sps:$4 sm:$0xff]   ;;  %v6812_v43 = vld [vmem:[%s6932_s23 + $0x1060] ss:$248 sps:$4 sm:$0xff]  }
 0x216   : > { %4771 = vmatprep.subr.bf16.mxu1 %v6787_v44  ;;  %v6815_v44 = vld [vmem:[%s6932_s23 + $0x1068] ss:$248 sps:$4 sm:$0xff]  }
 0x217   : > { %v7608_v49 = vpop.f32.mrf.mxu0 }
 0x218   : > { %v7610_v50 = vpop.f32.mrf.mxu1  ;;  %4731 = vmatpush1.bf16.msra.mxu0 %v6782_v45  ;;  %v6820_v45 = vld [vmem:[%s6932_s23 + $0xe84] ss:$248 sps:$4 sm:$0xff]  }
 0x219   : > { %4772 = vmatpush1.bf16.msra.mxu1 %v6785_v46  ;;  %v7614_v55 = vpop.f32.mrf.mxu0  ;;  %4732 = vmatprep.subr.bf16.mxu0 %v6790_v47  ;;  %v6818_v46 = vld [vmem:[%s6932_s23 + $0xe80] ss:$248 sps:$4 sm:$0xff]   ;;  %v6823_v47 = vld [vmem:[%s6932_s23 + $0xc94] ss:$248 sps:$4 sm:$0xff]  }
 0x21a   : > { %4773 = vmatprep.subr.bf16.mxu1 %v6793_v48  ;;  %v7616_v56 = vpop.f32.mrf.mxu1  ;;  %v6821_v48 = vld [vmem:[%s6932_s23 + $0xc90] ss:$248 sps:$4 sm:$0xff]  }
 0x21b   : > { %v4270_v61 = vpop.f32.mrf.mxu0 }
 0x21c   : > { %v4311_v62 = vpop.f32.mrf.mxu1  ;;  %4733 = vmatpush1.bf16.msra.mxu0 %v6788_v51  ;;  %v6826_v51 = vld [vmem:[%s6932_s23 + $0xaa4] ss:$248 sps:$4 sm:$0xff]  }
 0x21d   : > { %4774 = vmatpush1.bf16.msra.mxu1 %v6791_v52  ;;  %v4271_v6 = vpop.f32.mrf.mxu0  ;;  %4734 = vmatprep.subr.bf16.mxu0 %v6796_v57  ;;  %v6824_v52 = vld [vmem:[%s6932_s23 + $0xaa0] ss:$248 sps:$4 sm:$0xff]   ;;  %v6829_v57 = vld [vmem:[%s6932_s23 + $0x8b4] ss:$248 sps:$4 sm:$0xff]   ;;  %v6832_v61 = vld [vmem:[%s6932_s23 + $0x6c4] ss:$248 sps:$4 sm:$0xff]  }
 0x21e   : > { %4775 = vmatprep.subr.bf16.mxu1 %v6799_v60  ;;  %v4312_v19 = vpop.f32.mrf.mxu1  ;;  %v6827_v60 = vld [vmem:[%s6932_s23 + $0x8b0] ss:$248 sps:$4 sm:$0xff]  }
 0x220   : > { %4735 = vmatpush1.bf16.msra.mxu0 %v6794_v63 }
 0x221   : > { %4776 = vmatpush1.bf16.msra.mxu1 %v6797_v0  ;;  %4736 = vmatprep.subr.bf16.mxu0 %v6802_v7  ;;  %v6830_v0 = vld [vmem:[%s6932_s23 + $0x6c0] ss:$248 sps:$4 sm:$0xff]   ;;  %v6835_v7 = vld [vmem:[%s6932_s23 + $0x4d4] ss:$248 sps:$4 sm:$0xff]  }
 0x222   : > { %4777 = vmatprep.subr.bf16.mxu1 %v6805_v18  ;;  %v7657_v18 = vpop.permute.xlu0 %773 }
 0x224   : > { %4737 = vmatpush1.bf16.msra.mxu0 %v6800_v26 }
 0x225   : > { %4778 = vmatpush1.bf16.msra.mxu1 %v6803_v27  ;;  %4738 = vmatprep.subr.bf16.mxu0 %v6808_v28  ;;  %v6833_v27 = vld [vmem:[%s6932_s23 + $0x4d0] ss:$248 sps:$4 sm:$0xff]  }
 0x226   : > { %4779 = vmatprep.subr.bf16.mxu1 %v6811_v29  ;;  %v6838_v29 = vld [vmem:[%s6932_s23 + $0x2e4] ss:$248 sps:$4 sm:$0xff]  }
 0x228   : > { %4739 = vmatpush1.bf16.msra.mxu0 %v6806_v32 }
 0x229   : > { %4780 = vmatpush1.bf16.msra.mxu1 %v6809_v33  ;;  %4754 = vmatprep.subr.bf16.mxu0 %v6814_v40  ;;  %v7663_v33 = vadd.f32 %v7208_v53, %v7657_v18  ;;  %v7667_v40 = vadd.f32 %v7215_v58, %v7657_v18  ;;  %v6839_v53 = vld [vmem:[%s6932_s23 + $0xf0] ss:$248 sps:$4 sm:$0xff]  }
 0x22a   : > { %4795 = vmatprep.subr.bf16.mxu1 %v6817_v41  ;;  %v6836_v41 = vld [vmem:[%s6932_s23 + $0x2e0] ss:$248 sps:$4 sm:$0xff]  }
 0x22c   : > { %4755 = vmatpush2.bf16.msra.mxu0 %v6812_v43  ;;  %v6841_v43 = vld [vmem:[%s6932_s23 + $0xf4] ss:$248 sps:$4 sm:$0xff]  }
 0x22d   : > { %4796 = vmatpush2.bf16.msra.mxu1 %v6815_v44  ;;  %4806 = vmatprep.subr.bf16.mxu0 %v6820_v45  ;;  %v8789_v44 = vmax.f32 %v7663_v33, 0.0  ;;  %v8788_v45 = vmax.f32 %v7667_v40, 0.0 }
 0x22f   : > { %4757 = vmatmul.mubr.bf16.vlgmr.msra.gmra.mxu0 %v6974_v42  ;;  %v4909_v58 = vadd.f32 %v8788_v45, %v8789_v44 }
 0x230   : > { %4798 = vmatmul.mubr.bf16.vlgmr.msra.gmra.mxu1 %v6974_v42  ;;  %4807 = vmatpush1.bf16.msra.mxu0 %v6818_v46  ;;  %v7675_v46 = vadd.f32 %v7210_v54, %v7657_v18  ;;  %v6842_v54 = vld [vmem:[%s6932_s23 + $0x1070] ss:$248 sps:$4 sm:$0xff]  }
 0x231   : > { %5975 = vmatprep.mubr.msk.bf16.mxu0 %vm3572_vm0, %v6920_v2  ;;  %4808 = vmatprep.subr.bf16.mxu0 %v6823_v47  ;;  %v6844_v47 = vld [vmem:[%s6932_s23 + $0x1074] ss:$248 sps:$4 sm:$0xff]  }
 0x234   : > { %4809 = vmatpush1.bf16.msra.mxu0 %v6821_v48  ;;  %v8785_v48 = vmax.f32 %v7675_v46, 0.0 }
 0x235   : > { %4810 = vmatprep.subr.bf16.mxu0 %v6826_v51  ;;  %v7686_v51 = vadd.f32 %v7217_v59, %v7657_v18 }
 0x238   : > { %4811 = vmatpush1.bf16.msra.mxu0 %v6824_v52  ;;  %v7690_v52 = vadd.f32 %v7260_v36, %v7657_v18 }
 0x239   : > { %4812 = vmatprep.subr.bf16.mxu0 %v6829_v57  ;;  %v4910_v57 = vadd.f32 %v4909_v58, %v8785_v48 }
 0x23b   : > { %v7647_v62 = vpop.f32.mrf.mxu0 }
 0x23c   : > { %v7649_v63 = vpop.f32.mrf.mxu1  ;;  %4813 = vmatpush1.bf16.msra.mxu0 %v6827_v60  ;;  %v8775_v60 = vmax.f32 %v7686_v51, 0.0 }
 0x23d   : > { %v7652_v2 = vpop.f32.mrf.mxu0  ;;  %4814 = vmatprep.subr.bf16.mxu0 %v6832_v61  ;;  %v8774_v61 = vmax.f32 %v7690_v52, 0.0 }
 0x23e   : > { %v7654_v6 = vpop.f32.mrf.mxu1  ;;  %v4911_v59 = vadd.f32 %v4910_v57, %v8775_v60 }
 0x23f   : > { %v4352_v19 = vpop.f32.mrf.mxu0 }
 0x240   : > { %v4393_v26 = vpop.f32.mrf.mxu1  ;;  %4815 = vmatpush1.bf16.msra.mxu0 %v6830_v0  ;;  %v7699_v0 = vadd.f32 %v7264_v38, %v7657_v18  ;;  %v4912_v36 = vadd.f32 %v4911_v59, %v8774_v61  ;;  %v7709_v19 = vadd.f32 %v7262_v37, %v7657_v18 }
 0x241   : > { %v4353_v28 = vpop.f32.mrf.mxu0  ;;  %4816 = vmatprep.subr.bf16.mxu0 %v6835_v7 }
 0x242   : > { %v4394_v32 = vpop.f32.mrf.mxu1  ;;  %v8773_v7 = vmax.f32 %v7699_v0, 0.0  ;;  %v8772_v38 = vmax.f32 %v7709_v19, 0.0 }
 0x243   : > { %v7728_v32 = vadd.f32 %v7314_v24, %v7657_v18  ;;  %v7745_v24 = vadd.f32 %v7312_v23, %v7657_v18 }
 0x244   : > { %4817 = vmatpush1.bf16.msra.mxu0 %v6833_v27  ;;  %v4913_v26 = vadd.f32 %v4912_v36, %v8773_v7  ;;  %v7716_v27 = vadd.f32 %v7266_v39, %v7657_v18 }
 0x245   : > { %4818 = vmatprep.subr.bf16.mxu0 %v6838_v29  ;;  %v8767_v58 = vmax.f32 %v7728_v32, 0.0 }
 0x246   : > { %v4914_v28 = vadd.f32 %v4913_v26, %v8772_v38  ;;  %v8761_v29 = vmax.f32 %v7716_v27, 0.0  ;;  %v7828_v38 = vadd.f32 %v7464_v10, %v7657_v18 }
 0x248   : > { %4819 = vmatpush1.bf16.msra.mxu0 %v6836_v41  ;;  %v4915_v39 = vadd.f32 %v4914_v28, %v8761_v29  ;;  %v8762_v28 = vmax.f32 %v7745_v24, 0.0  ;;  %v7752_v29 = vadd.f32 %v7316_v25, %v7657_v18 }
 0x249   : > { %4820 = vmatprep.subr.bf16.mxu0 %v6841_v43 }
 0x24c   : > { %4821 = vmatpush1.bf16.msra.mxu0 %v6839_v53 }
 0x24d   : > { %4836 = vmatprep.subr.bf16.mxu0 %v6844_v47 }
 0x250   : > { %4837 = vmatpush2.bf16.msra.mxu0 %v6842_v54 }
 0x253   : > { %4839 = vmatmul.mubr.bf16.vlgmr.msra.gmra.mxu0 %v6974_v42  ;;  %v7720_v42 = vadd.f32 %v7310_v22, %v7657_v18 }
 0x255   : > { %v8771_v37 = vmax.f32 %v7720_v42, 0.0 }
 0x257   : > { %v4916_v47 = vadd.f32 %v4915_v39, %v8771_v37  ;;  %v7756_v39 = vadd.f32 %v7360_v12, %v7657_v18 }
 0x259   : > { %v4917_v26 = vadd.f32 %v4916_v47, %v8767_v58  ;;  %v7764_v47 = vadd.f32 %v7364_v14, %v7657_v18  ;;  %v7780_v14 = vadd.f32 %v7366_v15, %v7657_v18 }
 0x25b   : > { %v4918_v23 = vadd.f32 %v4917_v26, %v8762_v28  ;;  %v8764_v12 = vmax.f32 %v7764_v47, 0.0 }
 0x25f   : > { %v7730_v41 = vpop.f32.mrf.mxu0 }
 0x260   : > { %v7732_v43 = vpop.f32.mrf.mxu1 }
 0x261   : > { %v7736_v22 = vpop.f32.mrf.mxu0 }
 0x262   : > { %v7738_v53 = vpop.f32.mrf.mxu1 }
 0x263   : > { %v4434_v54 = vpop.f32.mrf.mxu0 }
 0x264   : > { %v4475_v57 = vpop.f32.mrf.mxu1  ;;  %v8765_v54 = vmax.f32 %v7752_v29, 0.0 }
 0x265   : > { %v4435_v59 = vpop.f32.mrf.mxu0  ;;  %v8763_v57 = vmax.f32 %v7756_v39, 0.0 }
 0x266   : > { %v4476_v36 = vpop.f32.mrf.mxu1  ;;  %v4919_v59 = vadd.f32 %v4918_v23, %v8765_v54  ;;  %v7784_v23 = vadd.f32 %v7408_v4, %v7657_v18  ;;  %v7801_v54 = vadd.f32 %v7410_v5, %v7657_v18 }
 0x267   : > { %v7773_v36 = vadd.f32 %v7362_v13, %v7657_v18 }
 0x268   : > { %v4920_v25 = vadd.f32 %v4919_v59, %v8763_v57  ;;  %v8770_v57 = vmax.f32 %v7780_v14, 0.0  ;;  %v8768_v13 = vmax.f32 %v7784_v23, 0.0 }
 0x269   : > { %v8766_v28 = vmax.f32 %v7773_v36, 0.0 }
 0x26a   : > { %v4921_v26 = vadd.f32 %v4920_v25, %v8764_v12  ;;  %v7792_v25 = vadd.f32 %v7414_v8, %v7657_v18  ;;  %v7808_v8 = vadd.f32 %v7416_v9, %v7657_v18 }
 0x26c   : > { %v4922_v59 = vadd.f32 %v4921_v26, %v8766_v28  ;;  %v8769_v4 = vmax.f32 %v7792_v25, 0.0  ;;  %v8784_v28 = vmax.f32 %v7801_v54, 0.0 }
 0x26e   : > { %v4923_v12 = vadd.f32 %v4922_v59, %v8770_v57 }
 0x270   : > { %v4924_v15 = vadd.f32 %v4923_v12, %v8768_v13  ;;  %v7816_v12 = vadd.f32 %v7458_v1, %v7657_v18 }
 0x272   : > { %v4925_v26 = vadd.f32 %v4924_v15, %v8769_v4  ;;  %v8783_v4 = vmax.f32 %v7808_v8, 0.0  ;;  %v8777_v37 = vmax.f32 %v7816_v12, 0.0 }
 0x274   : > { %v4926_v15 = vadd.f32 %v4925_v26, %v8784_v28  ;;  %v8776_v26 = vmax.f32 %v7828_v38, 0.0 }
 0x276   : > { %v4927_v61 = vadd.f32 %v4926_v15, %v8783_v4  ;;  %v7848_v15 = vadd.f32 %v7508_v16, %v7657_v18 }
 0x278   : > { %v4928_v60 = vadd.f32 %v4927_v61, %v8777_v37  ;;  %v7865_v37 = vadd.f32 %v7510_v17, %v7657_v18 }
 0x283   : > { %v7810_v58 = vpop.f32.mrf.mxu0 }
 0x284   : > { %v7812_v59 = vpop.f32.mrf.mxu1 }
 0x285   : > { %v7818_v13 = vpop.f32.mrf.mxu0 }
 0x286   : > { %v7820_v5 = vpop.f32.mrf.mxu1 }
 0x287   : > { %v4516_v57 = vpop.f32.mrf.mxu0 }
 0x288   : > { %v4557_v9 = vpop.f32.mrf.mxu1  ;;  %v7837_v57 = vadd.f32 %v7460_v3, %v7657_v18  ;;  %v8779_v3 = vmax.f32 %v7848_v15, 0.0 }
 0x289   : > { %v4517_v7 = vpop.f32.mrf.mxu0  ;;  %v4929_v9 = vadd.f32 %v4928_v60, %v8776_v26  ;;  %v7856_v60 = vadd.f32 %v7514_v20, %v7657_v18  ;;  %v7872_v20 = vadd.f32 %v7516_v21, %v7657_v18 }
 0x28a   : > { %v4558_v1 = vpop.f32.mrf.mxu1  ;;  %v8778_v10 = vmax.f32 %v7837_v57, 0.0  ;;  %v7844_v7 = vadd.f32 %v7466_v11, %v7657_v18 }
 0x28b   : > { %v8780_v16 = vmax.f32 %v7856_v60, 0.0 }
 0x28c   : > { %v4930_v61 = vadd.f32 %v4929_v9, %v8778_v10  ;;  %v8781_v1 = vmax.f32 %v7844_v7, 0.0  ;;  %v8782_v10 = vmax.f32 %v7865_v37, 0.0 }
 0x28e   : > { %v4931_v26 = vadd.f32 %v4930_v61, %v8781_v1  ;;  %v7876_v61 = vadd.f32 %v7558_v30, %v7657_v18 }
 0x290   : > { %v4932_v11 = vadd.f32 %v4931_v26, %v8779_v3  ;;  %v8786_v3 = vmax.f32 %v7872_v20, 0.0  ;;  %v8787_v17 = vmax.f32 %v7876_v61, 0.0 }
 0x292   : > { %v4933_v9 = vadd.f32 %v4932_v11, %v8780_v16  ;;  %v7884_v11 = vadd.f32 %v7564_v34, %v7657_v18 }
 0x294   : > { %v4934_v26 = vadd.f32 %v4933_v9, %v8782_v10  ;;  %v8797_v9 = vmax.f32 %v7884_v11, 0.0  ;;  %v7897_v10 = vadd.f32 %v7560_v31, %v7657_v18  ;;  %v7912_v31 = vadd.f32 %v7608_v49, %v7657_v18 }
 0x296   : > { %v4935_v16 = vadd.f32 %v4934_v26, %v8786_v3  ;;  %v8790_v3 = vmax.f32 %v7897_v10, 0.0 }
 0x298   : > { %v4936_v30 = vadd.f32 %v4935_v16, %v8787_v17  ;;  %v7908_v16 = vadd.f32 %v7566_v35, %v7657_v18 }
 0x29a   : > { %v4937_v26 = vadd.f32 %v4936_v30, %v8797_v9  ;;  %v7920_v30 = vadd.f32 %v7614_v55, %v7657_v18  ;;  %v7936_v55 = vadd.f32 %v7616_v56, %v7657_v18 }
 0x29c   : > { %v4938_v44 = vadd.f32 %v4937_v26, %v8790_v3  ;;  %v8792_v49 = vmax.f32 %v7920_v30, 0.0  ;;  %8847 = vst [vmem:[#allocation3_spill] sm:$0xff] %v7936_v55 }
 0x2a7   : > { %v7888_v21 = vpop.f32.mrf.mxu0 }
 0x2a8   : > { %v7890_v1 = vpop.f32.mrf.mxu1 }
 0x2a9   : > { %v7899_v4 = vpop.f32.mrf.mxu0 }
 0x2aa   : > { %v7901_v34 = vpop.f32.mrf.mxu1 }
 0x2ab   : > { %v4598_v28 = vpop.f32.mrf.mxu0 }
 0x2ac   : > { %v4639_v48 = vpop.f32.mrf.mxu1  ;;  %v8791_v28 = vmax.f32 %v7912_v31, 0.0 }
 0x2ad   : > { %v4599_v17 = vpop.f32.mrf.mxu0  ;;  %v8793_v48 = vmax.f32 %v7908_v16, 0.0 }
 0x2ae   : > { %v4640_v45 = vpop.f32.mrf.mxu1  ;;  %v7929_v17 = vadd.f32 %v7610_v50, %v7657_v18 }
 0x2af   : > { %v4939_v35 = vadd.f32 %v4938_v44, %v8793_v48  ;;  %v7940_v44 = vadd.f32 %v7647_v62, %v7657_v18  ;;  %v7957_v48 = vadd.f32 %v7649_v63, %v7657_v18 }
 0x2b0   : > { %8846 = vst [vmem:[#allocation2_spill] sm:$0xff] %v7929_v17  ;;  %v8794_v3 = vmax.f32 %v7929_v17, 0.0 }
 0x2b1   : > { %v4940_v45 = vadd.f32 %v4939_v35, %v8791_v28  ;;  %8848 = vst [vmem:[#allocation4_spill] sm:$0xff] %v7940_v44  ;;  %v8796_v28 = vmax.f32 %v7936_v55, 0.0  ;;  %v8795_v50 = vmax.f32 %v7940_v44, 0.0  ;;  %8850 = vst [vmem:[#allocation6_spill] sm:$0xff] %v7957_v48 }
 0x2b3   : > { %v4941_v26 = vadd.f32 %v4940_v45, %v8792_v49  ;;  %v7948_v45 = vadd.f32 %v7652_v2, %v7657_v18  ;;  %v7964_v2 = vadd.f32 %v7654_v6, %v7657_v18 }
 0x2b5   : > { %v4942_v35 = vadd.f32 %v4941_v26, %v8794_v3  ;;  %8849 = vst [vmem:[#allocation5_spill] sm:$0xff] %v7948_v45  ;;  %v8799_v62 = vmax.f32 %v7948_v45, 0.0  ;;  %v8803_v3 = vmax.f32 %v7957_v48, 0.0  ;;  %v8812_v63 = vmax.f32 %v7964_v2, 0.0 }
 0x2b6   : > { %v7985_v48 = vadd.f32 %v7732_v43, %v7657_v18 }
 0x2b7   : > { %v4943_v49 = vadd.f32 %v4942_v35, %v8796_v28  ;;  %v7968_v35 = vadd.f32 %v7730_v41, %v7657_v18 }
 0x2b9   : > { %v4944_v56 = vadd.f32 %v4943_v49, %v8795_v50 }
 0x2bb   : > { %v4945_v26 = vadd.f32 %v4944_v56, %v8799_v62  ;;  %v8810_v56 = vmax.f32 %v7968_v35, 0.0  ;;  %v7976_v62 = vadd.f32 %v7736_v22, %v7657_v18 }
 0x2bd   : > { %v4946_v28 = vadd.f32 %v4945_v26, %v8803_v3  ;;  %v8805_v3 = vmax.f32 %v7976_v62, 0.0 }
 0x2bf   : > { %v4947_v41 = vadd.f32 %v4946_v28, %v8812_v63  ;;  %v7996_v28 = vadd.f32 %v7810_v58, %v7657_v18 }
 0x2c1   : > { %v4948_v26 = vadd.f32 %v4947_v41, %v8810_v56  ;;  %v8807_v43 = vmax.f32 %v7996_v28, 0.0  ;;  %v8004_v41 = vadd.f32 %v7818_v13, %v7657_v18  ;;  %v8020_v13 = vadd.f32 %v7820_v5, %v7657_v18 }
 0x2c3   : > { %v4949_v22 = vadd.f32 %v4948_v26, %v8805_v3  ;;  %8851 = vst [vmem:[#allocation7_spill] sm:$0xff] %v8004_v41  ;;  %v8808_v58 = vmax.f32 %v8004_v41, 0.0  ;;  %v8013_v3 = vadd.f32 %v7812_v59, %v7657_v18  ;;  %8853 = vst [vmem:[#allocation9_spill] sm:$0xff] %v8020_v13 }
 0x2c5   : > { %8852 = vst [vmem:[#allocation8_spill] sm:$0xff] %v8013_v3 }
 0x2cb   : > { %v4676_v49 = vpop.f32.mrf.mxu0 }
 0x2cc   : > { %v4717_v50 = vpop.f32.mrf.mxu1 }
 0x2cd   : > { %v4678_v9 = vpop.f32.mrf.mxu0 }
 0x2ce   : > { %v4719_v45 = vpop.f32.mrf.mxu1 }
 0x2cf   : > { %v4680_v6 = vpop.f32.mrf.mxu0 }
 0x2d0   : > { %v4721_v44 = vpop.f32.mrf.mxu1  ;;  %v8806_v6 = vmax.f32 %v7985_v48, 0.0 }
 0x2d1   : > { %v4681_v55 = vpop.f32.mrf.mxu0  ;;  %v7992_v44 = vadd.f32 %v7738_v53, %v7657_v18 }
 0x2d2   : > { %v4722_v17 = vpop.f32.mrf.mxu1 }
 0x2d3   : > { %v4950_v17 = vadd.f32 %v4949_v22, %v8806_v6  ;;  %v8809_v55 = vmax.f32 %v7992_v44, 0.0  ;;  %v8811_v6 = vmax.f32 %v8013_v3, 0.0 }
 0x2d5   : > { %v4951_v26 = vadd.f32 %v4950_v17, %v8809_v55  ;;  %v8024_v17 = vadd.f32 %v7888_v21, %v7657_v18 }
 0x2d7   : > { %v4952_v53 = vadd.f32 %v4951_v26, %v8807_v43  ;;  %8854 = vst [vmem:[#allocation10_spill] sm:$0xff] %v8024_v17  ;;  %v8816_v43 = vmax.f32 %v8020_v13, 0.0  ;;  %v8815_v59 = vmax.f32 %v8024_v17, 0.0 }
 0x2d9   : > { %v4953_v22 = vadd.f32 %v4952_v53, %v8808_v58  ;;  %v8032_v53 = vadd.f32 %v7899_v4, %v7657_v18 }
 0x2db   : > { %v4954_v26 = vadd.f32 %v4953_v22, %v8811_v6  ;;  %v8828_v21 = vmax.f32 %v8032_v53, 0.0  ;;  %v8041_v22 = vadd.f32 %v7890_v1, %v7657_v18 }
 0x2dd   : > { %v4955_v58 = vadd.f32 %v4954_v26, %v8816_v43  ;;  %v8819_v26 = vmax.f32 %v8041_v22, 0.0 }
 0x2df   : > { %v4956_v5 = vadd.f32 %v4955_v58, %v8815_v59  ;;  %v8048_v58 = vadd.f32 %v7901_v34, %v7657_v18  ;;  %v8051_v59 = vadd.f32 %v4676_v49, %v7657_v18 }
 0x2e1   : > { %v4957_v4 = vadd.f32 %v4956_v5, %v8828_v21  ;;  %v8823_v13 = vmax.f32 %v8048_v58, 0.0  ;;  %v8820_v5 = vmax.f32 %v8051_v59, 0.0 }
 0x2e3   : > { %v4958_v1 = vadd.f32 %v4957_v4, %v8819_v26  ;;  %v8072_v26 = vadd.f32 %v4719_v45, %v7657_v18 }
 0x2ef   : > { %v4758_v55 = vpop.f32.mrf.mxu0 }
 0x2f0   : > { %v4799_v56 = vpop.f32.mrf.mxu1 }
 0x2f1   : > { %v4760_v6 = vpop.f32.mrf.mxu0 }
 0x2f2   : > { %v4801_v63 = vpop.f32.mrf.mxu1 }
 0x2f3   : > { %v4762_v3 = vpop.f32.mrf.mxu0 }
 0x2f4   : > { %v4803_v41 = vpop.f32.mrf.mxu1  ;;  %v8058_v3 = vadd.f32 %v4678_v9, %v7657_v18  ;;  %v8075_v9 = vadd.f32 %v4758_v55, %v7657_v18  ;;  %v8090_v55 = vadd.f32 %v4799_v56, %v7657_v18 }
 0x2f5   : > { %v4763_v43 = vpop.f32.mrf.mxu0  ;;  %v4959_v41 = vadd.f32 %v4958_v1, %v8823_v13  ;;  %v8096_v13 = vadd.f32 %v4801_v63, %v7657_v18 }
 0x2f6   : > { %v4804_v17 = vpop.f32.mrf.mxu1  ;;  %v8821_v49 = vmax.f32 %v8058_v3, 0.0  ;;  %v8066_v43 = vadd.f32 %v4717_v50, %v7657_v18  ;;  %v8082_v50 = vadd.f32 %v4760_v6, %v7657_v18  ;;  %8855 = vst [vmem:[#allocation11_spill] sm:$0xff] %v8090_v55 }
 0x2f7   : > { %v4960_v34 = vadd.f32 %v4959_v41, %v8820_v5  ;;  %v8824_v41 = vmax.f32 %v8072_v26, 0.0  ;;  %v8825_v5 = vmax.f32 %v8075_v9, 0.0 }
 0x2f8   : > { %v8822_v4 = vmax.f32 %v8066_v43, 0.0 }
 0x2f9   : > { %v4961_v17 = vadd.f32 %v4960_v34, %v8821_v49  ;;  %v8826_v49 = vmax.f32 %v8082_v50, 0.0 }
 0x2fb   : > { %v4962_v1 = vadd.f32 %v4961_v17, %v8822_v4  ;;  %v8827_v4 = vmax.f32 %v8090_v55, 0.0 }
 0x2fd   : > { %v4963_v34 = vadd.f32 %v4962_v1, %v8824_v41  ;;  %v8830_v41 = vmax.f32 %v8096_v13, 0.0 }
 0x2ff   : > { %v4964_v45 = vadd.f32 %v4963_v34, %v8825_v5 }
 0x301   : > { %v4965_v17 = vadd.f32 %v4964_v45, %v8826_v49 }
 0x303   : > { %v4966_v6 = vadd.f32 %v4965_v17, %v8827_v4 }
 0x305   : > { %v4967_v56 = vadd.f32 %v4966_v6, %v8830_v41 }
 0x313   : > { %v4840_v1 = vpop.f32.mrf.mxu0 }
 0x314   : > { %v8102_v34 = vadd.f32 %v4840_v1, %v7657_v18 }
 0x315   : > { %v4842_v5 = vpop.f32.mrf.mxu0 }
 0x316   : > { %v8831_v45 = vmax.f32 %v8102_v34, 0.0  ;;  %v8108_v49 = vadd.f32 %v4842_v5, %v7657_v18  ;;  %v8856_v18 = vmax.f32 %v7663_v33, 0.0  ;;  %v8860_v33 = vmax.f32 %v7686_v51, 0.0 }
 0x317   : > { %v4844_v63 = vpop.f32.mrf.mxu0 }
 0x318   : > { %v4968_v17 = vadd.f32 %v4967_v56, %v8831_v45  ;;  %v8832_v4 = vmax.f32 %v8108_v49, 0.0  ;;  %v8857_v56 = vmax.f32 %v7667_v40, 0.0  ;;  %v8861_v40 = vmax.f32 %v7690_v52, 0.0 }
 0x319   : > { %v4845_v21 = vpop.f32.mrf.mxu0 }
 0x31a   : > { %v4970_v1 = vsel %vm4969_vm1, %v8832_v4, 0.0  ;;  %v8859_v21 = vmax.f32 %v7675_v46, 0.0 }
 0x31b   : > { %v4971_v55 = vadd.f32 %v4970_v1, %v4968_v17 }
 0x31d   : > { %4972 = vadd.xlane.f32.xlu0 %v4971_v55 }
 0x3a6   : > { %v4973_v6 = vpop.xlane.xlu0 %4972 }
 0x3a7   : > { %v8116_v41 = vmul.f32 0.00012624668, %v4973_v6 }
 0x3a9   : > { %v8121_v5 = vsub.f32 %v8856_v18, %v8116_v41  ;;  %v8126_v63 = vsub.f32 %v8857_v56, %v8116_v41  ;;  %v8131_v45 = vsub.f32 %v8859_v21, %v8116_v41  ;;  %v8140_v1 = vsub.f32 %v8860_v33, %v8116_v41 }
 0x3aa   : > { %v8145_v6 = vsub.f32 %v8861_v40, %v8116_v41  ;;  %v8862_v56 = vmax.f32 %v7699_v0, 0.0  ;;  %v8863_v33 = vmax.f32 %v7709_v19, 0.0 }
 0x3ab   : > { %8858 = vst [vmem:[#allocation12_spill] sm:$0xff] %v8126_v63  ;;  %v5038_v55 = vmul.f32 %v8121_v5, %v8121_v5  ;;  %v5039_v17 = vmul.f32 %v8126_v63, %v8126_v63  ;;  %v5040_v46 = vmul.f32 %v8131_v45, %v8131_v45  ;;  %v5041_v4 = vmul.f32 %v8140_v1, %v8140_v1 }
 0x3ac   : > { %v8152_v21 = vsub.f32 %v8862_v56, %v8116_v41  ;;  %v8159_v63 = vsub.f32 %v8863_v33, %v8116_v41  ;;  %v5042_v52 = vmul.f32 %v8145_v6, %v8145_v6 }
 0x3ad   : > { %v5100_v18 = vadd.f32 %v5039_v17, %v5038_v55  ;;  %v8864_v55 = vmax.f32 %v7716_v27, 0.0 }
 0x3ae   : > { %v5043_v0 = vmul.f32 %v8152_v21, %v8152_v21  ;;  %v5044_v19 = vmul.f32 %v8159_v63, %v8159_v63 }
 0x3af   : > { %v5101_v51 = vadd.f32 %v5100_v18, %v5040_v46  ;;  %v8166_v17 = vsub.f32 %v8864_v55, %v8116_v41  ;;  %v8865_v46 = vmax.f32 %v7720_v42, 0.0 }
 0x3b1   : > { %v5102_v40 = vadd.f32 %v5101_v51, %v5041_v4  ;;  %v8173_v18 = vsub.f32 %v8865_v46, %v8116_v41  ;;  %v8866_v4 = vmax.f32 %v7728_v32, 0.0  ;;  %v5045_v27 = vmul.f32 %v8166_v17, %v8166_v17 }
 0x3b3   : > { %v5103_v56 = vadd.f32 %v5102_v40, %v5042_v52  ;;  %v8180_v51 = vsub.f32 %v8866_v4, %v8116_v41  ;;  %v8867_v52 = vmax.f32 %v7745_v24, 0.0  ;;  %v5046_v42 = vmul.f32 %v8173_v18, %v8173_v18 }
 0x3b5   : > { %v5104_v33 = vadd.f32 %v5103_v56, %v5043_v0  ;;  %v8187_v40 = vsub.f32 %v8867_v52, %v8116_v41  ;;  %v8868_v0 = vmax.f32 %v7752_v29, 0.0  ;;  %v5047_v32 = vmul.f32 %v8180_v51, %v8180_v51 }
 0x3b7   : > { %v5105_v55 = vadd.f32 %v5104_v33, %v5044_v19  ;;  %v8194_v56 = vsub.f32 %v8868_v0, %v8116_v41  ;;  %v8869_v19 = vmax.f32 %v7756_v39, 0.0  ;;  %v5048_v24 = vmul.f32 %v8187_v40, %v8187_v40 }
 0x3b9   : > { %v5106_v46 = vadd.f32 %v5105_v55, %v5045_v27  ;;  %v8201_v33 = vsub.f32 %v8869_v19, %v8116_v41  ;;  %v8870_v27 = vmax.f32 %v7764_v47, 0.0  ;;  %v5049_v29 = vmul.f32 %v8194_v56, %v8194_v56 }
 0x3bb   : > { %v5107_v4 = vadd.f32 %v5106_v46, %v5046_v42  ;;  %v8208_v55 = vsub.f32 %v8870_v27, %v8116_v41  ;;  %v8871_v42 = vmax.f32 %v7773_v36, 0.0  ;;  %v5050_v39 = vmul.f32 %v8201_v33, %v8201_v33 }
 0x3bd   : > { %v5108_v52 = vadd.f32 %v5107_v4, %v5047_v32  ;;  %v8215_v46 = vsub.f32 %v8871_v42, %v8116_v41  ;;  %v8872_v32 = vmax.f32 %v7780_v14, 0.0  ;;  %v5051_v47 = vmul.f32 %v8208_v55, %v8208_v55 }
 0x3bf   : > { %v5109_v0 = vadd.f32 %v5108_v52, %v5048_v24  ;;  %v8222_v4 = vsub.f32 %v8872_v32, %v8116_v41  ;;  %v8873_v24 = vmax.f32 %v7784_v23, 0.0  ;;  %v5052_v36 = vmul.f32 %v8215_v46, %v8215_v46 }
 0x3c1   : > { %v5110_v19 = vadd.f32 %v5109_v0, %v5049_v29  ;;  %v8229_v52 = vsub.f32 %v8873_v24, %v8116_v41  ;;  %v8874_v29 = vmax.f32 %v7792_v25, 0.0  ;;  %v5053_v14 = vmul.f32 %v8222_v4, %v8222_v4 }
 0x3c3   : > { %v5111_v27 = vadd.f32 %v5110_v19, %v5050_v39  ;;  %v8236_v0 = vsub.f32 %v8874_v29, %v8116_v41  ;;  %v8875_v39 = vmax.f32 %v7801_v54, 0.0  ;;  %v5054_v23 = vmul.f32 %v8229_v52, %v8229_v52 }
 0x3c5   : > { %v5112_v42 = vadd.f32 %v5111_v27, %v5051_v47  ;;  %v8243_v19 = vsub.f32 %v8875_v39, %v8116_v41  ;;  %v8876_v47 = vmax.f32 %v7808_v8, 0.0  ;;  %v5055_v25 = vmul.f32 %v8236_v0, %v8236_v0 }
 0x3c7   : > { %v5113_v32 = vadd.f32 %v5112_v42, %v5052_v36  ;;  %v8250_v27 = vsub.f32 %v8876_v47, %v8116_v41  ;;  %v8877_v36 = vmax.f32 %v7816_v12, 0.0  ;;  %v5056_v54 = vmul.f32 %v8243_v19, %v8243_v19 }
 0x3c9   : > { %v5114_v24 = vadd.f32 %v5113_v32, %v5053_v14  ;;  %v8257_v42 = vsub.f32 %v8877_v36, %v8116_v41  ;;  %v8878_v14 = vmax.f32 %v7828_v38, 0.0  ;;  %v5057_v8 = vmul.f32 %v8250_v27, %v8250_v27 }
 0x3cb   : > { %v5115_v29 = vadd.f32 %v5114_v24, %v5054_v23  ;;  %v8264_v32 = vsub.f32 %v8878_v14, %v8116_v41  ;;  %v8879_v23 = vmax.f32 %v7837_v57, 0.0  ;;  %v5058_v12 = vmul.f32 %v8257_v42, %v8257_v42 }
 0x3cd   : > { %v5116_v39 = vadd.f32 %v5115_v29, %v5055_v25  ;;  %v8271_v24 = vsub.f32 %v8879_v23, %v8116_v41  ;;  %v8880_v25 = vmax.f32 %v7844_v7, 0.0  ;;  %v5059_v38 = vmul.f32 %v8264_v32, %v8264_v32 }
 0x3cf   : > { %v5117_v47 = vadd.f32 %v5116_v39, %v5056_v54  ;;  %v8278_v29 = vsub.f32 %v8880_v25, %v8116_v41  ;;  %v8881_v54 = vmax.f32 %v7848_v15, 0.0  ;;  %v5060_v57 = vmul.f32 %v8271_v24, %v8271_v24 }
 0x3d1   : > { %v5118_v36 = vadd.f32 %v5117_v47, %v5057_v8  ;;  %v8285_v39 = vsub.f32 %v8881_v54, %v8116_v41  ;;  %v8882_v8 = vmax.f32 %v7856_v60, 0.0  ;;  %v5061_v7 = vmul.f32 %v8278_v29, %v8278_v29 }
 0x3d3   : > { %v5119_v14 = vadd.f32 %v5118_v36, %v5058_v12  ;;  %v8292_v47 = vsub.f32 %v8882_v8, %v8116_v41  ;;  %v8883_v12 = vmax.f32 %v7865_v37, 0.0  ;;  %v5062_v15 = vmul.f32 %v8285_v39, %v8285_v39 }
 0x3d5   : > { %v5120_v23 = vadd.f32 %v5119_v14, %v5059_v38  ;;  %v8299_v36 = vsub.f32 %v8883_v12, %v8116_v41  ;;  %v8884_v38 = vmax.f32 %v7872_v20, 0.0  ;;  %v5063_v60 = vmul.f32 %v8292_v47, %v8292_v47 }
 0x3d7   : > { %v5121_v25 = vadd.f32 %v5120_v23, %v5060_v57  ;;  %v8306_v14 = vsub.f32 %v8884_v38, %v8116_v41  ;;  %v8885_v57 = vmax.f32 %v7876_v61, 0.0  ;;  %v5064_v37 = vmul.f32 %v8299_v36, %v8299_v36 }
 0x3d9   : > { %v5122_v54 = vadd.f32 %v5121_v25, %v5061_v7  ;;  %v8313_v23 = vsub.f32 %v8885_v57, %v8116_v41  ;;  %v8886_v7 = vmax.f32 %v7884_v11, 0.0  ;;  %v5065_v20 = vmul.f32 %v8306_v14, %v8306_v14 }
 0x3db   : > { %v5123_v8 = vadd.f32 %v5122_v54, %v5062_v15  ;;  %v8320_v25 = vsub.f32 %v8886_v7, %v8116_v41  ;;  %v8888_v15 = vmax.f32 %v7897_v10, 0.0  ;;  %v5066_v61 = vmul.f32 %v8313_v23, %v8313_v23 }
 0x3dd   : > { %v5124_v12 = vadd.f32 %v5123_v8, %v5063_v60  ;;  %8887 = vst [vmem:[#allocation13_spill] sm:$0xff] %v8320_v25  ;;  %v8327_v54 = vsub.f32 %v8888_v15, %v8116_v41  ;;  %v8890_v60 = vmax.f32 %v7908_v16, 0.0  ;;  %v5067_v11 = vmul.f32 %v8320_v25, %v8320_v25 }
 0x3df   : > { %v5125_v38 = vadd.f32 %v5124_v12, %v5064_v37  ;;  %8889 = vst [vmem:[#allocation14_spill] sm:$0xff] %v8327_v54  ;;  %v8334_v8 = vsub.f32 %v8890_v60, %v8116_v41  ;;  %v8892_v37 = vmax.f32 %v7912_v31, 0.0  ;;  %v5068_v10 = vmul.f32 %v8327_v54, %v8327_v54 }
 0x3e1   : > { %v5126_v57 = vadd.f32 %v5125_v38, %v5065_v20  ;;  %8891 = vst [vmem:[#allocation15_spill] sm:$0xff] %v8334_v8  ;;  %v8341_v12 = vsub.f32 %v8892_v37, %v8116_v41  ;;  %v8894_v20 = vmax.f32 %v7920_v30, 0.0  ;;  %v5069_v16 = vmul.f32 %v8334_v8, %v8334_v8 }
 0x3e3   : > { %v5127_v7 = vadd.f32 %v5126_v57, %v5066_v61  ;;  %8893 = vst [vmem:[#allocation16_spill] sm:$0xff] %v8341_v12  ;;  %v8348_v38 = vsub.f32 %v8894_v20, %v8116_v41  ;;  %v8896_v61 = vld [vmem:[#allocation2_spill] sm:$0xff]  ;;  %v5070_v31 = vmul.f32 %v8341_v12, %v8341_v12 }
 0x3e4   : > { %v8897_v57 = vmax.f32 %v8896_v61, 0.0 }
 0x3e5   : > { %v5128_v15 = vadd.f32 %v5127_v7, %v5067_v11  ;;  %8895 = vst [vmem:[#allocation17_spill] sm:$0xff] %v8348_v38  ;;  %v8898_v11 = vld [vmem:[#allocation3_spill] sm:$0xff]  ;;  %v5071_v30 = vmul.f32 %v8348_v38, %v8348_v38 }
 0x3e6   : > { %v8355_v25 = vsub.f32 %v8897_v57, %v8116_v41  ;;  %v8899_v7 = vmax.f32 %v8898_v11, 0.0 }
 0x3e7   : > { %v5129_v60 = vadd.f32 %v5128_v15, %v5068_v10  ;;  %v8900_v10 = vld [vmem:[#allocation4_spill] sm:$0xff] }
 0x3e8   : > { %v8362_v54 = vsub.f32 %v8899_v7, %v8116_v41  ;;  %v8901_v15 = vmax.f32 %v8900_v10, 0.0  ;;  %v5072_v61 = vmul.f32 %v8355_v25, %v8355_v25 }
 0x3e9   : > { %v5130_v37 = vadd.f32 %v5129_v60, %v5069_v16  ;;  %v8902_v16 = vld [vmem:[#allocation5_spill] sm:$0xff] }
 0x3ea   : > { %v8369_v8 = vsub.f32 %v8901_v15, %v8116_v41  ;;  %v8903_v60 = vmax.f32 %v8902_v16, 0.0  ;;  %v5073_v11 = vmul.f32 %v8362_v54, %v8362_v54 }
 0x3eb   : > { %v5131_v20 = vadd.f32 %v5130_v37, %v5070_v31  ;;  %v8904_v31 = vld [vmem:[#allocation6_spill] sm:$0xff] }
 0x3ec   : > { %v8376_v12 = vsub.f32 %v8903_v60, %v8116_v41  ;;  %v8905_v37 = vmax.f32 %v8904_v31, 0.0  ;;  %v5074_v10 = vmul.f32 %v8369_v8, %v8369_v8 }
 0x3ed   : > { %v5132_v57 = vadd.f32 %v5131_v20, %v5071_v30  ;;  %v8906_v30 = vmax.f32 %v7964_v2, 0.0 }
 0x3ee   : > { %v8383_v38 = vsub.f32 %v8905_v37, %v8116_v41  ;;  %v5075_v16 = vmul.f32 %v8376_v12, %v8376_v12 }
 0x3ef   : > { %v5133_v7 = vadd.f32 %v5132_v57, %v5072_v61  ;;  %v8390_v20 = vsub.f32 %v8906_v30, %v8116_v41  ;;  %v8907_v61 = vmax.f32 %v7968_v35, 0.0 }
 0x3f0   : > { %v5076_v31 = vmul.f32 %v8383_v38, %v8383_v38 }
 0x3f1   : > { %v5134_v15 = vadd.f32 %v5133_v7, %v5073_v11  ;;  %v8397_v57 = vsub.f32 %v8907_v61, %v8116_v41  ;;  %v8909_v11 = vmax.f32 %v7976_v62, 0.0  ;;  %v5077_v2 = vmul.f32 %v8390_v20, %v8390_v20 }
 0x3f3   : > { %v5135_v60 = vadd.f32 %v5134_v15, %v5074_v10  ;;  %8908 = vst [vmem:[#allocation2_spill] sm:$0xff] %v8397_v57  ;;  %v8404_v7 = vsub.f32 %v8909_v11, %v8116_v41  ;;  %v8911_v10 = vmax.f32 %v7985_v48, 0.0  ;;  %v5078_v35 = vmul.f32 %v8397_v57, %v8397_v57 }
 0x3f5   : > { %v5136_v37 = vadd.f32 %v5135_v60, %v5075_v16  ;;  %8910 = vst [vmem:[#allocation3_spill] sm:$0xff] %v8404_v7  ;;  %v8411_v15 = vsub.f32 %v8911_v10, %v8116_v41  ;;  %v8913_v16 = vmax.f32 %v7992_v44, 0.0  ;;  %v5079_v62 = vmul.f32 %v8404_v7, %v8404_v7 }
 0x3f7   : > { %v5137_v30 = vadd.f32 %v5136_v37, %v5076_v31  ;;  %8912 = vst [vmem:[#allocation4_spill] sm:$0xff] %v8411_v15  ;;  %v8418_v60 = vsub.f32 %v8913_v16, %v8116_v41  ;;  %v8915_v31 = vmax.f32 %v7996_v28, 0.0  ;;  %v5080_v48 = vmul.f32 %v8411_v15, %v8411_v15 }
 0x3f9   : > { %v5138_v61 = vadd.f32 %v5137_v30, %v5077_v2  ;;  %8914 = vst [vmem:[#allocation5_spill] sm:$0xff] %v8418_v60  ;;  %v8425_v37 = vsub.f32 %v8915_v31, %v8116_v41  ;;  %v8916_v2 = vld [vmem:[#allocation7_spill] sm:$0xff]  ;;  %v5081_v44 = vmul.f32 %v8418_v60, %v8418_v60 }
 0x3fa   : > { %v8917_v30 = vmax.f32 %v8916_v2, 0.0 }
 0x3fb   : > { %v5139_v11 = vadd.f32 %v5138_v61, %v5078_v35  ;;  %v8918_v35 = vld [vmem:[#allocation8_spill] sm:$0xff]  ;;  %v5082_v28 = vmul.f32 %v8425_v37, %v8425_v37 }
 0x3fc   : > { %v8432_v57 = vsub.f32 %v8917_v30, %v8116_v41  ;;  %v8919_v61 = vmax.f32 %v8918_v35, 0.0 }
 0x3fd   : > { %v5140_v10 = vadd.f32 %v5139_v11, %v5079_v62  ;;  %v8920_v62 = vld [vmem:[#allocation9_spill] sm:$0xff] }
 0x3fe   : > { %v8439_v7 = vsub.f32 %v8919_v61, %v8116_v41  ;;  %v8921_v11 = vmax.f32 %v8920_v62, 0.0  ;;  %v5083_v2 = vmul.f32 %v8432_v57, %v8432_v57 }
 0x3ff   : > { %v5141_v16 = vadd.f32 %v5140_v10, %v5080_v48  ;;  %v8922_v48 = vld [vmem:[#allocation10_spill] sm:$0xff] }
 0x400   : > { %v8446_v15 = vsub.f32 %v8921_v11, %v8116_v41  ;;  %v8923_v10 = vmax.f32 %v8922_v48, 0.0  ;;  %v5084_v35 = vmul.f32 %v8439_v7, %v8439_v7 }
 0x401   : > { %v5142_v31 = vadd.f32 %v5141_v16, %v5081_v44  ;;  %v8924_v44 = vmax.f32 %v8032_v53, 0.0 }
 0x402   : > { %v8453_v60 = vsub.f32 %v8923_v10, %v8116_v41  ;;  %v5085_v62 = vmul.f32 %v8446_v15, %v8446_v15 }
 0x403   : > { %v5143_v30 = vadd.f32 %v5142_v31, %v5082_v28  ;;  %v8460_v16 = vsub.f32 %v8924_v44, %v8116_v41  ;;  %v8925_v28 = vmax.f32 %v8041_v22, 0.0 }
 0x404   : > { %v5086_v48 = vmul.f32 %v8453_v60, %v8453_v60 }
 0x405   : > { %v5144_v61 = vadd.f32 %v5143_v30, %v5083_v2  ;;  %v8467_v31 = vsub.f32 %v8925_v28, %v8116_v41  ;;  %v8926_v2 = vmax.f32 %v8048_v58, 0.0  ;;  %v5087_v53 = vmul.f32 %v8460_v16, %v8460_v16 }
 0x407   : > { %v5145_v11 = vadd.f32 %v5144_v61, %v5084_v35  ;;  %v8474_v30 = vsub.f32 %v8926_v2, %v8116_v41  ;;  %v8927_v35 = vmax.f32 %v8051_v59, 0.0  ;;  %v5088_v22 = vmul.f32 %v8467_v31, %v8467_v31 }
 0x409   : > { %v5146_v10 = vadd.f32 %v5145_v11, %v5085_v62  ;;  %v8481_v61 = vsub.f32 %v8927_v35, %v8116_v41  ;;  %v8928_v62 = vmax.f32 %v8058_v3, 0.0  ;;  %v5089_v58 = vmul.f32 %v8474_v30, %v8474_v30 }
 0x40b   : > { %v5147_v44 = vadd.f32 %v5146_v10, %v5086_v48  ;;  %v8488_v11 = vsub.f32 %v8928_v62, %v8116_v41  ;;  %v8930_v48 = vmax.f32 %v8066_v43, 0.0  ;;  %v5090_v59 = vmul.f32 %v8481_v61, %v8481_v61 }
 0x40d   : > { %v5148_v28 = vadd.f32 %v5147_v44, %v5087_v53  ;;  %8929 = vst [vmem:[#allocation6_spill] sm:$0xff] %v8488_v11  ;;  %v8495_v10 = vsub.f32 %v8930_v48, %v8116_v41  ;;  %v8931_v53 = vmax.f32 %v8072_v26, 0.0  ;;  %v5091_v3 = vmul.f32 %v8488_v11, %v8488_v11 }
 0x40f   : > { %v5149_v2 = vadd.f32 %v5148_v28, %v5088_v22  ;;  %v8502_v44 = vsub.f32 %v8931_v53, %v8116_v41  ;;  %v8932_v22 = vmax.f32 %v8075_v9, 0.0  ;;  %v5092_v43 = vmul.f32 %v8495_v10, %v8495_v10 }
 0x411   : > { %v5150_v35 = vadd.f32 %v5149_v2, %v5089_v58  ;;  %v8509_v28 = vsub.f32 %v8932_v22, %v8116_v41  ;;  %v8933_v58 = vmax.f32 %v8082_v50, 0.0  ;;  %v5093_v26 = vmul.f32 %v8502_v44, %v8502_v44 }
 0x413   : > { %v5151_v62 = vadd.f32 %v5150_v35, %v5090_v59  ;;  %v8516_v2 = vsub.f32 %v8933_v58, %v8116_v41  ;;  %v8935_v59 = vld [vmem:[#allocation11_spill] sm:$0xff]  ;;  %v5094_v9 = vmul.f32 %v8509_v28, %v8509_v28 }
 0x414   : > { %v8936_v35 = vmax.f32 %v8935_v59, 0.0  ;;  %v8940_v59 = vmax.f32 %v8102_v34, 0.0 }
 0x415   : > { %v5152_v48 = vadd.f32 %v5151_v62, %v5091_v3  ;;  %8934 = vst [vmem:[#allocation7_spill] sm:$0xff] %v8516_v2  ;;  %v8938_v3 = vmax.f32 %v8096_v13, 0.0  ;;  %v5095_v50 = vmul.f32 %v8516_v2, %v8516_v2 }
 0x416   : > { %v8523_v11 = vsub.f32 %v8936_v35, %v8116_v41  ;;  %v8542_v35 = vsub.f32 %v8940_v59, %v8116_v41 }
 0x417   : > { %v5153_v53 = vadd.f32 %v5152_v48, %v5092_v43  ;;  %v8530_v62 = vsub.f32 %v8938_v3, %v8116_v41  ;;  %v8939_v43 = vmax.f32 %v8108_v49, 0.0 }
 0x418   : > { %8937 = vst [vmem:[#allocation8_spill] sm:$0xff] %v8523_v11  ;;  %v5096_v13 = vmul.f32 %v8523_v11, %v8523_v11  ;;  %v5098_v49 = vmul.f32 %v8542_v35, %v8542_v35 }
 0x419   : > { %v5154_v22 = vadd.f32 %v5153_v53, %v5093_v26  ;;  %v8537_v48 = vsub.f32 %v8939_v43, %v8116_v41  ;;  %v5097_v53 = vmul.f32 %v8530_v62, %v8530_v62 }
 0x41b   : > { %v5155_v58 = vadd.f32 %v5154_v22, %v5094_v9  ;;  %v5099_v9 = vmul.f32 %v8537_v48, %v8537_v48 }
 0x41d   : > { %v5156_v26 = vadd.f32 %v5155_v58, %v5095_v50  ;;  %v5160_v41 = vsel %vm4969_vm1, %v5099_v9, 0.0 }
 0x41f   : > { %v5157_v3 = vadd.f32 %v5156_v26, %v5096_v13  ;;  %v8941_v13 = vld [vmem:[#allocation12_spill] sm:$0xff] }
 0x421   : > { %v5158_v22 = vadd.f32 %v5157_v3, %v5097_v53 }
 0x423   : > { %v5159_v43 = vadd.f32 %v5158_v22, %v5098_v49  ;;  %v8944_v49 = vld [vmem:[#allocation15_spill] sm:$0xff]  ;;  %v8945_v22 = vld [vmem:[#allocation16_spill] sm:$0xff] }
 0x425   : > { %v5161_v34 = vadd.f32 %v5160_v41, %v5159_v43  ;;  %v8946_v43 = vld [vmem:[#allocation17_spill] sm:$0xff] }
 0x427   : > { %5162 = vadd.xlane.f32.xlu1 %v5161_v34 }
 0x4b0   : > { %v5163_v59 = vpop.xlane.xlu1 %5162 }
 0x4b1   : > { %v5164_v2 = vmul.f32 0.00012624668, %v5163_v59 }
 0x4b3   : > { %v5165_v11 = vadd.f32 1e-05, %v5164_v2 }
 0x4b5   : > { %6845 = vrsqrt.f32 %v5165_v11 }
 0x4c2   : > { %v8554_v50 = vpop.eup %6845 }
 0x4c3   : > { %v5167_v58 = vmul.f32 %v8554_v50, %v8121_v5  ;;  %v5168_v26 = vmul.f32 %v8554_v50, %v8941_v13  ;;  %v5169_v11 = vmul.f32 %v8554_v50, %v8131_v45  ;;  %v5170_v2 = vmul.f32 %v8554_v50, %v8140_v1 }
 0x4c4   : > { %v5171_v53 = vmul.f32 %v8554_v50, %v8145_v6  ;;  %v5172_v3 = vmul.f32 %v8554_v50, %v8152_v21  ;;  %v5173_v5 = vmul.f32 %v8554_v50, %v8159_v63  ;;  %v5174_v9 = vmul.f32 %v8554_v50, %v8166_v17 }
 0x4c5   : > { %v5175_v45 = vmul.f32 %v8554_v50, %v8173_v18  ;;  %v5176_v1 = vmul.f32 %v8554_v50, %v8180_v51  ;;  %v5177_v6 = vmul.f32 %v8554_v50, %v8187_v40  ;;  %v5178_v21 = vmul.f32 %v8554_v50, %v8194_v56  ;;  %5229 = vst [vmem:[%s8559_s27] sm:$0xff] %v5167_v58 }
 0x4c6   : > { %5230 = vst [vmem:[%s8559_s27 + $0x8] sm:$0xff] %v5168_v26  ;;  %5231 = vst [vmem:[%s8559_s27 + $0x10] sm:$0xff] %v5169_v11  ;;  %v5179_v63 = vmul.f32 %v8554_v50, %v8201_v33  ;;  %v5180_v17 = vmul.f32 %v8554_v50, %v8208_v55  ;;  %v5181_v18 = vmul.f32 %v8554_v50, %v8215_v46  ;;  %v8947_v26 = vld [vmem:[#allocation2_spill] sm:$0xff]  ;;  %v8948_v11 = vld [vmem:[#allocation3_spill] sm:$0xff] }
 0x4c7   : > { %5232 = vst [vmem:[%s8559_s27 + $0x18] sm:$0xff] %v5170_v2  ;;  %v5182_v51 = vmul.f32 %v8554_v50, %v8222_v4  ;;  %5233 = vst [vmem:[%s8559_s27 + $0x20] sm:$0xff] %v5171_v53  ;;  %v5183_v40 = vmul.f32 %v8554_v50, %v8229_v52  ;;  %v5184_v56 = vmul.f32 %v8554_v50, %v8236_v0  ;;  %v8949_v2 = vld [vmem:[#allocation4_spill] sm:$0xff]  ;;  %v8950_v53 = vld [vmem:[#allocation5_spill] sm:$0xff] }
 0x4c8   : > { %5234 = vst [vmem:[%s8559_s27 + $0x28] sm:$0xff] %v5172_v3  ;;  %5235 = vst [vmem:[%s8559_s27 + $0x30] sm:$0xff] %v5173_v5  ;;  %v5185_v33 = vmul.f32 %v8554_v50, %v8243_v19  ;;  %v5186_v55 = vmul.f32 %v8554_v50, %v8250_v27  ;;  %v5187_v46 = vmul.f32 %v8554_v50, %v8257_v42 }
 0x4c9   : > { %5236 = vst [vmem:[%s8559_s27 + $0x38] sm:$0xff] %v5174_v9  ;;  %5237 = vst [vmem:[%s8559_s27 + $0x40] sm:$0xff] %v5175_v45  ;;  %v5188_v4 = vmul.f32 %v8554_v50, %v8264_v32  ;;  %v5189_v52 = vmul.f32 %v8554_v50, %v8271_v24  ;;  %v5190_v0 = vmul.f32 %v8554_v50, %v8278_v29  ;;  %v8942_v29 = vld [vmem:[#allocation13_spill] sm:$0xff] }
 0x4ca   : > { %5238 = vst [vmem:[%s8559_s27 + $0x48] sm:$0xff] %v5176_v1  ;;  %5239 = vst [vmem:[%s8559_s27 + $0x50] sm:$0xff] %v5177_v6  ;;  %v5191_v19 = vmul.f32 %v8554_v50, %v8285_v39  ;;  %v5192_v27 = vmul.f32 %v8554_v50, %v8292_v47  ;;  %v5193_v42 = vmul.f32 %v8554_v50, %v8299_v36  ;;  %v8943_v47 = vld [vmem:[#allocation14_spill] sm:$0xff]  ;;  %v8952_v6 = vld [vmem:[#allocation7_spill] sm:$0xff] }
 0x4cb   : > { %5240 = vst [vmem:[%s8559_s27 + $0x58] sm:$0xff] %v5178_v21  ;;  %5241 = vst [vmem:[%s8559_s27 + $0x60] sm:$0xff] %v5179_v63  ;;  %v5194_v32 = vmul.f32 %v8554_v50, %v8306_v14  ;;  %v5195_v24 = vmul.f32 %v8554_v50, %v8313_v23  ;;  %v5196_v39 = vmul.f32 %v8554_v50, %v8942_v29  ;;  %v8951_v1 = vld [vmem:[#allocation6_spill] sm:$0xff]  ;;  %v8953_v21 = vld [vmem:[#allocation8_spill] sm:$0xff] }
 0x4cc   : > { %5242 = vst [vmem:[%s8559_s27 + $0x68] sm:$0xff] %v5180_v17  ;;  %5243 = vst [vmem:[%s8559_s27 + $0x70] sm:$0xff] %v5181_v18  ;;  %v5197_v36 = vmul.f32 %v8554_v50, %v8943_v47  ;;  %v5198_v14 = vmul.f32 %v8554_v50, %v8944_v49  ;;  %v5199_v23 = vmul.f32 %v8554_v50, %v8945_v22 }
 0x4cd   : > { %5244 = vst [vmem:[%s8559_s27 + $0x78] sm:$0xff] %v5182_v51  ;;  %5245 = vst [vmem:[%s8559_s27 + $0x80] sm:$0xff] %v5183_v40  ;;  %v5200_v41 = vmul.f32 %v8554_v50, %v8946_v43  ;;  %v5201_v34 = vmul.f32 %v8554_v50, %v8355_v25  ;;  %v5202_v59 = vmul.f32 %v8554_v50, %v8362_v54 }
 0x4ce   : > { %5246 = vst [vmem:[%s8559_s27 + $0x88] sm:$0xff] %v5184_v56  ;;  %5247 = vst [vmem:[%s8559_s27 + $0x90] sm:$0xff] %v5185_v33  ;;  %v5203_v58 = vmul.f32 %v8554_v50, %v8369_v8  ;;  %v5204_v13 = vmul.f32 %v8554_v50, %v8376_v12  ;;  %v5205_v25 = vmul.f32 %v8554_v50, %v8383_v38 }
 0x4cf   : > { %5248 = vst [vmem:[%s8559_s27 + $0x98] sm:$0xff] %v5186_v55  ;;  %5249 = vst [vmem:[%s8559_s27 + $0xa0] sm:$0xff] %v5187_v46  ;;  %v5206_v54 = vmul.f32 %v8554_v50, %v8390_v20  ;;  %v5207_v8 = vmul.f32 %v8554_v50, %v8947_v26  ;;  %v5208_v12 = vmul.f32 %v8554_v50, %v8948_v11 }
 0x4d0   : > { %5250 = vst [vmem:[%s8559_s27 + $0xa8] sm:$0xff] %v5188_v4  ;;  %5251 = vst [vmem:[%s8559_s27 + $0xb0] sm:$0xff] %v5189_v52  ;;  %v5209_v38 = vmul.f32 %v8554_v50, %v8949_v2  ;;  %v5210_v20 = vmul.f32 %v8554_v50, %v8950_v53  ;;  %v5211_v3 = vmul.f32 %v8554_v50, %v8425_v37 }
 0x4d1   : > { %5252 = vst [vmem:[%s8559_s27 + $0xb8] sm:$0xff] %v5190_v0  ;;  %5253 = vst [vmem:[%s8559_s27 + $0xc0] sm:$0xff] %v5191_v19  ;;  %v5212_v5 = vmul.f32 %v8554_v50, %v8432_v57  ;;  %v5213_v9 = vmul.f32 %v8554_v50, %v8439_v7  ;;  %v5214_v45 = vmul.f32 %v8554_v50, %v8446_v15 }
 0x4d2   : > { %5254 = vst [vmem:[%s8559_s27 + $0xc8] sm:$0xff] %v5192_v27  ;;  %5255 = vst [vmem:[%s8559_s27 + $0xd0] sm:$0xff] %v5193_v42  ;;  %v5215_v37 = vmul.f32 %v8554_v50, %v8453_v60  ;;  %v5216_v57 = vmul.f32 %v8554_v50, %v8460_v16  ;;  %v5217_v7 = vmul.f32 %v8554_v50, %v8467_v31 }
 0x4d3   : > { %5256 = vst [vmem:[%s8559_s27 + $0xd8] sm:$0xff] %v5194_v32  ;;  %5257 = vst [vmem:[%s8559_s27 + $0xe0] sm:$0xff] %v5195_v24  ;;  %v5218_v15 = vmul.f32 %v8554_v50, %v8474_v30  ;;  %v5219_v60 = vmul.f32 %v8554_v50, %v8481_v61  ;;  %v5220_v16 = vmul.f32 %v8554_v50, %v8951_v1 }
 0x4d4   : > { %5258 = vst [vmem:[%s8559_s27 + $0xe8] sm:$0xff] %v5196_v39  ;;  %5259 = vst [vmem:[%s8559_s27 + $0xf0] sm:$0xff] %v5197_v36  ;;  %v5221_v31 = vmul.f32 %v8554_v50, %v8495_v10  ;;  %v5222_v30 = vmul.f32 %v8554_v50, %v8502_v44  ;;  %v5223_v61 = vmul.f32 %v8554_v50, %v8509_v28 }
 0x4d5   : > { %5260 = vst [vmem:[%s8559_s27 + $0xf8] sm:$0xff] %v5198_v14  ;;  %5261 = vst [vmem:[%s8559_s27 + $0x100] sm:$0xff] %v5199_v23  ;;  %v5224_v10 = vmul.f32 %v8554_v50, %v8952_v6  ;;  %v5225_v44 = vmul.f32 %v8554_v50, %v8953_v21  ;;  %v5226_v63 = vmul.f32 %v8554_v50, %v8530_v62 }
 0x4d6   : > { %5262 = vst [vmem:[%s8559_s27 + $0x108] sm:$0xff] %v5200_v41  ;;  %5263 = vst [vmem:[%s8559_s27 + $0x110] sm:$0xff] %v5201_v34  ;;  %v5227_v28 = vmul.f32 %v8554_v50, %v8542_v35  ;;  %v5228_v17 = vmul.f32 %v8554_v50, %v8537_v48 }
 0x4d7   : > { %5264 = vst [vmem:[%s8559_s27 + $0x118] sm:$0xff] %v5202_v59  ;;  %5265 = vst [vmem:[%s8559_s27 + $0x120] sm:$0xff] %v5203_v58 }
 0x4d8   : > { %5266 = vst [vmem:[%s8559_s27 + $0x128] sm:$0xff] %v5204_v13  ;;  %5267 = vst [vmem:[%s8559_s27 + $0x130] sm:$0xff] %v5205_v25 }
 0x4d9   : > { %5268 = vst [vmem:[%s8559_s27 + $0x138] sm:$0xff] %v5206_v54  ;;  %5269 = vst [vmem:[%s8559_s27 + $0x140] sm:$0xff] %v5207_v8 }
 0x4da   : > { %5270 = vst [vmem:[%s8559_s27 + $0x148] sm:$0xff] %v5208_v12  ;;  %5271 = vst [vmem:[%s8559_s27 + $0x150] sm:$0xff] %v5209_v38 }
 0x4db   : > { %5272 = vst [vmem:[%s8559_s27 + $0x158] sm:$0xff] %v5210_v20  ;;  %5273 = vst [vmem:[%s8559_s27 + $0x160] sm:$0xff] %v5211_v3 }
 0x4dc   : > { %5274 = vst [vmem:[%s8559_s27 + $0x168] sm:$0xff] %v5212_v5  ;;  %5275 = vst [vmem:[%s8559_s27 + $0x170] sm:$0xff] %v5213_v9 }
 0x4dd   : > { %5276 = vst [vmem:[%s8559_s27 + $0x178] sm:$0xff] %v5214_v45  ;;  %5277 = vst [vmem:[%s8559_s27 + $0x180] sm:$0xff] %v5215_v37 }
 0x4de   : > { %5278 = vst [vmem:[%s8559_s27 + $0x188] sm:$0xff] %v5216_v57  ;;  %5279 = vst [vmem:[%s8559_s27 + $0x190] sm:$0xff] %v5217_v7 }
 0x4df   : > { %5280 = vst [vmem:[%s8559_s27 + $0x198] sm:$0xff] %v5218_v15  ;;  %5281 = vst [vmem:[%s8559_s27 + $0x1a0] sm:$0xff] %v5219_v60 }
 0x4e0   : > { %5282 = vst [vmem:[%s8559_s27 + $0x1a8] sm:$0xff] %v5220_v16  ;;  %5283 = vst [vmem:[%s8559_s27 + $0x1b0] sm:$0xff] %v5221_v31 }
 0x4e1   : > { %5284 = vst [vmem:[%s8559_s27 + $0x1b8] sm:$0xff] %v5222_v30  ;;  %5285 = vst [vmem:[%s8559_s27 + $0x1c0] sm:$0xff] %v5223_v61 }
 0x4e2   : > { %5286 = vst [vmem:[%s8559_s27 + $0x1c8] sm:$0xff] %v5224_v10  ;;  %5287 = vst [vmem:[%s8559_s27 + $0x1d0] sm:$0xff] %v5225_v44 }
 0x4e3   : > { %5288 = vst [vmem:[%s8559_s27 + $0x1d8] sm:$0xff] %v5226_v63  ;;  %5289 = vst [vmem:[%s8559_s27 + $0x1e0] sm:$0xff] %v5227_v28 }
 0x4e4   : > { %5290 = vst.msk [vmem:[%s8559_s27 + $0x1e8] sm:$0xff] %vm4969_vm1, %v5228_v17 }
 0x4e5 PF: > { %s13_s14 = sadd.s32 1, %s6869_s14   ;;  %s8954_s12 = smov %s6865_s13 }
 0x4e6   : > { %p10_p5 = scmp.ge.s32.totalorder %s13_s14, 4   ;;  %s8955_s13 = smov %s8957_s15 }
 0x4e8   :  { %12 = sbr.rel (!%p10_p5) target bundleno = 2 (0x2), region = 62 }

// kernel: image_decoder_forward.11
= control target key start
LH: loop header
LB: loop body
LE: loop exit
PB: predicated region body
PF: predicated region fallthrough
CT: control target
= control target key end

     0   :  { %s1218_s12 = smov 0   ;;  %s1220_s13 = smov 0   ;;  %s1592_s0 = inlined_call_operand.vmem [shape: bf16[2,32,8100], index: 0, kind: input, shape index: {}]   ;;  %s1593_s1 = inlined_call_operand.vmem [shape: bf16[12,32], index: 1, kind: input, shape index: {}]   ;;  %s1594_s2 = inlined_call_operand.vmem [shape: f32[12,1], index: 2, kind: input, shape index: {}]   ;;  %s1595_s3 = inlined_call_operand.vmem [shape: f32[2,12,8100], index: 3, kind: output, shape index: {}]  }
   0x1   :  { %s1222_s14 = smov 0   ;;  %s1224_s15 = smov 0  }
   0x2   :  { %s1226_s16 = smov 0   ;;  %s1228_s17 = smov 0  }
   0x3   :  { %s1230_s18 = smov 0  }
   0x4 LB: > { %s22_s19 = sadd.s32 1, %s1187_s16  ;;  %s25_s20 = sadd.s32 1, %s1191_s17  ;;  %s1195_s18 = sphi %s1230_s18, %s13_s18   ;;  %s1191_s17 = sphi %s1228_s17, %s1602_s17   ;;  %s1187_s16 = sphi %s1226_s16, %s1601_s16   ;;  %s1183_s15 = sphi %s1224_s15, %s1600_s15   ;;  %s1179_s14 = sphi %s1222_s14, %s1599_s14   ;;  %s1175_s13 = sphi %s1220_s13, %s1598_s13   ;;  %s1171_s12 = sphi %s1218_s12, %s1597_s12  }
   0x5   : > { %p23_p0 = scmp.ge.s32.totalorder %s22_s19, 4  ;;  %s1024_s21 = sadd.s32 4294967295, %s1195_s18  }
   0x6   : > { %p41_p1 = scmp.ne.s32.totalorder %s1175_s13, %s1171_s12  ;;  %p42_p2 = scmp.eq.s32.totalorder %s1195_s18, 0 }
   0x7   : > { %s1604_s19 = smov (%p23_p0, %s22_s19), 0  ;;  %s1606_s20 = smov (!%p23_p0, %s25_s20), %s1191_s17 }
   0x8   : > { %p27_p3 = scmp.ge.s32.totalorder %s1606_s20, 2  ;;  %p115_p4 = scmp.eq.s32.totalorder %s1024_s21, 7 }
   0x9   : > { %s30_s22 = ssub.s32 %s1187_s16, %s1604_s19  ;;  %p43_p5 = por %p42_p2, %p41_p1 }
   0xa   : > { %s1608_s20 = smov (%p27_p3, %s1606_s20), 0  ;;  %p1266_p6 = por %p115_p4, %p41_p1 }
   0xb   : > { %s29_s24 = ssub.s32 %s1191_s17, %s1608_s20  ;;  %s34_s26 = sadd.s32 1, %s1175_s13 }
   0xc   : > { %s31_s25 = sor.u32 %s30_s22, %s29_s24  ;;  %p1027_p8 = scmp.ge.s32.totalorder %s1195_s18, 8 }
   0xd   : > { %p32_p7 = scmp.eq.s32.totalorder %s31_s25, 0 }
   0xe   : > { %143 = sbr.rel (%p1027_p8) target bundleno = 42 (0x2a), region = 24 }
   0xf   : > { %s1274_s27 = scalar_select %p32_p7, %s1175_s13, %s34_s26  }
  0x13   : > { %146 = sbr.rel (!%p43_p5) target bundleno = 42 (0x2a), region = 28  ;;  %s148_s28 = sand.u32 (%p43_p5), 1, %s1175_s13  }
  0x14   : > { %s1029_s29 = sshll.u32 (%p43_p5), %s1187_s16, 4  ;;  %s1028_s30 = sshll.u32 (%p43_p5), %s148_s28, 8 }
  0x15   : > { %s1030_s4 = sshll.u32 (%p43_p5), %s1191_s17, 8  ;;  %s1288_s10 = scalar_lea.vmem (%p43_p5), [#allocation2], %s1028_s30 }
  0x16   : > { %s153_s5 = sadd.s32 (%p43_p5), %s1030_s4, %s1029_s29 }
  0x17   : > { %s1031_s6 = sshll.u32 (%p43_p5), %s153_s5, 2 }
  0x18   : > { %s1283_s9 = scalar_lea.vmem %s1592_s0, %s1031_s6 }
  0x19   : > { %v168_v0 = vld [vmem:[%s1283_s9] sm:$0xff]  ;;  %v170_v1 = vld [vmem:[%s1283_s9 + $0x8] sm:$0xff]  ;;  %v172_v2 = vld [vmem:[%s1283_s9 + $0x10] sm:$0xff] }
  0x1a   : > { %169 = vst [vmem:[%s1288_s10] sm:$0xff] %v168_v0  ;;  %171 = vst [vmem:[%s1288_s10 + $0x8] sm:$0xff] %v170_v1  ;;  %v174_v3 = vld [vmem:[%s1283_s9 + $0x18] sm:$0xff]  ;;  %v176_v4 = vld [vmem:[%s1283_s9 + $0x20] sm:$0xff] }
  0x1b   : > { %173 = vst [vmem:[%s1288_s10 + $0x10] sm:$0xff] %v172_v2  ;;  %v178_v5 = vld [vmem:[%s1283_s9 + $0x28] sm:$0xff]  ;;  %175 = vst [vmem:[%s1288_s10 + $0x18] sm:$0xff] %v174_v3  ;;  %v180_v6 = vld [vmem:[%s1283_s9 + $0x30] sm:$0xff] }
  0x1c   : > { %177 = vst [vmem:[%s1288_s10 + $0x20] sm:$0xff] %v176_v4  ;;  %179 = vst [vmem:[%s1288_s10 + $0x28] sm:$0xff] %v178_v5  ;;  %v182_v7 = vld [vmem:[%s1283_s9 + $0x38] sm:$0xff]  ;;  %v184_v8 = vld [vmem:[%s1283_s9 + $0x100] sm:$0xff] }
  0x1d   : > { %181 = vst [vmem:[%s1288_s10 + $0x30] sm:$0xff] %v180_v6  ;;  %183 = vst [vmem:[%s1288_s10 + $0x38] sm:$0xff] %v182_v7  ;;  %v186_v9 = vld [vmem:[%s1283_s9 + $0x108] sm:$0xff]  ;;  %v188_v10 = vld [vmem:[%s1283_s9 + $0x110] sm:$0xff] }
  0x1e   : > { %185 = vst [vmem:[%s1288_s10 + $0x40] sm:$0xff] %v184_v8  ;;  %v190_v11 = vld [vmem:[%s1283_s9 + $0x118] sm:$0xff]  ;;  %187 = vst [vmem:[%s1288_s10 + $0x48] sm:$0xff] %v186_v9  ;;  %v192_v12 = vld [vmem:[%s1283_s9 + $0x120] sm:$0xff] }
  0x1f   : > { %189 = vst [vmem:[%s1288_s10 + $0x50] sm:$0xff] %v188_v10  ;;  %191 = vst [vmem:[%s1288_s10 + $0x58] sm:$0xff] %v190_v11  ;;  %v194_v13 = vld [vmem:[%s1283_s9 + $0x128] sm:$0xff]  ;;  %v196_v14 = vld [vmem:[%s1283_s9 + $0x130] sm:$0xff] }
  0x20   : > { %193 = vst [vmem:[%s1288_s10 + $0x60] sm:$0xff] %v192_v12  ;;  %195 = vst [vmem:[%s1288_s10 + $0x68] sm:$0xff] %v194_v13  ;;  %v198_v15 = vld [vmem:[%s1283_s9 + $0x138] sm:$0xff]  ;;  %v200_v16 = vld [vmem:[%s1283_s9 + $0x200] sm:$0xff] }
  0x21   : > { %197 = vst [vmem:[%s1288_s10 + $0x70] sm:$0xff] %v196_v14  ;;  %v202_v17 = vld [vmem:[%s1283_s9 + $0x208] sm:$0xff]  ;;  %199 = vst [vmem:[%s1288_s10 + $0x78] sm:$0xff] %v198_v15  ;;  %v204_v18 = vld [vmem:[%s1283_s9 + $0x210] sm:$0xff] }
  0x22   : > { %201 = vst [vmem:[%s1288_s10 + $0x80] sm:$0xff] %v200_v16  ;;  %203 = vst [vmem:[%s1288_s10 + $0x88] sm:$0xff] %v202_v17  ;;  %v206_v19 = vld [vmem:[%s1283_s9 + $0x218] sm:$0xff]  ;;  %v208_v20 = vld [vmem:[%s1283_s9 + $0x220] sm:$0xff] }
  0x23   : > { %205 = vst [vmem:[%s1288_s10 + $0x90] sm:$0xff] %v204_v18  ;;  %207 = vst [vmem:[%s1288_s10 + $0x98] sm:$0xff] %v206_v19  ;;  %v210_v21 = vld [vmem:[%s1283_s9 + $0x228] sm:$0xff]  ;;  %v212_v22 = vld [vmem:[%s1283_s9 + $0x230] sm:$0xff] }
  0x24   : > { %209 = vst [vmem:[%s1288_s10 + $0xa0] sm:$0xff] %v208_v20  ;;  %v214_v23 = vld [vmem:[%s1283_s9 + $0x238] sm:$0xff]  ;;  %211 = vst [vmem:[%s1288_s10 + $0xa8] sm:$0xff] %v210_v21  ;;  %v216_v24 = vld [vmem:[%s1283_s9 + $0x300] sm:$0xff] }
  0x25   : > { %213 = vst [vmem:[%s1288_s10 + $0xb0] sm:$0xff] %v212_v22  ;;  %215 = vst [vmem:[%s1288_s10 + $0xb8] sm:$0xff] %v214_v23  ;;  %v218_v25 = vld [vmem:[%s1283_s9 + $0x308] sm:$0xff]  ;;  %v220_v26 = vld [vmem:[%s1283_s9 + $0x310] sm:$0xff] }
  0x26   : > { %217 = vst [vmem:[%s1288_s10 + $0xc0] sm:$0xff] %v216_v24  ;;  %219 = vst [vmem:[%s1288_s10 + $0xc8] sm:$0xff] %v218_v25  ;;  %v222_v27 = vld [vmem:[%s1283_s9 + $0x318] sm:$0xff]  ;;  %v224_v28 = vld [vmem:[%s1283_s9 + $0x320] sm:$0xff] }
  0x27   : > { %221 = vst [vmem:[%s1288_s10 + $0xd0] sm:$0xff] %v220_v26  ;;  %v226_v29 = vld [vmem:[%s1283_s9 + $0x328] sm:$0xff]  ;;  %223 = vst [vmem:[%s1288_s10 + $0xd8] sm:$0xff] %v222_v27  ;;  %v228_v30 = vld [vmem:[%s1283_s9 + $0x330] sm:$0xff] }
  0x28   : > { %225 = vst [vmem:[%s1288_s10 + $0xe0] sm:$0xff] %v224_v28  ;;  %227 = vst [vmem:[%s1288_s10 + $0xe8] sm:$0xff] %v226_v29  ;;  %v230_v31 = vld [vmem:[%s1283_s9 + $0x338] sm:$0xff] }
  0x29   : > { %229 = vst [vmem:[%s1288_s10 + $0xf0] sm:$0xff] %v228_v30  ;;  %231 = vst [vmem:[%s1288_s10 + $0xf8] sm:$0xff] %v230_v31 }
  0x2a PF: > { %p1032_p9 = scmp.ge.s32.totalorder %s1195_s18, 1  ;;  %p236_p10 = scmp.lt.s32.totalorder %s1195_s18, 9 }
  0x2c   : > { %p237_p11 = pnand %p1032_p9, %p236_p10 }
  0x2d   : > { %s243_s11 = sand.u32 (!%p237_p11), 1, %s1171_s12  }
  0x2e   : > { %240 = sbr.rel (%p237_p11) target bundleno = 298 (0x12a), region = 51  ;;  %s1354_s21 = sshll.u32 (!%p237_p11), %s243_s11, 8 }
  0x2f   : > { %s1363_s25 = scalar_lea.vmem (!%p237_p11), [#allocation2], %s1354_s21  ;;  %s1434_s30 = scalar_lea.vmem (!%p237_p11), [#allocation3], %s1354_s21 }
  0x33   : > { %v1197_v32 = vmov 0   ;;  %v302_v33 = vld [vmem:[%s1594_s2] sm:$0xff]  ;;  %v287_v36 = vld [vmem:[%s1363_s25 + $0x88] sm:$0xff]  ;;  %v288_v47 = vld [vmem:[%s1363_s25 + $0x90] sm:$0xff]  ;;  %vm479_vm0 = vcmask 261120   ;;  %s1077_s4 = sshll.u32 (%p1266_p6), %s1179_s14, 4 }
  0x34   : > { %515 = vmatprep.mubr.bf16.mxu0 %v1197_v32  ;;  %558 = vmatprep.mubr.bf16.mxu1 %v1197_v32  ;;  %v286_v34 = vld [vmem:[%s1363_s25 + $0x80] sm:$0xff]  ;;  %v295_v38 = vld [vmem:[%s1363_s25 + $0xc8] sm:$0xff]  ;;  %v296_v49 = vld [vmem:[%s1363_s25 + $0xd0] sm:$0xff]  ;;  %s1078_s5 = sshll.u32 (%p1266_p6), %s1183_s15, 7 }
  0x35   : > { %1139 = vset.pattern.permute.xlu0 %v1197_v32  ;;  %v294_v35 = vld [vmem:[%s1363_s25 + $0xc0] sm:$0xff]  ;;  %v1055_v42 = vcombine.high %v287_v36, %v295_v38  ;;  %v1054_v43 = vcombine.low %v287_v36, %v295_v38  ;;  %v271_v45 = vld [vmem:[%s1363_s25 + $0x8] sm:$0xff]  ;;  %v289_v50 = vld [vmem:[%s1363_s25 + $0x98] sm:$0xff]  ;;  %v1057_v55 = vcombine.high %v288_v47, %v296_v49  ;;  %v1056_v62 = vcombine.low %v288_v47, %v296_v49  ;;  %s868_s23 = sadd.s32 (%p1266_p6), %s1078_s5, %s1077_s4 }
  0x36   : > { %306 = vperm.xlu0 %1139, %v302_v33   ;;  %v1053_v37 = vcombine.high %v286_v34, %v294_v35  ;;  %v1052_v39 = vcombine.low %v286_v34, %v294_v35  ;;  %v270_v40 = vld [vmem:[%s1363_s25] sm:$0xff]  ;;  %v279_v46 = vld [vmem:[%s1363_s25 + $0x48] sm:$0xff]  ;;  %v297_v51 = vld [vmem:[%s1363_s25 + $0xd8] sm:$0xff]  ;;  %s1079_s6 = sshll.u32 (%p1266_p6), %s868_s23, 3 }
  0x37   : > { %v278_v41 = vld [vmem:[%s1363_s25 + $0x40] sm:$0xff]  ;;  %v1039_v48 = vcombine.high %v271_v45, %v279_v46  ;;  %538 = vmatprep.subr.bf16.mxu1 %v1055_v42  ;;  %v303_v53 = vld [vmem:[%s1594_s2 + $0x8] sm:$0xf]  ;;  %v1038_v54 = vcombine.low %v271_v45, %v279_v46  ;;  %v1059_v56 = vcombine.high %v289_v50, %v297_v51  ;;  %v272_v57 = vld [vmem:[%s1363_s25 + $0x10] sm:$0xff]  ;;  %v1058_v63 = vcombine.low %v289_v50, %v297_v51  ;;  %s1514_s9 = scalar_lea.vmem (%p1266_p6), %s1595_s3, %s1079_s6 }
  0x38   : > { %v1037_v44 = vcombine.high %v270_v40, %v278_v41  ;;  %495 = vmatprep.subr.bf16.mxu0 %v1053_v37  ;;  %v1036_v52 = vcombine.low %v270_v40, %v278_v41  ;;  %539 = vmatpush1.bf16.msra.mxu1 %v1054_v43  ;;  %v280_v58 = vld [vmem:[%s1363_s25 + $0x50] sm:$0xff]  ;;  %v1385_v59 = vld [vmem:[%s1593_s1] sm:$0x3f]   ;;  %v273_v60 = vld [vmem:[%s1363_s25 + $0x18] sm:$0xff] }
  0x39   : > { %496 = vmatpush1.bf16.msra.mxu0 %v1052_v39  ;;  %540 = vmatprep.subr.bf16.mxu1 %v1039_v48  ;;  %v281_v61 = vld [vmem:[%s1363_s25 + $0x58] sm:$0xff]  ;;  %v1041_v0 = vcombine.high %v272_v57, %v280_v58  ;;  %v290_v2 = vld [vmem:[%s1363_s25 + $0xa0] sm:$0xff]  ;;  %v291_v4 = vld [vmem:[%s1363_s25 + $0xa8] sm:$0xff]  ;;  %v1040_v6 = vcombine.low %v272_v57, %v280_v58 }
  0x3a   : > { %497 = vmatprep.subr.bf16.mxu0 %v1037_v44  ;;  %311 = vperm.xlu0 %1139, %v303_v53   ;;  %v1043_v1 = vcombine.high %v273_v60, %v281_v61  ;;  %v298_v3 = vld [vmem:[%s1363_s25 + $0xe0] sm:$0xff]  ;;  %v299_v5 = vld [vmem:[%s1363_s25 + $0xe8] sm:$0xff]  ;;  %v1042_v7 = vcombine.low %v273_v60, %v281_v61  ;;  %v292_v18 = vld [vmem:[%s1363_s25 + $0xb0] sm:$0xff] }
  0x3b   : > { %v1061_v8 = vcombine.high %v290_v2, %v298_v3  ;;  %v1063_v9 = vcombine.high %v291_v4, %v299_v5  ;;  %v274_v10 = vld [vmem:[%s1363_s25 + $0x20] sm:$0xff]  ;;  %v275_v12 = vld [vmem:[%s1363_s25 + $0x28] sm:$0xff]  ;;  %v1060_v14 = vcombine.low %v290_v2, %v298_v3  ;;  %v1062_v15 = vcombine.low %v291_v4, %v299_v5  ;;  %v300_v19 = vld [vmem:[%s1363_s25 + $0xf0] sm:$0xff] }
  0x3c   : > { %541 = vmatpush1.bf16.msra.mxu1 %v1038_v54  ;;  %v282_v11 = vld [vmem:[%s1363_s25 + $0x60] sm:$0xff]  ;;  %v283_v13 = vld [vmem:[%s1363_s25 + $0x68] sm:$0xff]  ;;  %v293_v20 = vld [vmem:[%s1363_s25 + $0xb8] sm:$0xff]  ;;  %v1065_v24 = vcombine.high %v292_v18, %v300_v19  ;;  %v1064_v30 = vcombine.low %v292_v18, %v300_v19 }
  0x3d   : > { %498 = vmatpush1.bf16.msra.mxu0 %v1036_v52  ;;  %624 = vmatprep.subr.bf16.mxu1 %v1059_v56  ;;  %v1045_v16 = vcombine.high %v274_v10, %v282_v11  ;;  %v1047_v17 = vcombine.high %v275_v12, %v283_v13  ;;  %v301_v21 = vld [vmem:[%s1363_s25 + $0xf8] sm:$0xff]  ;;  %v1044_v22 = vcombine.low %v274_v10, %v282_v11  ;;  %v276_v26 = vld [vmem:[%s1363_s25 + $0x30] sm:$0xff] }
  0x3e   : > { %581 = vmatprep.subr.bf16.mxu0 %v1057_v55  ;;  %v1046_v23 = vcombine.low %v275_v12, %v283_v13  ;;  %v1067_v25 = vcombine.high %v293_v20, %v301_v21  ;;  %v284_v27 = vld [vmem:[%s1363_s25 + $0x70] sm:$0xff]  ;;  %v277_v28 = vld [vmem:[%s1363_s25 + $0x38] sm:$0xff]  ;;  %v1066_v31 = vcombine.low %v293_v20, %v301_v21 }
  0x3f   : > { %1069 = vmatmul.mubr.msk.bf16.vlgmr.msra.gmra.mxu1 %vm479_vm0, %v1385_v59  ;;  %v285_v29 = vld [vmem:[%s1363_s25 + $0x78] sm:$0xff]  ;;  %v1049_v33 = vcombine.high %v276_v26, %v284_v27  ;;  %v1048_v35 = vcombine.low %v276_v26, %v284_v27 }
  0x40   : > { %1068 = vmatmul.mubr.msk.bf16.vlgmr.msra.gmra.mxu0 %vm479_vm0, %v1385_v59  ;;  %625 = vmatpush1.bf16.msra.mxu1 %v1058_v63  ;;  %v1051_v34 = vcombine.high %v277_v28, %v285_v29  ;;  %v1050_v36 = vcombine.low %v277_v28, %v285_v29 }
  0x41   : > { %582 = vmatpush1.bf16.msra.mxu0 %v1056_v62  ;;  %626 = vmatprep.subr.bf16.mxu1 %v1043_v1 }
  0x42   : > { %583 = vmatprep.subr.bf16.mxu0 %v1041_v0  ;;  %601 = vmatprep.mubr.bf16.mxu0 %v1197_v32 }
  0x43   : > { %644 = vmatprep.mubr.bf16.mxu1 %v1197_v32 }
  0x44   : > { %627 = vmatpush1.bf16.msra.mxu1 %v1042_v7 }
  0x45   : > { %584 = vmatpush1.bf16.msra.mxu0 %v1040_v6  ;;  %710 = vmatprep.subr.bf16.mxu1 %v1063_v9 }
  0x46   : > { %667 = vmatprep.subr.bf16.mxu0 %v1061_v8 }
  0x47   : > { %1071 = vmatmul.mubr.msk.bf16.vlgmr.msra.gmra.mxu1 %vm479_vm0, %v1385_v59 }
  0x48   : > { %1070 = vmatmul.mubr.msk.bf16.vlgmr.msra.gmra.mxu0 %vm479_vm0, %v1385_v59  ;;  %711 = vmatpush1.bf16.msra.mxu1 %v1062_v15 }
  0x49   : > { %668 = vmatpush1.bf16.msra.mxu0 %v1060_v14  ;;  %712 = vmatprep.subr.bf16.mxu1 %v1047_v17 }
  0x4a   : > { %669 = vmatprep.subr.bf16.mxu0 %v1045_v16  ;;  %687 = vmatprep.mubr.bf16.mxu0 %v1197_v32 }
  0x4b   : > { %730 = vmatprep.mubr.bf16.mxu1 %v1197_v32 }
  0x4c   : > { %713 = vmatpush1.bf16.msra.mxu1 %v1046_v23 }
  0x4d   : > { %670 = vmatpush1.bf16.msra.mxu0 %v1044_v22  ;;  %796 = vmatprep.subr.bf16.mxu1 %v1067_v25 }
  0x4e   : > { %753 = vmatprep.subr.bf16.mxu0 %v1065_v24 }
  0x4f   : > { %1073 = vmatmul.mubr.msk.bf16.vlgmr.msra.gmra.mxu1 %vm479_vm0, %v1385_v59 }
  0x50   : > { %1072 = vmatmul.mubr.msk.bf16.vlgmr.msra.gmra.mxu0 %vm479_vm0, %v1385_v59  ;;  %797 = vmatpush1.bf16.msra.mxu1 %v1066_v31 }
  0x51   : > { %754 = vmatpush1.bf16.msra.mxu0 %v1064_v30  ;;  %798 = vmatprep.subr.bf16.mxu1 %v1051_v34 }
  0x52   : > { %755 = vmatprep.subr.bf16.mxu0 %v1049_v33  ;;  %773 = vmatprep.mubr.bf16.mxu0 %v1197_v32 }
  0x53   : > { %816 = vmatprep.mubr.bf16.mxu1 %v1197_v32 }
  0x54   : > { %799 = vmatpush1.bf16.msra.mxu1 %v1050_v36 }
  0x55   : > { %756 = vmatpush1.bf16.msra.mxu0 %v1048_v35 }
  0x57   : > { %1075 = vmatmul.mubr.msk.bf16.vlgmr.msra.gmra.mxu1 %vm479_vm0, %v1385_v59 }
  0x58   : > { %1074 = vmatmul.mubr.msk.bf16.vlgmr.msra.gmra.mxu0 %vm479_vm0, %v1385_v59 }
  0xb1   : > { %v1427_v37 = vpop.permute.xlu0 %306 }
  0xb5   : > { %v1431_v43 = vpop.permute.xlu0 %311 }
  0xff   : > { %v560_v40 = vpop.f32.mrf.mxu1 }
 0x100   : > { %v517_v38 = vpop.f32.mrf.mxu0  ;;  %v561_v41 = vadd.f32 %v560_v40, %v1427_v37 }
 0x101   : > { %v518_v39 = vadd.f32 %v517_v38, %v1427_v37  ;;  %v562_v44 = vpop.f32.mrf.mxu1 }
 0x102   : > { %v519_v42 = vpop.f32.mrf.mxu0  ;;  %829 = vst [vmem:[%s1434_s30 + $0x10] sm:$0xff] %v561_v41  ;;  %v563_v45 = vadd.f32 %v562_v44, %v1427_v37 }
 0x103   : > { %827 = vst [vmem:[%s1434_s30] sm:$0xff] %v518_v39  ;;  %v520_v32 = vadd.f32 %v519_v42, %v1427_v37  ;;  %v564_v48 = vpop.f32.mrf.mxu1 }
 0x104   : > { %v521_v46 = vpop.f32.mrf.mxu0  ;;  %830 = vst [vmem:[%s1434_s30 + $0x18] sm:$0xff] %v563_v45  ;;  %v565_v49 = vadd.f32 %v564_v48, %v1431_v43 }
 0x105   : > { %828 = vst [vmem:[%s1434_s30 + $0x8] sm:$0xff] %v520_v32  ;;  %v522_v47 = vadd.f32 %v521_v46, %v1431_v43  ;;  %v566_v52 = vpop.f32.mrf.mxu1 }
 0x106   : > { %v523_v50 = vpop.f32.mrf.mxu0  ;;  %845 = vst [vmem:[%s1434_s30 + $0x90] sm:$0xf] %v565_v49  ;;  %v567_v53 = vadd.f32 %v566_v52, %v1431_v43 }
 0x107   : > { %843 = vst [vmem:[%s1434_s30 + $0x80] sm:$0xf] %v522_v47  ;;  %v524_v51 = vadd.f32 %v523_v50, %v1431_v43  ;;  %v646_v56 = vpop.f32.mrf.mxu1 }
 0x108   : > { %v603_v54 = vpop.f32.mrf.mxu0  ;;  %846 = vst [vmem:[%s1434_s30 + $0x98] sm:$0xf] %v567_v53  ;;  %v647_v57 = vadd.f32 %v646_v56, %v1427_v37 }
 0x109   : > { %844 = vst [vmem:[%s1434_s30 + $0x88] sm:$0xf] %v524_v51  ;;  %v604_v55 = vadd.f32 %v603_v54, %v1427_v37  ;;  %v648_v60 = vpop.f32.mrf.mxu1  ;;  %v887_v41 = vld [vmem:[%s1434_s30 + $0x10] sm:$0xff] (%p1266_p6) }
 0x10a   : > { %v605_v58 = vpop.f32.mrf.mxu0  ;;  %833 = vst [vmem:[%s1434_s30 + $0x30] sm:$0xff] %v647_v57  ;;  %v649_v61 = vadd.f32 %v648_v60, %v1427_v37  ;;  %888 = vst [vmem:[%s1514_s9 + $0x10] sm:$0xff] (%p1266_p6), %v887_v41 }
 0x10b   : > { %831 = vst [vmem:[%s1434_s30 + $0x20] sm:$0xff] %v604_v55  ;;  %v606_v59 = vadd.f32 %v605_v58, %v1427_v37  ;;  %v650_v0 = vpop.f32.mrf.mxu1  ;;  %v889_v42 = vld [vmem:[%s1434_s30 + $0x18] sm:$0xff] (%p1266_p6) }
 0x10c   : > { %v607_v62 = vpop.f32.mrf.mxu0  ;;  %834 = vst [vmem:[%s1434_s30 + $0x38] sm:$0xff] %v649_v61  ;;  %v651_v1 = vadd.f32 %v650_v0, %v1431_v43  ;;  %v885_v40 = vld [vmem:[%s1434_s30 + $0x8] sm:$0xff] (%p1266_p6)  ;;  %890 = vst [vmem:[%s1514_s9 + $0x18] sm:$0xff] (%p1266_p6), %v889_v42 }
 0x10d   : > { %832 = vst [vmem:[%s1434_s30 + $0x28] sm:$0xff] %v606_v59  ;;  %v608_v63 = vadd.f32 %v607_v62, %v1431_v43  ;;  %v652_v4 = vpop.f32.mrf.mxu1  ;;  %886 = vst [vmem:[%s1514_s9 + $0x8] sm:$0xff] (%p1266_p6), %v885_v40  ;;  %v919_v56 = vld [vmem:[%s1434_s30 + $0x90] sm:$0xff] (%p1266_p6) }
 0x10e   : > { %v609_v2 = vpop.f32.mrf.mxu0  ;;  %849 = vst [vmem:[%s1434_s30 + $0xb0] sm:$0xf] %v651_v1  ;;  %v653_v5 = vadd.f32 %v652_v4, %v1431_v43  ;;  %v915_v54 = vld [vmem:[%s1434_s30 + $0x80] sm:$0xff] (%p1266_p6)  ;;  %920 = vst [vmem:[%s1514_s9 + $0x210] sm:$0xff] (%p1266_p6), %v919_v56 }
 0x10f   : > { %847 = vst [vmem:[%s1434_s30 + $0xa0] sm:$0xf] %v608_v63  ;;  %v610_v3 = vadd.f32 %v609_v2, %v1431_v43  ;;  %v732_v8 = vpop.f32.mrf.mxu1  ;;  %916 = vst [vmem:[%s1514_s9 + $0x200] sm:$0xff] (%p1266_p6), %v915_v54  ;;  %v921_v57 = vld [vmem:[%s1434_s30 + $0x98] sm:$0xff] (%p1266_p6) }
 0x110   : > { %v689_v6 = vpop.f32.mrf.mxu0  ;;  %850 = vst [vmem:[%s1434_s30 + $0xb8] sm:$0xf] %v653_v5  ;;  %v733_v9 = vadd.f32 %v732_v8, %v1427_v37  ;;  %v917_v55 = vld [vmem:[%s1434_s30 + $0x88] sm:$0xff] (%p1266_p6)  ;;  %922 = vst [vmem:[%s1514_s9 + $0x218] sm:$0xff] (%p1266_p6), %v921_v57 }
 0x111   : > { %848 = vst [vmem:[%s1434_s30 + $0xa8] sm:$0xf] %v610_v3  ;;  %v690_v7 = vadd.f32 %v689_v6, %v1427_v37  ;;  %v734_v12 = vpop.f32.mrf.mxu1  ;;  %v895_v44 = vld [vmem:[%s1434_s30 + $0x30] sm:$0xff] (%p1266_p6)  ;;  %918 = vst [vmem:[%s1514_s9 + $0x208] sm:$0xff] (%p1266_p6), %v917_v55 }
 0x112   : > { %v691_v10 = vpop.f32.mrf.mxu0  ;;  %837 = vst [vmem:[%s1434_s30 + $0x50] sm:$0xff] %v733_v9  ;;  %v735_v13 = vadd.f32 %v734_v12, %v1427_v37  ;;  %896 = vst [vmem:[%s1514_s9 + $0x30] sm:$0xff] (%p1266_p6), %v895_v44 }
 0x113   : > { %835 = vst [vmem:[%s1434_s30 + $0x40] sm:$0xff] %v690_v7  ;;  %v692_v11 = vadd.f32 %v691_v10, %v1427_v37  ;;  %v736_v16 = vpop.f32.mrf.mxu1  ;;  %v897_v45 = vld [vmem:[%s1434_s30 + $0x38] sm:$0xff] (%p1266_p6) }
 0x114   : > { %v693_v14 = vpop.f32.mrf.mxu0  ;;  %838 = vst [vmem:[%s1434_s30 + $0x58] sm:$0xff] %v735_v13  ;;  %v737_v17 = vadd.f32 %v736_v16, %v1431_v43  ;;  %v893_v32 = vld [vmem:[%s1434_s30 + $0x28] sm:$0xff] (%p1266_p6)  ;;  %898 = vst [vmem:[%s1514_s9 + $0x38] sm:$0xff] (%p1266_p6), %v897_v45 }
 0x115   : > { %836 = vst [vmem:[%s1434_s30 + $0x48] sm:$0xff] %v692_v11  ;;  %v694_v15 = vadd.f32 %v693_v14, %v1431_v43  ;;  %v738_v20 = vpop.f32.mrf.mxu1  ;;  %894 = vst [vmem:[%s1514_s9 + $0x28] sm:$0xff] (%p1266_p6), %v893_v32  ;;  %v927_v60 = vld [vmem:[%s1434_s30 + $0xb0] sm:$0xff] (%p1266_p6) }
 0x116   : > { %v695_v18 = vpop.f32.mrf.mxu0  ;;  %853 = vst [vmem:[%s1434_s30 + $0xd0] sm:$0xf] %v737_v17  ;;  %v739_v21 = vadd.f32 %v738_v20, %v1431_v43  ;;  %v923_v58 = vld [vmem:[%s1434_s30 + $0xa0] sm:$0xff] (%p1266_p6)  ;;  %928 = vst [vmem:[%s1514_s9 + $0x230] sm:$0xff] (%p1266_p6), %v927_v60 }
 0x117   : > { %851 = vst [vmem:[%s1434_s30 + $0xc0] sm:$0xf] %v694_v15  ;;  %v696_v19 = vadd.f32 %v695_v18, %v1431_v43  ;;  %v818_v24 = vpop.f32.mrf.mxu1  ;;  %924 = vst [vmem:[%s1514_s9 + $0x220] sm:$0xff] (%p1266_p6), %v923_v58  ;;  %v929_v61 = vld [vmem:[%s1434_s30 + $0xb8] sm:$0xff] (%p1266_p6) }
 0x118   : > { %v775_v22 = vpop.f32.mrf.mxu0  ;;  %854 = vst [vmem:[%s1434_s30 + $0xd8] sm:$0xf] %v739_v21  ;;  %v819_v25 = vadd.f32 %v818_v24, %v1427_v37  ;;  %v925_v59 = vld [vmem:[%s1434_s30 + $0xa8] sm:$0xff] (%p1266_p6)  ;;  %930 = vst [vmem:[%s1514_s9 + $0x238] sm:$0xff] (%p1266_p6), %v929_v61 }
 0x119   : > { %852 = vst [vmem:[%s1434_s30 + $0xc8] sm:$0xf] %v696_v19  ;;  %v776_v23 = vadd.f32 %v775_v22, %v1427_v37  ;;  %v820_v28 = vpop.f32.mrf.mxu1  ;;  %v903_v48 = vld [vmem:[%s1434_s30 + $0x50] sm:$0xff] (%p1266_p6)  ;;  %926 = vst [vmem:[%s1514_s9 + $0x228] sm:$0xff] (%p1266_p6), %v925_v59 }
 0x11a   : > { %v777_v26 = vpop.f32.mrf.mxu0  ;;  %841 = vst [vmem:[%s1434_s30 + $0x70] sm:$0xff] %v819_v25  ;;  %v821_v29 = vadd.f32 %v820_v28, %v1427_v37  ;;  %v899_v46 = vld [vmem:[%s1434_s30 + $0x40] sm:$0xff] (%p1266_p6)  ;;  %904 = vst [vmem:[%s1514_s9 + $0x50] sm:$0xff] (%p1266_p6), %v903_v48 }
 0x11b   : > { %839 = vst [vmem:[%s1434_s30 + $0x60] sm:$0xff] %v776_v23  ;;  %v778_v27 = vadd.f32 %v777_v26, %v1427_v37  ;;  %v822_v33 = vpop.f32.mrf.mxu1  ;;  %v883_v37 = vld [vmem:[%s1434_s30] sm:$0xff] (%p1266_p6)  ;;  %v905_v49 = vld [vmem:[%s1434_s30 + $0x58] sm:$0xff] (%p1266_p6)  ;;  %900 = vst [vmem:[%s1514_s9 + $0x40] sm:$0xff] (%p1266_p6), %v899_v46 }
 0x11c   : > { %v779_v30 = vpop.f32.mrf.mxu0  ;;  %842 = vst [vmem:[%s1434_s30 + $0x78] sm:$0xff] %v821_v29  ;;  %v823_v34 = vadd.f32 %v822_v33, %v1431_v43  ;;  %v901_v47 = vld [vmem:[%s1434_s30 + $0x48] sm:$0xff] (%p1266_p6)  ;;  %884 = vst [vmem:[%s1514_s9] sm:$0xff] (%p1266_p6), %v883_v37 }
 0x11d   : > { %840 = vst [vmem:[%s1434_s30 + $0x68] sm:$0xff] %v778_v27  ;;  %v780_v31 = vadd.f32 %v779_v30, %v1431_v43  ;;  %v824_v38 = vpop.f32.mrf.mxu1  ;;  %865 = sbr.rel (!%p1266_p6) target bundleno = 298 (0x12a), region = 59  ;;  %902 = vst [vmem:[%s1514_s9 + $0x48] sm:$0xff] (%p1266_p6), %v901_v47  ;;  %v935_v0 = vld [vmem:[%s1434_s30 + $0xd0] sm:$0xff] (%p1266_p6) }
 0x11e   : > { %v781_v35 = vpop.f32.mrf.mxu0  ;;  %857 = vst [vmem:[%s1434_s30 + $0xf0] sm:$0xf] %v823_v34  ;;  %v825_v39 = vadd.f32 %v824_v38, %v1431_v43  ;;  %906 = vst [vmem:[%s1514_s9 + $0x58] sm:$0xff] (%p1266_p6), %v905_v49  ;;  %v931_v62 = vld [vmem:[%s1434_s30 + $0xc0] sm:$0xff] (%p1266_p6) }
 0x11f   : > { %855 = vst [vmem:[%s1434_s30 + $0xe0] sm:$0xf] %v780_v31  ;;  %v782_v36 = vadd.f32 %v781_v35, %v1431_v43  ;;  %v891_v43 = vld [vmem:[%s1434_s30 + $0x20] sm:$0xff] (%p1266_p6)  ;;  %932 = vst [vmem:[%s1514_s9 + $0x240] sm:$0xff] (%p1266_p6), %v931_v62  ;;  %v937_v1 = vld [vmem:[%s1434_s30 + $0xd8] sm:$0xff] (%p1266_p6) }
 0x120   : > { %858 = vst [vmem:[%s1434_s30 + $0xf8] sm:$0xf] %v825_v39  ;;  %892 = vst [vmem:[%s1514_s9 + $0x20] sm:$0xff] (%p1266_p6), %v891_v43  ;;  %v933_v63 = vld [vmem:[%s1434_s30 + $0xc8] sm:$0xff] (%p1266_p6) }
 0x121   : > { %856 = vst [vmem:[%s1434_s30 + $0xe8] sm:$0xf] %v782_v36  ;;  %v911_v52 = vld [vmem:[%s1434_s30 + $0x70] sm:$0xff] (%p1266_p6)  ;;  %934 = vst [vmem:[%s1514_s9 + $0x248] sm:$0xff] (%p1266_p6), %v933_v63 }
 0x122   : > { %v907_v50 = vld [vmem:[%s1434_s30 + $0x60] sm:$0xff]  ;;  %912 = vst [vmem:[%s1514_s9 + $0x70] sm:$0xff] %v911_v52  ;;  %936 = vst [vmem:[%s1514_s9 + $0x250] sm:$0xff] %v935_v0 }
 0x123   : > { %908 = vst [vmem:[%s1514_s9 + $0x60] sm:$0xff] %v907_v50  ;;  %v913_v53 = vld [vmem:[%s1434_s30 + $0x78] sm:$0xff]  ;;  %938 = vst [vmem:[%s1514_s9 + $0x258] sm:$0xff] %v937_v1 }
 0x124   : > { %v909_v51 = vld [vmem:[%s1434_s30 + $0x68] sm:$0xff]  ;;  %914 = vst [vmem:[%s1514_s9 + $0x78] sm:$0xff] %v913_v53 }
 0x125   : > { %910 = vst [vmem:[%s1514_s9 + $0x68] sm:$0xff] %v909_v51  ;;  %v943_v4 = vld [vmem:[%s1434_s30 + $0xf0] sm:$0xff] }
 0x126   : > { %v939_v2 = vld [vmem:[%s1434_s30 + $0xe0] sm:$0xff]  ;;  %944 = vst [vmem:[%s1514_s9 + $0x270] sm:$0xff] %v943_v4 }
 0x127   : > { %940 = vst [vmem:[%s1514_s9 + $0x260] sm:$0xff] %v939_v2  ;;  %v945_v5 = vld [vmem:[%s1434_s30 + $0xf8] sm:$0xff] }
 0x128   : > { %v941_v3 = vld [vmem:[%s1434_s30 + $0xe8] sm:$0xff]  ;;  %946 = vst [vmem:[%s1514_s9 + $0x278] sm:$0xff] %v945_v5 }
 0x129   : > { %942 = vst [vmem:[%s1514_s9 + $0x268] sm:$0xff] %v941_v3 }
 0x12a PF: > { %s13_s18 = sadd.s32 1, %s1195_s18   ;;  %s1597_s12 = smov %s1175_s13 }
 0x12b   : > { %p10_p12 = scmp.ge.s32.totalorder %s13_s18, 10   ;;  %s1598_s13 = smov %s1274_s27 }
 0x12c   : > { %s1599_s14 = smov %s1187_s16  ;;  %s1600_s15 = smov %s1191_s17 }
 0x12d   : > { %s1601_s16 = smov %s1604_s19  ;;  %s1602_s17 = smov %s1608_s20 }
 0x12e   :  { %12 = sbr.rel (!%p10_p12) target bundleno = 4 (0x4), region = 113 }

</bundles_post_ra>
